<compile_context>
chip_gen: v5e
topology: v5e:2x2
jax: 0.10.0
libtpu: 0.0.40
codegen_flags: <defaults>
</compile_context>

<pallas_src>
import functools

import jax
import jax.numpy as jnp
from jax import lax
from jax.experimental import pallas as pl
from jax.experimental.pallas import tpu as pltpu


# ----------------------------------------------------------------------------
# Pallas kernel: Tt timesteps of the 2-layer stacked CA-LSTM per grid point.
# ----------------------------------------------------------------------------
def _stacked_ca_lstm_kernel(
    gx_ref,      # (Tt, B, 4H) f32  : x @ W_ih^T + b0 for this time block (bias folded)
    whh_ref,     # (H, 4H)     bf16 : layer0 W_hh^T
    w1_ref,      # (2H, 5H)    bf16 : layer1 W^T (rows 0:H act on h_lower, H:2H on h_prev)
    b1_ref,      # (1, 5H)     f32  : layer1 bias with +1 folded into f_prev / f_lower rows
    hs1_ref,     # (Tt, B, H)  f32  : layer1 h sequence (time-major)
    cs1_ref,     # (Tt, B, H)  f32  : layer1 c sequence (time-major)
    h0f_ref,     # (B, H)      f32  : layer0 final h (constant-index block)
    c0f_ref,     # (B, H)      f32  : layer0 final c (constant-index block)
    h0_s, c0_s, h1_s, c1_s,          # (B, H) f32 VMEM scratch (persists across grid steps)
):
    B, H = h0_s.shape
    Tt = gx_ref.shape[0]

    @pl.when(pl.program_id(0) == 0)
    def _init():
        h0_s[...] = jnp.zeros_like(h0_s)
        c0_s[...] = jnp.zeros_like(c0_s)
        h1_s[...] = jnp.zeros_like(h1_s)
        c1_s[...] = jnp.zeros_like(c1_s)

    # Weights loaded once per grid step (constant-index blocks stay resident in VMEM).
    whh = whh_ref[...]
    w1 = w1_ref[...]
    # Hoisted bias broadcast: JAX does not CSE broadcast_in_dim, so do it once, not per step.
    b1b = jnp.broadcast_to(b1_ref[...], (B, 5 * H))

    def _sig(z):
        # Exact sigmoid as a single EUP tanh (cheaper than exp + reciprocal, no approx error).
        return 0.5 * jnp.tanh(0.5 * z) + 0.5

    # Recurrent state carried in vregs; scratch refs touched only at entry (load) / exit (store).
    h0 = h0_s[...]
    c0 = c0_s[...]
    h1 = h1_s[...]
    c1 = c1_s[...]

    for s in range(Tt):  # fully unrolled, static indices into gx/hs1/cs1 blocks
        # ----- layer 0: plain LSTM (input projection + biases precomputed in gx) -----
        g0 = gx_ref[s] + jnp.dot(
            h0.astype(jnp.bfloat16), whh, preferred_element_type=jnp.float32
        )                                                       # (B, 4H)
        i0 = g0[:, 0 * H:1 * H]
        f0 = g0[:, 1 * H:2 * H]
        gg = g0[:, 2 * H:3 * H]
        o0 = g0[:, 3 * H:4 * H]
        c0 = _sig(i0) * jnp.tanh(gg) + _sig(f0) * c0
        h0 = _sig(o0) * jnp.tanh(c0)

        # ----- layer 1: CALSTM (fuse_type='add'); single fused (B,2H)@(2H,5H) matmul -----
        hcat = jnp.concatenate(
            [h0.astype(jnp.bfloat16), h1.astype(jnp.bfloat16)], axis=-1
        )                                                       # (B, 2H) bf16
        m = jnp.dot(hcat, w1, preferred_element_type=jnp.float32) + b1b   # (B, 5H)
        i1 = m[:, 0 * H:1 * H]
        fp = m[:, 1 * H:2 * H]      # +1 already folded into the bias
        fl = m[:, 2 * H:3 * H]      # +1 already folded into the bias
        u1 = m[:, 3 * H:4 * H]
        o1 = m[:, 4 * H:5 * H]
        c1 = c1 * _sig(fp) + c0 * _sig(fl) + jnp.tanh(u1) * _sig(i1)
        h1 = _sig(o1) * jnp.tanh(c1)

        hs1_ref[s] = h1
        cs1_ref[s] = c1

    h0_s[...] = h0
    c0_s[...] = c0
    h1_s[...] = h1
    c1_s[...] = c1

    # Constant-index output blocks -> single HBM writeback of the layer-0 final state.
    h0f_ref[...] = h0
    c0f_ref[...] = c0


# ----------------------------------------------------------------------------
# Wrapper: batch-first (B, T, Di) in, PyTorch-style outputs out.
# ----------------------------------------------------------------------------
@functools.partial(jax.jit, static_argnames=("time_block",))
def stacked_ca_lstm(x_btd, params, time_block=16):
    """Returns ((hs1, cs1), [ (h0_T, c0_T), (h1_T, c1_T) ]) with hs/cs of shape (B, T, H)."""
    wih_t, whh_t, b0, w1_t, b1 = params
    B, T, Di = x_btd.shape
    H = whh_t.shape[0]

    # Largest time block <= time_block that divides T (full in-kernel unroll; for blocks
    # larger than 16 switch to a partially-unrolled fori_loop instead).
    Tt = 1
    for cand in (16, 8, 4, 2, 1):
        if cand <= time_block and T % cand == 0:
            Tt = cand
            break

    x_tbd = jnp.transpose(x_btd, (1, 0, 2)).astype(jnp.float32)        # (T, B, Di)

    # Hoisted input projection: one big MXU-shaped matmul (bf16 operands, f32 accumulate).
    # Layer-0 bias (incl. forget bias = 1) folded in, so the kernel only adds the h-projection.
    gx = jnp.einsum(
        "tbd,dg->tbg",
        x_tbd.astype(jnp.bfloat16),
        wih_t.astype(jnp.bfloat16),
        preferred_element_type=jnp.float32,
    ) + b0                                                              # (T, B, 4H) f32

    whh_bf = whh_t.astype(jnp.bfloat16)                                 # (H, 4H)
    w1_bf = w1_t.astype(jnp.bfloat16)                                   # (2H, 5H)
    # Fold the CALSTM '+1' forget biases (f_prev, f_lower rows) into b1.
    b1_f = b1.astype(jnp.float32).at[:, H:3 * H].add(1.0)               # (1, 5H)

    seq_in = pl.BlockSpec((Tt, B, 4 * H), lambda t: (t, 0, 0))
    seq_out = pl.BlockSpec((Tt, B, H), lambda t: (t, 0, 0))
    full2d = lambda r, c: pl.BlockSpec((r, c), lambda t: (0, 0))
    state_out = pl.BlockSpec((B, H), lambda t: (0, 0))

    out_shape = (
        jax.ShapeDtypeStruct((T, B, H), jnp.float32),   # hs1 (time-major)
        jax.ShapeDtypeStruct((T, B, H), jnp.float32),   # cs1 (time-major)
        jax.ShapeDtypeStruct((B, H), jnp.float32),      # layer0 final h
        jax.ShapeDtypeStruct((B, H), jnp.float32),      # layer0 final c
    )

    grid_spec = pltpu.PrefetchScalarGridSpec(
        num_scalar_prefetch=0,
        grid=(T // Tt,),
        in_specs=[
            seq_in,                  # gx
            full2d(H, 4 * H),        # W_hh^T  (bf16)
            full2d(2 * H, 5 * H),    # W1^T    (bf16)
            full2d(1, 5 * H),        # b1 (with forget +1 folded)
        ],
        out_specs=(seq_out, seq_out, state_out, state_out),
        scratch_shapes=[pltpu.VMEM((B, H), jnp.float32)] * 4,
    )

    hs1, cs1, h0f, c0f = pl.pallas_call(
        _stacked_ca_lstm_kernel,
        out_shape=out_shape,
        grid_spec=grid_spec,
        compiler_params=pltpu.CompilerParams(
            dimension_semantics=("arbitrary",),   # sequential recurrence over time blocks
        ),
    )(gx, whh_bf, w1_bf, b1_f)

    # Back to batch-first (module semantics are (B, T, H)).
    hs1_b = jnp.transpose(hs1, (1, 0, 2))
    cs1_b = jnp.transpose(cs1, (1, 0, 2))

    state = [
        (h0f, c0f),                       # StatefulLSTM final hx
        (hs1_b[:, -1], cs1_b[:, -1]),     # CALSTM final hx
    ]
    return (hs1_b, cs1_b), state


# ----------------------------------------------------------------------------
# Pure-JAX f32 reference (mirrors the PyTorch forward) for a correctness check.
# ----------------------------------------------------------------------------
def reference(x_btd, params):
    wih_t, whh_t, b0, w1_t, b1 = params
    B, T, Di = x_btd.shape
    H = whh_t.shape[0]

    def step(carry, x_t):
        h0, c0, h1, c1 = carry
        g = x_t @ wih_t + h0 @ whh_t + b0[0]
        i0, f0, g0, o0 = jnp.split(g, 4, axis=1)
        c0n = jax.nn.sigmoid(i0) * jnp.tanh(g0) + jax.nn.sigmoid(f0) * c0
        h0n = jax.nn.sigmoid(o0) * jnp.tanh(c0n)
        m = jnp.concatenate([h0n, h1], axis=1) @ w1_t + b1[0]
        i1, fp, fl, u1, o1 = jnp.split(m, 5, axis=1)
        c1n = (c1 * jax.nn.sigmoid(fp + 1.0)
               + c0n * jax.nn.sigmoid(fl + 1.0)
               + jnp.tanh(u1) * jax.nn.sigmoid(i1))
        h1n = jax.nn.sigmoid(o1) * jnp.tanh(c1n)
        return (h0n, c0n, h1n, c1n), (h1n, c1n)

    z = jnp.zeros((B, H), jnp.float32)
    x_tbd = jnp.transpose(x_btd, (1, 0, 2))
    (h0f, c0f, _, _), (hs1, cs1) = lax.scan(step, (z, z, z, z), x_tbd)
    return jnp.transpose(hs1, (1, 0, 2)), jnp.transpose(cs1, (1, 0, 2)), h0f, c0f


# ----------------------------------------------------------------------------
# Deterministic parameter construction (mirrors reset_parameters semantics).
# ----------------------------------------------------------------------------
def orthogonal(key, shape):
    a = jax.random.normal(key, shape, jnp.float32)
    q, r = jnp.linalg.qr(a)
    q = q * jnp.sign(jnp.diagonal(r))[None, :]
    return q[:, : shape[1]]


def make_params(key, input_size, hidden_size):
    k1, k2, k3 = jax.random.split(key, 3)
    H, Di = hidden_size, input_size
    # layer 0 (StatefulLSTM): orthogonal W_hh, kaiming-normal W_ih, zero biases,
    # forget-gate bias = 1
    w_hh = orthogonal(k1, (4 * H, H))
    w_ih = jax.random.normal(k2, (4 * H, Di), jnp.float32) * jnp.sqrt(2.0 / Di)
    b0 = jnp.zeros((4 * H,), jnp.float32).at[H:2 * H].set(1.0)
    # layer 1 (CALSTMCell, no h_lower_proj): orthogonal Linear(2H -> 5H), zero bias
    w1 = orthogonal(k3, (5 * H, 2 * H))
    b1 = jnp.zeros((5 * H,), jnp.float32)

    wih_t = w_ih.T                      # (Di, 4H)
    whh_t = w_hh.T                      # (H, 4H)
    w1_t = w1.T                         # (2H, 5H)
    return (wih_t, whh_t, b0.reshape(1, -1), w1_t, b1.reshape(1, -1))


if __name__ == "__main__":
    B, T, Di, H = 8, 16, 128, 128

    key = jax.random.PRNGKey(0)
    kx, kp = jax.random.split(key)
    x = jax.random.normal(kx, (B, T, Di), jnp.float32)
    params = make_params(kp, Di, H)

    (hs1, cs1), state = stacked_ca_lstm(x, params, time_block=16)
    jax.block_until_ready((hs1, cs1, state))

    ref_h, ref_c, ref_h0f, ref_c0f = reference(x, params)
    # Exact sigmoids now; remaining error is bf16 matmul-operand rounding over T steps.
    assert jnp.allclose(hs1, ref_h, atol=3e-2, rtol=3e-2)
    assert jnp.allclose(cs1, ref_c, atol=3e-2, rtol=3e-2)
    assert jnp.allclose(state[0][0], ref_h0f, atol=3e-2, rtol=3e-2)
    assert jnp.allclose(state[0][1], ref_c0f, atol=3e-2, rtol=3e-2)
    assert jnp.allclose(state[1][0], ref_h[:, -1], atol=3e-2, rtol=3e-2)
    assert jnp.allclose(state[1][1], ref_c[:, -1], atol=3e-2, rtol=3e-2)

    print("KERNEL_OK")
</pallas_src>

<mosaic_0001>
module attributes {stable_mosaic.version = 11 : i64} {
  func.func @_stacked_ca_lstm_kernel(%arg0: i32, %arg1: memref<16x8x512xf32, #tpu.memory_space<vmem>>, %arg2: memref<128x512xbf16, #tpu.memory_space<vmem>>, %arg3: memref<256x640xbf16, #tpu.memory_space<vmem>>, %arg4: memref<1x640xf32, #tpu.memory_space<vmem>>, %arg5: memref<16x8x128xf32, #tpu.memory_space<vmem>>, %arg6: memref<16x8x128xf32, #tpu.memory_space<vmem>>, %arg7: memref<8x128xf32, #tpu.memory_space<vmem>>, %arg8: memref<8x128xf32, #tpu.memory_space<vmem>>, %arg9: memref<8x128xf32, #tpu.memory_space<vmem>>, %arg10: memref<8x128xf32, #tpu.memory_space<vmem>>, %arg11: memref<8x128xf32, #tpu.memory_space<vmem>>, %arg12: memref<8x128xf32, #tpu.memory_space<vmem>>) attributes {dimension_semantics = [#tpu.dimension_semantics<arbitrary>], iteration_bounds = array<i64: 1>, scalar_prefetch = 0 : i64, scratch_operands = 4 : i64, tpu.core_type = #tpu.core_type<tc>, window_params = [{transform_indices = @transform_0, window_bounds = array<i64: 16, 8, 512>}, {pipeline_mode = #tpu.pipeline_mode<synchronous>, transform_indices = @transform_1, window_bounds = array<i64: 128, 512>}, {pipeline_mode = #tpu.pipeline_mode<synchronous>, transform_indices = @transform_2, window_bounds = array<i64: 256, 640>}, {pipeline_mode = #tpu.pipeline_mode<synchronous>, transform_indices = @transform_3, window_bounds = array<i64: 1, 640>}, {transform_indices = @transform_4, window_bounds = array<i64: 16, 8, 128>}, {transform_indices = @transform_5, window_bounds = array<i64: 16, 8, 128>}, {pipeline_mode = #tpu.pipeline_mode<synchronous>, transform_indices = @transform_6, window_bounds = array<i64: 8, 128>}, {pipeline_mode = #tpu.pipeline_mode<synchronous>, transform_indices = @transform_7, window_bounds = array<i64: 8, 128>}]} {
    %c0_i32 = arith.constant 0 : i32
    %0 = arith.cmpi eq, %arg0, %c0_i32 : i32
    %1 = arith.extui %0 : i1 to i32
    %c0_i32_0 = arith.constant 0 : i32
    %2 = arith.cmpi ne, %1, %c0_i32_0 : i32
    scf.if %2 {
      %cst_522 = arith.constant 0.000000e+00 : f32
      %1426 = vector.broadcast %cst_522 : f32 to vector<8x128xf32>
      %c0_523 = arith.constant 0 : index
      %c0_524 = arith.constant 0 : index
      %1427 = vector.load %arg9[%c0_523, %c0_524] : memref<8x128xf32, #tpu.memory_space<vmem>>, vector<8x128xf32>
      tpu.vector_store %arg9[%c0_523, %c0_524], %1426 {strides = array<i32>} : memref<8x128xf32, #tpu.memory_space<vmem>>, vector<8x128xf32>,
      %cst_525 = arith.constant 0.000000e+00 : f32
      %1428 = vector.broadcast %cst_525 : f32 to vector<8x128xf32>
      %c0_526 = arith.constant 0 : index
      %c0_527 = arith.constant 0 : index
      %1429 = vector.load %arg10[%c0_526, %c0_527] : memref<8x128xf32, #tpu.memory_space<vmem>>, vector<8x128xf32>
      tpu.vector_store %arg10[%c0_526, %c0_527], %1428 {strides = array<i32>} : memref<8x128xf32, #tpu.memory_space<vmem>>, vector<8x128xf32>,
      %cst_528 = arith.constant 0.000000e+00 : f32
      %1430 = vector.broadcast %cst_528 : f32 to vector<8x128xf32>
      %c0_529 = arith.constant 0 : index
      %c0_530 = arith.constant 0 : index
      %1431 = vector.load %arg11[%c0_529, %c0_530] : memref<8x128xf32, #tpu.memory_space<vmem>>, vector<8x128xf32>
      tpu.vector_store %arg11[%c0_529, %c0_530], %1430 {strides = array<i32>} : memref<8x128xf32, #tpu.memory_space<vmem>>, vector<8x128xf32>,
      %cst_531 = arith.constant 0.000000e+00 : f32
      %1432 = vector.broadcast %cst_531 : f32 to vector<8x128xf32>
      %c0_532 = arith.constant 0 : index
      %c0_533 = arith.constant 0 : index
      %1433 = vector.load %arg12[%c0_532, %c0_533] : memref<8x128xf32, #tpu.memory_space<vmem>>, vector<8x128xf32>
      tpu.vector_store %arg12[%c0_532, %c0_533], %1432 {strides = array<i32>} : memref<8x128xf32, #tpu.memory_space<vmem>>, vector<8x128xf32>,
    } else {
    }
    %c0 = arith.constant 0 : index
    %c0_1 = arith.constant 0 : index
    %3 = vector.load %arg2[%c0, %c0_1] : memref<128x512xbf16, #tpu.memory_space<vmem>>, vector<128x512xbf16>
    %c0_2 = arith.constant 0 : index
    %c0_3 = arith.constant 0 : index
    %4 = vector.load %arg3[%c0_2, %c0_3] : memref<256x640xbf16, #tpu.memory_space<vmem>>, vector<256x640xbf16>
    %c0_4 = arith.constant 0 : index
    %c0_5 = arith.constant 0 : index
    %5 = vector.load %arg4[%c0_4, %c0_5] : memref<1x640xf32, #tpu.memory_space<vmem>>, vector<1x640xf32>
    %6 = vector.shape_cast %5 : vector<1x640xf32> to vector<1x640xf32>
    %7 = vector.broadcast %6 : vector<1x640xf32> to vector<8x640xf32>
    %c0_6 = arith.constant 0 : index
    %c0_7 = arith.constant 0 : index
    %8 = vector.load %arg9[%c0_6, %c0_7] : memref<8x128xf32, #tpu.memory_space<vmem>>, vector<8x128xf32>
    %c0_8 = arith.constant 0 : index
    %c0_9 = arith.constant 0 : index
    %9 = vector.load %arg10[%c0_8, %c0_9] : memref<8x128xf32, #tpu.memory_space<vmem>>, vector<8x128xf32>
    %c0_10 = arith.constant 0 : index
    %c0_11 = arith.constant 0 : index
    %10 = vector.load %arg11[%c0_10, %c0_11] : memref<8x128xf32, #tpu.memory_space<vmem>>, vector<8x128xf32>
    %c0_12 = arith.constant 0 : index
    %c0_13 = arith.constant 0 : index
    %11 = vector.load %arg12[%c0_12, %c0_13] : memref<8x128xf32, #tpu.memory_space<vmem>>, vector<8x128xf32>
    %c0_14 = arith.constant 0 : index
    %c0_15 = arith.constant 0 : index
    %c0_16 = arith.constant 0 : index
    %12 = vector.load %arg1[%c0_14, %c0_15, %c0_16] : memref<16x8x512xf32, #tpu.memory_space<vmem>>, vector<1x8x512xf32>
    %13 = vector.shape_cast %12 : vector<1x8x512xf32> to vector<8x512xf32>
    %14 = arith.truncf %8 : vector<8x128xf32> to vector<8x128xbf16>
    %cst = arith.constant dense<0.000000e+00> : vector<8x512xf32>
    %15 = tpu.matmul %14, %3, %cst {dimension_numbers = #tpu.dot_dimension_numbers<[1], [0], [0], [1], [0, 0, 1, 1], [], []>} : vector<8x128xbf16>, vector<128x512xbf16>, vector<8x512xf32> -> vector<8x512xf32>
    %16 = arith.addf %13, %15 : vector<8x512xf32>
    %17 = vector.extract_strided_slice %16 {offsets = [0, 0], sizes = [8, 128], strides = [1, 1]} : vector<8x512xf32> to vector<8x128xf32>
    %18 = vector.extract_strided_slice %16 {offsets = [0, 128], sizes = [8, 128], strides = [1, 1]} : vector<8x512xf32> to vector<8x128xf32>
    %19 = vector.extract_strided_slice %16 {offsets = [0, 256], sizes = [8, 128], strides = [1, 1]} : vector<8x512xf32> to vector<8x128xf32>
    %20 = vector.extract_strided_slice %16 {offsets = [0, 384], sizes = [8, 128], strides = [1, 1]} : vector<8x512xf32> to vector<8x128xf32>
    %cst_17 = arith.constant 5.000000e-01 : f32
    %21 = vector.broadcast %cst_17 : f32 to vector<8x128xf32>
    %22 = arith.mulf %21, %17 : vector<8x128xf32>
    %23 = math.tanh %22 : vector<8x128xf32>
    %cst_18 = arith.constant 5.000000e-01 : f32
    %24 = vector.broadcast %cst_18 : f32 to vector<8x128xf32>
    %25 = arith.mulf %24, %23 : vector<8x128xf32>
    %cst_19 = arith.constant 5.000000e-01 : f32
    %26 = vector.broadcast %cst_19 : f32 to vector<8x128xf32>
    %27 = arith.addf %25, %26 : vector<8x128xf32>
    %28 = math.tanh %19 : vector<8x128xf32>
    %29 = arith.mulf %27, %28 : vector<8x128xf32>
    %cst_20 = arith.constant 5.000000e-01 : f32
    %30 = vector.broadcast %cst_20 : f32 to vector<8x128xf32>
    %31 = arith.mulf %30, %18 : vector<8x128xf32>
    %32 = math.tanh %31 : vector<8x128xf32>
    %cst_21 = arith.constant 5.000000e-01 : f32
    %33 = vector.broadcast %cst_21 : f32 to vector<8x128xf32>
    %34 = arith.mulf %33, %32 : vector<8x128xf32>
    %cst_22 = arith.constant 5.000000e-01 : f32
    %35 = vector.broadcast %cst_22 : f32 to vector<8x128xf32>
    %36 = arith.addf %34, %35 : vector<8x128xf32>
    %37 = arith.mulf %36, %9 : vector<8x128xf32>
    %38 = arith.addf %29, %37 : vector<8x128xf32>
    %cst_23 = arith.constant 5.000000e-01 : f32
    %39 = vector.broadcast %cst_23 : f32 to vector<8x128xf32>
    %40 = arith.mulf %39, %20 : vector<8x128xf32>
    %41 = math.tanh %40 : vector<8x128xf32>
    %cst_24 = arith.constant 5.000000e-01 : f32
    %42 = vector.broadcast %cst_24 : f32 to vector<8x128xf32>
    %43 = arith.mulf %42, %41 : vector<8x128xf32>
    %cst_25 = arith.constant 5.000000e-01 : f32
    %44 = vector.broadcast %cst_25 : f32 to vector<8x128xf32>
    %45 = arith.addf %43, %44 : vector<8x128xf32>
    %46 = math.tanh %38 : vector<8x128xf32>
    %47 = arith.mulf %45, %46 : vector<8x128xf32>
    %48 = arith.truncf %47 : vector<8x128xf32> to vector<8x128xbf16>
    %49 = arith.truncf %10 : vector<8x128xf32> to vector<8x128xbf16>
    %50 = tpu.concatenate %48, %49 in 1 : vector<8x128xbf16>, vector<8x128xbf16> -> vector<8x256xbf16>
    %cst_26 = arith.constant dense<0.000000e+00> : vector<8x640xf32>
    %51 = tpu.matmul %50, %4, %cst_26 {dimension_numbers = #tpu.dot_dimension_numbers<[1], [0], [0], [1], [0, 0, 1, 1], [], []>} : vector<8x256xbf16>, vector<256x640xbf16>, vector<8x640xf32> -> vector<8x640xf32>
    %52 = arith.addf %51, %7 : vector<8x640xf32>
    %53 = vector.extract_strided_slice %52 {offsets = [0, 0], sizes = [8, 128], strides = [1, 1]} : vector<8x640xf32> to vector<8x128xf32>
    %54 = vector.extract_strided_slice %52 {offsets = [0, 128], sizes = [8, 128], strides = [1, 1]} : vector<8x640xf32> to vector<8x128xf32>
    %55 = vector.extract_strided_slice %52 {offsets = [0, 256], sizes = [8, 128], strides = [1, 1]} : vector<8x640xf32> to vector<8x128xf32>
    %56 = vector.extract_strided_slice %52 {offsets = [0, 384], sizes = [8, 128], strides = [1, 1]} : vector<8x640xf32> to vector<8x128xf32>
    %57 = vector.extract_strided_slice %52 {offsets = [0, 512], sizes = [8, 128], strides = [1, 1]} : vector<8x640xf32> to vector<8x128xf32>
    %cst_27 = arith.constant 5.000000e-01 : f32
    %58 = vector.broadcast %cst_27 : f32 to vector<8x128xf32>
    %59 = arith.mulf %58, %54 : vector<8x128xf32>
    %60 = math.tanh %59 : vector<8x128xf32>
    %cst_28 = arith.constant 5.000000e-01 : f32
    %61 = vector.broadcast %cst_28 : f32 to vector<8x128xf32>
    %62 = arith.mulf %61, %60 : vector<8x128xf32>
    %cst_29 = arith.constant 5.000000e-01 : f32
    %63 = vector.broadcast %cst_29 : f32 to vector<8x128xf32>
    %64 = arith.addf %62, %63 : vector<8x128xf32>
    %65 = arith.mulf %11, %64 : vector<8x128xf32>
    %cst_30 = arith.constant 5.000000e-01 : f32
    %66 = vector.broadcast %cst_30 : f32 to vector<8x128xf32>
    %67 = arith.mulf %66, %55 : vector<8x128xf32>
    %68 = math.tanh %67 : vector<8x128xf32>
    %cst_31 = arith.constant 5.000000e-01 : f32
    %69 = vector.broadcast %cst_31 : f32 to vector<8x128xf32>
    %70 = arith.mulf %69, %68 : vector<8x128xf32>
    %cst_32 = arith.constant 5.000000e-01 : f32
    %71 = vector.broadcast %cst_32 : f32 to vector<8x128xf32>
    %72 = arith.addf %70, %71 : vector<8x128xf32>
    %73 = arith.mulf %38, %72 : vector<8x128xf32>
    %74 = arith.addf %65, %73 : vector<8x128xf32>
    %75 = math.tanh %56 : vector<8x128xf32>
    %cst_33 = arith.constant 5.000000e-01 : f32
    %76 = vector.broadcast %cst_33 : f32 to vector<8x128xf32>
    %77 = arith.mulf %76, %53 : vector<8x128xf32>
    %78 = math.tanh %77 : vector<8x128xf32>
    %cst_34 = arith.constant 5.000000e-01 : f32
    %79 = vector.broadcast %cst_34 : f32 to vector<8x128xf32>
    %80 = arith.mulf %79, %78 : vector<8x128xf32>
    %cst_35 = arith.constant 5.000000e-01 : f32
    %81 = vector.broadcast %cst_35 : f32 to vector<8x128xf32>
    %82 = arith.addf %80, %81 : vector<8x128xf32>
    %83 = arith.mulf %75, %82 : vector<8x128xf32>
    %84 = arith.addf %74, %83 : vector<8x128xf32>
    %cst_36 = arith.constant 5.000000e-01 : f32
    %85 = vector.broadcast %cst_36 : f32 to vector<8x128xf32>
    %86 = arith.mulf %85, %57 : vector<8x128xf32>
    %87 = math.tanh %86 : vector<8x128xf32>
    %cst_37 = arith.constant 5.000000e-01 : f32
    %88 = vector.broadcast %cst_37 : f32 to vector<8x128xf32>
    %89 = arith.mulf %88, %87 : vector<8x128xf32>
    %cst_38 = arith.constant 5.000000e-01 : f32
    %90 = vector.broadcast %cst_38 : f32 to vector<8x128xf32>
    %91 = arith.addf %89, %90 : vector<8x128xf32>
    %92 = math.tanh %84 : vector<8x128xf32>
    %93 = arith.mulf %91, %92 : vector<8x128xf32>
    %c0_39 = arith.constant 0 : index
    %c0_40 = arith.constant 0 : index
    %c0_41 = arith.constant 0 : index
    %94 = vector.load %arg5[%c0_39, %c0_40, %c0_41] : memref<16x8x128xf32, #tpu.memory_space<vmem>>, vector<1x8x128xf32>
    %95 = vector.shape_cast %94 : vector<1x8x128xf32> to vector<8x128xf32>
    %96 = vector.shape_cast %93 : vector<8x128xf32> to vector<1x8x128xf32>
    tpu.vector_store %arg5[%c0_39, %c0_40, %c0_41], %96 {strides = array<i32>} : memref<16x8x128xf32, #tpu.memory_space<vmem>>, vector<1x8x128xf32>,
    %c0_42 = arith.constant 0 : index
    %c0_43 = arith.constant 0 : index
    %c0_44 = arith.constant 0 : index
    %97 = vector.load %arg6[%c0_42, %c0_43, %c0_44] : memref<16x8x128xf32, #tpu.memory_space<vmem>>, vector<1x8x128xf32>
    %98 = vector.shape_cast %97 : vector<1x8x128xf32> to vector<8x128xf32>
    %99 = vector.shape_cast %84 : vector<8x128xf32> to vector<1x8x128xf32>
    tpu.vector_store %arg6[%c0_42, %c0_43, %c0_44], %99 {strides = array<i32>} : memref<16x8x128xf32, #tpu.memory_space<vmem>>, vector<1x8x128xf32>,
    %c1 = arith.constant 1 : index
    %c0_45 = arith.constant 0 : index
    %c0_46 = arith.constant 0 : index
    %100 = vector.load %arg1[%c1, %c0_45, %c0_46] : memref<16x8x512xf32, #tpu.memory_space<vmem>>, vector<1x8x512xf32>
    %101 = vector.shape_cast %100 : vector<1x8x512xf32> to vector<8x512xf32>
    %102 = arith.truncf %47 : vector<8x128xf32> to vector<8x128xbf16>
    %cst_47 = arith.constant dense<0.000000e+00> : vector<8x512xf32>
    %103 = tpu.matmul %102, %3, %cst_47 {dimension_numbers = #tpu.dot_dimension_numbers<[1], [0], [0], [1], [0, 0, 1, 1], [], []>} : vector<8x128xbf16>, vector<128x512xbf16>, vector<8x512xf32> -> vector<8x512xf32>
    %104 = arith.addf %101, %103 : vector<8x512xf32>
    %105 = vector.extract_strided_slice %104 {offsets = [0, 0], sizes = [8, 128], strides = [1, 1]} : vector<8x512xf32> to vector<8x128xf32>
    %106 = vector.extract_strided_slice %104 {offsets = [0, 128], sizes = [8, 128], strides = [1, 1]} : vector<8x512xf32> to vector<8x128xf32>
    %107 = vector.extract_strided_slice %104 {offsets = [0, 256], sizes = [8, 128], strides = [1, 1]} : vector<8x512xf32> to vector<8x128xf32>
    %108 = vector.extract_strided_slice %104 {offsets = [0, 384], sizes = [8, 128], strides = [1, 1]} : vector<8x512xf32> to vector<8x128xf32>
    %cst_48 = arith.constant 5.000000e-01 : f32
    %109 = vector.broadcast %cst_48 : f32 to vector<8x128xf32>
    %110 = arith.mulf %109, %105 : vector<8x128xf32>
    %111 = math.tanh %110 : vector<8x128xf32>
    %cst_49 = arith.constant 5.000000e-01 : f32
    %112 = vector.broadcast %cst_49 : f32 to vector<8x128xf32>
    %113 = arith.mulf %112, %111 : vector<8x128xf32>
    %cst_50 = arith.constant 5.000000e-01 : f32
    %114 = vector.broadcast %cst_50 : f32 to vector<8x128xf32>
    %115 = arith.addf %113, %114 : vector<8x128xf32>
    %116 = math.tanh %107 : vector<8x128xf32>
    %117 = arith.mulf %115, %116 : vector<8x128xf32>
    %cst_51 = arith.constant 5.000000e-01 : f32
    %118 = vector.broadcast %cst_51 : f32 to vector<8x128xf32>
    %119 = arith.mulf %118, %106 : vector<8x128xf32>
    %120 = math.tanh %119 : vector<8x128xf32>
    %cst_52 = arith.constant 5.000000e-01 : f32
    %121 = vector.broadcast %cst_52 : f32 to vector<8x128xf32>
    %122 = arith.mulf %121, %120 : vector<8x128xf32>
    %cst_53 = arith.constant 5.000000e-01 : f32
    %123 = vector.broadcast %cst_53 : f32 to vector<8x128xf32>
    %124 = arith.addf %122, %123 : vector<8x128xf32>
    %125 = arith.mulf %124, %38 : vector<8x128xf32>
    %126 = arith.addf %117, %125 : vector<8x128xf32>
    %cst_54 = arith.constant 5.000000e-01 : f32
    %127 = vector.broadcast %cst_54 : f32 to vector<8x128xf32>
    %128 = arith.mulf %127, %108 : vector<8x128xf32>
    %129 = math.tanh %128 : vector<8x128xf32>
    %cst_55 = arith.constant 5.000000e-01 : f32
    %130 = vector.broadcast %cst_55 : f32 to vector<8x128xf32>
    %131 = arith.mulf %130, %129 : vector<8x128xf32>
    %cst_56 = arith.constant 5.000000e-01 : f32
    %132 = vector.broadcast %cst_56 : f32 to vector<8x128xf32>
    %133 = arith.addf %131, %132 : vector<8x128xf32>
    %134 = math.tanh %126 : vector<8x128xf32>
    %135 = arith.mulf %133, %134 : vector<8x128xf32>
    %136 = arith.truncf %135 : vector<8x128xf32> to vector<8x128xbf16>
    %137 = arith.truncf %93 : vector<8x128xf32> to vector<8x128xbf16>
    %138 = tpu.concatenate %136, %137 in 1 : vector<8x128xbf16>, vector<8x128xbf16> -> vector<8x256xbf16>
    %cst_57 = arith.constant dense<0.000000e+00> : vector<8x640xf32>
    %139 = tpu.matmul %138, %4, %cst_57 {dimension_numbers = #tpu.dot_dimension_numbers<[1], [0], [0], [1], [0, 0, 1, 1], [], []>} : vector<8x256xbf16>, vector<256x640xbf16>, vector<8x640xf32> -> vector<8x640xf32>
    %140 = arith.addf %139, %7 : vector<8x640xf32>
    %141 = vector.extract_strided_slice %140 {offsets = [0, 0], sizes = [8, 128], strides = [1, 1]} : vector<8x640xf32> to vector<8x128xf32>
    %142 = vector.extract_strided_slice %140 {offsets = [0, 128], sizes = [8, 128], strides = [1, 1]} : vector<8x640xf32> to vector<8x128xf32>
    %143 = vector.extract_strided_slice %140 {offsets = [0, 256], sizes = [8, 128], strides = [1, 1]} : vector<8x640xf32> to vector<8x128xf32>
    %144 = vector.extract_strided_slice %140 {offsets = [0, 384], sizes = [8, 128], strides = [1, 1]} : vector<8x640xf32> to vector<8x128xf32>
    %145 = vector.extract_strided_slice %140 {offsets = [0, 512], sizes = [8, 128], strides = [1, 1]} : vector<8x640xf32> to vector<8x128xf32>
    %cst_58 = arith.constant 5.000000e-01 : f32
    %146 = vector.broadcast %cst_58 : f32 to vector<8x128xf32>
    %147 = arith.mulf %146, %142 : vector<8x128xf32>
    %148 = math.tanh %147 : vector<8x128xf32>
    %cst_59 = arith.constant 5.000000e-01 : f32
    %149 = vector.broadcast %cst_59 : f32 to vector<8x128xf32>
    %150 = arith.mulf %149, %148 : vector<8x128xf32>
    %cst_60 = arith.constant 5.000000e-01 : f32
    %151 = vector.broadcast %cst_60 : f32 to vector<8x128xf32>
    %152 = arith.addf %150, %151 : vector<8x128xf32>
    %153 = arith.mulf %84, %152 : vector<8x128xf32>
    %cst_61 = arith.constant 5.000000e-01 : f32
    %154 = vector.broadcast %cst_61 : f32 to vector<8x128xf32>
    %155 = arith.mulf %154, %143 : vector<8x128xf32>
    %156 = math.tanh %155 : vector<8x128xf32>
    %cst_62 = arith.constant 5.000000e-01 : f32
    %157 = vector.broadcast %cst_62 : f32 to vector<8x128xf32>
    %158 = arith.mulf %157, %156 : vector<8x128xf32>
    %cst_63 = arith.constant 5.000000e-01 : f32
    %159 = vector.broadcast %cst_63 : f32 to vector<8x128xf32>
    %160 = arith.addf %158, %159 : vector<8x128xf32>
    %161 = arith.mulf %126, %160 : vector<8x128xf32>
    %162 = arith.addf %153, %161 : vector<8x128xf32>
    %163 = math.tanh %144 : vector<8x128xf32>
    %cst_64 = arith.constant 5.000000e-01 : f32
    %164 = vector.broadcast %cst_64 : f32 to vector<8x128xf32>
    %165 = arith.mulf %164, %141 : vector<8x128xf32>
    %166 = math.tanh %165 : vector<8x128xf32>
    %cst_65 = arith.constant 5.000000e-01 : f32
    %167 = vector.broadcast %cst_65 : f32 to vector<8x128xf32>
    %168 = arith.mulf %167, %166 : vector<8x128xf32>
    %cst_66 = arith.constant 5.000000e-01 : f32
    %169 = vector.broadcast %cst_66 : f32 to vector<8x128xf32>
    %170 = arith.addf %168, %169 : vector<8x128xf32>
    %171 = arith.mulf %163, %170 : vector<8x128xf32>
    %172 = arith.addf %162, %171 : vector<8x128xf32>
    %cst_67 = arith.constant 5.000000e-01 : f32
    %173 = vector.broadcast %cst_67 : f32 to vector<8x128xf32>
    %174 = arith.mulf %173, %145 : vector<8x128xf32>
    %175 = math.tanh %174 : vector<8x128xf32>
    %cst_68 = arith.constant 5.000000e-01 : f32
    %176 = vector.broadcast %cst_68 : f32 to vector<8x128xf32>
    %177 = arith.mulf %176, %175 : vector<8x128xf32>
    %cst_69 = arith.constant 5.000000e-01 : f32
    %178 = vector.broadcast %cst_69 : f32 to vector<8x128xf32>
    %179 = arith.addf %177, %178 : vector<8x128xf32>
    %180 = math.tanh %172 : vector<8x128xf32>
    %181 = arith.mulf %179, %180 : vector<8x128xf32>
    %c1_70 = arith.constant 1 : index
    %c0_71 = arith.constant 0 : index
    %c0_72 = arith.constant 0 : index
    %182 = vector.load %arg5[%c1_70, %c0_71, %c0_72] : memref<16x8x128xf32, #tpu.memory_space<vmem>>, vector<1x8x128xf32>
    %183 = vector.shape_cast %182 : vector<1x8x128xf32> to vector<8x128xf32>
    %184 = vector.shape_cast %181 : vector<8x128xf32> to vector<1x8x128xf32>
    tpu.vector_store %arg5[%c1_70, %c0_71, %c0_72], %184 {strides = array<i32>} : memref<16x8x128xf32, #tpu.memory_space<vmem>>, vector<1x8x128xf32>,
    %c1_73 = arith.constant 1 : index
    %c0_74 = arith.constant 0 : index
    %c0_75 = arith.constant 0 : index
    %185 = vector.load %arg6[%c1_73, %c0_74, %c0_75] : memref<16x8x128xf32, #tpu.memory_space<vmem>>, vector<1x8x128xf32>
    %186 = vector.shape_cast %185 : vector<1x8x128xf32> to vector<8x128xf32>
    %187 = vector.shape_cast %172 : vector<8x128xf32> to vector<1x8x128xf32>
    tpu.vector_store %arg6[%c1_73, %c0_74, %c0_75], %187 {strides = array<i32>} : memref<16x8x128xf32, #tpu.memory_space<vmem>>, vector<1x8x128xf32>,
    %c2 = arith.constant 2 : index
    %c0_76 = arith.constant 0 : index
    %c0_77 = arith.constant 0 : index
    %188 = vector.load %arg1[%c2, %c0_76, %c0_77] : memref<16x8x512xf32, #tpu.memory_space<vmem>>, vector<1x8x512xf32>
    %189 = vector.shape_cast %188 : vector<1x8x512xf32> to vector<8x512xf32>
    %190 = arith.truncf %135 : vector<8x128xf32> to vector<8x128xbf16>
    %cst_78 = arith.constant dense<0.000000e+00> : vector<8x512xf32>
    %191 = tpu.matmul %190, %3, %cst_78 {dimension_numbers = #tpu.dot_dimension_numbers<[1], [0], [0], [1], [0, 0, 1, 1], [], []>} : vector<8x128xbf16>, vector<128x512xbf16>, vector<8x512xf32> -> vector<8x512xf32>
    %192 = arith.addf %189, %191 : vector<8x512xf32>
    %193 = vector.extract_strided_slice %192 {offsets = [0, 0], sizes = [8, 128], strides = [1, 1]} : vector<8x512xf32> to vector<8x128xf32>
    %194 = vector.extract_strided_slice %192 {offsets = [0, 128], sizes = [8, 128], strides = [1, 1]} : vector<8x512xf32> to vector<8x128xf32>
    %195 = vector.extract_strided_slice %192 {offsets = [0, 256], sizes = [8, 128], strides = [1, 1]} : vector<8x512xf32> to vector<8x128xf32>
    %196 = vector.extract_strided_slice %192 {offsets = [0, 384], sizes = [8, 128], strides = [1, 1]} : vector<8x512xf32> to vector<8x128xf32>
    %cst_79 = arith.constant 5.000000e-01 : f32
    %197 = vector.broadcast %cst_79 : f32 to vector<8x128xf32>
    %198 = arith.mulf %197, %193 : vector<8x128xf32>
    %199 = math.tanh %198 : vector<8x128xf32>
    %cst_80 = arith.constant 5.000000e-01 : f32
    %200 = vector.broadcast %cst_80 : f32 to vector<8x128xf32>
    %201 = arith.mulf %200, %199 : vector<8x128xf32>
    %cst_81 = arith.constant 5.000000e-01 : f32
    %202 = vector.broadcast %cst_81 : f32 to vector<8x128xf32>
    %203 = arith.addf %201, %202 : vector<8x128xf32>
    %204 = math.tanh %195 : vector<8x128xf32>
    %205 = arith.mulf %203, %204 : vector<8x128xf32>
    %cst_82 = arith.constant 5.000000e-01 : f32
    %206 = vector.broadcast %cst_82 : f32 to vector<8x128xf32>
    %207 = arith.mulf %206, %194 : vector<8x128xf32>
    %208 = math.tanh %207 : vector<8x128xf32>
    %cst_83 = arith.constant 5.000000e-01 : f32
    %209 = vector.broadcast %cst_83 : f32 to vector<8x128xf32>
    %210 = arith.mulf %209, %208 : vector<8x128xf32>
    %cst_84 = arith.constant 5.000000e-01 : f32
    %211 = vector.broadcast %cst_84 : f32 to vector<8x128xf32>
    %212 = arith.addf %210, %211 : vector<8x128xf32>
    %213 = arith.mulf %212, %126 : vector<8x128xf32>
    %214 = arith.addf %205, %213 : vector<8x128xf32>
    %cst_85 = arith.constant 5.000000e-01 : f32
    %215 = vector.broadcast %cst_85 : f32 to vector<8x128xf32>
    %216 = arith.mulf %215, %196 : vector<8x128xf32>
    %217 = math.tanh %216 : vector<8x128xf32>
    %cst_86 = arith.constant 5.000000e-01 : f32
    %218 = vector.broadcast %cst_86 : f32 to vector<8x128xf32>
    %219 = arith.mulf %218, %217 : vector<8x128xf32>
    %cst_87 = arith.constant 5.000000e-01 : f32
    %220 = vector.broadcast %cst_87 : f32 to vector<8x128xf32>
    %221 = arith.addf %219, %220 : vector<8x128xf32>
    %222 = math.tanh %214 : vector<8x128xf32>
    %223 = arith.mulf %221, %222 : vector<8x128xf32>
    %224 = arith.truncf %223 : vector<8x128xf32> to vector<8x128xbf16>
    %225 = arith.truncf %181 : vector<8x128xf32> to vector<8x128xbf16>
    %226 = tpu.concatenate %224, %225 in 1 : vector<8x128xbf16>, vector<8x128xbf16> -> vector<8x256xbf16>
    %cst_88 = arith.constant dense<0.000000e+00> : vector<8x640xf32>
    %227 = tpu.matmul %226, %4, %cst_88 {dimension_numbers = #tpu.dot_dimension_numbers<[1], [0], [0], [1], [0, 0, 1, 1], [], []>} : vector<8x256xbf16>, vector<256x640xbf16>, vector<8x640xf32> -> vector<8x640xf32>
    %228 = arith.addf %227, %7 : vector<8x640xf32>
    %229 = vector.extract_strided_slice %228 {offsets = [0, 0], sizes = [8, 128], strides = [1, 1]} : vector<8x640xf32> to vector<8x128xf32>
    %230 = vector.extract_strided_slice %228 {offsets = [0, 128], sizes = [8, 128], strides = [1, 1]} : vector<8x640xf32> to vector<8x128xf32>
    %231 = vector.extract_strided_slice %228 {offsets = [0, 256], sizes = [8, 128], strides = [1, 1]} : vector<8x640xf32> to vector<8x128xf32>
    %232 = vector.extract_strided_slice %228 {offsets = [0, 384], sizes = [8, 128], strides = [1, 1]} : vector<8x640xf32> to vector<8x128xf32>
    %233 = vector.extract_strided_slice %228 {offsets = [0, 512], sizes = [8, 128], strides = [1, 1]} : vector<8x640xf32> to vector<8x128xf32>
    %cst_89 = arith.constant 5.000000e-01 : f32
    %234 = vector.broadcast %cst_89 : f32 to vector<8x128xf32>
    %235 = arith.mulf %234, %230 : vector<8x128xf32>
    %236 = math.tanh %235 : vector<8x128xf32>
    %cst_90 = arith.constant 5.000000e-01 : f32
    %237 = vector.broadcast %cst_90 : f32 to vector<8x128xf32>
    %238 = arith.mulf %237, %236 : vector<8x128xf32>
    %cst_91 = arith.constant 5.000000e-01 : f32
    %239 = vector.broadcast %cst_91 : f32 to vector<8x128xf32>
    %240 = arith.addf %238, %239 : vector<8x128xf32>
    %241 = arith.mulf %172, %240 : vector<8x128xf32>
    %cst_92 = arith.constant 5.000000e-01 : f32
    %242 = vector.broadcast %cst_92 : f32 to vector<8x128xf32>
    %243 = arith.mulf %242, %231 : vector<8x128xf32>
    %244 = math.tanh %243 : vector<8x128xf32>
    %cst_93 = arith.constant 5.000000e-01 : f32
    %245 = vector.broadcast %cst_93 : f32 to vector<8x128xf32>
    %246 = arith.mulf %245, %244 : vector<8x128xf32>
    %cst_94 = arith.constant 5.000000e-01 : f32
    %247 = vector.broadcast %cst_94 : f32 to vector<8x128xf32>
    %248 = arith.addf %246, %247 : vector<8x128xf32>
    %249 = arith.mulf %214, %248 : vector<8x128xf32>
    %250 = arith.addf %241, %249 : vector<8x128xf32>
    %251 = math.tanh %232 : vector<8x128xf32>
    %cst_95 = arith.constant 5.000000e-01 : f32
    %252 = vector.broadcast %cst_95 : f32 to vector<8x128xf32>
    %253 = arith.mulf %252, %229 : vector<8x128xf32>
    %254 = math.tanh %253 : vector<8x128xf32>
    %cst_96 = arith.constant 5.000000e-01 : f32
    %255 = vector.broadcast %cst_96 : f32 to vector<8x128xf32>
    %256 = arith.mulf %255, %254 : vector<8x128xf32>
    %cst_97 = arith.constant 5.000000e-01 : f32
    %257 = vector.broadcast %cst_97 : f32 to vector<8x128xf32>
    %258 = arith.addf %256, %257 : vector<8x128xf32>
    %259 = arith.mulf %251, %258 : vector<8x128xf32>
    %260 = arith.addf %250, %259 : vector<8x128xf32>
    %cst_98 = arith.constant 5.000000e-01 : f32
    %261 = vector.broadcast %cst_98 : f32 to vector<8x128xf32>
    %262 = arith.mulf %261, %233 : vector<8x128xf32>
    %263 = math.tanh %262 : vector<8x128xf32>
    %cst_99 = arith.constant 5.000000e-01 : f32
    %264 = vector.broadcast %cst_99 : f32 to vector<8x128xf32>
    %265 = arith.mulf %264, %263 : vector<8x128xf32>
    %cst_100 = arith.constant 5.000000e-01 : f32
    %266 = vector.broadcast %cst_100 : f32 to vector<8x128xf32>
    %267 = arith.addf %265, %266 : vector<8x128xf32>
    %268 = math.tanh %260 : vector<8x128xf32>
    %269 = arith.mulf %267, %268 : vector<8x128xf32>
    %c2_101 = arith.constant 2 : index
    %c0_102 = arith.constant 0 : index
    %c0_103 = arith.constant 0 : index
    %270 = vector.load %arg5[%c2_101, %c0_102, %c0_103] : memref<16x8x128xf32, #tpu.memory_space<vmem>>, vector<1x8x128xf32>
    %271 = vector.shape_cast %270 : vector<1x8x128xf32> to vector<8x128xf32>
    %272 = vector.shape_cast %269 : vector<8x128xf32> to vector<1x8x128xf32>
    tpu.vector_store %arg5[%c2_101, %c0_102, %c0_103], %272 {strides = array<i32>} : memref<16x8x128xf32, #tpu.memory_space<vmem>>, vector<1x8x128xf32>,
    %c2_104 = arith.constant 2 : index
    %c0_105 = arith.constant 0 : index
    %c0_106 = arith.constant 0 : index
    %273 = vector.load %arg6[%c2_104, %c0_105, %c0_106] : memref<16x8x128xf32, #tpu.memory_space<vmem>>, vector<1x8x128xf32>
    %274 = vector.shape_cast %273 : vector<1x8x128xf32> to vector<8x128xf32>
    %275 = vector.shape_cast %260 : vector<8x128xf32> to vector<1x8x128xf32>
    tpu.vector_store %arg6[%c2_104, %c0_105, %c0_106], %275 {strides = array<i32>} : memref<16x8x128xf32, #tpu.memory_space<vmem>>, vector<1x8x128xf32>,
    %c3 = arith.constant 3 : index
    %c0_107 = arith.constant 0 : index
    %c0_108 = arith.constant 0 : index
    %276 = vector.load %arg1[%c3, %c0_107, %c0_108] : memref<16x8x512xf32, #tpu.memory_space<vmem>>, vector<1x8x512xf32>
    %277 = vector.shape_cast %276 : vector<1x8x512xf32> to vector<8x512xf32>
    %278 = arith.truncf %223 : vector<8x128xf32> to vector<8x128xbf16>
    %cst_109 = arith.constant dense<0.000000e+00> : vector<8x512xf32>
    %279 = tpu.matmul %278, %3, %cst_109 {dimension_numbers = #tpu.dot_dimension_numbers<[1], [0], [0], [1], [0, 0, 1, 1], [], []>} : vector<8x128xbf16>, vector<128x512xbf16>, vector<8x512xf32> -> vector<8x512xf32>
    %280 = arith.addf %277, %279 : vector<8x512xf32>
    %281 = vector.extract_strided_slice %280 {offsets = [0, 0], sizes = [8, 128], strides = [1, 1]} : vector<8x512xf32> to vector<8x128xf32>
    %282 = vector.extract_strided_slice %280 {offsets = [0, 128], sizes = [8, 128], strides = [1, 1]} : vector<8x512xf32> to vector<8x128xf32>
    %283 = vector.extract_strided_slice %280 {offsets = [0, 256], sizes = [8, 128], strides = [1, 1]} : vector<8x512xf32> to vector<8x128xf32>
    %284 = vector.extract_strided_slice %280 {offsets = [0, 384], sizes = [8, 128], strides = [1, 1]} : vector<8x512xf32> to vector<8x128xf32>
    %cst_110 = arith.constant 5.000000e-01 : f32
    %285 = vector.broadcast %cst_110 : f32 to vector<8x128xf32>
    %286 = arith.mulf %285, %281 : vector<8x128xf32>
    %287 = math.tanh %286 : vector<8x128xf32>
    %cst_111 = arith.constant 5.000000e-01 : f32
    %288 = vector.broadcast %cst_111 : f32 to vector<8x128xf32>
    %289 = arith.mulf %288, %287 : vector<8x128xf32>
    %cst_112 = arith.constant 5.000000e-01 : f32
    %290 = vector.broadcast %cst_112 : f32 to vector<8x128xf32>
    %291 = arith.addf %289, %290 : vector<8x128xf32>
    %292 = math.tanh %283 : vector<8x128xf32>
    %293 = arith.mulf %291, %292 : vector<8x128xf32>
    %cst_113 = arith.constant 5.000000e-01 : f32
    %294 = vector.broadcast %cst_113 : f32 to vector<8x128xf32>
    %295 = arith.mulf %294, %282 : vector<8x128xf32>
    %296 = math.tanh %295 : vector<8x128xf32>
    %cst_114 = arith.constant 5.000000e-01 : f32
    %297 = vector.broadcast %cst_114 : f32 to vector<8x128xf32>
    %298 = arith.mulf %297, %296 : vector<8x128xf32>
    %cst_115 = arith.constant 5.000000e-01 : f32
    %299 = vector.broadcast %cst_115 : f32 to vector<8x128xf32>
    %300 = arith.addf %298, %299 : vector<8x128xf32>
    %301 = arith.mulf %300, %214 : vector<8x128xf32>
    %302 = arith.addf %293, %301 : vector<8x128xf32>
    %cst_116 = arith.constant 5.000000e-01 : f32
    %303 = vector.broadcast %cst_116 : f32 to vector<8x128xf32>
    %304 = arith.mulf %303, %284 : vector<8x128xf32>
    %305 = math.tanh %304 : vector<8x128xf32>
    %cst_117 = arith.constant 5.000000e-01 : f32
    %306 = vector.broadcast %cst_117 : f32 to vector<8x128xf32>
    %307 = arith.mulf %306, %305 : vector<8x128xf32>
    %cst_118 = arith.constant 5.000000e-01 : f32
    %308 = vector.broadcast %cst_118 : f32 to vector<8x128xf32>
    %309 = arith.addf %307, %308 : vector<8x128xf32>
    %310 = math.tanh %302 : vector<8x128xf32>
    %311 = arith.mulf %309, %310 : vector<8x128xf32>
    %312 = arith.truncf %311 : vector<8x128xf32> to vector<8x128xbf16>
    %313 = arith.truncf %269 : vector<8x128xf32> to vector<8x128xbf16>
    %314 = tpu.concatenate %312, %313 in 1 : vector<8x128xbf16>, vector<8x128xbf16> -> vector<8x256xbf16>
    %cst_119 = arith.constant dense<0.000000e+00> : vector<8x640xf32>
    %315 = tpu.matmul %314, %4, %cst_119 {dimension_numbers = #tpu.dot_dimension_numbers<[1], [0], [0], [1], [0, 0, 1, 1], [], []>} : vector<8x256xbf16>, vector<256x640xbf16>, vector<8x640xf32> -> vector<8x640xf32>
    %316 = arith.addf %315, %7 : vector<8x640xf32>
    %317 = vector.extract_strided_slice %316 {offsets = [0, 0], sizes = [8, 128], strides = [1, 1]} : vector<8x640xf32> to vector<8x128xf32>
    %318 = vector.extract_strided_slice %316 {offsets = [0, 128], sizes = [8, 128], strides = [1, 1]} : vector<8x640xf32> to vector<8x128xf32>
    %319 = vector.extract_strided_slice %316 {offsets = [0, 256], sizes = [8, 128], strides = [1, 1]} : vector<8x640xf32> to vector<8x128xf32>
    %320 = vector.extract_strided_slice %316 {offsets = [0, 384], sizes = [8, 128], strides = [1, 1]} : vector<8x640xf32> to vector<8x128xf32>
    %321 = vector.extract_strided_slice %316 {offsets = [0, 512], sizes = [8, 128], strides = [1, 1]} : vector<8x640xf32> to vector<8x128xf32>
    %cst_120 = arith.constant 5.000000e-01 : f32
    %322 = vector.broadcast %cst_120 : f32 to vector<8x128xf32>
    %323 = arith.mulf %322, %318 : vector<8x128xf32>
    %324 = math.tanh %323 : vector<8x128xf32>
    %cst_121 = arith.constant 5.000000e-01 : f32
    %325 = vector.broadcast %cst_121 : f32 to vector<8x128xf32>
    %326 = arith.mulf %325, %324 : vector<8x128xf32>
    %cst_122 = arith.constant 5.000000e-01 : f32
    %327 = vector.broadcast %cst_122 : f32 to vector<8x128xf32>
    %328 = arith.addf %326, %327 : vector<8x128xf32>
    %329 = arith.mulf %260, %328 : vector<8x128xf32>
    %cst_123 = arith.constant 5.000000e-01 : f32
    %330 = vector.broadcast %cst_123 : f32 to vector<8x128xf32>
    %331 = arith.mulf %330, %319 : vector<8x128xf32>
    %332 = math.tanh %331 : vector<8x128xf32>
    %cst_124 = arith.constant 5.000000e-01 : f32
    %333 = vector.broadcast %cst_124 : f32 to vector<8x128xf32>
    %334 = arith.mulf %333, %332 : vector<8x128xf32>
    %cst_125 = arith.constant 5.000000e-01 : f32
    %335 = vector.broadcast %cst_125 : f32 to vector<8x128xf32>
    %336 = arith.addf %334, %335 : vector<8x128xf32>
    %337 = arith.mulf %302, %336 : vector<8x128xf32>
    %338 = arith.addf %329, %337 : vector<8x128xf32>
    %339 = math.tanh %320 : vector<8x128xf32>
    %cst_126 = arith.constant 5.000000e-01 : f32
    %340 = vector.broadcast %cst_126 : f32 to vector<8x128xf32>
    %341 = arith.mulf %340, %317 : vector<8x128xf32>
    %342 = math.tanh %341 : vector<8x128xf32>
    %cst_127 = arith.constant 5.000000e-01 : f32
    %343 = vector.broadcast %cst_127 : f32 to vector<8x128xf32>
    %344 = arith.mulf %343, %342 : vector<8x128xf32>
    %cst_128 = arith.constant 5.000000e-01 : f32
    %345 = vector.broadcast %cst_128 : f32 to vector<8x128xf32>
    %346 = arith.addf %344, %345 : vector<8x128xf32>
    %347 = arith.mulf %339, %346 : vector<8x128xf32>
    %348 = arith.addf %338, %347 : vector<8x128xf32>
    %cst_129 = arith.constant 5.000000e-01 : f32
    %349 = vector.broadcast %cst_129 : f32 to vector<8x128xf32>
    %350 = arith.mulf %349, %321 : vector<8x128xf32>
    %351 = math.tanh %350 : vector<8x128xf32>
    %cst_130 = arith.constant 5.000000e-01 : f32
    %352 = vector.broadcast %cst_130 : f32 to vector<8x128xf32>
    %353 = arith.mulf %352, %351 : vector<8x128xf32>
    %cst_131 = arith.constant 5.000000e-01 : f32
    %354 = vector.broadcast %cst_131 : f32 to vector<8x128xf32>
    %355 = arith.addf %353, %354 : vector<8x128xf32>
    %356 = math.tanh %348 : vector<8x128xf32>
    %357 = arith.mulf %355, %356 : vector<8x128xf32>
    %c3_132 = arith.constant 3 : index
    %c0_133 = arith.constant 0 : index
    %c0_134 = arith.constant 0 : index
    %358 = vector.load %arg5[%c3_132, %c0_133, %c0_134] : memref<16x8x128xf32, #tpu.memory_space<vmem>>, vector<1x8x128xf32>
    %359 = vector.shape_cast %358 : vector<1x8x128xf32> to vector<8x128xf32>
    %360 = vector.shape_cast %357 : vector<8x128xf32> to vector<1x8x128xf32>
    tpu.vector_store %arg5[%c3_132, %c0_133, %c0_134], %360 {strides = array<i32>} : memref<16x8x128xf32, #tpu.memory_space<vmem>>, vector<1x8x128xf32>,
    %c3_135 = arith.constant 3 : index
    %c0_136 = arith.constant 0 : index
    %c0_137 = arith.constant 0 : index
    %361 = vector.load %arg6[%c3_135, %c0_136, %c0_137] : memref<16x8x128xf32, #tpu.memory_space<vmem>>, vector<1x8x128xf32>
    %362 = vector.shape_cast %361 : vector<1x8x128xf32> to vector<8x128xf32>
    %363 = vector.shape_cast %348 : vector<8x128xf32> to vector<1x8x128xf32>
    tpu.vector_store %arg6[%c3_135, %c0_136, %c0_137], %363 {strides = array<i32>} : memref<16x8x128xf32, #tpu.memory_space<vmem>>, vector<1x8x128xf32>,
    %c4 = arith.constant 4 : index
    %c0_138 = arith.constant 0 : index
    %c0_139 = arith.constant 0 : index
    %364 = vector.load %arg1[%c4, %c0_138, %c0_139] : memref<16x8x512xf32, #tpu.memory_space<vmem>>, vector<1x8x512xf32>
    %365 = vector.shape_cast %364 : vector<1x8x512xf32> to vector<8x512xf32>
    %366 = arith.truncf %311 : vector<8x128xf32> to vector<8x128xbf16>
    %cst_140 = arith.constant dense<0.000000e+00> : vector<8x512xf32>
    %367 = tpu.matmul %366, %3, %cst_140 {dimension_numbers = #tpu.dot_dimension_numbers<[1], [0], [0], [1], [0, 0, 1, 1], [], []>} : vector<8x128xbf16>, vector<128x512xbf16>, vector<8x512xf32> -> vector<8x512xf32>
    %368 = arith.addf %365, %367 : vector<8x512xf32>
    %369 = vector.extract_strided_slice %368 {offsets = [0, 0], sizes = [8, 128], strides = [1, 1]} : vector<8x512xf32> to vector<8x128xf32>
    %370 = vector.extract_strided_slice %368 {offsets = [0, 128], sizes = [8, 128], strides = [1, 1]} : vector<8x512xf32> to vector<8x128xf32>
    %371 = vector.extract_strided_slice %368 {offsets = [0, 256], sizes = [8, 128], strides = [1, 1]} : vector<8x512xf32> to vector<8x128xf32>
    %372 = vector.extract_strided_slice %368 {offsets = [0, 384], sizes = [8, 128], strides = [1, 1]} : vector<8x512xf32> to vector<8x128xf32>
    %cst_141 = arith.constant 5.000000e-01 : f32
    %373 = vector.broadcast %cst_141 : f32 to vector<8x128xf32>
    %374 = arith.mulf %373, %369 : vector<8x128xf32>
    %375 = math.tanh %374 : vector<8x128xf32>
    %cst_142 = arith.constant 5.000000e-01 : f32
    %376 = vector.broadcast %cst_142 : f32 to vector<8x128xf32>
    %377 = arith.mulf %376, %375 : vector<8x128xf32>
    %cst_143 = arith.constant 5.000000e-01 : f32
    %378 = vector.broadcast %cst_143 : f32 to vector<8x128xf32>
    %379 = arith.addf %377, %378 : vector<8x128xf32>
    %380 = math.tanh %371 : vector<8x128xf32>
    %381 = arith.mulf %379, %380 : vector<8x128xf32>
    %cst_144 = arith.constant 5.000000e-01 : f32
    %382 = vector.broadcast %cst_144 : f32 to vector<8x128xf32>
    %383 = arith.mulf %382, %370 : vector<8x128xf32>
    %384 = math.tanh %383 : vector<8x128xf32>
    %cst_145 = arith.constant 5.000000e-01 : f32
    %385 = vector.broadcast %cst_145 : f32 to vector<8x128xf32>
    %386 = arith.mulf %385, %384 : vector<8x128xf32>
    %cst_146 = arith.constant 5.000000e-01 : f32
    %387 = vector.broadcast %cst_146 : f32 to vector<8x128xf32>
    %388 = arith.addf %386, %387 : vector<8x128xf32>
    %389 = arith.mulf %388, %302 : vector<8x128xf32>
    %390 = arith.addf %381, %389 : vector<8x128xf32>
    %cst_147 = arith.constant 5.000000e-01 : f32
    %391 = vector.broadcast %cst_147 : f32 to vector<8x128xf32>
    %392 = arith.mulf %391, %372 : vector<8x128xf32>
    %393 = math.tanh %392 : vector<8x128xf32>
    %cst_148 = arith.constant 5.000000e-01 : f32
    %394 = vector.broadcast %cst_148 : f32 to vector<8x128xf32>
    %395 = arith.mulf %394, %393 : vector<8x128xf32>
    %cst_149 = arith.constant 5.000000e-01 : f32
    %396 = vector.broadcast %cst_149 : f32 to vector<8x128xf32>
    %397 = arith.addf %395, %396 : vector<8x128xf32>
    %398 = math.tanh %390 : vector<8x128xf32>
    %399 = arith.mulf %397, %398 : vector<8x128xf32>
    %400 = arith.truncf %399 : vector<8x128xf32> to vector<8x128xbf16>
    %401 = arith.truncf %357 : vector<8x128xf32> to vector<8x128xbf16>
    %402 = tpu.concatenate %400, %401 in 1 : vector<8x128xbf16>, vector<8x128xbf16> -> vector<8x256xbf16>
    %cst_150 = arith.constant dense<0.000000e+00> : vector<8x640xf32>
    %403 = tpu.matmul %402, %4, %cst_150 {dimension_numbers = #tpu.dot_dimension_numbers<[1], [0], [0], [1], [0, 0, 1, 1], [], []>} : vector<8x256xbf16>, vector<256x640xbf16>, vector<8x640xf32> -> vector<8x640xf32>
    %404 = arith.addf %403, %7 : vector<8x640xf32>
    %405 = vector.extract_strided_slice %404 {offsets = [0, 0], sizes = [8, 128], strides = [1, 1]} : vector<8x640xf32> to vector<8x128xf32>
    %406 = vector.extract_strided_slice %404 {offsets = [0, 128], sizes = [8, 128], strides = [1, 1]} : vector<8x640xf32> to vector<8x128xf32>
    %407 = vector.extract_strided_slice %404 {offsets = [0, 256], sizes = [8, 128], strides = [1, 1]} : vector<8x640xf32> to vector<8x128xf32>
    %408 = vector.extract_strided_slice %404 {offsets = [0, 384], sizes = [8, 128], strides = [1, 1]} : vector<8x640xf32> to vector<8x128xf32>
    %409 = vector.extract_strided_slice %404 {offsets = [0, 512], sizes = [8, 128], strides = [1, 1]} : vector<8x640xf32> to vector<8x128xf32>
    %cst_151 = arith.constant 5.000000e-01 : f32
    %410 = vector.broadcast %cst_151 : f32 to vector<8x128xf32>
    %411 = arith.mulf %410, %406 : vector<8x128xf32>
    %412 = math.tanh %411 : vector<8x128xf32>
    %cst_152 = arith.constant 5.000000e-01 : f32
    %413 = vector.broadcast %cst_152 : f32 to vector<8x128xf32>
    %414 = arith.mulf %413, %412 : vector<8x128xf32>
    %cst_153 = arith.constant 5.000000e-01 : f32
    %415 = vector.broadcast %cst_153 : f32 to vector<8x128xf32>
    %416 = arith.addf %414, %415 : vector<8x128xf32>
    %417 = arith.mulf %348, %416 : vector<8x128xf32>
    %cst_154 = arith.constant 5.000000e-01 : f32
    %418 = vector.broadcast %cst_154 : f32 to vector<8x128xf32>
    %419 = arith.mulf %418, %407 : vector<8x128xf32>
    %420 = math.tanh %419 : vector<8x128xf32>
    %cst_155 = arith.constant 5.000000e-01 : f32
    %421 = vector.broadcast %cst_155 : f32 to vector<8x128xf32>
    %422 = arith.mulf %421, %420 : vector<8x128xf32>
    %cst_156 = arith.constant 5.000000e-01 : f32
    %423 = vector.broadcast %cst_156 : f32 to vector<8x128xf32>
    %424 = arith.addf %422, %423 : vector<8x128xf32>
    %425 = arith.mulf %390, %424 : vector<8x128xf32>
    %426 = arith.addf %417, %425 : vector<8x128xf32>
    %427 = math.tanh %408 : vector<8x128xf32>
    %cst_157 = arith.constant 5.000000e-01 : f32
    %428 = vector.broadcast %cst_157 : f32 to vector<8x128xf32>
    %429 = arith.mulf %428, %405 : vector<8x128xf32>
    %430 = math.tanh %429 : vector<8x128xf32>
    %cst_158 = arith.constant 5.000000e-01 : f32
    %431 = vector.broadcast %cst_158 : f32 to vector<8x128xf32>
    %432 = arith.mulf %431, %430 : vector<8x128xf32>
    %cst_159 = arith.constant 5.000000e-01 : f32
    %433 = vector.broadcast %cst_159 : f32 to vector<8x128xf32>
    %434 = arith.addf %432, %433 : vector<8x128xf32>
    %435 = arith.mulf %427, %434 : vector<8x128xf32>
    %436 = arith.addf %426, %435 : vector<8x128xf32>
    %cst_160 = arith.constant 5.000000e-01 : f32
    %437 = vector.broadcast %cst_160 : f32 to vector<8x128xf32>
    %438 = arith.mulf %437, %409 : vector<8x128xf32>
    %439 = math.tanh %438 : vector<8x128xf32>
    %cst_161 = arith.constant 5.000000e-01 : f32
    %440 = vector.broadcast %cst_161 : f32 to vector<8x128xf32>
    %441 = arith.mulf %440, %439 : vector<8x128xf32>
    %cst_162 = arith.constant 5.000000e-01 : f32
    %442 = vector.broadcast %cst_162 : f32 to vector<8x128xf32>
    %443 = arith.addf %441, %442 : vector<8x128xf32>
    %444 = math.tanh %436 : vector<8x128xf32>
    %445 = arith.mulf %443, %444 : vector<8x128xf32>
    %c4_163 = arith.constant 4 : index
    %c0_164 = arith.constant 0 : index
    %c0_165 = arith.constant 0 : index
    %446 = vector.load %arg5[%c4_163, %c0_164, %c0_165] : memref<16x8x128xf32, #tpu.memory_space<vmem>>, vector<1x8x128xf32>
    %447 = vector.shape_cast %446 : vector<1x8x128xf32> to vector<8x128xf32>
    %448 = vector.shape_cast %445 : vector<8x128xf32> to vector<1x8x128xf32>
    tpu.vector_store %arg5[%c4_163, %c0_164, %c0_165], %448 {strides = array<i32>} : memref<16x8x128xf32, #tpu.memory_space<vmem>>, vector<1x8x128xf32>,
    %c4_166 = arith.constant 4 : index
    %c0_167 = arith.constant 0 : index
    %c0_168 = arith.constant 0 : index
    %449 = vector.load %arg6[%c4_166, %c0_167, %c0_168] : memref<16x8x128xf32, #tpu.memory_space<vmem>>, vector<1x8x128xf32>
    %450 = vector.shape_cast %449 : vector<1x8x128xf32> to vector<8x128xf32>
    %451 = vector.shape_cast %436 : vector<8x128xf32> to vector<1x8x128xf32>
    tpu.vector_store %arg6[%c4_166, %c0_167, %c0_168], %451 {strides = array<i32>} : memref<16x8x128xf32, #tpu.memory_space<vmem>>, vector<1x8x128xf32>,
    %c5 = arith.constant 5 : index
    %c0_169 = arith.constant 0 : index
    %c0_170 = arith.constant 0 : index
    %452 = vector.load %arg1[%c5, %c0_169, %c0_170] : memref<16x8x512xf32, #tpu.memory_space<vmem>>, vector<1x8x512xf32>
    %453 = vector.shape_cast %452 : vector<1x8x512xf32> to vector<8x512xf32>
    %454 = arith.truncf %399 : vector<8x128xf32> to vector<8x128xbf16>
    %cst_171 = arith.constant dense<0.000000e+00> : vector<8x512xf32>
    %455 = tpu.matmul %454, %3, %cst_171 {dimension_numbers = #tpu.dot_dimension_numbers<[1], [0], [0], [1], [0, 0, 1, 1], [], []>} : vector<8x128xbf16>, vector<128x512xbf16>, vector<8x512xf32> -> vector<8x512xf32>
    %456 = arith.addf %453, %455 : vector<8x512xf32>
    %457 = vector.extract_strided_slice %456 {offsets = [0, 0], sizes = [8, 128], strides = [1, 1]} : vector<8x512xf32> to vector<8x128xf32>
    %458 = vector.extract_strided_slice %456 {offsets = [0, 128], sizes = [8, 128], strides = [1, 1]} : vector<8x512xf32> to vector<8x128xf32>
    %459 = vector.extract_strided_slice %456 {offsets = [0, 256], sizes = [8, 128], strides = [1, 1]} : vector<8x512xf32> to vector<8x128xf32>
    %460 = vector.extract_strided_slice %456 {offsets = [0, 384], sizes = [8, 128], strides = [1, 1]} : vector<8x512xf32> to vector<8x128xf32>
    %cst_172 = arith.constant 5.000000e-01 : f32
    %461 = vector.broadcast %cst_172 : f32 to vector<8x128xf32>
    %462 = arith.mulf %461, %457 : vector<8x128xf32>
    %463 = math.tanh %462 : vector<8x128xf32>
    %cst_173 = arith.constant 5.000000e-01 : f32
    %464 = vector.broadcast %cst_173 : f32 to vector<8x128xf32>
    %465 = arith.mulf %464, %463 : vector<8x128xf32>
    %cst_174 = arith.constant 5.000000e-01 : f32
    %466 = vector.broadcast %cst_174 : f32 to vector<8x128xf32>
    %467 = arith.addf %465, %466 : vector<8x128xf32>
    %468 = math.tanh %459 : vector<8x128xf32>
    %469 = arith.mulf %467, %468 : vector<8x128xf32>
    %cst_175 = arith.constant 5.000000e-01 : f32
    %470 = vector.broadcast %cst_175 : f32 to vector<8x128xf32>
    %471 = arith.mulf %470, %458 : vector<8x128xf32>
    %472 = math.tanh %471 : vector<8x128xf32>
    %cst_176 = arith.constant 5.000000e-01 : f32
    %473 = vector.broadcast %cst_176 : f32 to vector<8x128xf32>
    %474 = arith.mulf %473, %472 : vector<8x128xf32>
    %cst_177 = arith.constant 5.000000e-01 : f32
    %475 = vector.broadcast %cst_177 : f32 to vector<8x128xf32>
    %476 = arith.addf %474, %475 : vector<8x128xf32>
    %477 = arith.mulf %476, %390 : vector<8x128xf32>
    %478 = arith.addf %469, %477 : vector<8x128xf32>
    %cst_178 = arith.constant 5.000000e-01 : f32
    %479 = vector.broadcast %cst_178 : f32 to vector<8x128xf32>
    %480 = arith.mulf %479, %460 : vector<8x128xf32>
    %481 = math.tanh %480 : vector<8x128xf32>
    %cst_179 = arith.constant 5.000000e-01 : f32
    %482 = vector.broadcast %cst_179 : f32 to vector<8x128xf32>
    %483 = arith.mulf %482, %481 : vector<8x128xf32>
    %cst_180 = arith.constant 5.000000e-01 : f32
    %484 = vector.broadcast %cst_180 : f32 to vector<8x128xf32>
    %485 = arith.addf %483, %484 : vector<8x128xf32>
    %486 = math.tanh %478 : vector<8x128xf32>
    %487 = arith.mulf %485, %486 : vector<8x128xf32>
    %488 = arith.truncf %487 : vector<8x128xf32> to vector<8x128xbf16>
    %489 = arith.truncf %445 : vector<8x128xf32> to vector<8x128xbf16>
    %490 = tpu.concatenate %488, %489 in 1 : vector<8x128xbf16>, vector<8x128xbf16> -> vector<8x256xbf16>
    %cst_181 = arith.constant dense<0.000000e+00> : vector<8x640xf32>
    %491 = tpu.matmul %490, %4, %cst_181 {dimension_numbers = #tpu.dot_dimension_numbers<[1], [0], [0], [1], [0, 0, 1, 1], [], []>} : vector<8x256xbf16>, vector<256x640xbf16>, vector<8x640xf32> -> vector<8x640xf32>
    %492 = arith.addf %491, %7 : vector<8x640xf32>
    %493 = vector.extract_strided_slice %492 {offsets = [0, 0], sizes = [8, 128], strides = [1, 1]} : vector<8x640xf32> to vector<8x128xf32>
    %494 = vector.extract_strided_slice %492 {offsets = [0, 128], sizes = [8, 128], strides = [1, 1]} : vector<8x640xf32> to vector<8x128xf32>
    %495 = vector.extract_strided_slice %492 {offsets = [0, 256], sizes = [8, 128], strides = [1, 1]} : vector<8x640xf32> to vector<8x128xf32>
    %496 = vector.extract_strided_slice %492 {offsets = [0, 384], sizes = [8, 128], strides = [1, 1]} : vector<8x640xf32> to vector<8x128xf32>
    %497 = vector.extract_strided_slice %492 {offsets = [0, 512], sizes = [8, 128], strides = [1, 1]} : vector<8x640xf32> to vector<8x128xf32>
    %cst_182 = arith.constant 5.000000e-01 : f32
    %498 = vector.broadcast %cst_182 : f32 to vector<8x128xf32>
    %499 = arith.mulf %498, %494 : vector<8x128xf32>
    %500 = math.tanh %499 : vector<8x128xf32>
    %cst_183 = arith.constant 5.000000e-01 : f32
    %501 = vector.broadcast %cst_183 : f32 to vector<8x128xf32>
    %502 = arith.mulf %501, %500 : vector<8x128xf32>
    %cst_184 = arith.constant 5.000000e-01 : f32
    %503 = vector.broadcast %cst_184 : f32 to vector<8x128xf32>
    %504 = arith.addf %502, %503 : vector<8x128xf32>
    %505 = arith.mulf %436, %504 : vector<8x128xf32>
    %cst_185 = arith.constant 5.000000e-01 : f32
    %506 = vector.broadcast %cst_185 : f32 to vector<8x128xf32>
    %507 = arith.mulf %506, %495 : vector<8x128xf32>
    %508 = math.tanh %507 : vector<8x128xf32>
    %cst_186 = arith.constant 5.000000e-01 : f32
    %509 = vector.broadcast %cst_186 : f32 to vector<8x128xf32>
    %510 = arith.mulf %509, %508 : vector<8x128xf32>
    %cst_187 = arith.constant 5.000000e-01 : f32
    %511 = vector.broadcast %cst_187 : f32 to vector<8x128xf32>
    %512 = arith.addf %510, %511 : vector<8x128xf32>
    %513 = arith.mulf %478, %512 : vector<8x128xf32>
    %514 = arith.addf %505, %513 : vector<8x128xf32>
    %515 = math.tanh %496 : vector<8x128xf32>
    %cst_188 = arith.constant 5.000000e-01 : f32
    %516 = vector.broadcast %cst_188 : f32 to vector<8x128xf32>
    %517 = arith.mulf %516, %493 : vector<8x128xf32>
    %518 = math.tanh %517 : vector<8x128xf32>
    %cst_189 = arith.constant 5.000000e-01 : f32
    %519 = vector.broadcast %cst_189 : f32 to vector<8x128xf32>
    %520 = arith.mulf %519, %518 : vector<8x128xf32>
    %cst_190 = arith.constant 5.000000e-01 : f32
    %521 = vector.broadcast %cst_190 : f32 to vector<8x128xf32>
    %522 = arith.addf %520, %521 : vector<8x128xf32>
    %523 = arith.mulf %515, %522 : vector<8x128xf32>
    %524 = arith.addf %514, %523 : vector<8x128xf32>
    %cst_191 = arith.constant 5.000000e-01 : f32
    %525 = vector.broadcast %cst_191 : f32 to vector<8x128xf32>
    %526 = arith.mulf %525, %497 : vector<8x128xf32>
    %527 = math.tanh %526 : vector<8x128xf32>
    %cst_192 = arith.constant 5.000000e-01 : f32
    %528 = vector.broadcast %cst_192 : f32 to vector<8x128xf32>
    %529 = arith.mulf %528, %527 : vector<8x128xf32>
    %cst_193 = arith.constant 5.000000e-01 : f32
    %530 = vector.broadcast %cst_193 : f32 to vector<8x128xf32>
    %531 = arith.addf %529, %530 : vector<8x128xf32>
    %532 = math.tanh %524 : vector<8x128xf32>
    %533 = arith.mulf %531, %532 : vector<8x128xf32>
    %c5_194 = arith.constant 5 : index
    %c0_195 = arith.constant 0 : index
    %c0_196 = arith.constant 0 : index
    %534 = vector.load %arg5[%c5_194, %c0_195, %c0_196] : memref<16x8x128xf32, #tpu.memory_space<vmem>>, vector<1x8x128xf32>
    %535 = vector.shape_cast %534 : vector<1x8x128xf32> to vector<8x128xf32>
    %536 = vector.shape_cast %533 : vector<8x128xf32> to vector<1x8x128xf32>
    tpu.vector_store %arg5[%c5_194, %c0_195, %c0_196], %536 {strides = array<i32>} : memref<16x8x128xf32, #tpu.memory_space<vmem>>, vector<1x8x128xf32>,
    %c5_197 = arith.constant 5 : index
    %c0_198 = arith.constant 0 : index
    %c0_199 = arith.constant 0 : index
    %537 = vector.load %arg6[%c5_197, %c0_198, %c0_199] : memref<16x8x128xf32, #tpu.memory_space<vmem>>, vector<1x8x128xf32>
    %538 = vector.shape_cast %537 : vector<1x8x128xf32> to vector<8x128xf32>
    %539 = vector.shape_cast %524 : vector<8x128xf32> to vector<1x8x128xf32>
    tpu.vector_store %arg6[%c5_197, %c0_198, %c0_199], %539 {strides = array<i32>} : memref<16x8x128xf32, #tpu.memory_space<vmem>>, vector<1x8x128xf32>,
    %c6 = arith.constant 6 : index
    %c0_200 = arith.constant 0 : index
    %c0_201 = arith.constant 0 : index
    %540 = vector.load %arg1[%c6, %c0_200, %c0_201] : memref<16x8x512xf32, #tpu.memory_space<vmem>>, vector<1x8x512xf32>
    %541 = vector.shape_cast %540 : vector<1x8x512xf32> to vector<8x512xf32>
    %542 = arith.truncf %487 : vector<8x128xf32> to vector<8x128xbf16>
    %cst_202 = arith.constant dense<0.000000e+00> : vector<8x512xf32>
    %543 = tpu.matmul %542, %3, %cst_202 {dimension_numbers = #tpu.dot_dimension_numbers<[1], [0], [0], [1], [0, 0, 1, 1], [], []>} : vector<8x128xbf16>, vector<128x512xbf16>, vector<8x512xf32> -> vector<8x512xf32>
    %544 = arith.addf %541, %543 : vector<8x512xf32>
    %545 = vector.extract_strided_slice %544 {offsets = [0, 0], sizes = [8, 128], strides = [1, 1]} : vector<8x512xf32> to vector<8x128xf32>
    %546 = vector.extract_strided_slice %544 {offsets = [0, 128], sizes = [8, 128], strides = [1, 1]} : vector<8x512xf32> to vector<8x128xf32>
    %547 = vector.extract_strided_slice %544 {offsets = [0, 256], sizes = [8, 128], strides = [1, 1]} : vector<8x512xf32> to vector<8x128xf32>
    %548 = vector.extract_strided_slice %544 {offsets = [0, 384], sizes = [8, 128], strides = [1, 1]} : vector<8x512xf32> to vector<8x128xf32>
    %cst_203 = arith.constant 5.000000e-01 : f32
    %549 = vector.broadcast %cst_203 : f32 to vector<8x128xf32>
    %550 = arith.mulf %549, %545 : vector<8x128xf32>
    %551 = math.tanh %550 : vector<8x128xf32>
    %cst_204 = arith.constant 5.000000e-01 : f32
    %552 = vector.broadcast %cst_204 : f32 to vector<8x128xf32>
    %553 = arith.mulf %552, %551 : vector<8x128xf32>
    %cst_205 = arith.constant 5.000000e-01 : f32
    %554 = vector.broadcast %cst_205 : f32 to vector<8x128xf32>
    %555 = arith.addf %553, %554 : vector<8x128xf32>
    %556 = math.tanh %547 : vector<8x128xf32>
    %557 = arith.mulf %555, %556 : vector<8x128xf32>
    %cst_206 = arith.constant 5.000000e-01 : f32
    %558 = vector.broadcast %cst_206 : f32 to vector<8x128xf32>
    %559 = arith.mulf %558, %546 : vector<8x128xf32>
    %560 = math.tanh %559 : vector<8x128xf32>
    %cst_207 = arith.constant 5.000000e-01 : f32
    %561 = vector.broadcast %cst_207 : f32 to vector<8x128xf32>
    %562 = arith.mulf %561, %560 : vector<8x128xf32>
    %cst_208 = arith.constant 5.000000e-01 : f32
    %563 = vector.broadcast %cst_208 : f32 to vector<8x128xf32>
    %564 = arith.addf %562, %563 : vector<8x128xf32>
    %565 = arith.mulf %564, %478 : vector<8x128xf32>
    %566 = arith.addf %557, %565 : vector<8x128xf32>
    %cst_209 = arith.constant 5.000000e-01 : f32
    %567 = vector.broadcast %cst_209 : f32 to vector<8x128xf32>
    %568 = arith.mulf %567, %548 : vector<8x128xf32>
    %569 = math.tanh %568 : vector<8x128xf32>
    %cst_210 = arith.constant 5.000000e-01 : f32
    %570 = vector.broadcast %cst_210 : f32 to vector<8x128xf32>
    %571 = arith.mulf %570, %569 : vector<8x128xf32>
    %cst_211 = arith.constant 5.000000e-01 : f32
    %572 = vector.broadcast %cst_211 : f32 to vector<8x128xf32>
    %573 = arith.addf %571, %572 : vector<8x128xf32>
    %574 = math.tanh %566 : vector<8x128xf32>
    %575 = arith.mulf %573, %574 : vector<8x128xf32>
    %576 = arith.truncf %575 : vector<8x128xf32> to vector<8x128xbf16>
    %577 = arith.truncf %533 : vector<8x128xf32> to vector<8x128xbf16>
    %578 = tpu.concatenate %576, %577 in 1 : vector<8x128xbf16>, vector<8x128xbf16> -> vector<8x256xbf16>
    %cst_212 = arith.constant dense<0.000000e+00> : vector<8x640xf32>
    %579 = tpu.matmul %578, %4, %cst_212 {dimension_numbers = #tpu.dot_dimension_numbers<[1], [0], [0], [1], [0, 0, 1, 1], [], []>} : vector<8x256xbf16>, vector<256x640xbf16>, vector<8x640xf32> -> vector<8x640xf32>
    %580 = arith.addf %579, %7 : vector<8x640xf32>
    %581 = vector.extract_strided_slice %580 {offsets = [0, 0], sizes = [8, 128], strides = [1, 1]} : vector<8x640xf32> to vector<8x128xf32>
    %582 = vector.extract_strided_slice %580 {offsets = [0, 128], sizes = [8, 128], strides = [1, 1]} : vector<8x640xf32> to vector<8x128xf32>
    %583 = vector.extract_strided_slice %580 {offsets = [0, 256], sizes = [8, 128], strides = [1, 1]} : vector<8x640xf32> to vector<8x128xf32>
    %584 = vector.extract_strided_slice %580 {offsets = [0, 384], sizes = [8, 128], strides = [1, 1]} : vector<8x640xf32> to vector<8x128xf32>
    %585 = vector.extract_strided_slice %580 {offsets = [0, 512], sizes = [8, 128], strides = [1, 1]} : vector<8x640xf32> to vector<8x128xf32>
    %cst_213 = arith.constant 5.000000e-01 : f32
    %586 = vector.broadcast %cst_213 : f32 to vector<8x128xf32>
    %587 = arith.mulf %586, %582 : vector<8x128xf32>
    %588 = math.tanh %587 : vector<8x128xf32>
    %cst_214 = arith.constant 5.000000e-01 : f32
    %589 = vector.broadcast %cst_214 : f32 to vector<8x128xf32>
    %590 = arith.mulf %589, %588 : vector<8x128xf32>
    %cst_215 = arith.constant 5.000000e-01 : f32
    %591 = vector.broadcast %cst_215 : f32 to vector<8x128xf32>
    %592 = arith.addf %590, %591 : vector<8x128xf32>
    %593 = arith.mulf %524, %592 : vector<8x128xf32>
    %cst_216 = arith.constant 5.000000e-01 : f32
    %594 = vector.broadcast %cst_216 : f32 to vector<8x128xf32>
    %595 = arith.mulf %594, %583 : vector<8x128xf32>
    %596 = math.tanh %595 : vector<8x128xf32>
    %cst_217 = arith.constant 5.000000e-01 : f32
    %597 = vector.broadcast %cst_217 : f32 to vector<8x128xf32>
    %598 = arith.mulf %597, %596 : vector<8x128xf32>
    %cst_218 = arith.constant 5.000000e-01 : f32
    %599 = vector.broadcast %cst_218 : f32 to vector<8x128xf32>
    %600 = arith.addf %598, %599 : vector<8x128xf32>
    %601 = arith.mulf %566, %600 : vector<8x128xf32>
    %602 = arith.addf %593, %601 : vector<8x128xf32>
    %603 = math.tanh %584 : vector<8x128xf32>
    %cst_219 = arith.constant 5.000000e-01 : f32
    %604 = vector.broadcast %cst_219 : f32 to vector<8x128xf32>
    %605 = arith.mulf %604, %581 : vector<8x128xf32>
    %606 = math.tanh %605 : vector<8x128xf32>
    %cst_220 = arith.constant 5.000000e-01 : f32
    %607 = vector.broadcast %cst_220 : f32 to vector<8x128xf32>
    %608 = arith.mulf %607, %606 : vector<8x128xf32>
    %cst_221 = arith.constant 5.000000e-01 : f32
    %609 = vector.broadcast %cst_221 : f32 to vector<8x128xf32>
    %610 = arith.addf %608, %609 : vector<8x128xf32>
    %611 = arith.mulf %603, %610 : vector<8x128xf32>
    %612 = arith.addf %602, %611 : vector<8x128xf32>
    %cst_222 = arith.constant 5.000000e-01 : f32
    %613 = vector.broadcast %cst_222 : f32 to vector<8x128xf32>
    %614 = arith.mulf %613, %585 : vector<8x128xf32>
    %615 = math.tanh %614 : vector<8x128xf32>
    %cst_223 = arith.constant 5.000000e-01 : f32
    %616 = vector.broadcast %cst_223 : f32 to vector<8x128xf32>
    %617 = arith.mulf %616, %615 : vector<8x128xf32>
    %cst_224 = arith.constant 5.000000e-01 : f32
    %618 = vector.broadcast %cst_224 : f32 to vector<8x128xf32>
    %619 = arith.addf %617, %618 : vector<8x128xf32>
    %620 = math.tanh %612 : vector<8x128xf32>
    %621 = arith.mulf %619, %620 : vector<8x128xf32>
    %c6_225 = arith.constant 6 : index
    %c0_226 = arith.constant 0 : index
    %c0_227 = arith.constant 0 : index
    %622 = vector.load %arg5[%c6_225, %c0_226, %c0_227] : memref<16x8x128xf32, #tpu.memory_space<vmem>>, vector<1x8x128xf32>
    %623 = vector.shape_cast %622 : vector<1x8x128xf32> to vector<8x128xf32>
    %624 = vector.shape_cast %621 : vector<8x128xf32> to vector<1x8x128xf32>
    tpu.vector_store %arg5[%c6_225, %c0_226, %c0_227], %624 {strides = array<i32>} : memref<16x8x128xf32, #tpu.memory_space<vmem>>, vector<1x8x128xf32>,
    %c6_228 = arith.constant 6 : index
    %c0_229 = arith.constant 0 : index
    %c0_230 = arith.constant 0 : index
    %625 = vector.load %arg6[%c6_228, %c0_229, %c0_230] : memref<16x8x128xf32, #tpu.memory_space<vmem>>, vector<1x8x128xf32>
    %626 = vector.shape_cast %625 : vector<1x8x128xf32> to vector<8x128xf32>
    %627 = vector.shape_cast %612 : vector<8x128xf32> to vector<1x8x128xf32>
    tpu.vector_store %arg6[%c6_228, %c0_229, %c0_230], %627 {strides = array<i32>} : memref<16x8x128xf32, #tpu.memory_space<vmem>>, vector<1x8x128xf32>,
    %c7 = arith.constant 7 : index
    %c0_231 = arith.constant 0 : index
    %c0_232 = arith.constant 0 : index
    %628 = vector.load %arg1[%c7, %c0_231, %c0_232] : memref<16x8x512xf32, #tpu.memory_space<vmem>>, vector<1x8x512xf32>
    %629 = vector.shape_cast %628 : vector<1x8x512xf32> to vector<8x512xf32>
    %630 = arith.truncf %575 : vector<8x128xf32> to vector<8x128xbf16>
    %cst_233 = arith.constant dense<0.000000e+00> : vector<8x512xf32>
    %631 = tpu.matmul %630, %3, %cst_233 {dimension_numbers = #tpu.dot_dimension_numbers<[1], [0], [0], [1], [0, 0, 1, 1], [], []>} : vector<8x128xbf16>, vector<128x512xbf16>, vector<8x512xf32> -> vector<8x512xf32>
    %632 = arith.addf %629, %631 : vector<8x512xf32>
    %633 = vector.extract_strided_slice %632 {offsets = [0, 0], sizes = [8, 128], strides = [1, 1]} : vector<8x512xf32> to vector<8x128xf32>
    %634 = vector.extract_strided_slice %632 {offsets = [0, 128], sizes = [8, 128], strides = [1, 1]} : vector<8x512xf32> to vector<8x128xf32>
    %635 = vector.extract_strided_slice %632 {offsets = [0, 256], sizes = [8, 128], strides = [1, 1]} : vector<8x512xf32> to vector<8x128xf32>
    %636 = vector.extract_strided_slice %632 {offsets = [0, 384], sizes = [8, 128], strides = [1, 1]} : vector<8x512xf32> to vector<8x128xf32>
    %cst_234 = arith.constant 5.000000e-01 : f32
    %637 = vector.broadcast %cst_234 : f32 to vector<8x128xf32>
    %638 = arith.mulf %637, %633 : vector<8x128xf32>
    %639 = math.tanh %638 : vector<8x128xf32>
    %cst_235 = arith.constant 5.000000e-01 : f32
    %640 = vector.broadcast %cst_235 : f32 to vector<8x128xf32>
    %641 = arith.mulf %640, %639 : vector<8x128xf32>
    %cst_236 = arith.constant 5.000000e-01 : f32
    %642 = vector.broadcast %cst_236 : f32 to vector<8x128xf32>
    %643 = arith.addf %641, %642 : vector<8x128xf32>
    %644 = math.tanh %635 : vector<8x128xf32>
    %645 = arith.mulf %643, %644 : vector<8x128xf32>
    %cst_237 = arith.constant 5.000000e-01 : f32
    %646 = vector.broadcast %cst_237 : f32 to vector<8x128xf32>
    %647 = arith.mulf %646, %634 : vector<8x128xf32>
    %648 = math.tanh %647 : vector<8x128xf32>
    %cst_238 = arith.constant 5.000000e-01 : f32
    %649 = vector.broadcast %cst_238 : f32 to vector<8x128xf32>
    %650 = arith.mulf %649, %648 : vector<8x128xf32>
    %cst_239 = arith.constant 5.000000e-01 : f32
    %651 = vector.broadcast %cst_239 : f32 to vector<8x128xf32>
    %652 = arith.addf %650, %651 : vector<8x128xf32>
    %653 = arith.mulf %652, %566 : vector<8x128xf32>
    %654 = arith.addf %645, %653 : vector<8x128xf32>
    %cst_240 = arith.constant 5.000000e-01 : f32
    %655 = vector.broadcast %cst_240 : f32 to vector<8x128xf32>
    %656 = arith.mulf %655, %636 : vector<8x128xf32>
    %657 = math.tanh %656 : vector<8x128xf32>
    %cst_241 = arith.constant 5.000000e-01 : f32
    %658 = vector.broadcast %cst_241 : f32 to vector<8x128xf32>
    %659 = arith.mulf %658, %657 : vector<8x128xf32>
    %cst_242 = arith.constant 5.000000e-01 : f32
    %660 = vector.broadcast %cst_242 : f32 to vector<8x128xf32>
    %661 = arith.addf %659, %660 : vector<8x128xf32>
    %662 = math.tanh %654 : vector<8x128xf32>
    %663 = arith.mulf %661, %662 : vector<8x128xf32>
    %664 = arith.truncf %663 : vector<8x128xf32> to vector<8x128xbf16>
    %665 = arith.truncf %621 : vector<8x128xf32> to vector<8x128xbf16>
    %666 = tpu.concatenate %664, %665 in 1 : vector<8x128xbf16>, vector<8x128xbf16> -> vector<8x256xbf16>
    %cst_243 = arith.constant dense<0.000000e+00> : vector<8x640xf32>
    %667 = tpu.matmul %666, %4, %cst_243 {dimension_numbers = #tpu.dot_dimension_numbers<[1], [0], [0], [1], [0, 0, 1, 1], [], []>} : vector<8x256xbf16>, vector<256x640xbf16>, vector<8x640xf32> -> vector<8x640xf32>
    %668 = arith.addf %667, %7 : vector<8x640xf32>
    %669 = vector.extract_strided_slice %668 {offsets = [0, 0], sizes = [8, 128], strides = [1, 1]} : vector<8x640xf32> to vector<8x128xf32>
    %670 = vector.extract_strided_slice %668 {offsets = [0, 128], sizes = [8, 128], strides = [1, 1]} : vector<8x640xf32> to vector<8x128xf32>
    %671 = vector.extract_strided_slice %668 {offsets = [0, 256], sizes = [8, 128], strides = [1, 1]} : vector<8x640xf32> to vector<8x128xf32>
    %672 = vector.extract_strided_slice %668 {offsets = [0, 384], sizes = [8, 128], strides = [1, 1]} : vector<8x640xf32> to vector<8x128xf32>
    %673 = vector.extract_strided_slice %668 {offsets = [0, 512], sizes = [8, 128], strides = [1, 1]} : vector<8x640xf32> to vector<8x128xf32>
    %cst_244 = arith.constant 5.000000e-01 : f32
    %674 = vector.broadcast %cst_244 : f32 to vector<8x128xf32>
    %675 = arith.mulf %674, %670 : vector<8x128xf32>
    %676 = math.tanh %675 : vector<8x128xf32>
    %cst_245 = arith.constant 5.000000e-01 : f32
    %677 = vector.broadcast %cst_245 : f32 to vector<8x128xf32>
    %678 = arith.mulf %677, %676 : vector<8x128xf32>
    %cst_246 = arith.constant 5.000000e-01 : f32
    %679 = vector.broadcast %cst_246 : f32 to vector<8x128xf32>
    %680 = arith.addf %678, %679 : vector<8x128xf32>
    %681 = arith.mulf %612, %680 : vector<8x128xf32>
    %cst_247 = arith.constant 5.000000e-01 : f32
    %682 = vector.broadcast %cst_247 : f32 to vector<8x128xf32>
    %683 = arith.mulf %682, %671 : vector<8x128xf32>
    %684 = math.tanh %683 : vector<8x128xf32>
    %cst_248 = arith.constant 5.000000e-01 : f32
    %685 = vector.broadcast %cst_248 : f32 to vector<8x128xf32>
    %686 = arith.mulf %685, %684 : vector<8x128xf32>
    %cst_249 = arith.constant 5.000000e-01 : f32
    %687 = vector.broadcast %cst_249 : f32 to vector<8x128xf32>
    %688 = arith.addf %686, %687 : vector<8x128xf32>
    %689 = arith.mulf %654, %688 : vector<8x128xf32>
    %690 = arith.addf %681, %689 : vector<8x128xf32>
    %691 = math.tanh %672 : vector<8x128xf32>
    %cst_250 = arith.constant 5.000000e-01 : f32
    %692 = vector.broadcast %cst_250 : f32 to vector<8x128xf32>
    %693 = arith.mulf %692, %669 : vector<8x128xf32>
    %694 = math.tanh %693 : vector<8x128xf32>
    %cst_251 = arith.constant 5.000000e-01 : f32
    %695 = vector.broadcast %cst_251 : f32 to vector<8x128xf32>
    %696 = arith.mulf %695, %694 : vector<8x128xf32>
    %cst_252 = arith.constant 5.000000e-01 : f32
    %697 = vector.broadcast %cst_252 : f32 to vector<8x128xf32>
    %698 = arith.addf %696, %697 : vector<8x128xf32>
    %699 = arith.mulf %691, %698 : vector<8x128xf32>
    %700 = arith.addf %690, %699 : vector<8x128xf32>
    %cst_253 = arith.constant 5.000000e-01 : f32
    %701 = vector.broadcast %cst_253 : f32 to vector<8x128xf32>
    %702 = arith.mulf %701, %673 : vector<8x128xf32>
    %703 = math.tanh %702 : vector<8x128xf32>
    %cst_254 = arith.constant 5.000000e-01 : f32
    %704 = vector.broadcast %cst_254 : f32 to vector<8x128xf32>
    %705 = arith.mulf %704, %703 : vector<8x128xf32>
    %cst_255 = arith.constant 5.000000e-01 : f32
    %706 = vector.broadcast %cst_255 : f32 to vector<8x128xf32>
    %707 = arith.addf %705, %706 : vector<8x128xf32>
    %708 = math.tanh %700 : vector<8x128xf32>
    %709 = arith.mulf %707, %708 : vector<8x128xf32>
    %c7_256 = arith.constant 7 : index
    %c0_257 = arith.constant 0 : index
    %c0_258 = arith.constant 0 : index
    %710 = vector.load %arg5[%c7_256, %c0_257, %c0_258] : memref<16x8x128xf32, #tpu.memory_space<vmem>>, vector<1x8x128xf32>
    %711 = vector.shape_cast %710 : vector<1x8x128xf32> to vector<8x128xf32>
    %712 = vector.shape_cast %709 : vector<8x128xf32> to vector<1x8x128xf32>
    tpu.vector_store %arg5[%c7_256, %c0_257, %c0_258], %712 {strides = array<i32>} : memref<16x8x128xf32, #tpu.memory_space<vmem>>, vector<1x8x128xf32>,
    %c7_259 = arith.constant 7 : index
    %c0_260 = arith.constant 0 : index
    %c0_261 = arith.constant 0 : index
    %713 = vector.load %arg6[%c7_259, %c0_260, %c0_261] : memref<16x8x128xf32, #tpu.memory_space<vmem>>, vector<1x8x128xf32>
    %714 = vector.shape_cast %713 : vector<1x8x128xf32> to vector<8x128xf32>
    %715 = vector.shape_cast %700 : vector<8x128xf32> to vector<1x8x128xf32>
    tpu.vector_store %arg6[%c7_259, %c0_260, %c0_261], %715 {strides = array<i32>} : memref<16x8x128xf32, #tpu.memory_space<vmem>>, vector<1x8x128xf32>,
    %c8 = arith.constant 8 : index
    %c0_262 = arith.constant 0 : index
    %c0_263 = arith.constant 0 : index
    %716 = vector.load %arg1[%c8, %c0_262, %c0_263] : memref<16x8x512xf32, #tpu.memory_space<vmem>>, vector<1x8x512xf32>
    %717 = vector.shape_cast %716 : vector<1x8x512xf32> to vector<8x512xf32>
    %718 = arith.truncf %663 : vector<8x128xf32> to vector<8x128xbf16>
    %cst_264 = arith.constant dense<0.000000e+00> : vector<8x512xf32>
    %719 = tpu.matmul %718, %3, %cst_264 {dimension_numbers = #tpu.dot_dimension_numbers<[1], [0], [0], [1], [0, 0, 1, 1], [], []>} : vector<8x128xbf16>, vector<128x512xbf16>, vector<8x512xf32> -> vector<8x512xf32>
    %720 = arith.addf %717, %719 : vector<8x512xf32>
    %721 = vector.extract_strided_slice %720 {offsets = [0, 0], sizes = [8, 128], strides = [1, 1]} : vector<8x512xf32> to vector<8x128xf32>
    %722 = vector.extract_strided_slice %720 {offsets = [0, 128], sizes = [8, 128], strides = [1, 1]} : vector<8x512xf32> to vector<8x128xf32>
    %723 = vector.extract_strided_slice %720 {offsets = [0, 256], sizes = [8, 128], strides = [1, 1]} : vector<8x512xf32> to vector<8x128xf32>
    %724 = vector.extract_strided_slice %720 {offsets = [0, 384], sizes = [8, 128], strides = [1, 1]} : vector<8x512xf32> to vector<8x128xf32>
    %cst_265 = arith.constant 5.000000e-01 : f32
    %725 = vector.broadcast %cst_265 : f32 to vector<8x128xf32>
    %726 = arith.mulf %725, %721 : vector<8x128xf32>
    %727 = math.tanh %726 : vector<8x128xf32>
    %cst_266 = arith.constant 5.000000e-01 : f32
    %728 = vector.broadcast %cst_266 : f32 to vector<8x128xf32>
    %729 = arith.mulf %728, %727 : vector<8x128xf32>
    %cst_267 = arith.constant 5.000000e-01 : f32
    %730 = vector.broadcast %cst_267 : f32 to vector<8x128xf32>
    %731 = arith.addf %729, %730 : vector<8x128xf32>
    %732 = math.tanh %723 : vector<8x128xf32>
    %733 = arith.mulf %731, %732 : vector<8x128xf32>
    %cst_268 = arith.constant 5.000000e-01 : f32
    %734 = vector.broadcast %cst_268 : f32 to vector<8x128xf32>
    %735 = arith.mulf %734, %722 : vector<8x128xf32>
    %736 = math.tanh %735 : vector<8x128xf32>
    %cst_269 = arith.constant 5.000000e-01 : f32
    %737 = vector.broadcast %cst_269 : f32 to vector<8x128xf32>
    %738 = arith.mulf %737, %736 : vector<8x128xf32>
    %cst_270 = arith.constant 5.000000e-01 : f32
    %739 = vector.broadcast %cst_270 : f32 to vector<8x128xf32>
    %740 = arith.addf %738, %739 : vector<8x128xf32>
    %741 = arith.mulf %740, %654 : vector<8x128xf32>
    %742 = arith.addf %733, %741 : vector<8x128xf32>
    %cst_271 = arith.constant 5.000000e-01 : f32
    %743 = vector.broadcast %cst_271 : f32 to vector<8x128xf32>
    %744 = arith.mulf %743, %724 : vector<8x128xf32>
    %745 = math.tanh %744 : vector<8x128xf32>
    %cst_272 = arith.constant 5.000000e-01 : f32
    %746 = vector.broadcast %cst_272 : f32 to vector<8x128xf32>
    %747 = arith.mulf %746, %745 : vector<8x128xf32>
    %cst_273 = arith.constant 5.000000e-01 : f32
    %748 = vector.broadcast %cst_273 : f32 to vector<8x128xf32>
    %749 = arith.addf %747, %748 : vector<8x128xf32>
    %750 = math.tanh %742 : vector<8x128xf32>
    %751 = arith.mulf %749, %750 : vector<8x128xf32>
    %752 = arith.truncf %751 : vector<8x128xf32> to vector<8x128xbf16>
    %753 = arith.truncf %709 : vector<8x128xf32> to vector<8x128xbf16>
    %754 = tpu.concatenate %752, %753 in 1 : vector<8x128xbf16>, vector<8x128xbf16> -> vector<8x256xbf16>
    %cst_274 = arith.constant dense<0.000000e+00> : vector<8x640xf32>
    %755 = tpu.matmul %754, %4, %cst_274 {dimension_numbers = #tpu.dot_dimension_numbers<[1], [0], [0], [1], [0, 0, 1, 1], [], []>} : vector<8x256xbf16>, vector<256x640xbf16>, vector<8x640xf32> -> vector<8x640xf32>
    %756 = arith.addf %755, %7 : vector<8x640xf32>
    %757 = vector.extract_strided_slice %756 {offsets = [0, 0], sizes = [8, 128], strides = [1, 1]} : vector<8x640xf32> to vector<8x128xf32>
    %758 = vector.extract_strided_slice %756 {offsets = [0, 128], sizes = [8, 128], strides = [1, 1]} : vector<8x640xf32> to vector<8x128xf32>
    %759 = vector.extract_strided_slice %756 {offsets = [0, 256], sizes = [8, 128], strides = [1, 1]} : vector<8x640xf32> to vector<8x128xf32>
    %760 = vector.extract_strided_slice %756 {offsets = [0, 384], sizes = [8, 128], strides = [1, 1]} : vector<8x640xf32> to vector<8x128xf32>
    %761 = vector.extract_strided_slice %756 {offsets = [0, 512], sizes = [8, 128], strides = [1, 1]} : vector<8x640xf32> to vector<8x128xf32>
    %cst_275 = arith.constant 5.000000e-01 : f32
    %762 = vector.broadcast %cst_275 : f32 to vector<8x128xf32>
    %763 = arith.mulf %762, %758 : vector<8x128xf32>
    %764 = math.tanh %763 : vector<8x128xf32>
    %cst_276 = arith.constant 5.000000e-01 : f32
    %765 = vector.broadcast %cst_276 : f32 to vector<8x128xf32>
    %766 = arith.mulf %765, %764 : vector<8x128xf32>
    %cst_277 = arith.constant 5.000000e-01 : f32
    %767 = vector.broadcast %cst_277 : f32 to vector<8x128xf32>
    %768 = arith.addf %766, %767 : vector<8x128xf32>
    %769 = arith.mulf %700, %768 : vector<8x128xf32>
    %cst_278 = arith.constant 5.000000e-01 : f32
    %770 = vector.broadcast %cst_278 : f32 to vector<8x128xf32>
    %771 = arith.mulf %770, %759 : vector<8x128xf32>
    %772 = math.tanh %771 : vector<8x128xf32>
    %cst_279 = arith.constant 5.000000e-01 : f32
    %773 = vector.broadcast %cst_279 : f32 to vector<8x128xf32>
    %774 = arith.mulf %773, %772 : vector<8x128xf32>
    %cst_280 = arith.constant 5.000000e-01 : f32
    %775 = vector.broadcast %cst_280 : f32 to vector<8x128xf32>
    %776 = arith.addf %774, %775 : vector<8x128xf32>
    %777 = arith.mulf %742, %776 : vector<8x128xf32>
    %778 = arith.addf %769, %777 : vector<8x128xf32>
    %779 = math.tanh %760 : vector<8x128xf32>
    %cst_281 = arith.constant 5.000000e-01 : f32
    %780 = vector.broadcast %cst_281 : f32 to vector<8x128xf32>
    %781 = arith.mulf %780, %757 : vector<8x128xf32>
    %782 = math.tanh %781 : vector<8x128xf32>
    %cst_282 = arith.constant 5.000000e-01 : f32
    %783 = vector.broadcast %cst_282 : f32 to vector<8x128xf32>
    %784 = arith.mulf %783, %782 : vector<8x128xf32>
    %cst_283 = arith.constant 5.000000e-01 : f32
    %785 = vector.broadcast %cst_283 : f32 to vector<8x128xf32>
    %786 = arith.addf %784, %785 : vector<8x128xf32>
    %787 = arith.mulf %779, %786 : vector<8x128xf32>
    %788 = arith.addf %778, %787 : vector<8x128xf32>
    %cst_284 = arith.constant 5.000000e-01 : f32
    %789 = vector.broadcast %cst_284 : f32 to vector<8x128xf32>
    %790 = arith.mulf %789, %761 : vector<8x128xf32>
    %791 = math.tanh %790 : vector<8x128xf32>
    %cst_285 = arith.constant 5.000000e-01 : f32
    %792 = vector.broadcast %cst_285 : f32 to vector<8x128xf32>
    %793 = arith.mulf %792, %791 : vector<8x128xf32>
    %cst_286 = arith.constant 5.000000e-01 : f32
    %794 = vector.broadcast %cst_286 : f32 to vector<8x128xf32>
    %795 = arith.addf %793, %794 : vector<8x128xf32>
    %796 = math.tanh %788 : vector<8x128xf32>
    %797 = arith.mulf %795, %796 : vector<8x128xf32>
    %c8_287 = arith.constant 8 : index
    %c0_288 = arith.constant 0 : index
    %c0_289 = arith.constant 0 : index
    %798 = vector.load %arg5[%c8_287, %c0_288, %c0_289] : memref<16x8x128xf32, #tpu.memory_space<vmem>>, vector<1x8x128xf32>
    %799 = vector.shape_cast %798 : vector<1x8x128xf32> to vector<8x128xf32>
    %800 = vector.shape_cast %797 : vector<8x128xf32> to vector<1x8x128xf32>
    tpu.vector_store %arg5[%c8_287, %c0_288, %c0_289], %800 {strides = array<i32>} : memref<16x8x128xf32, #tpu.memory_space<vmem>>, vector<1x8x128xf32>,
    %c8_290 = arith.constant 8 : index
    %c0_291 = arith.constant 0 : index
    %c0_292 = arith.constant 0 : index
    %801 = vector.load %arg6[%c8_290, %c0_291, %c0_292] : memref<16x8x128xf32, #tpu.memory_space<vmem>>, vector<1x8x128xf32>
    %802 = vector.shape_cast %801 : vector<1x8x128xf32> to vector<8x128xf32>
    %803 = vector.shape_cast %788 : vector<8x128xf32> to vector<1x8x128xf32>
    tpu.vector_store %arg6[%c8_290, %c0_291, %c0_292], %803 {strides = array<i32>} : memref<16x8x128xf32, #tpu.memory_space<vmem>>, vector<1x8x128xf32>,
    %c9 = arith.constant 9 : index
    %c0_293 = arith.constant 0 : index
    %c0_294 = arith.constant 0 : index
    %804 = vector.load %arg1[%c9, %c0_293, %c0_294] : memref<16x8x512xf32, #tpu.memory_space<vmem>>, vector<1x8x512xf32>
    %805 = vector.shape_cast %804 : vector<1x8x512xf32> to vector<8x512xf32>
    %806 = arith.truncf %751 : vector<8x128xf32> to vector<8x128xbf16>
    %cst_295 = arith.constant dense<0.000000e+00> : vector<8x512xf32>
    %807 = tpu.matmul %806, %3, %cst_295 {dimension_numbers = #tpu.dot_dimension_numbers<[1], [0], [0], [1], [0, 0, 1, 1], [], []>} : vector<8x128xbf16>, vector<128x512xbf16>, vector<8x512xf32> -> vector<8x512xf32>
    %808 = arith.addf %805, %807 : vector<8x512xf32>
    %809 = vector.extract_strided_slice %808 {offsets = [0, 0], sizes = [8, 128], strides = [1, 1]} : vector<8x512xf32> to vector<8x128xf32>
    %810 = vector.extract_strided_slice %808 {offsets = [0, 128], sizes = [8, 128], strides = [1, 1]} : vector<8x512xf32> to vector<8x128xf32>
    %811 = vector.extract_strided_slice %808 {offsets = [0, 256], sizes = [8, 128], strides = [1, 1]} : vector<8x512xf32> to vector<8x128xf32>
    %812 = vector.extract_strided_slice %808 {offsets = [0, 384], sizes = [8, 128], strides = [1, 1]} : vector<8x512xf32> to vector<8x128xf32>
    %cst_296 = arith.constant 5.000000e-01 : f32
    %813 = vector.broadcast %cst_296 : f32 to vector<8x128xf32>
    %814 = arith.mulf %813, %809 : vector<8x128xf32>
    %815 = math.tanh %814 : vector<8x128xf32>
    %cst_297 = arith.constant 5.000000e-01 : f32
    %816 = vector.broadcast %cst_297 : f32 to vector<8x128xf32>
    %817 = arith.mulf %816, %815 : vector<8x128xf32>
    %cst_298 = arith.constant 5.000000e-01 : f32
    %818 = vector.broadcast %cst_298 : f32 to vector<8x128xf32>
    %819 = arith.addf %817, %818 : vector<8x128xf32>
    %820 = math.tanh %811 : vector<8x128xf32>
    %821 = arith.mulf %819, %820 : vector<8x128xf32>
    %cst_299 = arith.constant 5.000000e-01 : f32
    %822 = vector.broadcast %cst_299 : f32 to vector<8x128xf32>
    %823 = arith.mulf %822, %810 : vector<8x128xf32>
    %824 = math.tanh %823 : vector<8x128xf32>
    %cst_300 = arith.constant 5.000000e-01 : f32
    %825 = vector.broadcast %cst_300 : f32 to vector<8x128xf32>
    %826 = arith.mulf %825, %824 : vector<8x128xf32>
    %cst_301 = arith.constant 5.000000e-01 : f32
    %827 = vector.broadcast %cst_301 : f32 to vector<8x128xf32>
    %828 = arith.addf %826, %827 : vector<8x128xf32>
    %829 = arith.mulf %828, %742 : vector<8x128xf32>
    %830 = arith.addf %821, %829 : vector<8x128xf32>
    %cst_302 = arith.constant 5.000000e-01 : f32
    %831 = vector.broadcast %cst_302 : f32 to vector<8x128xf32>
    %832 = arith.mulf %831, %812 : vector<8x128xf32>
    %833 = math.tanh %832 : vector<8x128xf32>
    %cst_303 = arith.constant 5.000000e-01 : f32
    %834 = vector.broadcast %cst_303 : f32 to vector<8x128xf32>
    %835 = arith.mulf %834, %833 : vector<8x128xf32>
    %cst_304 = arith.constant 5.000000e-01 : f32
    %836 = vector.broadcast %cst_304 : f32 to vector<8x128xf32>
    %837 = arith.addf %835, %836 : vector<8x128xf32>
    %838 = math.tanh %830 : vector<8x128xf32>
    %839 = arith.mulf %837, %838 : vector<8x128xf32>
    %840 = arith.truncf %839 : vector<8x128xf32> to vector<8x128xbf16>
    %841 = arith.truncf %797 : vector<8x128xf32> to vector<8x128xbf16>
    %842 = tpu.concatenate %840, %841 in 1 : vector<8x128xbf16>, vector<8x128xbf16> -> vector<8x256xbf16>
    %cst_305 = arith.constant dense<0.000000e+00> : vector<8x640xf32>
    %843 = tpu.matmul %842, %4, %cst_305 {dimension_numbers = #tpu.dot_dimension_numbers<[1], [0], [0], [1], [0, 0, 1, 1], [], []>} : vector<8x256xbf16>, vector<256x640xbf16>, vector<8x640xf32> -> vector<8x640xf32>
    %844 = arith.addf %843, %7 : vector<8x640xf32>
    %845 = vector.extract_strided_slice %844 {offsets = [0, 0], sizes = [8, 128], strides = [1, 1]} : vector<8x640xf32> to vector<8x128xf32>
    %846 = vector.extract_strided_slice %844 {offsets = [0, 128], sizes = [8, 128], strides = [1, 1]} : vector<8x640xf32> to vector<8x128xf32>
    %847 = vector.extract_strided_slice %844 {offsets = [0, 256], sizes = [8, 128], strides = [1, 1]} : vector<8x640xf32> to vector<8x128xf32>
    %848 = vector.extract_strided_slice %844 {offsets = [0, 384], sizes = [8, 128], strides = [1, 1]} : vector<8x640xf32> to vector<8x128xf32>
    %849 = vector.extract_strided_slice %844 {offsets = [0, 512], sizes = [8, 128], strides = [1, 1]} : vector<8x640xf32> to vector<8x128xf32>
    %cst_306 = arith.constant 5.000000e-01 : f32
    %850 = vector.broadcast %cst_306 : f32 to vector<8x128xf32>
    %851 = arith.mulf %850, %846 : vector<8x128xf32>
    %852 = math.tanh %851 : vector<8x128xf32>
    %cst_307 = arith.constant 5.000000e-01 : f32
    %853 = vector.broadcast %cst_307 : f32 to vector<8x128xf32>
    %854 = arith.mulf %853, %852 : vector<8x128xf32>
    %cst_308 = arith.constant 5.000000e-01 : f32
    %855 = vector.broadcast %cst_308 : f32 to vector<8x128xf32>
    %856 = arith.addf %854, %855 : vector<8x128xf32>
    %857 = arith.mulf %788, %856 : vector<8x128xf32>
    %cst_309 = arith.constant 5.000000e-01 : f32
    %858 = vector.broadcast %cst_309 : f32 to vector<8x128xf32>
    %859 = arith.mulf %858, %847 : vector<8x128xf32>
    %860 = math.tanh %859 : vector<8x128xf32>
    %cst_310 = arith.constant 5.000000e-01 : f32
    %861 = vector.broadcast %cst_310 : f32 to vector<8x128xf32>
    %862 = arith.mulf %861, %860 : vector<8x128xf32>
    %cst_311 = arith.constant 5.000000e-01 : f32
    %863 = vector.broadcast %cst_311 : f32 to vector<8x128xf32>
    %864 = arith.addf %862, %863 : vector<8x128xf32>
    %865 = arith.mulf %830, %864 : vector<8x128xf32>
    %866 = arith.addf %857, %865 : vector<8x128xf32>
    %867 = math.tanh %848 : vector<8x128xf32>
    %cst_312 = arith.constant 5.000000e-01 : f32
    %868 = vector.broadcast %cst_312 : f32 to vector<8x128xf32>
    %869 = arith.mulf %868, %845 : vector<8x128xf32>
    %870 = math.tanh %869 : vector<8x128xf32>
    %cst_313 = arith.constant 5.000000e-01 : f32
    %871 = vector.broadcast %cst_313 : f32 to vector<8x128xf32>
    %872 = arith.mulf %871, %870 : vector<8x128xf32>
    %cst_314 = arith.constant 5.000000e-01 : f32
    %873 = vector.broadcast %cst_314 : f32 to vector<8x128xf32>
    %874 = arith.addf %872, %873 : vector<8x128xf32>
    %875 = arith.mulf %867, %874 : vector<8x128xf32>
    %876 = arith.addf %866, %875 : vector<8x128xf32>
    %cst_315 = arith.constant 5.000000e-01 : f32
    %877 = vector.broadcast %cst_315 : f32 to vector<8x128xf32>
    %878 = arith.mulf %877, %849 : vector<8x128xf32>
    %879 = math.tanh %878 : vector<8x128xf32>
    %cst_316 = arith.constant 5.000000e-01 : f32
    %880 = vector.broadcast %cst_316 : f32 to vector<8x128xf32>
    %881 = arith.mulf %880, %879 : vector<8x128xf32>
    %cst_317 = arith.constant 5.000000e-01 : f32
    %882 = vector.broadcast %cst_317 : f32 to vector<8x128xf32>
    %883 = arith.addf %881, %882 : vector<8x128xf32>
    %884 = math.tanh %876 : vector<8x128xf32>
    %885 = arith.mulf %883, %884 : vector<8x128xf32>
    %c9_318 = arith.constant 9 : index
    %c0_319 = arith.constant 0 : index
    %c0_320 = arith.constant 0 : index
    %886 = vector.load %arg5[%c9_318, %c0_319, %c0_320] : memref<16x8x128xf32, #tpu.memory_space<vmem>>, vector<1x8x128xf32>
    %887 = vector.shape_cast %886 : vector<1x8x128xf32> to vector<8x128xf32>
    %888 = vector.shape_cast %885 : vector<8x128xf32> to vector<1x8x128xf32>
    tpu.vector_store %arg5[%c9_318, %c0_319, %c0_320], %888 {strides = array<i32>} : memref<16x8x128xf32, #tpu.memory_space<vmem>>, vector<1x8x128xf32>,
    %c9_321 = arith.constant 9 : index
    %c0_322 = arith.constant 0 : index
    %c0_323 = arith.constant 0 : index
    %889 = vector.load %arg6[%c9_321, %c0_322, %c0_323] : memref<16x8x128xf32, #tpu.memory_space<vmem>>, vector<1x8x128xf32>
    %890 = vector.shape_cast %889 : vector<1x8x128xf32> to vector<8x128xf32>
    %891 = vector.shape_cast %876 : vector<8x128xf32> to vector<1x8x128xf32>
    tpu.vector_store %arg6[%c9_321, %c0_322, %c0_323], %891 {strides = array<i32>} : memref<16x8x128xf32, #tpu.memory_space<vmem>>, vector<1x8x128xf32>,
    %c10 = arith.constant 10 : index
    %c0_324 = arith.constant 0 : index
    %c0_325 = arith.constant 0 : index
    %892 = vector.load %arg1[%c10, %c0_324, %c0_325] : memref<16x8x512xf32, #tpu.memory_space<vmem>>, vector<1x8x512xf32>
    %893 = vector.shape_cast %892 : vector<1x8x512xf32> to vector<8x512xf32>
    %894 = arith.truncf %839 : vector<8x128xf32> to vector<8x128xbf16>
    %cst_326 = arith.constant dense<0.000000e+00> : vector<8x512xf32>
    %895 = tpu.matmul %894, %3, %cst_326 {dimension_numbers = #tpu.dot_dimension_numbers<[1], [0], [0], [1], [0, 0, 1, 1], [], []>} : vector<8x128xbf16>, vector<128x512xbf16>, vector<8x512xf32> -> vector<8x512xf32>
    %896 = arith.addf %893, %895 : vector<8x512xf32>
    %897 = vector.extract_strided_slice %896 {offsets = [0, 0], sizes = [8, 128], strides = [1, 1]} : vector<8x512xf32> to vector<8x128xf32>
    %898 = vector.extract_strided_slice %896 {offsets = [0, 128], sizes = [8, 128], strides = [1, 1]} : vector<8x512xf32> to vector<8x128xf32>
    %899 = vector.extract_strided_slice %896 {offsets = [0, 256], sizes = [8, 128], strides = [1, 1]} : vector<8x512xf32> to vector<8x128xf32>
    %900 = vector.extract_strided_slice %896 {offsets = [0, 384], sizes = [8, 128], strides = [1, 1]} : vector<8x512xf32> to vector<8x128xf32>
    %cst_327 = arith.constant 5.000000e-01 : f32
    %901 = vector.broadcast %cst_327 : f32 to vector<8x128xf32>
    %902 = arith.mulf %901, %897 : vector<8x128xf32>
    %903 = math.tanh %902 : vector<8x128xf32>
    %cst_328 = arith.constant 5.000000e-01 : f32
    %904 = vector.broadcast %cst_328 : f32 to vector<8x128xf32>
    %905 = arith.mulf %904, %903 : vector<8x128xf32>
    %cst_329 = arith.constant 5.000000e-01 : f32
    %906 = vector.broadcast %cst_329 : f32 to vector<8x128xf32>
    %907 = arith.addf %905, %906 : vector<8x128xf32>
    %908 = math.tanh %899 : vector<8x128xf32>
    %909 = arith.mulf %907, %908 : vector<8x128xf32>
    %cst_330 = arith.constant 5.000000e-01 : f32
    %910 = vector.broadcast %cst_330 : f32 to vector<8x128xf32>
    %911 = arith.mulf %910, %898 : vector<8x128xf32>
    %912 = math.tanh %911 : vector<8x128xf32>
    %cst_331 = arith.constant 5.000000e-01 : f32
    %913 = vector.broadcast %cst_331 : f32 to vector<8x128xf32>
    %914 = arith.mulf %913, %912 : vector<8x128xf32>
    %cst_332 = arith.constant 5.000000e-01 : f32
    %915 = vector.broadcast %cst_332 : f32 to vector<8x128xf32>
    %916 = arith.addf %914, %915 : vector<8x128xf32>
    %917 = arith.mulf %916, %830 : vector<8x128xf32>
    %918 = arith.addf %909, %917 : vector<8x128xf32>
    %cst_333 = arith.constant 5.000000e-01 : f32
    %919 = vector.broadcast %cst_333 : f32 to vector<8x128xf32>
    %920 = arith.mulf %919, %900 : vector<8x128xf32>
    %921 = math.tanh %920 : vector<8x128xf32>
    %cst_334 = arith.constant 5.000000e-01 : f32
    %922 = vector.broadcast %cst_334 : f32 to vector<8x128xf32>
    %923 = arith.mulf %922, %921 : vector<8x128xf32>
    %cst_335 = arith.constant 5.000000e-01 : f32
    %924 = vector.broadcast %cst_335 : f32 to vector<8x128xf32>
    %925 = arith.addf %923, %924 : vector<8x128xf32>
    %926 = math.tanh %918 : vector<8x128xf32>
    %927 = arith.mulf %925, %926 : vector<8x128xf32>
    %928 = arith.truncf %927 : vector<8x128xf32> to vector<8x128xbf16>
    %929 = arith.truncf %885 : vector<8x128xf32> to vector<8x128xbf16>
    %930 = tpu.concatenate %928, %929 in 1 : vector<8x128xbf16>, vector<8x128xbf16> -> vector<8x256xbf16>
    %cst_336 = arith.constant dense<0.000000e+00> : vector<8x640xf32>
    %931 = tpu.matmul %930, %4, %cst_336 {dimension_numbers = #tpu.dot_dimension_numbers<[1], [0], [0], [1], [0, 0, 1, 1], [], []>} : vector<8x256xbf16>, vector<256x640xbf16>, vector<8x640xf32> -> vector<8x640xf32>
    %932 = arith.addf %931, %7 : vector<8x640xf32>
    %933 = vector.extract_strided_slice %932 {offsets = [0, 0], sizes = [8, 128], strides = [1, 1]} : vector<8x640xf32> to vector<8x128xf32>
    %934 = vector.extract_strided_slice %932 {offsets = [0, 128], sizes = [8, 128], strides = [1, 1]} : vector<8x640xf32> to vector<8x128xf32>
    %935 = vector.extract_strided_slice %932 {offsets = [0, 256], sizes = [8, 128], strides = [1, 1]} : vector<8x640xf32> to vector<8x128xf32>
    %936 = vector.extract_strided_slice %932 {offsets = [0, 384], sizes = [8, 128], strides = [1, 1]} : vector<8x640xf32> to vector<8x128xf32>
    %937 = vector.extract_strided_slice %932 {offsets = [0, 512], sizes = [8, 128], strides = [1, 1]} : vector<8x640xf32> to vector<8x128xf32>
    %cst_337 = arith.constant 5.000000e-01 : f32
    %938 = vector.broadcast %cst_337 : f32 to vector<8x128xf32>
    %939 = arith.mulf %938, %934 : vector<8x128xf32>
    %940 = math.tanh %939 : vector<8x128xf32>
    %cst_338 = arith.constant 5.000000e-01 : f32
    %941 = vector.broadcast %cst_338 : f32 to vector<8x128xf32>
    %942 = arith.mulf %941, %940 : vector<8x128xf32>
    %cst_339 = arith.constant 5.000000e-01 : f32
    %943 = vector.broadcast %cst_339 : f32 to vector<8x128xf32>
    %944 = arith.addf %942, %943 : vector<8x128xf32>
    %945 = arith.mulf %876, %944 : vector<8x128xf32>
    %cst_340 = arith.constant 5.000000e-01 : f32
    %946 = vector.broadcast %cst_340 : f32 to vector<8x128xf32>
    %947 = arith.mulf %946, %935 : vector<8x128xf32>
    %948 = math.tanh %947 : vector<8x128xf32>
    %cst_341 = arith.constant 5.000000e-01 : f32
    %949 = vector.broadcast %cst_341 : f32 to vector<8x128xf32>
    %950 = arith.mulf %949, %948 : vector<8x128xf32>
    %cst_342 = arith.constant 5.000000e-01 : f32
    %951 = vector.broadcast %cst_342 : f32 to vector<8x128xf32>
    %952 = arith.addf %950, %951 : vector<8x128xf32>
    %953 = arith.mulf %918, %952 : vector<8x128xf32>
    %954 = arith.addf %945, %953 : vector<8x128xf32>
    %955 = math.tanh %936 : vector<8x128xf32>
    %cst_343 = arith.constant 5.000000e-01 : f32
    %956 = vector.broadcast %cst_343 : f32 to vector<8x128xf32>
    %957 = arith.mulf %956, %933 : vector<8x128xf32>
    %958 = math.tanh %957 : vector<8x128xf32>
    %cst_344 = arith.constant 5.000000e-01 : f32
    %959 = vector.broadcast %cst_344 : f32 to vector<8x128xf32>
    %960 = arith.mulf %959, %958 : vector<8x128xf32>
    %cst_345 = arith.constant 5.000000e-01 : f32
    %961 = vector.broadcast %cst_345 : f32 to vector<8x128xf32>
    %962 = arith.addf %960, %961 : vector<8x128xf32>
    %963 = arith.mulf %955, %962 : vector<8x128xf32>
    %964 = arith.addf %954, %963 : vector<8x128xf32>
    %cst_346 = arith.constant 5.000000e-01 : f32
    %965 = vector.broadcast %cst_346 : f32 to vector<8x128xf32>
    %966 = arith.mulf %965, %937 : vector<8x128xf32>
    %967 = math.tanh %966 : vector<8x128xf32>
    %cst_347 = arith.constant 5.000000e-01 : f32
    %968 = vector.broadcast %cst_347 : f32 to vector<8x128xf32>
    %969 = arith.mulf %968, %967 : vector<8x128xf32>
    %cst_348 = arith.constant 5.000000e-01 : f32
    %970 = vector.broadcast %cst_348 : f32 to vector<8x128xf32>
    %971 = arith.addf %969, %970 : vector<8x128xf32>
    %972 = math.tanh %964 : vector<8x128xf32>
    %973 = arith.mulf %971, %972 : vector<8x128xf32>
    %c10_349 = arith.constant 10 : index
    %c0_350 = arith.constant 0 : index
    %c0_351 = arith.constant 0 : index
    %974 = vector.load %arg5[%c10_349, %c0_350, %c0_351] : memref<16x8x128xf32, #tpu.memory_space<vmem>>, vector<1x8x128xf32>
    %975 = vector.shape_cast %974 : vector<1x8x128xf32> to vector<8x128xf32>
    %976 = vector.shape_cast %973 : vector<8x128xf32> to vector<1x8x128xf32>
    tpu.vector_store %arg5[%c10_349, %c0_350, %c0_351], %976 {strides = array<i32>} : memref<16x8x128xf32, #tpu.memory_space<vmem>>, vector<1x8x128xf32>,
    %c10_352 = arith.constant 10 : index
    %c0_353 = arith.constant 0 : index
    %c0_354 = arith.constant 0 : index
    %977 = vector.load %arg6[%c10_352, %c0_353, %c0_354] : memref<16x8x128xf32, #tpu.memory_space<vmem>>, vector<1x8x128xf32>
    %978 = vector.shape_cast %977 : vector<1x8x128xf32> to vector<8x128xf32>
    %979 = vector.shape_cast %964 : vector<8x128xf32> to vector<1x8x128xf32>
    tpu.vector_store %arg6[%c10_352, %c0_353, %c0_354], %979 {strides = array<i32>} : memref<16x8x128xf32, #tpu.memory_space<vmem>>, vector<1x8x128xf32>,
    %c11 = arith.constant 11 : index
    %c0_355 = arith.constant 0 : index
    %c0_356 = arith.constant 0 : index
    %980 = vector.load %arg1[%c11, %c0_355, %c0_356] : memref<16x8x512xf32, #tpu.memory_space<vmem>>, vector<1x8x512xf32>
    %981 = vector.shape_cast %980 : vector<1x8x512xf32> to vector<8x512xf32>
    %982 = arith.truncf %927 : vector<8x128xf32> to vector<8x128xbf16>
    %cst_357 = arith.constant dense<0.000000e+00> : vector<8x512xf32>
    %983 = tpu.matmul %982, %3, %cst_357 {dimension_numbers = #tpu.dot_dimension_numbers<[1], [0], [0], [1], [0, 0, 1, 1], [], []>} : vector<8x128xbf16>, vector<128x512xbf16>, vector<8x512xf32> -> vector<8x512xf32>
    %984 = arith.addf %981, %983 : vector<8x512xf32>
    %985 = vector.extract_strided_slice %984 {offsets = [0, 0], sizes = [8, 128], strides = [1, 1]} : vector<8x512xf32> to vector<8x128xf32>
    %986 = vector.extract_strided_slice %984 {offsets = [0, 128], sizes = [8, 128], strides = [1, 1]} : vector<8x512xf32> to vector<8x128xf32>
    %987 = vector.extract_strided_slice %984 {offsets = [0, 256], sizes = [8, 128], strides = [1, 1]} : vector<8x512xf32> to vector<8x128xf32>
    %988 = vector.extract_strided_slice %984 {offsets = [0, 384], sizes = [8, 128], strides = [1, 1]} : vector<8x512xf32> to vector<8x128xf32>
    %cst_358 = arith.constant 5.000000e-01 : f32
    %989 = vector.broadcast %cst_358 : f32 to vector<8x128xf32>
    %990 = arith.mulf %989, %985 : vector<8x128xf32>
    %991 = math.tanh %990 : vector<8x128xf32>
    %cst_359 = arith.constant 5.000000e-01 : f32
    %992 = vector.broadcast %cst_359 : f32 to vector<8x128xf32>
    %993 = arith.mulf %992, %991 : vector<8x128xf32>
    %cst_360 = arith.constant 5.000000e-01 : f32
    %994 = vector.broadcast %cst_360 : f32 to vector<8x128xf32>
    %995 = arith.addf %993, %994 : vector<8x128xf32>
    %996 = math.tanh %987 : vector<8x128xf32>
    %997 = arith.mulf %995, %996 : vector<8x128xf32>
    %cst_361 = arith.constant 5.000000e-01 : f32
    %998 = vector.broadcast %cst_361 : f32 to vector<8x128xf32>
    %999 = arith.mulf %998, %986 : vector<8x128xf32>
    %1000 = math.tanh %999 : vector<8x128xf32>
    %cst_362 = arith.constant 5.000000e-01 : f32
    %1001 = vector.broadcast %cst_362 : f32 to vector<8x128xf32>
    %1002 = arith.mulf %1001, %1000 : vector<8x128xf32>
    %cst_363 = arith.constant 5.000000e-01 : f32
    %1003 = vector.broadcast %cst_363 : f32 to vector<8x128xf32>
    %1004 = arith.addf %1002, %1003 : vector<8x128xf32>
    %1005 = arith.mulf %1004, %918 : vector<8x128xf32>
    %1006 = arith.addf %997, %1005 : vector<8x128xf32>
    %cst_364 = arith.constant 5.000000e-01 : f32
    %1007 = vector.broadcast %cst_364 : f32 to vector<8x128xf32>
    %1008 = arith.mulf %1007, %988 : vector<8x128xf32>
    %1009 = math.tanh %1008 : vector<8x128xf32>
    %cst_365 = arith.constant 5.000000e-01 : f32
    %1010 = vector.broadcast %cst_365 : f32 to vector<8x128xf32>
    %1011 = arith.mulf %1010, %1009 : vector<8x128xf32>
    %cst_366 = arith.constant 5.000000e-01 : f32
    %1012 = vector.broadcast %cst_366 : f32 to vector<8x128xf32>
    %1013 = arith.addf %1011, %1012 : vector<8x128xf32>
    %1014 = math.tanh %1006 : vector<8x128xf32>
    %1015 = arith.mulf %1013, %1014 : vector<8x128xf32>
    %1016 = arith.truncf %1015 : vector<8x128xf32> to vector<8x128xbf16>
    %1017 = arith.truncf %973 : vector<8x128xf32> to vector<8x128xbf16>
    %1018 = tpu.concatenate %1016, %1017 in 1 : vector<8x128xbf16>, vector<8x128xbf16> -> vector<8x256xbf16>
    %cst_367 = arith.constant dense<0.000000e+00> : vector<8x640xf32>
    %1019 = tpu.matmul %1018, %4, %cst_367 {dimension_numbers = #tpu.dot_dimension_numbers<[1], [0], [0], [1], [0, 0, 1, 1], [], []>} : vector<8x256xbf16>, vector<256x640xbf16>, vector<8x640xf32> -> vector<8x640xf32>
    %1020 = arith.addf %1019, %7 : vector<8x640xf32>
    %1021 = vector.extract_strided_slice %1020 {offsets = [0, 0], sizes = [8, 128], strides = [1, 1]} : vector<8x640xf32> to vector<8x128xf32>
    %1022 = vector.extract_strided_slice %1020 {offsets = [0, 128], sizes = [8, 128], strides = [1, 1]} : vector<8x640xf32> to vector<8x128xf32>
    %1023 = vector.extract_strided_slice %1020 {offsets = [0, 256], sizes = [8, 128], strides = [1, 1]} : vector<8x640xf32> to vector<8x128xf32>
    %1024 = vector.extract_strided_slice %1020 {offsets = [0, 384], sizes = [8, 128], strides = [1, 1]} : vector<8x640xf32> to vector<8x128xf32>
    %1025 = vector.extract_strided_slice %1020 {offsets = [0, 512], sizes = [8, 128], strides = [1, 1]} : vector<8x640xf32> to vector<8x128xf32>
    %cst_368 = arith.constant 5.000000e-01 : f32
    %1026 = vector.broadcast %cst_368 : f32 to vector<8x128xf32>
    %1027 = arith.mulf %1026, %1022 : vector<8x128xf32>
    %1028 = math.tanh %1027 : vector<8x128xf32>
    %cst_369 = arith.constant 5.000000e-01 : f32
    %1029 = vector.broadcast %cst_369 : f32 to vector<8x128xf32>
    %1030 = arith.mulf %1029, %1028 : vector<8x128xf32>
    %cst_370 = arith.constant 5.000000e-01 : f32
    %1031 = vector.broadcast %cst_370 : f32 to vector<8x128xf32>
    %1032 = arith.addf %1030, %1031 : vector<8x128xf32>
    %1033 = arith.mulf %964, %1032 : vector<8x128xf32>
    %cst_371 = arith.constant 5.000000e-01 : f32
    %1034 = vector.broadcast %cst_371 : f32 to vector<8x128xf32>
    %1035 = arith.mulf %1034, %1023 : vector<8x128xf32>
    %1036 = math.tanh %1035 : vector<8x128xf32>
    %cst_372 = arith.constant 5.000000e-01 : f32
    %1037 = vector.broadcast %cst_372 : f32 to vector<8x128xf32>
    %1038 = arith.mulf %1037, %1036 : vector<8x128xf32>
    %cst_373 = arith.constant 5.000000e-01 : f32
    %1039 = vector.broadcast %cst_373 : f32 to vector<8x128xf32>
    %1040 = arith.addf %1038, %1039 : vector<8x128xf32>
    %1041 = arith.mulf %1006, %1040 : vector<8x128xf32>
    %1042 = arith.addf %1033, %1041 : vector<8x128xf32>
    %1043 = math.tanh %1024 : vector<8x128xf32>
    %cst_374 = arith.constant 5.000000e-01 : f32
    %1044 = vector.broadcast %cst_374 : f32 to vector<8x128xf32>
    %1045 = arith.mulf %1044, %1021 : vector<8x128xf32>
    %1046 = math.tanh %1045 : vector<8x128xf32>
    %cst_375 = arith.constant 5.000000e-01 : f32
    %1047 = vector.broadcast %cst_375 : f32 to vector<8x128xf32>
    %1048 = arith.mulf %1047, %1046 : vector<8x128xf32>
    %cst_376 = arith.constant 5.000000e-01 : f32
    %1049 = vector.broadcast %cst_376 : f32 to vector<8x128xf32>
    %1050 = arith.addf %1048, %1049 : vector<8x128xf32>
    %1051 = arith.mulf %1043, %1050 : vector<8x128xf32>
    %1052 = arith.addf %1042, %1051 : vector<8x128xf32>
    %cst_377 = arith.constant 5.000000e-01 : f32
    %1053 = vector.broadcast %cst_377 : f32 to vector<8x128xf32>
    %1054 = arith.mulf %1053, %1025 : vector<8x128xf32>
    %1055 = math.tanh %1054 : vector<8x128xf32>
    %cst_378 = arith.constant 5.000000e-01 : f32
    %1056 = vector.broadcast %cst_378 : f32 to vector<8x128xf32>
    %1057 = arith.mulf %1056, %1055 : vector<8x128xf32>
    %cst_379 = arith.constant 5.000000e-01 : f32
    %1058 = vector.broadcast %cst_379 : f32 to vector<8x128xf32>
    %1059 = arith.addf %1057, %1058 : vector<8x128xf32>
    %1060 = math.tanh %1052 : vector<8x128xf32>
    %1061 = arith.mulf %1059, %1060 : vector<8x128xf32>
    %c11_380 = arith.constant 11 : index
    %c0_381 = arith.constant 0 : index
    %c0_382 = arith.constant 0 : index
    %1062 = vector.load %arg5[%c11_380, %c0_381, %c0_382] : memref<16x8x128xf32, #tpu.memory_space<vmem>>, vector<1x8x128xf32>
    %1063 = vector.shape_cast %1062 : vector<1x8x128xf32> to vector<8x128xf32>
    %1064 = vector.shape_cast %1061 : vector<8x128xf32> to vector<1x8x128xf32>
    tpu.vector_store %arg5[%c11_380, %c0_381, %c0_382], %1064 {strides = array<i32>} : memref<16x8x128xf32, #tpu.memory_space<vmem>>, vector<1x8x128xf32>,
    %c11_383 = arith.constant 11 : index
    %c0_384 = arith.constant 0 : index
    %c0_385 = arith.constant 0 : index
    %1065 = vector.load %arg6[%c11_383, %c0_384, %c0_385] : memref<16x8x128xf32, #tpu.memory_space<vmem>>, vector<1x8x128xf32>
    %1066 = vector.shape_cast %1065 : vector<1x8x128xf32> to vector<8x128xf32>
    %1067 = vector.shape_cast %1052 : vector<8x128xf32> to vector<1x8x128xf32>
    tpu.vector_store %arg6[%c11_383, %c0_384, %c0_385], %1067 {strides = array<i32>} : memref<16x8x128xf32, #tpu.memory_space<vmem>>, vector<1x8x128xf32>,
    %c12 = arith.constant 12 : index
    %c0_386 = arith.constant 0 : index
    %c0_387 = arith.constant 0 : index
    %1068 = vector.load %arg1[%c12, %c0_386, %c0_387] : memref<16x8x512xf32, #tpu.memory_space<vmem>>, vector<1x8x512xf32>
    %1069 = vector.shape_cast %1068 : vector<1x8x512xf32> to vector<8x512xf32>
    %1070 = arith.truncf %1015 : vector<8x128xf32> to vector<8x128xbf16>
    %cst_388 = arith.constant dense<0.000000e+00> : vector<8x512xf32>
    %1071 = tpu.matmul %1070, %3, %cst_388 {dimension_numbers = #tpu.dot_dimension_numbers<[1], [0], [0], [1], [0, 0, 1, 1], [], []>} : vector<8x128xbf16>, vector<128x512xbf16>, vector<8x512xf32> -> vector<8x512xf32>
    %1072 = arith.addf %1069, %1071 : vector<8x512xf32>
    %1073 = vector.extract_strided_slice %1072 {offsets = [0, 0], sizes = [8, 128], strides = [1, 1]} : vector<8x512xf32> to vector<8x128xf32>
    %1074 = vector.extract_strided_slice %1072 {offsets = [0, 128], sizes = [8, 128], strides = [1, 1]} : vector<8x512xf32> to vector<8x128xf32>
    %1075 = vector.extract_strided_slice %1072 {offsets = [0, 256], sizes = [8, 128], strides = [1, 1]} : vector<8x512xf32> to vector<8x128xf32>
    %1076 = vector.extract_strided_slice %1072 {offsets = [0, 384], sizes = [8, 128], strides = [1, 1]} : vector<8x512xf32> to vector<8x128xf32>
    %cst_389 = arith.constant 5.000000e-01 : f32
    %1077 = vector.broadcast %cst_389 : f32 to vector<8x128xf32>
    %1078 = arith.mulf %1077, %1073 : vector<8x128xf32>
    %1079 = math.tanh %1078 : vector<8x128xf32>
    %cst_390 = arith.constant 5.000000e-01 : f32
    %1080 = vector.broadcast %cst_390 : f32 to vector<8x128xf32>
    %1081 = arith.mulf %1080, %1079 : vector<8x128xf32>
    %cst_391 = arith.constant 5.000000e-01 : f32
    %1082 = vector.broadcast %cst_391 : f32 to vector<8x128xf32>
    %1083 = arith.addf %1081, %1082 : vector<8x128xf32>
    %1084 = math.tanh %1075 : vector<8x128xf32>
    %1085 = arith.mulf %1083, %1084 : vector<8x128xf32>
    %cst_392 = arith.constant 5.000000e-01 : f32
    %1086 = vector.broadcast %cst_392 : f32 to vector<8x128xf32>
    %1087 = arith.mulf %1086, %1074 : vector<8x128xf32>
    %1088 = math.tanh %1087 : vector<8x128xf32>
    %cst_393 = arith.constant 5.000000e-01 : f32
    %1089 = vector.broadcast %cst_393 : f32 to vector<8x128xf32>
    %1090 = arith.mulf %1089, %1088 : vector<8x128xf32>
    %cst_394 = arith.constant 5.000000e-01 : f32
    %1091 = vector.broadcast %cst_394 : f32 to vector<8x128xf32>
    %1092 = arith.addf %1090, %1091 : vector<8x128xf32>
    %1093 = arith.mulf %1092, %1006 : vector<8x128xf32>
    %1094 = arith.addf %1085, %1093 : vector<8x128xf32>
    %cst_395 = arith.constant 5.000000e-01 : f32
    %1095 = vector.broadcast %cst_395 : f32 to vector<8x128xf32>
    %1096 = arith.mulf %1095, %1076 : vector<8x128xf32>
    %1097 = math.tanh %1096 : vector<8x128xf32>
    %cst_396 = arith.constant 5.000000e-01 : f32
    %1098 = vector.broadcast %cst_396 : f32 to vector<8x128xf32>
    %1099 = arith.mulf %1098, %1097 : vector<8x128xf32>
    %cst_397 = arith.constant 5.000000e-01 : f32
    %1100 = vector.broadcast %cst_397 : f32 to vector<8x128xf32>
    %1101 = arith.addf %1099, %1100 : vector<8x128xf32>
    %1102 = math.tanh %1094 : vector<8x128xf32>
    %1103 = arith.mulf %1101, %1102 : vector<8x128xf32>
    %1104 = arith.truncf %1103 : vector<8x128xf32> to vector<8x128xbf16>
    %1105 = arith.truncf %1061 : vector<8x128xf32> to vector<8x128xbf16>
    %1106 = tpu.concatenate %1104, %1105 in 1 : vector<8x128xbf16>, vector<8x128xbf16> -> vector<8x256xbf16>
    %cst_398 = arith.constant dense<0.000000e+00> : vector<8x640xf32>
    %1107 = tpu.matmul %1106, %4, %cst_398 {dimension_numbers = #tpu.dot_dimension_numbers<[1], [0], [0], [1], [0, 0, 1, 1], [], []>} : vector<8x256xbf16>, vector<256x640xbf16>, vector<8x640xf32> -> vector<8x640xf32>
    %1108 = arith.addf %1107, %7 : vector<8x640xf32>
    %1109 = vector.extract_strided_slice %1108 {offsets = [0, 0], sizes = [8, 128], strides = [1, 1]} : vector<8x640xf32> to vector<8x128xf32>
    %1110 = vector.extract_strided_slice %1108 {offsets = [0, 128], sizes = [8, 128], strides = [1, 1]} : vector<8x640xf32> to vector<8x128xf32>
    %1111 = vector.extract_strided_slice %1108 {offsets = [0, 256], sizes = [8, 128], strides = [1, 1]} : vector<8x640xf32> to vector<8x128xf32>
    %1112 = vector.extract_strided_slice %1108 {offsets = [0, 384], sizes = [8, 128], strides = [1, 1]} : vector<8x640xf32> to vector<8x128xf32>
    %1113 = vector.extract_strided_slice %1108 {offsets = [0, 512], sizes = [8, 128], strides = [1, 1]} : vector<8x640xf32> to vector<8x128xf32>
    %cst_399 = arith.constant 5.000000e-01 : f32
    %1114 = vector.broadcast %cst_399 : f32 to vector<8x128xf32>
    %1115 = arith.mulf %1114, %1110 : vector<8x128xf32>
    %1116 = math.tanh %1115 : vector<8x128xf32>
    %cst_400 = arith.constant 5.000000e-01 : f32
    %1117 = vector.broadcast %cst_400 : f32 to vector<8x128xf32>
    %1118 = arith.mulf %1117, %1116 : vector<8x128xf32>
    %cst_401 = arith.constant 5.000000e-01 : f32
    %1119 = vector.broadcast %cst_401 : f32 to vector<8x128xf32>
    %1120 = arith.addf %1118, %1119 : vector<8x128xf32>
    %1121 = arith.mulf %1052, %1120 : vector<8x128xf32>
    %cst_402 = arith.constant 5.000000e-01 : f32
    %1122 = vector.broadcast %cst_402 : f32 to vector<8x128xf32>
    %1123 = arith.mulf %1122, %1111 : vector<8x128xf32>
    %1124 = math.tanh %1123 : vector<8x128xf32>
    %cst_403 = arith.constant 5.000000e-01 : f32
    %1125 = vector.broadcast %cst_403 : f32 to vector<8x128xf32>
    %1126 = arith.mulf %1125, %1124 : vector<8x128xf32>
    %cst_404 = arith.constant 5.000000e-01 : f32
    %1127 = vector.broadcast %cst_404 : f32 to vector<8x128xf32>
    %1128 = arith.addf %1126, %1127 : vector<8x128xf32>
    %1129 = arith.mulf %1094, %1128 : vector<8x128xf32>
    %1130 = arith.addf %1121, %1129 : vector<8x128xf32>
    %1131 = math.tanh %1112 : vector<8x128xf32>
    %cst_405 = arith.constant 5.000000e-01 : f32
    %1132 = vector.broadcast %cst_405 : f32 to vector<8x128xf32>
    %1133 = arith.mulf %1132, %1109 : vector<8x128xf32>
    %1134 = math.tanh %1133 : vector<8x128xf32>
    %cst_406 = arith.constant 5.000000e-01 : f32
    %1135 = vector.broadcast %cst_406 : f32 to vector<8x128xf32>
    %1136 = arith.mulf %1135, %1134 : vector<8x128xf32>
    %cst_407 = arith.constant 5.000000e-01 : f32
    %1137 = vector.broadcast %cst_407 : f32 to vector<8x128xf32>
    %1138 = arith.addf %1136, %1137 : vector<8x128xf32>
    %1139 = arith.mulf %1131, %1138 : vector<8x128xf32>
    %1140 = arith.addf %1130, %1139 : vector<8x128xf32>
    %cst_408 = arith.constant 5.000000e-01 : f32
    %1141 = vector.broadcast %cst_408 : f32 to vector<8x128xf32>
    %1142 = arith.mulf %1141, %1113 : vector<8x128xf32>
    %1143 = math.tanh %1142 : vector<8x128xf32>
    %cst_409 = arith.constant 5.000000e-01 : f32
    %1144 = vector.broadcast %cst_409 : f32 to vector<8x128xf32>
    %1145 = arith.mulf %1144, %1143 : vector<8x128xf32>
    %cst_410 = arith.constant 5.000000e-01 : f32
    %1146 = vector.broadcast %cst_410 : f32 to vector<8x128xf32>
    %1147 = arith.addf %1145, %1146 : vector<8x128xf32>
    %1148 = math.tanh %1140 : vector<8x128xf32>
    %1149 = arith.mulf %1147, %1148 : vector<8x128xf32>
    %c12_411 = arith.constant 12 : index
    %c0_412 = arith.constant 0 : index
    %c0_413 = arith.constant 0 : index
    %1150 = vector.load %arg5[%c12_411, %c0_412, %c0_413] : memref<16x8x128xf32, #tpu.memory_space<vmem>>, vector<1x8x128xf32>
    %1151 = vector.shape_cast %1150 : vector<1x8x128xf32> to vector<8x128xf32>
    %1152 = vector.shape_cast %1149 : vector<8x128xf32> to vector<1x8x128xf32>
    tpu.vector_store %arg5[%c12_411, %c0_412, %c0_413], %1152 {strides = array<i32>} : memref<16x8x128xf32, #tpu.memory_space<vmem>>, vector<1x8x128xf32>,
    %c12_414 = arith.constant 12 : index
    %c0_415 = arith.constant 0 : index
    %c0_416 = arith.constant 0 : index
    %1153 = vector.load %arg6[%c12_414, %c0_415, %c0_416] : memref<16x8x128xf32, #tpu.memory_space<vmem>>, vector<1x8x128xf32>
    %1154 = vector.shape_cast %1153 : vector<1x8x128xf32> to vector<8x128xf32>
    %1155 = vector.shape_cast %1140 : vector<8x128xf32> to vector<1x8x128xf32>
    tpu.vector_store %arg6[%c12_414, %c0_415, %c0_416], %1155 {strides = array<i32>} : memref<16x8x128xf32, #tpu.memory_space<vmem>>, vector<1x8x128xf32>,
    %c13 = arith.constant 13 : index
    %c0_417 = arith.constant 0 : index
    %c0_418 = arith.constant 0 : index
    %1156 = vector.load %arg1[%c13, %c0_417, %c0_418] : memref<16x8x512xf32, #tpu.memory_space<vmem>>, vector<1x8x512xf32>
    %1157 = vector.shape_cast %1156 : vector<1x8x512xf32> to vector<8x512xf32>
    %1158 = arith.truncf %1103 : vector<8x128xf32> to vector<8x128xbf16>
    %cst_419 = arith.constant dense<0.000000e+00> : vector<8x512xf32>
    %1159 = tpu.matmul %1158, %3, %cst_419 {dimension_numbers = #tpu.dot_dimension_numbers<[1], [0], [0], [1], [0, 0, 1, 1], [], []>} : vector<8x128xbf16>, vector<128x512xbf16>, vector<8x512xf32> -> vector<8x512xf32>
    %1160 = arith.addf %1157, %1159 : vector<8x512xf32>
    %1161 = vector.extract_strided_slice %1160 {offsets = [0, 0], sizes = [8, 128], strides = [1, 1]} : vector<8x512xf32> to vector<8x128xf32>
    %1162 = vector.extract_strided_slice %1160 {offsets = [0, 128], sizes = [8, 128], strides = [1, 1]} : vector<8x512xf32> to vector<8x128xf32>
    %1163 = vector.extract_strided_slice %1160 {offsets = [0, 256], sizes = [8, 128], strides = [1, 1]} : vector<8x512xf32> to vector<8x128xf32>
    %1164 = vector.extract_strided_slice %1160 {offsets = [0, 384], sizes = [8, 128], strides = [1, 1]} : vector<8x512xf32> to vector<8x128xf32>
    %cst_420 = arith.constant 5.000000e-01 : f32
    %1165 = vector.broadcast %cst_420 : f32 to vector<8x128xf32>
    %1166 = arith.mulf %1165, %1161 : vector<8x128xf32>
    %1167 = math.tanh %1166 : vector<8x128xf32>
    %cst_421 = arith.constant 5.000000e-01 : f32
    %1168 = vector.broadcast %cst_421 : f32 to vector<8x128xf32>
    %1169 = arith.mulf %1168, %1167 : vector<8x128xf32>
    %cst_422 = arith.constant 5.000000e-01 : f32
    %1170 = vector.broadcast %cst_422 : f32 to vector<8x128xf32>
    %1171 = arith.addf %1169, %1170 : vector<8x128xf32>
    %1172 = math.tanh %1163 : vector<8x128xf32>
    %1173 = arith.mulf %1171, %1172 : vector<8x128xf32>
    %cst_423 = arith.constant 5.000000e-01 : f32
    %1174 = vector.broadcast %cst_423 : f32 to vector<8x128xf32>
    %1175 = arith.mulf %1174, %1162 : vector<8x128xf32>
    %1176 = math.tanh %1175 : vector<8x128xf32>
    %cst_424 = arith.constant 5.000000e-01 : f32
    %1177 = vector.broadcast %cst_424 : f32 to vector<8x128xf32>
    %1178 = arith.mulf %1177, %1176 : vector<8x128xf32>
    %cst_425 = arith.constant 5.000000e-01 : f32
    %1179 = vector.broadcast %cst_425 : f32 to vector<8x128xf32>
    %1180 = arith.addf %1178, %1179 : vector<8x128xf32>
    %1181 = arith.mulf %1180, %1094 : vector<8x128xf32>
    %1182 = arith.addf %1173, %1181 : vector<8x128xf32>
    %cst_426 = arith.constant 5.000000e-01 : f32
    %1183 = vector.broadcast %cst_426 : f32 to vector<8x128xf32>
    %1184 = arith.mulf %1183, %1164 : vector<8x128xf32>
    %1185 = math.tanh %1184 : vector<8x128xf32>
    %cst_427 = arith.constant 5.000000e-01 : f32
    %1186 = vector.broadcast %cst_427 : f32 to vector<8x128xf32>
    %1187 = arith.mulf %1186, %1185 : vector<8x128xf32>
    %cst_428 = arith.constant 5.000000e-01 : f32
    %1188 = vector.broadcast %cst_428 : f32 to vector<8x128xf32>
    %1189 = arith.addf %1187, %1188 : vector<8x128xf32>
    %1190 = math.tanh %1182 : vector<8x128xf32>
    %1191 = arith.mulf %1189, %1190 : vector<8x128xf32>
    %1192 = arith.truncf %1191 : vector<8x128xf32> to vector<8x128xbf16>
    %1193 = arith.truncf %1149 : vector<8x128xf32> to vector<8x128xbf16>
    %1194 = tpu.concatenate %1192, %1193 in 1 : vector<8x128xbf16>, vector<8x128xbf16> -> vector<8x256xbf16>
    %cst_429 = arith.constant dense<0.000000e+00> : vector<8x640xf32>
    %1195 = tpu.matmul %1194, %4, %cst_429 {dimension_numbers = #tpu.dot_dimension_numbers<[1], [0], [0], [1], [0, 0, 1, 1], [], []>} : vector<8x256xbf16>, vector<256x640xbf16>, vector<8x640xf32> -> vector<8x640xf32>
    %1196 = arith.addf %1195, %7 : vector<8x640xf32>
    %1197 = vector.extract_strided_slice %1196 {offsets = [0, 0], sizes = [8, 128], strides = [1, 1]} : vector<8x640xf32> to vector<8x128xf32>
    %1198 = vector.extract_strided_slice %1196 {offsets = [0, 128], sizes = [8, 128], strides = [1, 1]} : vector<8x640xf32> to vector<8x128xf32>
    %1199 = vector.extract_strided_slice %1196 {offsets = [0, 256], sizes = [8, 128], strides = [1, 1]} : vector<8x640xf32> to vector<8x128xf32>
    %1200 = vector.extract_strided_slice %1196 {offsets = [0, 384], sizes = [8, 128], strides = [1, 1]} : vector<8x640xf32> to vector<8x128xf32>
    %1201 = vector.extract_strided_slice %1196 {offsets = [0, 512], sizes = [8, 128], strides = [1, 1]} : vector<8x640xf32> to vector<8x128xf32>
    %cst_430 = arith.constant 5.000000e-01 : f32
    %1202 = vector.broadcast %cst_430 : f32 to vector<8x128xf32>
    %1203 = arith.mulf %1202, %1198 : vector<8x128xf32>
    %1204 = math.tanh %1203 : vector<8x128xf32>
    %cst_431 = arith.constant 5.000000e-01 : f32
    %1205 = vector.broadcast %cst_431 : f32 to vector<8x128xf32>
    %1206 = arith.mulf %1205, %1204 : vector<8x128xf32>
    %cst_432 = arith.constant 5.000000e-01 : f32
    %1207 = vector.broadcast %cst_432 : f32 to vector<8x128xf32>
    %1208 = arith.addf %1206, %1207 : vector<8x128xf32>
    %1209 = arith.mulf %1140, %1208 : vector<8x128xf32>
    %cst_433 = arith.constant 5.000000e-01 : f32
    %1210 = vector.broadcast %cst_433 : f32 to vector<8x128xf32>
    %1211 = arith.mulf %1210, %1199 : vector<8x128xf32>
    %1212 = math.tanh %1211 : vector<8x128xf32>
    %cst_434 = arith.constant 5.000000e-01 : f32
    %1213 = vector.broadcast %cst_434 : f32 to vector<8x128xf32>
    %1214 = arith.mulf %1213, %1212 : vector<8x128xf32>
    %cst_435 = arith.constant 5.000000e-01 : f32
    %1215 = vector.broadcast %cst_435 : f32 to vector<8x128xf32>
    %1216 = arith.addf %1214, %1215 : vector<8x128xf32>
    %1217 = arith.mulf %1182, %1216 : vector<8x128xf32>
    %1218 = arith.addf %1209, %1217 : vector<8x128xf32>
    %1219 = math.tanh %1200 : vector<8x128xf32>
    %cst_436 = arith.constant 5.000000e-01 : f32
    %1220 = vector.broadcast %cst_436 : f32 to vector<8x128xf32>
    %1221 = arith.mulf %1220, %1197 : vector<8x128xf32>
    %1222 = math.tanh %1221 : vector<8x128xf32>
    %cst_437 = arith.constant 5.000000e-01 : f32
    %1223 = vector.broadcast %cst_437 : f32 to vector<8x128xf32>
    %1224 = arith.mulf %1223, %1222 : vector<8x128xf32>
    %cst_438 = arith.constant 5.000000e-01 : f32
    %1225 = vector.broadcast %cst_438 : f32 to vector<8x128xf32>
    %1226 = arith.addf %1224, %1225 : vector<8x128xf32>
    %1227 = arith.mulf %1219, %1226 : vector<8x128xf32>
    %1228 = arith.addf %1218, %1227 : vector<8x128xf32>
    %cst_439 = arith.constant 5.000000e-01 : f32
    %1229 = vector.broadcast %cst_439 : f32 to vector<8x128xf32>
    %1230 = arith.mulf %1229, %1201 : vector<8x128xf32>
    %1231 = math.tanh %1230 : vector<8x128xf32>
    %cst_440 = arith.constant 5.000000e-01 : f32
    %1232 = vector.broadcast %cst_440 : f32 to vector<8x128xf32>
    %1233 = arith.mulf %1232, %1231 : vector<8x128xf32>
    %cst_441 = arith.constant 5.000000e-01 : f32
    %1234 = vector.broadcast %cst_441 : f32 to vector<8x128xf32>
    %1235 = arith.addf %1233, %1234 : vector<8x128xf32>
    %1236 = math.tanh %1228 : vector<8x128xf32>
    %1237 = arith.mulf %1235, %1236 : vector<8x128xf32>
    %c13_442 = arith.constant 13 : index
    %c0_443 = arith.constant 0 : index
    %c0_444 = arith.constant 0 : index
    %1238 = vector.load %arg5[%c13_442, %c0_443, %c0_444] : memref<16x8x128xf32, #tpu.memory_space<vmem>>, vector<1x8x128xf32>
    %1239 = vector.shape_cast %1238 : vector<1x8x128xf32> to vector<8x128xf32>
    %1240 = vector.shape_cast %1237 : vector<8x128xf32> to vector<1x8x128xf32>
    tpu.vector_store %arg5[%c13_442, %c0_443, %c0_444], %1240 {strides = array<i32>} : memref<16x8x128xf32, #tpu.memory_space<vmem>>, vector<1x8x128xf32>,
    %c13_445 = arith.constant 13 : index
    %c0_446 = arith.constant 0 : index
    %c0_447 = arith.constant 0 : index
    %1241 = vector.load %arg6[%c13_445, %c0_446, %c0_447] : memref<16x8x128xf32, #tpu.memory_space<vmem>>, vector<1x8x128xf32>
    %1242 = vector.shape_cast %1241 : vector<1x8x128xf32> to vector<8x128xf32>
    %1243 = vector.shape_cast %1228 : vector<8x128xf32> to vector<1x8x128xf32>
    tpu.vector_store %arg6[%c13_445, %c0_446, %c0_447], %1243 {strides = array<i32>} : memref<16x8x128xf32, #tpu.memory_space<vmem>>, vector<1x8x128xf32>,
    %c14 = arith.constant 14 : index
    %c0_448 = arith.constant 0 : index
    %c0_449 = arith.constant 0 : index
    %1244 = vector.load %arg1[%c14, %c0_448, %c0_449] : memref<16x8x512xf32, #tpu.memory_space<vmem>>, vector<1x8x512xf32>
    %1245 = vector.shape_cast %1244 : vector<1x8x512xf32> to vector<8x512xf32>
    %1246 = arith.truncf %1191 : vector<8x128xf32> to vector<8x128xbf16>
    %cst_450 = arith.constant dense<0.000000e+00> : vector<8x512xf32>
    %1247 = tpu.matmul %1246, %3, %cst_450 {dimension_numbers = #tpu.dot_dimension_numbers<[1], [0], [0], [1], [0, 0, 1, 1], [], []>} : vector<8x128xbf16>, vector<128x512xbf16>, vector<8x512xf32> -> vector<8x512xf32>
    %1248 = arith.addf %1245, %1247 : vector<8x512xf32>
    %1249 = vector.extract_strided_slice %1248 {offsets = [0, 0], sizes = [8, 128], strides = [1, 1]} : vector<8x512xf32> to vector<8x128xf32>
    %1250 = vector.extract_strided_slice %1248 {offsets = [0, 128], sizes = [8, 128], strides = [1, 1]} : vector<8x512xf32> to vector<8x128xf32>
    %1251 = vector.extract_strided_slice %1248 {offsets = [0, 256], sizes = [8, 128], strides = [1, 1]} : vector<8x512xf32> to vector<8x128xf32>
    %1252 = vector.extract_strided_slice %1248 {offsets = [0, 384], sizes = [8, 128], strides = [1, 1]} : vector<8x512xf32> to vector<8x128xf32>
    %cst_451 = arith.constant 5.000000e-01 : f32
    %1253 = vector.broadcast %cst_451 : f32 to vector<8x128xf32>
    %1254 = arith.mulf %1253, %1249 : vector<8x128xf32>
    %1255 = math.tanh %1254 : vector<8x128xf32>
    %cst_452 = arith.constant 5.000000e-01 : f32
    %1256 = vector.broadcast %cst_452 : f32 to vector<8x128xf32>
    %1257 = arith.mulf %1256, %1255 : vector<8x128xf32>
    %cst_453 = arith.constant 5.000000e-01 : f32
    %1258 = vector.broadcast %cst_453 : f32 to vector<8x128xf32>
    %1259 = arith.addf %1257, %1258 : vector<8x128xf32>
    %1260 = math.tanh %1251 : vector<8x128xf32>
    %1261 = arith.mulf %1259, %1260 : vector<8x128xf32>
    %cst_454 = arith.constant 5.000000e-01 : f32
    %1262 = vector.broadcast %cst_454 : f32 to vector<8x128xf32>
    %1263 = arith.mulf %1262, %1250 : vector<8x128xf32>
    %1264 = math.tanh %1263 : vector<8x128xf32>
    %cst_455 = arith.constant 5.000000e-01 : f32
    %1265 = vector.broadcast %cst_455 : f32 to vector<8x128xf32>
    %1266 = arith.mulf %1265, %1264 : vector<8x128xf32>
    %cst_456 = arith.constant 5.000000e-01 : f32
    %1267 = vector.broadcast %cst_456 : f32 to vector<8x128xf32>
    %1268 = arith.addf %1266, %1267 : vector<8x128xf32>
    %1269 = arith.mulf %1268, %1182 : vector<8x128xf32>
    %1270 = arith.addf %1261, %1269 : vector<8x128xf32>
    %cst_457 = arith.constant 5.000000e-01 : f32
    %1271 = vector.broadcast %cst_457 : f32 to vector<8x128xf32>
    %1272 = arith.mulf %1271, %1252 : vector<8x128xf32>
    %1273 = math.tanh %1272 : vector<8x128xf32>
    %cst_458 = arith.constant 5.000000e-01 : f32
    %1274 = vector.broadcast %cst_458 : f32 to vector<8x128xf32>
    %1275 = arith.mulf %1274, %1273 : vector<8x128xf32>
    %cst_459 = arith.constant 5.000000e-01 : f32
    %1276 = vector.broadcast %cst_459 : f32 to vector<8x128xf32>
    %1277 = arith.addf %1275, %1276 : vector<8x128xf32>
    %1278 = math.tanh %1270 : vector<8x128xf32>
    %1279 = arith.mulf %1277, %1278 : vector<8x128xf32>
    %1280 = arith.truncf %1279 : vector<8x128xf32> to vector<8x128xbf16>
    %1281 = arith.truncf %1237 : vector<8x128xf32> to vector<8x128xbf16>
    %1282 = tpu.concatenate %1280, %1281 in 1 : vector<8x128xbf16>, vector<8x128xbf16> -> vector<8x256xbf16>
    %cst_460 = arith.constant dense<0.000000e+00> : vector<8x640xf32>
    %1283 = tpu.matmul %1282, %4, %cst_460 {dimension_numbers = #tpu.dot_dimension_numbers<[1], [0], [0], [1], [0, 0, 1, 1], [], []>} : vector<8x256xbf16>, vector<256x640xbf16>, vector<8x640xf32> -> vector<8x640xf32>
    %1284 = arith.addf %1283, %7 : vector<8x640xf32>
    %1285 = vector.extract_strided_slice %1284 {offsets = [0, 0], sizes = [8, 128], strides = [1, 1]} : vector<8x640xf32> to vector<8x128xf32>
    %1286 = vector.extract_strided_slice %1284 {offsets = [0, 128], sizes = [8, 128], strides = [1, 1]} : vector<8x640xf32> to vector<8x128xf32>
    %1287 = vector.extract_strided_slice %1284 {offsets = [0, 256], sizes = [8, 128], strides = [1, 1]} : vector<8x640xf32> to vector<8x128xf32>
    %1288 = vector.extract_strided_slice %1284 {offsets = [0, 384], sizes = [8, 128], strides = [1, 1]} : vector<8x640xf32> to vector<8x128xf32>
    %1289 = vector.extract_strided_slice %1284 {offsets = [0, 512], sizes = [8, 128], strides = [1, 1]} : vector<8x640xf32> to vector<8x128xf32>
    %cst_461 = arith.constant 5.000000e-01 : f32
    %1290 = vector.broadcast %cst_461 : f32 to vector<8x128xf32>
    %1291 = arith.mulf %1290, %1286 : vector<8x128xf32>
    %1292 = math.tanh %1291 : vector<8x128xf32>
    %cst_462 = arith.constant 5.000000e-01 : f32
    %1293 = vector.broadcast %cst_462 : f32 to vector<8x128xf32>
    %1294 = arith.mulf %1293, %1292 : vector<8x128xf32>
    %cst_463 = arith.constant 5.000000e-01 : f32
    %1295 = vector.broadcast %cst_463 : f32 to vector<8x128xf32>
    %1296 = arith.addf %1294, %1295 : vector<8x128xf32>
    %1297 = arith.mulf %1228, %1296 : vector<8x128xf32>
    %cst_464 = arith.constant 5.000000e-01 : f32
    %1298 = vector.broadcast %cst_464 : f32 to vector<8x128xf32>
    %1299 = arith.mulf %1298, %1287 : vector<8x128xf32>
    %1300 = math.tanh %1299 : vector<8x128xf32>
    %cst_465 = arith.constant 5.000000e-01 : f32
    %1301 = vector.broadcast %cst_465 : f32 to vector<8x128xf32>
    %1302 = arith.mulf %1301, %1300 : vector<8x128xf32>
    %cst_466 = arith.constant 5.000000e-01 : f32
    %1303 = vector.broadcast %cst_466 : f32 to vector<8x128xf32>
    %1304 = arith.addf %1302, %1303 : vector<8x128xf32>
    %1305 = arith.mulf %1270, %1304 : vector<8x128xf32>
    %1306 = arith.addf %1297, %1305 : vector<8x128xf32>
    %1307 = math.tanh %1288 : vector<8x128xf32>
    %cst_467 = arith.constant 5.000000e-01 : f32
    %1308 = vector.broadcast %cst_467 : f32 to vector<8x128xf32>
    %1309 = arith.mulf %1308, %1285 : vector<8x128xf32>
    %1310 = math.tanh %1309 : vector<8x128xf32>
    %cst_468 = arith.constant 5.000000e-01 : f32
    %1311 = vector.broadcast %cst_468 : f32 to vector<8x128xf32>
    %1312 = arith.mulf %1311, %1310 : vector<8x128xf32>
    %cst_469 = arith.constant 5.000000e-01 : f32
    %1313 = vector.broadcast %cst_469 : f32 to vector<8x128xf32>
    %1314 = arith.addf %1312, %1313 : vector<8x128xf32>
    %1315 = arith.mulf %1307, %1314 : vector<8x128xf32>
    %1316 = arith.addf %1306, %1315 : vector<8x128xf32>
    %cst_470 = arith.constant 5.000000e-01 : f32
    %1317 = vector.broadcast %cst_470 : f32 to vector<8x128xf32>
    %1318 = arith.mulf %1317, %1289 : vector<8x128xf32>
    %1319 = math.tanh %1318 : vector<8x128xf32>
    %cst_471 = arith.constant 5.000000e-01 : f32
    %1320 = vector.broadcast %cst_471 : f32 to vector<8x128xf32>
    %1321 = arith.mulf %1320, %1319 : vector<8x128xf32>
    %cst_472 = arith.constant 5.000000e-01 : f32
    %1322 = vector.broadcast %cst_472 : f32 to vector<8x128xf32>
    %1323 = arith.addf %1321, %1322 : vector<8x128xf32>
    %1324 = math.tanh %1316 : vector<8x128xf32>
    %1325 = arith.mulf %1323, %1324 : vector<8x128xf32>
    %c14_473 = arith.constant 14 : index
    %c0_474 = arith.constant 0 : index
    %c0_475 = arith.constant 0 : index
    %1326 = vector.load %arg5[%c14_473, %c0_474, %c0_475] : memref<16x8x128xf32, #tpu.memory_space<vmem>>, vector<1x8x128xf32>
    %1327 = vector.shape_cast %1326 : vector<1x8x128xf32> to vector<8x128xf32>
    %1328 = vector.shape_cast %1325 : vector<8x128xf32> to vector<1x8x128xf32>
    tpu.vector_store %arg5[%c14_473, %c0_474, %c0_475], %1328 {strides = array<i32>} : memref<16x8x128xf32, #tpu.memory_space<vmem>>, vector<1x8x128xf32>,
    %c14_476 = arith.constant 14 : index
    %c0_477 = arith.constant 0 : index
    %c0_478 = arith.constant 0 : index
    %1329 = vector.load %arg6[%c14_476, %c0_477, %c0_478] : memref<16x8x128xf32, #tpu.memory_space<vmem>>, vector<1x8x128xf32>
    %1330 = vector.shape_cast %1329 : vector<1x8x128xf32> to vector<8x128xf32>
    %1331 = vector.shape_cast %1316 : vector<8x128xf32> to vector<1x8x128xf32>
    tpu.vector_store %arg6[%c14_476, %c0_477, %c0_478], %1331 {strides = array<i32>} : memref<16x8x128xf32, #tpu.memory_space<vmem>>, vector<1x8x128xf32>,
    %c15 = arith.constant 15 : index
    %c0_479 = arith.constant 0 : index
    %c0_480 = arith.constant 0 : index
    %1332 = vector.load %arg1[%c15, %c0_479, %c0_480] : memref<16x8x512xf32, #tpu.memory_space<vmem>>, vector<1x8x512xf32>
    %1333 = vector.shape_cast %1332 : vector<1x8x512xf32> to vector<8x512xf32>
    %1334 = arith.truncf %1279 : vector<8x128xf32> to vector<8x128xbf16>
    %cst_481 = arith.constant dense<0.000000e+00> : vector<8x512xf32>
    %1335 = tpu.matmul %1334, %3, %cst_481 {dimension_numbers = #tpu.dot_dimension_numbers<[1], [0], [0], [1], [0, 0, 1, 1], [], []>} : vector<8x128xbf16>, vector<128x512xbf16>, vector<8x512xf32> -> vector<8x512xf32>
    %1336 = arith.addf %1333, %1335 : vector<8x512xf32>
    %1337 = vector.extract_strided_slice %1336 {offsets = [0, 0], sizes = [8, 128], strides = [1, 1]} : vector<8x512xf32> to vector<8x128xf32>
    %1338 = vector.extract_strided_slice %1336 {offsets = [0, 128], sizes = [8, 128], strides = [1, 1]} : vector<8x512xf32> to vector<8x128xf32>
    %1339 = vector.extract_strided_slice %1336 {offsets = [0, 256], sizes = [8, 128], strides = [1, 1]} : vector<8x512xf32> to vector<8x128xf32>
    %1340 = vector.extract_strided_slice %1336 {offsets = [0, 384], sizes = [8, 128], strides = [1, 1]} : vector<8x512xf32> to vector<8x128xf32>
    %cst_482 = arith.constant 5.000000e-01 : f32
    %1341 = vector.broadcast %cst_482 : f32 to vector<8x128xf32>
    %1342 = arith.mulf %1341, %1337 : vector<8x128xf32>
    %1343 = math.tanh %1342 : vector<8x128xf32>
    %cst_483 = arith.constant 5.000000e-01 : f32
    %1344 = vector.broadcast %cst_483 : f32 to vector<8x128xf32>
    %1345 = arith.mulf %1344, %1343 : vector<8x128xf32>
    %cst_484 = arith.constant 5.000000e-01 : f32
    %1346 = vector.broadcast %cst_484 : f32 to vector<8x128xf32>
    %1347 = arith.addf %1345, %1346 : vector<8x128xf32>
    %1348 = math.tanh %1339 : vector<8x128xf32>
    %1349 = arith.mulf %1347, %1348 : vector<8x128xf32>
    %cst_485 = arith.constant 5.000000e-01 : f32
    %1350 = vector.broadcast %cst_485 : f32 to vector<8x128xf32>
    %1351 = arith.mulf %1350, %1338 : vector<8x128xf32>
    %1352 = math.tanh %1351 : vector<8x128xf32>
    %cst_486 = arith.constant 5.000000e-01 : f32
    %1353 = vector.broadcast %cst_486 : f32 to vector<8x128xf32>
    %1354 = arith.mulf %1353, %1352 : vector<8x128xf32>
    %cst_487 = arith.constant 5.000000e-01 : f32
    %1355 = vector.broadcast %cst_487 : f32 to vector<8x128xf32>
    %1356 = arith.addf %1354, %1355 : vector<8x128xf32>
    %1357 = arith.mulf %1356, %1270 : vector<8x128xf32>
    %1358 = arith.addf %1349, %1357 : vector<8x128xf32>
    %cst_488 = arith.constant 5.000000e-01 : f32
    %1359 = vector.broadcast %cst_488 : f32 to vector<8x128xf32>
    %1360 = arith.mulf %1359, %1340 : vector<8x128xf32>
    %1361 = math.tanh %1360 : vector<8x128xf32>
    %cst_489 = arith.constant 5.000000e-01 : f32
    %1362 = vector.broadcast %cst_489 : f32 to vector<8x128xf32>
    %1363 = arith.mulf %1362, %1361 : vector<8x128xf32>
    %cst_490 = arith.constant 5.000000e-01 : f32
    %1364 = vector.broadcast %cst_490 : f32 to vector<8x128xf32>
    %1365 = arith.addf %1363, %1364 : vector<8x128xf32>
    %1366 = math.tanh %1358 : vector<8x128xf32>
    %1367 = arith.mulf %1365, %1366 : vector<8x128xf32>
    %1368 = arith.truncf %1367 : vector<8x128xf32> to vector<8x128xbf16>
    %1369 = arith.truncf %1325 : vector<8x128xf32> to vector<8x128xbf16>
    %1370 = tpu.concatenate %1368, %1369 in 1 : vector<8x128xbf16>, vector<8x128xbf16> -> vector<8x256xbf16>
    %cst_491 = arith.constant dense<0.000000e+00> : vector<8x640xf32>
    %1371 = tpu.matmul %1370, %4, %cst_491 {dimension_numbers = #tpu.dot_dimension_numbers<[1], [0], [0], [1], [0, 0, 1, 1], [], []>} : vector<8x256xbf16>, vector<256x640xbf16>, vector<8x640xf32> -> vector<8x640xf32>
    %1372 = arith.addf %1371, %7 : vector<8x640xf32>
    %1373 = vector.extract_strided_slice %1372 {offsets = [0, 0], sizes = [8, 128], strides = [1, 1]} : vector<8x640xf32> to vector<8x128xf32>
    %1374 = vector.extract_strided_slice %1372 {offsets = [0, 128], sizes = [8, 128], strides = [1, 1]} : vector<8x640xf32> to vector<8x128xf32>
    %1375 = vector.extract_strided_slice %1372 {offsets = [0, 256], sizes = [8, 128], strides = [1, 1]} : vector<8x640xf32> to vector<8x128xf32>
    %1376 = vector.extract_strided_slice %1372 {offsets = [0, 384], sizes = [8, 128], strides = [1, 1]} : vector<8x640xf32> to vector<8x128xf32>
    %1377 = vector.extract_strided_slice %1372 {offsets = [0, 512], sizes = [8, 128], strides = [1, 1]} : vector<8x640xf32> to vector<8x128xf32>
    %cst_492 = arith.constant 5.000000e-01 : f32
    %1378 = vector.broadcast %cst_492 : f32 to vector<8x128xf32>
    %1379 = arith.mulf %1378, %1374 : vector<8x128xf32>
    %1380 = math.tanh %1379 : vector<8x128xf32>
    %cst_493 = arith.constant 5.000000e-01 : f32
    %1381 = vector.broadcast %cst_493 : f32 to vector<8x128xf32>
    %1382 = arith.mulf %1381, %1380 : vector<8x128xf32>
    %cst_494 = arith.constant 5.000000e-01 : f32
    %1383 = vector.broadcast %cst_494 : f32 to vector<8x128xf32>
    %1384 = arith.addf %1382, %1383 : vector<8x128xf32>
    %1385 = arith.mulf %1316, %1384 : vector<8x128xf32>
    %cst_495 = arith.constant 5.000000e-01 : f32
    %1386 = vector.broadcast %cst_495 : f32 to vector<8x128xf32>
    %1387 = arith.mulf %1386, %1375 : vector<8x128xf32>
    %1388 = math.tanh %1387 : vector<8x128xf32>
    %cst_496 = arith.constant 5.000000e-01 : f32
    %1389 = vector.broadcast %cst_496 : f32 to vector<8x128xf32>
    %1390 = arith.mulf %1389, %1388 : vector<8x128xf32>
    %cst_497 = arith.constant 5.000000e-01 : f32
    %1391 = vector.broadcast %cst_497 : f32 to vector<8x128xf32>
    %1392 = arith.addf %1390, %1391 : vector<8x128xf32>
    %1393 = arith.mulf %1358, %1392 : vector<8x128xf32>
    %1394 = arith.addf %1385, %1393 : vector<8x128xf32>
    %1395 = math.tanh %1376 : vector<8x128xf32>
    %cst_498 = arith.constant 5.000000e-01 : f32
    %1396 = vector.broadcast %cst_498 : f32 to vector<8x128xf32>
    %1397 = arith.mulf %1396, %1373 : vector<8x128xf32>
    %1398 = math.tanh %1397 : vector<8x128xf32>
    %cst_499 = arith.constant 5.000000e-01 : f32
    %1399 = vector.broadcast %cst_499 : f32 to vector<8x128xf32>
    %1400 = arith.mulf %1399, %1398 : vector<8x128xf32>
    %cst_500 = arith.constant 5.000000e-01 : f32
    %1401 = vector.broadcast %cst_500 : f32 to vector<8x128xf32>
    %1402 = arith.addf %1400, %1401 : vector<8x128xf32>
    %1403 = arith.mulf %1395, %1402 : vector<8x128xf32>
    %1404 = arith.addf %1394, %1403 : vector<8x128xf32>
    %cst_501 = arith.constant 5.000000e-01 : f32
    %1405 = vector.broadcast %cst_501 : f32 to vector<8x128xf32>
    %1406 = arith.mulf %1405, %1377 : vector<8x128xf32>
    %1407 = math.tanh %1406 : vector<8x128xf32>
    %cst_502 = arith.constant 5.000000e-01 : f32
    %1408 = vector.broadcast %cst_502 : f32 to vector<8x128xf32>
    %1409 = arith.mulf %1408, %1407 : vector<8x128xf32>
    %cst_503 = arith.constant 5.000000e-01 : f32
    %1410 = vector.broadcast %cst_503 : f32 to vector<8x128xf32>
    %1411 = arith.addf %1409, %1410 : vector<8x128xf32>
    %1412 = math.tanh %1404 : vector<8x128xf32>
    %1413 = arith.mulf %1411, %1412 : vector<8x128xf32>
    %c15_504 = arith.constant 15 : index
    %c0_505 = arith.constant 0 : index
    %c0_506 = arith.constant 0 : index
    %1414 = vector.load %arg5[%c15_504, %c0_505, %c0_506] : memref<16x8x128xf32, #tpu.memory_space<vmem>>, vector<1x8x128xf32>
    %1415 = vector.shape_cast %1414 : vector<1x8x128xf32> to vector<8x128xf32>
    %1416 = vector.shape_cast %1413 : vector<8x128xf32> to vector<1x8x128xf32>
    tpu.vector_store %arg5[%c15_504, %c0_505, %c0_506], %1416 {strides = array<i32>} : memref<16x8x128xf32, #tpu.memory_space<vmem>>, vector<1x8x128xf32>,
    %c15_507 = arith.constant 15 : index
    %c0_508 = arith.constant 0 : index
    %c0_509 = arith.constant 0 : index
    %1417 = vector.load %arg6[%c15_507, %c0_508, %c0_509] : memref<16x8x128xf32, #tpu.memory_space<vmem>>, vector<1x8x128xf32>
    %1418 = vector.shape_cast %1417 : vector<1x8x128xf32> to vector<8x128xf32>
    %1419 = vector.shape_cast %1404 : vector<8x128xf32> to vector<1x8x128xf32>
    tpu.vector_store %arg6[%c15_507, %c0_508, %c0_509], %1419 {strides = array<i32>} : memref<16x8x128xf32, #tpu.memory_space<vmem>>, vector<1x8x128xf32>,
    %c0_510 = arith.constant 0 : index
    %c0_511 = arith.constant 0 : index
    %1420 = vector.load %arg9[%c0_510, %c0_511] : memref<8x128xf32, #tpu.memory_space<vmem>>, vector<8x128xf32>
    tpu.vector_store %arg9[%c0_510, %c0_511], %1367 {strides = array<i32>} : memref<8x128xf32, #tpu.memory_space<vmem>>, vector<8x128xf32>,
    %c0_512 = arith.constant 0 : index
    %c0_513 = arith.constant 0 : index
    %1421 = vector.load %arg10[%c0_512, %c0_513] : memref<8x128xf32, #tpu.memory_space<vmem>>, vector<8x128xf32>
    tpu.vector_store %arg10[%c0_512, %c0_513], %1358 {strides = array<i32>} : memref<8x128xf32, #tpu.memory_space<vmem>>, vector<8x128xf32>,
    %c0_514 = arith.constant 0 : index
    %c0_515 = arith.constant 0 : index
    %1422 = vector.load %arg11[%c0_514, %c0_515] : memref<8x128xf32, #tpu.memory_space<vmem>>, vector<8x128xf32>
    tpu.vector_store %arg11[%c0_514, %c0_515], %1413 {strides = array<i32>} : memref<8x128xf32, #tpu.memory_space<vmem>>, vector<8x128xf32>,
    %c0_516 = arith.constant 0 : index
    %c0_517 = arith.constant 0 : index
    %1423 = vector.load %arg12[%c0_516, %c0_517] : memref<8x128xf32, #tpu.memory_space<vmem>>, vector<8x128xf32>
    tpu.vector_store %arg12[%c0_516, %c0_517], %1404 {strides = array<i32>} : memref<8x128xf32, #tpu.memory_space<vmem>>, vector<8x128xf32>,
    %c0_518 = arith.constant 0 : index
    %c0_519 = arith.constant 0 : index
    %1424 = vector.load %arg7[%c0_518, %c0_519] : memref<8x128xf32, #tpu.memory_space<vmem>>, vector<8x128xf32>
    tpu.vector_store %arg7[%c0_518, %c0_519], %1367 {strides = array<i32>} : memref<8x128xf32, #tpu.memory_space<vmem>>, vector<8x128xf32>,
    %c0_520 = arith.constant 0 : index
    %c0_521 = arith.constant 0 : index
    %1425 = vector.load %arg8[%c0_520, %c0_521] : memref<8x128xf32, #tpu.memory_space<vmem>>, vector<8x128xf32>
    tpu.vector_store %arg8[%c0_520, %c0_521], %1358 {strides = array<i32>} : memref<8x128xf32, #tpu.memory_space<vmem>>, vector<8x128xf32>,
    return
  }
  func.func @transform_0(%arg0: i32) -> (i32, i32, i32) {
    %c0_i32 = arith.constant 0 : i32
    %c0_i32_0 = arith.constant 0 : i32
    %c0_i32_1 = arith.constant 0 : i32
    return %arg0, %c0_i32, %c0_i32_0 : i32, i32, i32
  }
  func.func @transform_1(%arg0: i32) -> (i32, i32) {
    %c0_i32 = arith.constant 0 : i32
    %c0_i32_0 = arith.constant 0 : i32
    %c0_i32_1 = arith.constant 0 : i32
    return %c0_i32, %c0_i32_0 : i32, i32
  }
  func.func @transform_2(%arg0: i32) -> (i32, i32) {
    %c0_i32 = arith.constant 0 : i32
    %c0_i32_0 = arith.constant 0 : i32
    %c0_i32_1 = arith.constant 0 : i32
    return %c0_i32, %c0_i32_0 : i32, i32
  }
  func.func @transform_3(%arg0: i32) -> (i32, i32) {
    %c0_i32 = arith.constant 0 : i32
    %c0_i32_0 = arith.constant 0 : i32
    %c0_i32_1 = arith.constant 0 : i32
    return %c0_i32, %c0_i32_0 : i32, i32
  }
  func.func @transform_4(%arg0: i32) -> (i32, i32, i32) {
    %c0_i32 = arith.constant 0 : i32
    %c0_i32_0 = arith.constant 0 : i32
    %c0_i32_1 = arith.constant 0 : i32
    return %arg0, %c0_i32, %c0_i32_0 : i32, i32, i32
  }
  func.func @transform_5(%arg0: i32) -> (i32, i32, i32) {
    %c0_i32 = arith.constant 0 : i32
    %c0_i32_0 = arith.constant 0 : i32
    %c0_i32_1 = arith.constant 0 : i32
    return %arg0, %c0_i32, %c0_i32_0 : i32, i32, i32
  }
  func.func @transform_6(%arg0: i32) -> (i32, i32) {
    %c0_i32 = arith.constant 0 : i32
    %c0_i32_0 = arith.constant 0 : i32
    %c0_i32_1 = arith.constant 0 : i32
    return %c0_i32, %c0_i32_0 : i32, i32
  }
  func.func @transform_7(%arg0: i32) -> (i32, i32) {
    %c0_i32 = arith.constant 0 : i32
    %c0_i32_0 = arith.constant 0 : i32
    %c0_i32_1 = arith.constant 0 : i32
    return %c0_i32, %c0_i32_0 : i32, i32
  }
}

</mosaic_0001>

<bundles_post_ra>
// kernel: stacked_ca_lstm.1
= control target key start
LH: loop header
LB: loop body
LE: loop exit
PB: predicated region body
PF: predicated region fallthrough
CT: control target
= control target key end

     0   :  { %13 = vsyncpa [#allocation7], 0  ;;  %s9138_s0 = inlined_call_operand.vmem [shape: f32[16,8,512], index: 0, kind: input, shape index: {}]   ;;  %s9139_s1 = inlined_call_operand.vmem [shape: bf16[128,512], index: 1, kind: input, shape index: {}]   ;;  %s9140_s2 = inlined_call_operand.vmem [shape: bf16[256,640], index: 2, kind: input, shape index: {}]   ;;  %s9141_s3 = inlined_call_operand.vmem [shape: f32[1,640], index: 3, kind: input, shape index: {}]   ;;  %s9142_s4 = inlined_call_operand.vmem [shape: f32[16,8,128], index: 4, kind: output, shape index: {0}]   ;;  %s9143_s5 = inlined_call_operand.vmem [shape: f32[16,8,128], index: 5, kind: output, shape index: {1}]   ;;  %s9144_s6 = inlined_call_operand.hbm [shape: f32[8,128], index: 6, kind: output, shape index: {2}]   ;;  %s9145_s7 = inlined_call_operand.hbm [shape: f32[8,128], index: 7, kind: output, shape index: {3}]  }
   0x1   :  { %v4733_v0 = vld [vmem:[%s9139_s1 + $0xe0] sm:$0xf]  ;;  %v5187_v1 = vld [vmem:[%s9139_s1 + $0xec] sm:$0xf0]  ;;  %v5185_v2 = vld [vmem:[%s9139_s1 + $0xe4] sm:$0xf] }
   0x2   :  { %v5728_v3 = vor.u32 %v5187_v1, %v4733_v0  ;;  %v4735_v4 = vld [vmem:[%s9139_s1 + $0xf0] sm:$0xf0]  ;;  %v4741_v5 = vld [vmem:[%s9139_s1 + $0xe8] sm:$0xf]  ;;  %v5188_v6 = vld [vmem:[%s9139_s1 + $0xf4] sm:$0xf0] }
   0x3   :  { %v5739_v7 = vor.u32 %v5185_v2, %v4735_v4  ;;  %v5741_v8 = vor.u32 %v5188_v6, %v4741_v5  ;;  %v5186_v9 = vld [vmem:[%s9139_s1 + $0xec] sm:$0xf]  ;;  %v4743_v10 = vld [vmem:[%s9139_s1 + $0xf8] sm:$0xf0]  ;;  %v4717_v11 = vld [vmem:[%s9139_s1 + $0xc0] sm:$0xf] }
   0x4   :  { %340 = vmatpush.bf16.msra.mxu0 %v5728_v3  ;;  %v5753_v12 = vor.u32 %v5186_v9, %v4743_v10  ;;  %v5183_v13 = vld [vmem:[%s9139_s1 + $0xcc] sm:$0xf0]  ;;  %v5181_v14 = vld [vmem:[%s9139_s1 + $0xc4] sm:$0xf]  ;;  %v4719_v15 = vld [vmem:[%s9139_s1 + $0xd0] sm:$0xf0] }
   0x5   :  { %9382 = vst [vmem:[#allocation12_spill] sm:$0xff] %v5741_v8  ;;  %353 = vmatpush.bf16.msra.mxu1 %v5739_v7  ;;  %366 = vmatpush.bf16.msra.mxu2 %v5741_v8  ;;  %v5766_v16 = vor.u32 %v5183_v13, %v4717_v11  ;;  %v5768_v17 = vor.u32 %v5181_v14, %v4719_v15  ;;  %v4725_v18 = vld [vmem:[%s9139_s1 + $0xc8] sm:$0xf]  ;;  %v5184_v19 = vld [vmem:[%s9139_s1 + $0xd4] sm:$0xf0] }
   0x6   :  { %9383 = vst [vmem:[#allocation13_spill] sm:$0xff] %v5753_v12  ;;  %v5182_v20 = vld [vmem:[%s9139_s1 + $0xcc] sm:$0xf]  ;;  %379 = vmatpush.bf16.msra.mxu3 %v5753_v12  ;;  %v5780_v21 = vor.u32 %v5184_v19, %v4725_v18  ;;  %v4727_v22 = vld [vmem:[%s9139_s1 + $0xd8] sm:$0xf0] }
   0x7   :  { %v4701_v23 = vld [vmem:[%s9139_s1 + $0xa0] sm:$0xf]  ;;  %v5179_v24 = vld [vmem:[%s9139_s1 + $0xac] sm:$0xf0]  ;;  %v5791_v25 = vor.u32 %v5182_v20, %v4727_v22  ;;  %v5177_v26 = vld [vmem:[%s9139_s1 + $0xa4] sm:$0xf] }
   0x8   :  { %9384 = vst [vmem:[#allocation14_spill] sm:$0xff] %v5780_v21  ;;  %v4703_v27 = vld [vmem:[%s9139_s1 + $0xb0] sm:$0xf0]  ;;  %v4709_v28 = vld [vmem:[%s9139_s1 + $0xa8] sm:$0xf]  ;;  %341 = vmatpush.bf16.msra.mxu0 %v5766_v16  ;;  %v5803_v29 = vor.u32 %v5179_v24, %v4701_v23 }
   0x9   :  { %9385 = vst [vmem:[#allocation15_spill] sm:$0xff] %v5791_v25  ;;  %v5180_v30 = vld [vmem:[%s9139_s1 + $0xb4] sm:$0xf0]  ;;  %v5178_v31 = vld [vmem:[%s9139_s1 + $0xac] sm:$0xf]  ;;  %354 = vmatpush.bf16.msra.mxu1 %v5768_v17  ;;  %367 = vmatpush.bf16.msra.mxu2 %v5780_v21  ;;  %v5816_v33 = vor.u32 %v5177_v26, %v4703_v27 }
   0xa   :  { %9386 = vst [vmem:[#allocation16_spill] sm:$0xff] %v5803_v29  ;;  %v4711_v32 = vld [vmem:[%s9139_s1 + $0xb8] sm:$0xf0]  ;;  %v5818_v34 = vor.u32 %v5180_v30, %v4709_v28  ;;  %v4685_v35 = vld [vmem:[%s9139_s1 + $0x80] sm:$0xf]  ;;  %380 = vmatpush.bf16.msra.mxu3 %v5791_v25 }
   0xb   :  { %9387 = vst [vmem:[#allocation17_spill] sm:$0xff] %v5816_v33  ;;  %v5175_v36 = vld [vmem:[%s9139_s1 + $0x8c] sm:$0xf0]  ;;  %v5173_v37 = vld [vmem:[%s9139_s1 + $0x84] sm:$0xf]  ;;  %v5830_v38 = vor.u32 %v5178_v31, %v4711_v32 }
   0xc   :  { %9388 = vst [vmem:[#allocation18_spill] sm:$0xff] %v5818_v34  ;;  %v4687_v39 = vld [vmem:[%s9139_s1 + $0x90] sm:$0xf0]  ;;  %v4693_v40 = vld [vmem:[%s9139_s1 + $0x88] sm:$0xf]  ;;  %342 = vmatpush.bf16.msra.mxu0 %v5803_v29  ;;  %v5848_v44 = vor.u32 %v5175_v36, %v4685_v35 }
   0xd   :  { %9389 = vst [vmem:[#allocation19_spill] sm:$0xff] %v5830_v38  ;;  %v5176_v41 = vld [vmem:[%s9139_s1 + $0x94] sm:$0xf0]  ;;  %v5174_v42 = vld [vmem:[%s9139_s1 + $0x8c] sm:$0xf]  ;;  %355 = vmatpush.bf16.msra.mxu1 %v5816_v33  ;;  %368 = vmatpush.bf16.msra.mxu2 %v5818_v34  ;;  %v5852_v45 = vor.u32 %v5173_v37, %v4687_v39 }
   0xe   :  { %v4695_v43 = vld [vmem:[%s9139_s1 + $0x98] sm:$0xf0]  ;;  %9390 = vst [vmem:[#allocation20_spill] sm:$0xff] %v5848_v44  ;;  %v5854_v46 = vor.u32 %v5176_v41, %v4693_v40  ;;  %v4669_v47 = vld [vmem:[%s9139_s1 + $0x60] sm:$0xf]  ;;  %381 = vmatpush.bf16.msra.mxu3 %v5830_v38 }
   0xf   :  { %9391 = vst [vmem:[#allocation21_spill] sm:$0xff] %v5852_v45  ;;  %v5171_v48 = vld [vmem:[%s9139_s1 + $0x6c] sm:$0xf0]  ;;  %v5169_v49 = vld [vmem:[%s9139_s1 + $0x64] sm:$0xf]  ;;  %v5866_v50 = vor.u32 %v5174_v42, %v4695_v43 }
  0x10   :  { %9392 = vst [vmem:[#allocation22_spill] sm:$0xff] %v5854_v46  ;;  %v4671_v51 = vld [vmem:[%s9139_s1 + $0x70] sm:$0xf0]  ;;  %v4677_v52 = vld [vmem:[%s9139_s1 + $0x68] sm:$0xf]  ;;  %343 = vmatpush.bf16.msra.mxu0 %v5848_v44  ;;  %v5884_v56 = vor.u32 %v5171_v48, %v4669_v47 }
  0x11   :  { %9393 = vst [vmem:[#allocation23_spill] sm:$0xff] %v5866_v50  ;;  %v5172_v53 = vld [vmem:[%s9139_s1 + $0x74] sm:$0xf0]  ;;  %v5170_v54 = vld [vmem:[%s9139_s1 + $0x6c] sm:$0xf]  ;;  %356 = vmatpush.bf16.msra.mxu1 %v5852_v45  ;;  %369 = vmatpush.bf16.msra.mxu2 %v5854_v46  ;;  %v5888_v57 = vor.u32 %v5169_v49, %v4671_v51 }
  0x12   :  { %v4679_v55 = vld [vmem:[%s9139_s1 + $0x78] sm:$0xf0]  ;;  %9394 = vst [vmem:[#allocation24_spill] sm:$0xff] %v5884_v56  ;;  %v5890_v58 = vor.u32 %v5172_v53, %v4677_v52  ;;  %v4653_v59 = vld [vmem:[%s9139_s1 + $0x40] sm:$0xf]  ;;  %382 = vmatpush.bf16.msra.mxu3 %v5866_v50 }
  0x13   :  { %9395 = vst [vmem:[#allocation25_spill] sm:$0xff] %v5888_v57  ;;  %v5167_v60 = vld [vmem:[%s9139_s1 + $0x4c] sm:$0xf0]  ;;  %v5165_v61 = vld [vmem:[%s9139_s1 + $0x44] sm:$0xf]  ;;  %v5902_v62 = vor.u32 %v5170_v54, %v4679_v55 }
  0x14   :  { %9396 = vst [vmem:[#allocation26_spill] sm:$0xff] %v5890_v58  ;;  %v4655_v63 = vld [vmem:[%s9139_s1 + $0x50] sm:$0xf0]  ;;  %v4661_v0 = vld [vmem:[%s9139_s1 + $0x48] sm:$0xf]  ;;  %344 = vmatpush.bf16.msra.mxu0 %v5884_v56  ;;  %v5920_v5 = vor.u32 %v5167_v60, %v4653_v59 }
  0x15   :  { %9397 = vst [vmem:[#allocation27_spill] sm:$0xff] %v5902_v62  ;;  %v5168_v1 = vld [vmem:[%s9139_s1 + $0x54] sm:$0xf0]  ;;  %v5166_v2 = vld [vmem:[%s9139_s1 + $0x4c] sm:$0xf]  ;;  %357 = vmatpush.bf16.msra.mxu1 %v5888_v57  ;;  %370 = vmatpush.bf16.msra.mxu2 %v5890_v58  ;;  %v5924_v6 = vor.u32 %v5165_v61, %v4655_v63 }
  0x16   :  { %v4663_v4 = vld [vmem:[%s9139_s1 + $0x58] sm:$0xf0]  ;;  %9398 = vst [vmem:[#allocation28_spill] sm:$0xff] %v5920_v5  ;;  %v5926_v9 = vor.u32 %v5168_v1, %v4661_v0  ;;  %v4637_v10 = vld [vmem:[%s9139_s1 + $0x20] sm:$0xf]  ;;  %383 = vmatpush.bf16.msra.mxu3 %v5902_v62 }
  0x17   :  { %9399 = vst [vmem:[#allocation29_spill] sm:$0xff] %v5924_v6  ;;  %v5163_v11 = vld [vmem:[%s9139_s1 + $0x2c] sm:$0xf0]  ;;  %v5161_v13 = vld [vmem:[%s9139_s1 + $0x24] sm:$0xf]  ;;  %v5938_v14 = vor.u32 %v5166_v2, %v4663_v4 }
  0x18   :  { %9400 = vst [vmem:[#allocation30_spill] sm:$0xff] %v5926_v9  ;;  %v4639_v15 = vld [vmem:[%s9139_s1 + $0x30] sm:$0xf0]  ;;  %v4645_v18 = vld [vmem:[%s9139_s1 + $0x28] sm:$0xf]  ;;  %345 = vmatpush.bf16.msra.mxu0 %v5920_v5  ;;  %v5956_v23 = vor.u32 %v5163_v11, %v4637_v10 }
  0x19   :  { %9401 = vst [vmem:[#allocation31_spill] sm:$0xff] %v5938_v14  ;;  %v5164_v19 = vld [vmem:[%s9139_s1 + $0x34] sm:$0xf0]  ;;  %v5162_v20 = vld [vmem:[%s9139_s1 + $0x2c] sm:$0xf]  ;;  %358 = vmatpush.bf16.msra.mxu1 %v5924_v6  ;;  %371 = vmatpush.bf16.msra.mxu2 %v5926_v9  ;;  %v5963_v26 = vor.u32 %v5161_v13, %v4639_v15 }
  0x1a   :  { %v4647_v22 = vld [vmem:[%s9139_s1 + $0x38] sm:$0xf0]  ;;  %9402 = vst [vmem:[#allocation32_spill] sm:$0xff] %v5956_v23  ;;  %v4621_v24 = vld [vmem:[%s9139_s1] sm:$0xf]  ;;  %v5965_v27 = vor.u32 %v5164_v19, %v4645_v18  ;;  %384 = vmatpush.bf16.msra.mxu3 %v5938_v14 }
  0x1b   :  { %9403 = vst [vmem:[#allocation33_spill] sm:$0xff] %v5963_v26  ;;  %v5159_v28 = vld [vmem:[%s9139_s1 + $0xc] sm:$0xf0]  ;;  %v5157_v30 = vld [vmem:[%s9139_s1 + $0x4] sm:$0xf]  ;;  %v5977_v32 = vor.u32 %v5162_v20, %v4647_v22 }
  0x1c   :  { %9404 = vst [vmem:[#allocation34_spill] sm:$0xff] %v5965_v27  ;;  %v4623_v31 = vld [vmem:[%s9139_s1 + $0x10] sm:$0xf0]  ;;  %v4629_v35 = vld [vmem:[%s9139_s1 + $0x8] sm:$0xf]  ;;  %346 = vmatpush.bf16.msra.mxu0 %v5956_v23  ;;  %v5998_v42 = vor.u32 %v5159_v28, %v4621_v24 }
  0x1d   :  { %9405 = vst [vmem:[#allocation35_spill] sm:$0xff] %v5977_v32  ;;  %v5160_v36 = vld [vmem:[%s9139_s1 + $0x14] sm:$0xf0]  ;;  %v5158_v37 = vld [vmem:[%s9139_s1 + $0xc] sm:$0xf] }
  0x1e   :  { %v4631_v39 = vld [vmem:[%s9139_s1 + $0x18] sm:$0xf0]  ;;  %v5049_v40 = vld [vmem:[%s9140_s2 + $0x258] sm:$0xf]  ;;  %v5266_v41 = vld [vmem:[%s9140_s2 + $0x268] sm:$0xf0] }
  0x1f   :  { %9406 = vst [vmem:[#allocation36_spill] sm:$0xff] %v5998_v42 }
  0x20   :  { %14 = vsyncpa [#allocation9], 0  ;;  %359 = vmatpush.bf16.msra.mxu1 %v5963_v26  ;;  %372 = vmatpush.bf16.msra.mxu2 %v5965_v27  ;;  %v6002_v43 = vor.u32 %v5157_v30, %v4623_v31  ;;  %v6004_v47 = vor.u32 %v5160_v36, %v4629_v35  ;;  %v6007_v48 = vor.u32 %v5158_v37, %v4631_v39  ;;  %v5264_v51 = vld [vmem:[%s9140_s2 + $0x25c] sm:$0xf]  ;;  %v5051_v52 = vld [vmem:[%s9140_s2 + $0x26c] sm:$0xf0] }
  0x21   :  { %385 = vmatpush.bf16.msra.mxu3 %v5977_v32  ;;  %v6009_v49 = vor.u32 %v5266_v41, %v5049_v40  ;;  %v5029_v53 = vld [vmem:[%s9140_s2 + $0x230] sm:$0xf]  ;;  %v5261_v54 = vld [vmem:[%s9140_s2 + $0x240] sm:$0xf0]  ;;  %v6023_v55 = vor.u32 %v5264_v51, %v5051_v52  ;;  %347 = vmatpush.bf16.msra.mxu0 %v5998_v42  ;;  %v5259_v59 = vld [vmem:[%s9140_s2 + $0x234] sm:$0xf] }
  0x22   :  { %9407 = vst [vmem:[#allocation37_spill] sm:$0xff] %v6002_v43  ;;  %v5031_v60 = vld [vmem:[%s9140_s2 + $0x244] sm:$0xf0]  ;;  %v6036_v61 = vor.u32 %v5261_v54, %v5029_v53  ;;  %v9150_v63 = vmov 0.0|0.0   ;;  %v5256_v1 = vld [vmem:[%s9140_s2 + $0x218] sm:$0xf0] }
  0x23   :  { %9408 = vst [vmem:[#allocation38_spill] sm:$0xff] %v6004_v47  ;;  %v5009_v0 = vld [vmem:[%s9140_s2 + $0x208] sm:$0xf]  ;;  %v6046_v2 = vor.u32 %v5259_v59, %v5031_v60  ;;  %v5254_v4 = vld [vmem:[%s9140_s2 + $0x20c] sm:$0xf]  ;;  %s4590_s30 = sshll.u32 %s9144_s6, 4  ;;  %s4591_s30 = int_to_ptr.hbm [resolvable:$true] %s4590_s30 }
  0x24   :  { %9409 = vst [vmem:[#allocation39_spill] sm:$0xff] %v6007_v48  ;;  %360 = vmatpush.bf16.msra.mxu1 %v6002_v43  ;;  %373 = vmatpush.bf16.msra.mxu2 %v6004_v47  ;;  %v5011_v10 = vld [vmem:[%s9140_s2 + $0x21c] sm:$0xf0]  ;;  %v6058_v11 = vor.u32 %v5256_v1, %v5009_v0  ;;  %v5251_v15 = vld [vmem:[%s9140_s2 + $0x1f0] sm:$0xf0]  ;;  %s5678_s8 = smov [#allocation8]  }
  0x25   :  { %9410 = vst [vmem:[#allocation40_spill] sm:$0xff] %v6009_v49  ;;  %386 = vmatpush.bf16.msra.mxu3 %v6007_v48  ;;  %348 = vmatmul.bf16.vlgmr.msra.gmra.mxu0 %v9150_v63  ;;  %v4989_v13 = vld [vmem:[%s9140_s2 + $0x1e0] sm:$0xf]  ;;  %v6067_v18 = vor.u32 %v5254_v4, %v5011_v10  ;;  %v5249_v19 = vld [vmem:[%s9140_s2 + $0x1e4] sm:$0xf]  ;;  %s4599_s9 = sshll.u32 %s5678_s8, 4  ;;  %s4600_s9 = int_to_ptr.vmem [resolvable:$true] %s4599_s9 }
  0x26   :  { %9411 = vst [vmem:[#allocation41_spill] sm:$0xff] %v6023_v55  ;;  %v4991_v20 = vld [vmem:[%s9140_s2 + $0x1f4] sm:$0xf0]  ;;  %v6076_v22 = vor.u32 %v5251_v15, %v4989_v13  ;;  %v5246_v28 = vld [vmem:[%s9140_s2 + $0x1c8] sm:$0xf0]  ;;  %s4601_s12 = sshll.u32 %s9145_s7, 4  ;;  %s4602_s12 = int_to_ptr.hbm [resolvable:$true] %s4601_s12 }
  0x27   :  { %9412 = vst [vmem:[#allocation42_spill] sm:$0xff] %v6036_v61  ;;  %361 = vmatmul.bf16.vlgmr.msra.gmra.mxu1 %v9150_v63  ;;  %374 = vmatmul.bf16.vlgmr.msra.gmra.mxu2 %v9150_v63  ;;  %v4969_v24 = vld [vmem:[%s9140_s2 + $0x1b8] sm:$0xf]  ;;  %v6085_v30 = vor.u32 %v5249_v19, %v4991_v20  ;;  %v5244_v31 = vld [vmem:[%s9140_s2 + $0x1bc] sm:$0xf] }
  0x28   :  { %845 = vmatpush.bf16.msrb.mxu1 %v6009_v49  ;;  %9413 = vst [vmem:[#allocation43_spill] sm:$0xff] %v6046_v2  ;;  %387 = vmatmul.bf16.vlgmr.msra.gmra.mxu3 %v9150_v63  ;;  %v4971_v35 = vld [vmem:[%s9140_s2 + $0x1cc] sm:$0xf0]  ;;  %v6094_v36 = vor.u32 %v5246_v28, %v4969_v24  ;;  %v5241_v39 = vld [vmem:[%s9140_s2 + $0x1a0] sm:$0xf0] }
  0x29   :  { %871 = vmatpush.bf16.msrb.mxu3 %v6023_v55  ;;  %9414 = vst [vmem:[#allocation44_spill] sm:$0xff] %v6058_v11  ;;  %v4949_v37 = vld [vmem:[%s9140_s2 + $0x190] sm:$0xf]  ;;  %v6103_v40 = vor.u32 %v5244_v31, %v4971_v35  ;;  %v5239_v41 = vld [vmem:[%s9140_s2 + $0x194] sm:$0xf] }
  0x2a   :  { %9415 = vst [vmem:[#allocation45_spill] sm:$0xff] %v6067_v18  ;;  %v4951_v51 = vld [vmem:[%s9140_s2 + $0x1a4] sm:$0xf0]  ;;  %v6112_v52 = vor.u32 %v5241_v39, %v4949_v37  ;;  %v5236_v54 = vld [vmem:[%s9140_s2 + $0x178] sm:$0xf0] }
  0x2b   :  { %9416 = vst [vmem:[#allocation46_spill] sm:$0xff] %v6076_v22  ;;  %v4929_v53 = vld [vmem:[%s9140_s2 + $0x168] sm:$0xf]  ;;  %v6121_v59 = vor.u32 %v5239_v41, %v4951_v51  ;;  %v5234_v60 = vld [vmem:[%s9140_s2 + $0x16c] sm:$0xf] }
  0x2c   :  { %846 = vmatpush.bf16.msrb.mxu1 %v6036_v61  ;;  %9417 = vst [vmem:[#allocation47_spill] sm:$0xff] %v6085_v30  ;;  %v4931_v0 = vld [vmem:[%s9140_s2 + $0x17c] sm:$0xf0]  ;;  %v6130_v1 = vor.u32 %v5236_v54, %v4929_v53  ;;  %v5231_v10 = vld [vmem:[%s9140_s2 + $0x150] sm:$0xf0] }
  0x2d   :  { %872 = vmatpush.bf16.msrb.mxu3 %v6046_v2  ;;  %9418 = vst [vmem:[#allocation48_spill] sm:$0xff] %v6094_v36  ;;  %v4909_v4 = vld [vmem:[%s9140_s2 + $0x140] sm:$0xf]  ;;  %v6142_v15 = vor.u32 %v5234_v60, %v4931_v0  ;;  %v5267_v19 = vld [vmem:[%s9140_s2 + $0x270] sm:$0xf0] }
  0x2e   :  { %9419 = vst [vmem:[#allocation49_spill] sm:$0xff] %v6103_v40  ;;  %v5057_v13 = vld [vmem:[%s9140_s2 + $0x260] sm:$0xf]  ;;  %v5229_v20 = vld [vmem:[%s9140_s2 + $0x144] sm:$0xf]  ;;  %v6154_v28 = vor.u32 %v5231_v10, %v4909_v4 }
  0x2f   :  { %9420 = vst [vmem:[#allocation50_spill] sm:$0xff] %v6112_v52  ;;  %v4911_v24 = vld [vmem:[%s9140_s2 + $0x154] sm:$0xf0]  ;;  %v6156_v31 = vor.u32 %v5267_v19, %v5057_v13  ;;  %v5265_v39 = vld [vmem:[%s9140_s2 + $0x264] sm:$0xf] }
  0x30   :  { %847 = vmatpush.bf16.msrb.mxu1 %v6058_v11  ;;  %9421 = vst [vmem:[#allocation51_spill] sm:$0xff] %v6121_v59  ;;  %v5037_v35 = vld [vmem:[%s9140_s2 + $0x238] sm:$0xf]  ;;  %v6162_v37 = vor.u32 %v5229_v20, %v4911_v24  ;;  %v5262_v51 = vld [vmem:[%s9140_s2 + $0x248] sm:$0xf0] }
  0x31   :  { %873 = vmatpush.bf16.msrb.mxu3 %v6067_v18  ;;  %9422 = vst [vmem:[#allocation52_spill] sm:$0xff] %v6130_v1  ;;  %v5059_v41 = vld [vmem:[%s9140_s2 + $0x274] sm:$0xf0]  ;;  %v5226_v60 = vld [vmem:[%s9140_s2 + $0x128] sm:$0xf0]  ;;  %v6199_v24 = vor.u32 %v5262_v51, %v5037_v35 }
  0x32   :  { %9423 = vst [vmem:[#allocation53_spill] sm:$0xff] %v6142_v15  ;;  %v6173_v53 = vor.u32 %v5265_v39, %v5059_v41  ;;  %v4889_v54 = vld [vmem:[%s9140_s2 + $0x118] sm:$0xf]  ;;  %v5224_v4 = vld [vmem:[%s9140_s2 + $0x11c] sm:$0xf] }
  0x33   :  { %9424 = vst [vmem:[#allocation54_spill] sm:$0xff] %v6154_v28  ;;  %v6181_v0 = vor.u32 %v5226_v60, %v4889_v54  ;;  %v4891_v10 = vld [vmem:[%s9140_s2 + $0x12c] sm:$0xf0]  ;;  %v5260_v13 = vld [vmem:[%s9140_s2 + $0x23c] sm:$0xf] }
  0x34   :  { %848 = vmatpush.bf16.msrb.mxu1 %v6076_v22  ;;  %9425 = vst [vmem:[#allocation55_spill] sm:$0xff] %v6156_v31  ;;  %v6193_v19 = vor.u32 %v5224_v4, %v4891_v10  ;;  %v5039_v20 = vld [vmem:[%s9140_s2 + $0x24c] sm:$0xf0]  ;;  %v5257_v41 = vld [vmem:[%s9140_s2 + $0x220] sm:$0xf0] }
  0x35   :  { %874 = vmatpush.bf16.msrb.mxu3 %v6085_v30  ;;  %9426 = vst [vmem:[#allocation56_spill] sm:$0xff] %v6162_v37  ;;  %v5017_v39 = vld [vmem:[%s9140_s2 + $0x210] sm:$0xf]  ;;  %832 = vmatpush.bf16.msrb.mxu0 %v6181_v0  ;;  %v6210_v54 = vor.u32 %v5260_v13, %v5039_v20  ;;  %v5221_v51 = vld [vmem:[%s9140_s2 + $0x100] sm:$0xf0] }
  0x36   :  { %9427 = vst [vmem:[#allocation57_spill] sm:$0xff] %v6173_v53  ;;  %v4869_v35 = vld [vmem:[%s9140_s2 + $0xf0] sm:$0xf]  ;;  %v5219_v60 = vld [vmem:[%s9140_s2 + $0xf4] sm:$0xf]  ;;  %858 = vmatpush.bf16.msrb.mxu2 %v6193_v19 }
  0x37   :  { %9428 = vst [vmem:[#allocation58_spill] sm:$0xff] %v6181_v0  ;;  %v6223_v4 = vor.u32 %v5221_v51, %v4869_v35  ;;  %v4871_v10 = vld [vmem:[%s9140_s2 + $0x104] sm:$0xf0]  ;;  %v5255_v13 = vld [vmem:[%s9140_s2 + $0x214] sm:$0xf]  ;;  %v6238_v35 = vor.u32 %v5257_v41, %v5017_v39 }
  0x38   :  { %849 = vmatpush.bf16.msrb.mxu1 %v6094_v36  ;;  %9429 = vst [vmem:[#allocation59_spill] sm:$0xff] %v6193_v19  ;;  %v5019_v20 = vld [vmem:[%s9140_s2 + $0x224] sm:$0xf0]  ;;  %v6234_v47 = vor.u32 %v5219_v60, %v4871_v10  ;;  %v5252_v19 = vld [vmem:[%s9140_s2 + $0x1f8] sm:$0xf0] }
  0x39   :  { %875 = vmatpush.bf16.msrb.mxu3 %v6103_v40  ;;  %9430 = vst [vmem:[#allocation60_spill] sm:$0xff] %v6199_v24  ;;  %v4997_v51 = vld [vmem:[%s9140_s2 + $0x1e8] sm:$0xf]  ;;  %833 = vmatpush.bf16.msrb.mxu0 %v6223_v4  ;;  %v6248_v60 = vor.u32 %v5255_v13, %v5019_v20  ;;  %v5216_v39 = vld [vmem:[%s9140_s2 + $0xd8] sm:$0xf0] }
  0x3a   :  { %9431 = vst [vmem:[#allocation61_spill] sm:$0xff] %v6210_v54  ;;  %v4849_v10 = vld [vmem:[%s9140_s2 + $0xc8] sm:$0xf]  ;;  %v5214_v41 = vld [vmem:[%s9140_s2 + $0xcc] sm:$0xf]  ;;  %859 = vmatpush.bf16.msrb.mxu2 %v6234_v47  ;;  %v6274_v58 = vor.u32 %v5252_v19, %v4997_v51 }
  0x3b   :  { %9432 = vst [vmem:[#allocation62_spill] sm:$0xff] %v6223_v4  ;;  %v4851_v13 = vld [vmem:[%s9140_s2 + $0xdc] sm:$0xf0]  ;;  %v5250_v20 = vld [vmem:[%s9140_s2 + $0x1ec] sm:$0xf] }
  0x3c   :  { %850 = vmatpush.bf16.msrb.mxu1 %v6112_v52  ;;  %9433 = vst [vmem:[#allocation63_spill] sm:$0xff] %v6234_v47  ;;  %v4999_v27 = vld [vmem:[%s9140_s2 + $0x1fc] sm:$0xf0]  ;;  %v6271_v9 = vor.u32 %v5214_v41, %v4851_v13  ;;  %v5211_v19 = vld [vmem:[%s9140_s2 + $0xb0] sm:$0xf0] }
  0x3d   :  { %876 = vmatpush.bf16.msrb.mxu3 %v6121_v59  ;;  %9434 = vst [vmem:[#allocation64_spill] sm:$0xff] %v6238_v35  ;;  %v6284_v47 = vor.u32 %v5250_v20, %v4999_v27  ;;  %v4829_v41 = vld [vmem:[%s9140_s2 + $0xa0] sm:$0xf]  ;;  %v5209_v51 = vld [vmem:[%s9140_s2 + $0xa4] sm:$0xf] }
  0x3e   :  { %9435 = vst [vmem:[#allocation65_spill] sm:$0xff] %v6248_v60  ;;  %860 = vmatpush.bf16.msrb.mxu2 %v6271_v9  ;;  %v6296_v13 = vor.u32 %v5211_v19, %v4829_v41  ;;  %v4831_v27 = vld [vmem:[%s9140_s2 + $0xb4] sm:$0xf0]  ;;  %v5245_v20 = vld [vmem:[%s9140_s2 + $0x1c4] sm:$0xf] }
  0x3f   :  { %9437 = vst [vmem:[#allocation67_spill] sm:$0xff] %v6271_v9  ;;  %v4979_v46 = vld [vmem:[%s9140_s2 + $0x1d4] sm:$0xf0]  ;;  %v5242_v19 = vld [vmem:[%s9140_s2 + $0x1a8] sm:$0xf0] }
  0x40   :  { %851 = vmatpush.bf16.msrb.mxu1 %v6130_v1  ;;  %9438 = vst [vmem:[#allocation68_spill] sm:$0xff] %v6274_v58  ;;  %v4957_v41 = vld [vmem:[%s9140_s2 + $0x198] sm:$0xf]  ;;  %v6320_v9 = vor.u32 %v5245_v20, %v4979_v46  ;;  %v4811_v46 = vld [vmem:[%s9140_s2 + $0x8c] sm:$0xf0] }
  0x41   :  { %877 = vmatpush.bf16.msrb.mxu3 %v6142_v15  ;;  %9439 = vst [vmem:[#allocation69_spill] sm:$0xff] %v6284_v47  ;;  %v5240_v20 = vld [vmem:[%s9140_s2 + $0x19c] sm:$0xf]  ;;  %v6346_v21 = vor.u32 %v5242_v19, %v4957_v41  ;;  %v5201_v41 = vld [vmem:[%s9140_s2 + $0x60] sm:$0xf0] }
  0x42   :  { %9440 = vst [vmem:[#allocation70_spill] sm:$0xff] %v6296_v13  ;;  %v5199_v19 = vld [vmem:[%s9140_s2 + $0x54] sm:$0xf]  ;;  %v4917_v0 = vld [vmem:[%s9140_s2 + $0x148] sm:$0xf] }
  0x43   :  { %9443 = vst [vmem:[#allocation73_spill] sm:$0xff] %v6320_v9  ;;  %v5268_v42 = vld [vmem:[%s9140_s2 + $0x278] sm:$0xf0] }
  0x44   :  { %852 = vmatpush.bf16.msrb.mxu1 %v6154_v28  ;;  %9446 = vst [vmem:[#allocation76_spill] sm:$0xff] %v6346_v21 }
  0x45   :  { %878 = vmatpush.bf16.msrb.mxu3 %v6162_v37 }
  0x47   :  { %853 = vmatmul.bf16.vlgmr.msrb.gmra.mxu1 %v9150_v63 }
  0x48   :  { %897 = vmatpush.bf16.msra.mxu1 %v6156_v31  ;;  %879 = vmatmul.bf16.vlgmr.msrb.gmra.mxu3 %v9150_v63  ;;  %v6260_v63 = vor.u32 %v5216_v39, %v4849_v10  ;;  %v4977_v10 = vld [vmem:[%s9140_s2 + $0x1c0] sm:$0xf]  ;;  %v5247_v39 = vld [vmem:[%s9140_s2 + $0x1d0] sm:$0xf0] }
  0x49   :  { %923 = vmatpush.bf16.msra.mxu3 %v6173_v53  ;;  %v6310_v34 = vor.u32 %v5247_v39, %v4977_v10  ;;  %v5206_v10 = vld [vmem:[%s9140_s2 + $0x88] sm:$0xf0]  ;;  %v5204_v39 = vld [vmem:[%s9140_s2 + $0x7c] sm:$0xf] }
  0x4a   :  { %9436 = vst [vmem:[#allocation66_spill] sm:$0xff] %v6260_v63  ;;  %834 = vmatpush.bf16.msrb.mxu0 %v6260_v63  ;;  %v6307_v63 = vor.u32 %v5209_v51, %v4831_v27  ;;  %v4809_v51 = vld [vmem:[%s9140_s2 + $0x78] sm:$0xf]  ;;  %v6343_v4 = vor.u32 %v5204_v39, %v4811_v46  ;;  %v4789_v39 = vld [vmem:[%s9140_s2 + $0x50] sm:$0xf] }
  0x4b   :  { %9442 = vst [vmem:[#allocation72_spill] sm:$0xff] %v6310_v34  ;;  %v6332_v27 = vor.u32 %v5206_v10, %v4809_v51  ;;  %v4937_v51 = vld [vmem:[%s9140_s2 + $0x170] sm:$0xf]  ;;  %v5237_v10 = vld [vmem:[%s9140_s2 + $0x180] sm:$0xf0]  ;;  %v6368_v46 = vor.u32 %v5201_v41, %v4789_v39 }
  0x4c   :  { %898 = vmatpush.bf16.msra.mxu1 %v6199_v24  ;;  %9441 = vst [vmem:[#allocation71_spill] sm:$0xff] %v6307_v63  ;;  %861 = vmatpush.bf16.msrb.mxu2 %v6307_v63  ;;  %v6385_v39 = vor.u32 %v5237_v10, %v4937_v51  ;;  %v5232_v41 = vld [vmem:[%s9140_s2 + $0x158] sm:$0xf0]  ;;  %v4769_v51 = vld [vmem:[%s9140_s2 + $0x28] sm:$0xf] }
  0x4d   :  { %924 = vmatpush.bf16.msra.mxu3 %v6210_v54  ;;  %9444 = vst [vmem:[#allocation74_spill] sm:$0xff] %v6332_v27  ;;  %v5196_v10 = vld [vmem:[%s9140_s2 + $0x38] sm:$0xf0] }
  0x4e   :  { %835 = vmatpush.bf16.msrb.mxu0 %v6296_v13  ;;  %v4959_v13 = vld [vmem:[%s9140_s2 + $0x1ac] sm:$0xf0]  ;;  %9445 = vst [vmem:[#allocation75_spill] sm:$0xff] %v6343_v4  ;;  %v6410_v23 = vor.u32 %v5196_v10, %v4769_v51 }
  0x4f   :  { %v6356_v63 = vor.u32 %v5240_v20, %v4959_v13  ;;  %9448 = vst [vmem:[#allocation78_spill] sm:$0xff] %v6368_v46  ;;  %v4791_v13 = vld [vmem:[%s9140_s2 + $0x64] sm:$0xf0]  ;;  %v5235_v20 = vld [vmem:[%s9140_s2 + $0x174] sm:$0xf] }
  0x50   :  { %899 = vmatpush.bf16.msra.mxu1 %v6238_v35  ;;  %862 = vmatpush.bf16.msrb.mxu2 %v6343_v4  ;;  %v6382_v8 = vor.u32 %v5199_v19, %v4791_v13  ;;  %9450 = vst [vmem:[#allocation80_spill] sm:$0xff] %v6385_v39  ;;  %v5065_v4 = vld [vmem:[%s9140_s2 + $0x268] sm:$0xf]  ;;  %v5194_v13 = vld [vmem:[%s9140_s2 + $0x2c] sm:$0xf] }
  0x51   :  { %925 = vmatpush.bf16.msra.mxu3 %v6248_v60  ;;  %9447 = vst [vmem:[#allocation77_spill] sm:$0xff] %v6356_v63  ;;  %v6426_v51 = vor.u32 %v5268_v42, %v5065_v4  ;;  %v5258_v4 = vld [vmem:[%s9140_s2 + $0x228] sm:$0xf0] }
  0x52   :  { %836 = vmatpush.bf16.msrb.mxu0 %v6332_v27  ;;  %v4939_v27 = vld [vmem:[%s9140_s2 + $0x184] sm:$0xf0]  ;;  %9449 = vst [vmem:[#allocation79_spill] sm:$0xff] %v6382_v8 }
  0x53   :  { %v6398_v19 = vor.u32 %v5235_v20, %v4939_v27  ;;  %9452 = vst [vmem:[#allocation82_spill] sm:$0xff] %v6410_v23  ;;  %v4771_v27 = vld [vmem:[%s9140_s2 + $0x3c] sm:$0xf0]  ;;  %v5230_v20 = vld [vmem:[%s9140_s2 + $0x14c] sm:$0xf] }
  0x54   :  { %900 = vmatpush.bf16.msra.mxu1 %v6274_v58  ;;  %863 = vmatpush.bf16.msrb.mxu2 %v6382_v8  ;;  %v5045_v8 = vld [vmem:[%s9140_s2 + $0x240] sm:$0xf] }
  0x55   :  { %926 = vmatpush.bf16.msra.mxu3 %v6284_v47  ;;  %9451 = vst [vmem:[#allocation81_spill] sm:$0xff] %v6398_v19 }
  0x56   :  { %837 = vmatpush.bf16.msrb.mxu0 %v6368_v46  ;;  %v4919_v46 = vld [vmem:[%s9140_s2 + $0x15c] sm:$0xf0] }
  0x57   :  { %v6430_v10 = vor.u32 %v5230_v20, %v4919_v46  ;;  %v9456_v46 = vmov 0.0|0.0  }
  0x58   :  { %901 = vmatpush.bf16.msra.mxu1 %v6310_v34 }
  0x59   :  { %927 = vmatpush.bf16.msra.mxu3 %v6320_v9  ;;  %9455 = vst [vmem:[#allocation85_spill] sm:$0xff] %v6430_v10 }
  0x5a   :  { %838 = vmatpush.bf16.msrb.mxu0 %v6410_v23 }
  0x5c   :  { %902 = vmatpush.bf16.msra.mxu1 %v6346_v21  ;;  %v6424_v21 = vor.u32 %v5232_v41, %v4917_v0  ;;  %v5025_v0 = vld [vmem:[%s9140_s2 + $0x218] sm:$0xf]  ;;  %v5005_v41 = vld [vmem:[%s9140_s2 + $0x1f0] sm:$0xf] }
  0x5d   :  { %928 = vmatpush.bf16.msra.mxu3 %v6356_v63  ;;  %v6421_v63 = vor.u32 %v5194_v13, %v4771_v27  ;;  %v5263_v13 = vld [vmem:[%s9140_s2 + $0x250] sm:$0xf0]  ;;  %v5253_v27 = vld [vmem:[%s9140_s2 + $0x200] sm:$0xf0] }
  0x5e   :  { %9454 = vst [vmem:[#allocation84_spill] sm:$0xff] %v6424_v21  ;;  %v6441_v42 = vor.u32 %v5263_v13, %v5045_v8  ;;  %v6454_v8 = vor.u32 %v5258_v4, %v5025_v0  ;;  %v6464_v20 = vor.u32 %v5253_v27, %v5005_v41  ;;  %v4985_v13 = vld [vmem:[%s9140_s2 + $0x1c8] sm:$0xf]  ;;  %v5248_v0 = vld [vmem:[%s9140_s2 + $0x1d8] sm:$0xf0] }
  0x5f   :  { %9453 = vst [vmem:[#allocation83_spill] sm:$0xff] %v6421_v63  ;;  %864 = vmatpush.bf16.msrb.mxu2 %v6421_v63  ;;  %v6474_v4 = vor.u32 %v5248_v0, %v4985_v13  ;;  %v5243_v41 = vld [vmem:[%s9140_s2 + $0x1b0] sm:$0xf0]  ;;  %v5238_v13 = vld [vmem:[%s9140_s2 + $0x188] sm:$0xf0] }
  0x60   :  { %903 = vmatpush.bf16.msra.mxu1 %v6385_v39  ;;  %9457 = vst [vmem:[#allocation86_spill] sm:$0xff] %v6454_v8 }
  0x61   :  { %929 = vmatpush.bf16.msra.mxu3 %v6398_v19  ;;  %9458 = vst [vmem:[#allocation87_spill] sm:$0xff] %v6464_v20 }
  0x62   :  { %9459 = vst [vmem:[#allocation88_spill] sm:$0xff] %v6474_v4 }
  0x64   :  { %904 = vmatpush.bf16.msra.mxu1 %v6424_v21 }
  0x65   :  { %930 = vmatpush.bf16.msra.mxu3 %v6430_v10 }
  0x67   :  { %905 = vmatmul.bf16.vlgmr.msra.gmra.mxu1 %v9456_v46 }
  0x68   :  { %949 = vmatpush.bf16.msrb.mxu1 %v6426_v51  ;;  %931 = vmatmul.bf16.vlgmr.msra.gmra.mxu3 %v9456_v46 }
  0x69   :  { %1006 = vmatpush.bf16.msrb.mxu3 %v5739_v7 }
  0x6c   :  { %950 = vmatpush.bf16.msrb.mxu1 %v6441_v42 }
  0x6d   :  { %1007 = vmatpush.bf16.msrb.mxu3 %v5768_v17 }
  0x70   :  { %951 = vmatpush.bf16.msrb.mxu1 %v6454_v8  ;;  %v4965_v8 = vld [vmem:[%s9140_s2 + $0x1a0] sm:$0xf] }
  0x71   :  { %1008 = vmatpush.bf16.msrb.mxu3 %v5816_v33  ;;  %v6484_v27 = vor.u32 %v5243_v41, %v4965_v8  ;;  %v5233_v8 = vld [vmem:[%s9140_s2 + $0x160] sm:$0xf0] }
  0x73   :  { %9460 = vst [vmem:[#allocation89_spill] sm:$0xff] %v6484_v27 }
  0x74   :  { %952 = vmatpush.bf16.msrb.mxu1 %v6464_v20  ;;  %v4945_v20 = vld [vmem:[%s9140_s2 + $0x178] sm:$0xf] }
  0x75   :  { %1009 = vmatpush.bf16.msrb.mxu3 %v5852_v45  ;;  %v6494_v0 = vor.u32 %v5238_v13, %v4945_v20  ;;  %v4749_v20 = vld [vmem:[%s9140_s2] sm:$0xf] }
  0x77   :  { %9461 = vst [vmem:[#allocation90_spill] sm:$0xff] %v6494_v0 }
  0x78   :  { %953 = vmatpush.bf16.msrb.mxu1 %v6474_v4  ;;  %v4925_v4 = vld [vmem:[%s9140_s2 + $0x150] sm:$0xf] }
  0x79   :  { %1010 = vmatpush.bf16.msrb.mxu3 %v5888_v57  ;;  %v6504_v41 = vor.u32 %v5233_v8, %v4925_v4  ;;  %v5191_v4 = vld [vmem:[%s9140_s2 + $0x10] sm:$0xf0]  ;;  %v5189_v8 = vld [vmem:[%s9140_s2 + $0x4] sm:$0xf] }
  0x7a   :  { %v6520_v13 = vor.u32 %v5191_v4, %v4749_v20  ;;  %v5227_v20 = vld [vmem:[%s9140_s2 + $0x130] sm:$0xf0]  ;;  %v5225_v4 = vld [vmem:[%s9140_s2 + $0x124] sm:$0xf] }
  0x7b   :  { %9462 = vst [vmem:[#allocation91_spill] sm:$0xff] %v6504_v41 }
  0x7c   :  { %954 = vmatpush.bf16.msrb.mxu1 %v6484_v27  ;;  %9463 = vst [vmem:[#allocation92_spill] sm:$0xff] %v6520_v13  ;;  %839 = vmatpush.bf16.msrb.mxu0 %v6520_v13 }
  0x7d   :  { %1011 = vmatpush.bf16.msrb.mxu3 %v5924_v6 }
  0x80   :  { %955 = vmatpush.bf16.msrb.mxu1 %v6494_v0 }
  0x81   :  { %1012 = vmatpush.bf16.msrb.mxu3 %v5963_v26 }
  0x84   :  { %956 = vmatpush.bf16.msrb.mxu1 %v6504_v41 }
  0x85   :  { %1013 = vmatpush.bf16.msrb.mxu3 %v6002_v43 }
  0x87   :  { %957 = vmatmul.bf16.vlgmr.msrb.gmra.mxu1 %v9456_v46  ;;  %v4751_v46 = vld [vmem:[%s9140_s2 + $0x14] sm:$0xf0] }
  0x88   :  { %1032 = vmatpush.bf16.msra.mxu1 %v5753_v12 }
  0x89   :  { %1082 = vmatpush.bf16.msra.mxu3 %v6009_v49 }
  0x8c   :  { %1033 = vmatpush.bf16.msra.mxu1 %v5791_v25  ;;  %v6532_v25 = vor.u32 %v5189_v8, %v4751_v46  ;;  %v4877_v46 = vld [vmem:[%s9140_s2 + $0xf8] sm:$0xf] }
  0x8d   :  { %1083 = vmatpush.bf16.msra.mxu3 %v6036_v61  ;;  %v4897_v61 = vld [vmem:[%s9140_s2 + $0x120] sm:$0xf] }
  0x8e   :  { %9464 = vst [vmem:[#allocation93_spill] sm:$0xff] %v6532_v25  ;;  %v6542_v49 = vor.u32 %v5227_v20, %v4897_v61  ;;  %865 = vmatpush.bf16.msrb.mxu2 %v6532_v25  ;;  %v4879_v20 = vld [vmem:[%s9140_s2 + $0x10c] sm:$0xf0] }
  0x90   :  { %1034 = vmatpush.bf16.msra.mxu1 %v5830_v38  ;;  %9465 = vst [vmem:[#allocation94_spill] sm:$0xff] %v6542_v49  ;;  %v4899_v38 = vld [vmem:[%s9140_s2 + $0x134] sm:$0xf0]  ;;  %884 = vmatpush.bf16.msra.mxu0 %v6542_v49 }
  0x91   :  { %1084 = vmatpush.bf16.msra.mxu3 %v6058_v11  ;;  %v6548_v8 = vor.u32 %v5225_v4, %v4899_v38  ;;  %v5222_v11 = vld [vmem:[%s9140_s2 + $0x108] sm:$0xf0]  ;;  %v5220_v38 = vld [vmem:[%s9140_s2 + $0xfc] sm:$0xf] }
  0x92   :  { %v6559_v61 = vor.u32 %v5222_v11, %v4877_v46  ;;  %v6568_v4 = vor.u32 %v5220_v38, %v4879_v20  ;;  %v5217_v11 = vld [vmem:[%s9140_s2 + $0xe0] sm:$0xf0]  ;;  %v5215_v38 = vld [vmem:[%s9140_s2 + $0xd4] sm:$0xf]  ;;  %v4859_v20 = vld [vmem:[%s9140_s2 + $0xe4] sm:$0xf0] }
  0x93   :  { %9466 = vst [vmem:[#allocation95_spill] sm:$0xff] %v6548_v8  ;;  %910 = vmatpush.bf16.msra.mxu2 %v6548_v8 }
  0x94   :  { %1035 = vmatpush.bf16.msra.mxu1 %v5866_v50  ;;  %9467 = vst [vmem:[#allocation96_spill] sm:$0xff] %v6559_v61  ;;  %885 = vmatpush.bf16.msra.mxu0 %v6559_v61  ;;  %v4857_v50 = vld [vmem:[%s9140_s2 + $0xd0] sm:$0xf] }
  0x95   :  { %1085 = vmatpush.bf16.msra.mxu3 %v6076_v22  ;;  %9468 = vst [vmem:[#allocation97_spill] sm:$0xff] %v6568_v4  ;;  %v6579_v46 = vor.u32 %v5217_v11, %v4857_v50  ;;  %v6588_v22 = vor.u32 %v5215_v38, %v4859_v20  ;;  %v5212_v50 = vld [vmem:[%s9140_s2 + $0xb8] sm:$0xf0]  ;;  %v5210_v38 = vld [vmem:[%s9140_s2 + $0xac] sm:$0xf] }
  0x96   :  { %v4839_v20 = vld [vmem:[%s9140_s2 + $0xbc] sm:$0xf0] }
  0x97   :  { %911 = vmatpush.bf16.msra.mxu2 %v6568_v4  ;;  %9469 = vst [vmem:[#allocation98_spill] sm:$0xff] %v6579_v46 }
  0x98   :  { %1036 = vmatpush.bf16.msra.mxu1 %v5902_v62  ;;  %9470 = vst [vmem:[#allocation99_spill] sm:$0xff] %v6588_v22  ;;  %886 = vmatpush.bf16.msra.mxu0 %v6579_v46  ;;  %v4837_v62 = vld [vmem:[%s9140_s2 + $0xa8] sm:$0xf] }
  0x99   :  { %1086 = vmatpush.bf16.msra.mxu3 %v6094_v36  ;;  %v6599_v11 = vor.u32 %v5212_v50, %v4837_v62  ;;  %v6608_v36 = vor.u32 %v5210_v38, %v4839_v20  ;;  %v5207_v62 = vld [vmem:[%s9140_s2 + $0x90] sm:$0xf0]  ;;  %v5205_v38 = vld [vmem:[%s9140_s2 + $0x84] sm:$0xf]  ;;  %v4819_v20 = vld [vmem:[%s9140_s2 + $0x94] sm:$0xf0] }
  0x9b   :  { %912 = vmatpush.bf16.msra.mxu2 %v6588_v22  ;;  %9471 = vst [vmem:[#allocation100_spill] sm:$0xff] %v6599_v11 }
  0x9c   :  { %1037 = vmatpush.bf16.msra.mxu1 %v5938_v14  ;;  %9472 = vst [vmem:[#allocation101_spill] sm:$0xff] %v6608_v36  ;;  %887 = vmatpush.bf16.msra.mxu0 %v6599_v11  ;;  %v4817_v14 = vld [vmem:[%s9140_s2 + $0x80] sm:$0xf] }
  0x9d   :  { %1087 = vmatpush.bf16.msra.mxu3 %v6112_v52  ;;  %v6619_v50 = vor.u32 %v5207_v62, %v4817_v14  ;;  %v6628_v52 = vor.u32 %v5205_v38, %v4819_v20  ;;  %v5202_v14 = vld [vmem:[%s9140_s2 + $0x68] sm:$0xf0]  ;;  %v5200_v38 = vld [vmem:[%s9140_s2 + $0x5c] sm:$0xf]  ;;  %v4799_v20 = vld [vmem:[%s9140_s2 + $0x6c] sm:$0xf0] }
  0x9f   :  { %913 = vmatpush.bf16.msra.mxu2 %v6608_v36  ;;  %9473 = vst [vmem:[#allocation102_spill] sm:$0xff] %v6619_v50 }
  0xa0   :  { %1038 = vmatpush.bf16.msra.mxu1 %v5977_v32  ;;  %9474 = vst [vmem:[#allocation103_spill] sm:$0xff] %v6628_v52  ;;  %888 = vmatpush.bf16.msra.mxu0 %v6619_v50  ;;  %v4797_v32 = vld [vmem:[%s9140_s2 + $0x58] sm:$0xf] }
  0xa1   :  { %1088 = vmatpush.bf16.msra.mxu3 %v6130_v1  ;;  %v6639_v62 = vor.u32 %v5202_v14, %v4797_v32  ;;  %v6648_v1 = vor.u32 %v5200_v38, %v4799_v20  ;;  %v4777_v32 = vld [vmem:[%s9140_s2 + $0x30] sm:$0xf]  ;;  %v5197_v14 = vld [vmem:[%s9140_s2 + $0x40] sm:$0xf0]  ;;  %v5195_v38 = vld [vmem:[%s9140_s2 + $0x34] sm:$0xf] }
  0xa2   :  { %v4779_v20 = vld [vmem:[%s9140_s2 + $0x44] sm:$0xf0]  ;;  %v349_v41 = vpop.f32.mrf.mxu0 }
  0xa3   :  { %914 = vmatpush.bf16.msra.mxu2 %v6628_v52  ;;  %9475 = vst [vmem:[#allocation104_spill] sm:$0xff] %v6639_v62 }
  0xa4   :  { %1039 = vmatpush.bf16.msra.mxu1 %v6007_v48  ;;  %9476 = vst [vmem:[#allocation105_spill] sm:$0xff] %v6648_v1  ;;  %889 = vmatpush.bf16.msra.mxu0 %v6639_v62  ;;  %v6659_v48 = vor.u32 %v5197_v14, %v4777_v32  ;;  %v5192_v32 = vld [vmem:[%s9140_s2 + $0x18] sm:$0xf0]  ;;  %v175_v14 = vld [vmem:[%s9138_s0] sm:$0xff] }
  0xa5   :  { %1089 = vmatpush.bf16.msra.mxu3 %v6154_v28  ;;  %v4757_v28 = vld [vmem:[%s9140_s2 + $0x8] sm:$0xf]  ;;  %v392_v26 = vadd.f32 %v349_v41, %v175_v14  ;;  %v178_v41 = vld [vmem:[%s9138_s0 + $0x18] sm:$0xff] }
  0xa6   :  { %9477 = vst [vmem:[#allocation106_spill] sm:$0xff] %v6659_v48  ;;  %v6681_v12 = vor.u32 %v5192_v32, %v4757_v28  ;;  %v362_v28 = vpop.f32.mrf.mxu1 }
  0xa7   :  { %915 = vmatpush.bf16.msra.mxu2 %v6648_v1  ;;  %v396_v0 = vmul.f32 0.5, %v392_v26 }
  0xa8   :  { %1108 = vmatpush.bf16.msrb.mxu1 %v6023_v55  ;;  %v6668_v55 = vor.u32 %v5195_v38, %v4779_v20  ;;  %890 = vmatpush.bf16.msra.mxu0 %v6659_v48  ;;  %9479 = vst [vmem:[#allocation108_spill] sm:$0xff] %v6681_v12  ;;  %v5190_v38 = vld [vmem:[%s9140_s2 + $0xc] sm:$0xf]  ;;  %v4759_v20 = vld [vmem:[%s9140_s2 + $0x1c] sm:$0xf0] }
  0xa9   :  { %v6693_v43 = vor.u32 %v5190_v38, %v4759_v20  ;;  %5272 = vtanh.f32 %v396_v0 }
  0xaa   :  { %9478 = vst [vmem:[#allocation107_spill] sm:$0xff] %v6668_v55  ;;  %v375_v14 = vpop.f32.mrf.mxu2  ;;  %v351_v20 = vpop.f32.mrf.mxu0 }
  0xab   :  { %916 = vmatpush.bf16.msra.mxu2 %v6668_v55  ;;  %9480 = vst [vmem:[#allocation109_spill] sm:$0xff] %v6693_v43  ;;  %v388_v38 = vpop.f32.mrf.mxu3 }
  0xac   :  { %1109 = vmatpush.bf16.msrb.mxu1 %v6046_v2  ;;  %v176_v2 = vld [vmem:[%s9138_s0 + $0x8] sm:$0xff]  ;;  %891 = vmatpush.bf16.msra.mxu0 %v6681_v12 }
  0xad   :  { %v393_v32 = vadd.f32 %v362_v28, %v176_v2  ;;  %v395_v28 = vadd.f32 %v388_v38, %v178_v41 }
  0xaf   :  { %917 = vmatpush.bf16.msra.mxu2 %v6693_v43  ;;  %v402_v6 = vmul.f32 0.5, %v393_v32  ;;  %v5273_v26 = vpop.eup %5272  ;;  %v408_v0 = vmul.f32 0.5, %v395_v28 }
  0xb0   :  { %1110 = vmatpush.bf16.msrb.mxu1 %v6067_v18  ;;  %v177_v18 = vld [vmem:[%s9138_s0 + $0x10] sm:$0xff]  ;;  %v398_v27 = vmul.f32 0.5, %v5273_v26  ;;  %v4885_v26 = vld [vmem:[%s9140_s2 + $0x100] sm:$0xf] }
  0xb1   :  { %5274 = vtanh.f32 %v402_v6  ;;  %v394_v2 = vadd.f32 %v375_v14, %v177_v18 }
  0xb2   :  { %v399_v57 = vadd.f32 0.5, %v398_v27  ;;  %v4905_v27 = vld [vmem:[%s9140_s2 + $0x128] sm:$0xf] }
  0xb3   :  { %5276 = vtanh.f32 %v394_v2  ;;  %v390_v18 = vpop.f32.mrf.mxu3 }
  0xb4   :  { %1111 = vmatpush.bf16.msrb.mxu1 %v6085_v30  ;;  %v364_v30 = vpop.f32.mrf.mxu1  ;;  %5278 = vtanh.f32 %v408_v0  ;;  %v5223_v0 = vld [vmem:[%s9140_s2 + $0x110] sm:$0xf0]  ;;  %v5218_v18 = vld [vmem:[%s9140_s2 + $0xe8] sm:$0xf0] }
  0xb7   :  { %v5275_v32 = vpop.eup %5274 }
  0xb8   :  { %1112 = vmatpush.bf16.msrb.mxu1 %v6103_v40  ;;  %v404_v6 = vmul.f32 0.5, %v5275_v32  ;;  %v377_v40 = vpop.f32.mrf.mxu2  ;;  %v6731_v32 = vor.u32 %v5223_v0, %v4885_v26  ;;  %v4785_v0 = vld [vmem:[%s9140_s2 + $0x38] sm:$0xf] }
  0xb9   :  { %v5277_v33 = vpop.eup %5276  ;;  %v5228_v40 = vld [vmem:[%s9140_s2 + $0x138] sm:$0xf0] }
  0xba   :  { %v405_v45 = vadd.f32 0.5, %v404_v6  ;;  %v401_v20 = vmul.f32 %v5277_v33, %v399_v57  ;;  %v5279_v30 = vpop.eup %5278  ;;  %v6717_v33 = vor.u32 %v5228_v40, %v4905_v27  ;;  %9481 = vst [vmem:[#allocation110_spill] sm:$0xff] %v6731_v32  ;;  %v4865_v6 = vld [vmem:[%s9140_s2 + $0xd8] sm:$0xf]  ;;  %v5208_v27 = vld [vmem:[%s9140_s2 + $0x98] sm:$0xf0] }
  0xbb   :  { %v410_v2 = vmul.f32 0.5, %v5279_v30  ;;  %v5213_v30 = vld [vmem:[%s9140_s2 + $0xc0] sm:$0xf0] }
  0xbc   :  { %1113 = vmatpush.bf16.msrb.mxu1 %v6121_v59  ;;  %v406_v14 = vmul.f32 0.0, %v405_v45  ;;  %v9500_v59 = vld [vmem:[#allocation30_spill] sm:$0xff] }
  0xbd   :  { %v411_v38 = vadd.f32 0.5, %v410_v2 }
  0xbe   :  { %v6708_v41 = vadd.f32 %v406_v14, %v401_v20  ;;  %v6744_v14 = vor.u32 %v5218_v18, %v4865_v6  ;;  %v4845_v20 = vld [vmem:[%s9140_s2 + $0xb0] sm:$0xf]  ;;  %v5198_v6 = vld [vmem:[%s9140_s2 + $0x48] sm:$0xf0] }
  0xbf   :  { %v6756_v2 = vor.u32 %v5213_v30, %v4845_v20  ;;  %v6794_v18 = vor.u32 %v5198_v6, %v4785_v0  ;;  %v4765_v20 = vld [vmem:[%s9140_s2 + $0x10] sm:$0xf]  ;;  %v5193_v30 = vld [vmem:[%s9140_s2 + $0x20] sm:$0xf0] }
  0xc0   :  { %1114 = vmatpush.bf16.msrb.mxu1 %v6142_v15  ;;  %5280 = vtanh.f32 %v6708_v41 }
  0xc1   :  { %9484 = vst [vmem:[#allocation113_spill] sm:$0xff] %v6794_v18 }
  0xc4   :  { %1115 = vmatpush.bf16.msrb.mxu1 %v6162_v37  ;;  %v6812_v0 = vpop.f32.mrf.mxu1  ;;  %v9496_v37 = vld [vmem:[#allocation22_spill] sm:$0xff] }
  0xc6   :  { %v5281_v28 = vpop.eup %5280 }
  0xc7   :  { %v413_v45 = vmul.f32 %v5281_v28, %v411_v38  ;;  %v4825_v38 = vld [vmem:[%s9140_s2 + $0x88] sm:$0xf]  ;;  %v4805_v28 = vld [vmem:[%s9140_s2 + $0x60] sm:$0xf] }
  0xc8   :  { %v6768_v40 = vor.u32 %v5208_v27, %v4825_v38  ;;  %v9485_v38 = vld [vmem:[#allocation76_spill] sm:$0xff]  ;;  %v9486_v27 = vld [vmem:[#allocation77_spill] sm:$0xff] }
  0xc9   :  { %v6719_v57 = vpack.c.bf16 %v413_v45, %v413_v45  ;;  %v5203_v45 = vld [vmem:[%s9140_s2 + $0x70] sm:$0xf0] }
  0xca   :  { %9482 = vst [vmem:[#allocation111_spill] sm:$0xff] %v6768_v40  ;;  %v6782_v26 = vor.u32 %v5203_v45, %v4805_v28  ;;  %v6806_v28 = vor.u32 %v5193_v30, %v4765_v20  ;;  %v9488_v45 = vld [vmem:[#allocation32_spill] sm:$0xff]  ;;  %v9492_v20 = vld [vmem:[#allocation14_spill] sm:$0xff] }
  0xcb   :  { %840 = vmatmul.bf16.vlgmr.msrb.gmra.mxu0 %v6719_v57  ;;  %866 = vmatmul.bf16.vlgmr.msrb.gmra.mxu2 %v6719_v57  ;;  %v6814_v6 = vpop.f32.mrf.mxu3  ;;  %v9493_v30 = vld [vmem:[#allocation62_spill] sm:$0xff] }
  0xcc   :  { %936 = vmatpush.bf16.msrb.mxu0 %v6717_v33  ;;  %1014 = vmatmul.bf16.vlgmr.msrb.gmra.mxu3 %v6719_v57  ;;  %9483 = vst [vmem:[#allocation112_spill] sm:$0xff] %v6782_v26 }
  0xcd   :  { %1040 = vmatmul.bf16.vlgmr.msra.gmra.mxu1 %v6719_v57  ;;  %993 = vmatpush.bf16.msrb.mxu2 %v5728_v3  ;;  %9487 = vst [vmem:[#allocation114_spill] sm:$0xff] %v6806_v28 }
  0xce   :  { %1134 = vmatpush.bf16.msrb.mxu3 %v6156_v31  ;;  %1160 = vmatpush.bf16.msra.mxu1 %v6173_v53  ;;  %v9495_v53 = vld [vmem:[#allocation66_spill] sm:$0xff] }
  0xd0   :  { %937 = vmatpush.bf16.msrb.mxu0 %v6731_v32 }
  0xd1   :  { %994 = vmatpush.bf16.msrb.mxu2 %v5766_v16 }
  0xd2   :  { %1135 = vmatpush.bf16.msrb.mxu3 %v6199_v24  ;;  %1161 = vmatpush.bf16.msra.mxu1 %v6210_v54  ;;  %v9494_v54 = vld [vmem:[#allocation18_spill] sm:$0xff] }
  0xd4   :  { %938 = vmatpush.bf16.msrb.mxu0 %v6744_v14 }
  0xd5   :  { %995 = vmatpush.bf16.msrb.mxu2 %v5803_v29 }
  0xd6   :  { %1136 = vmatpush.bf16.msrb.mxu3 %v6238_v35  ;;  %1162 = vmatpush.bf16.msra.mxu1 %v6248_v60  ;;  %v882_v60 = vpop.f32.mrf.mxu3 }
  0xd8   :  { %939 = vmatpush.bf16.msrb.mxu0 %v6756_v2 }
  0xd9   :  { %996 = vmatpush.bf16.msrb.mxu2 %v5848_v44 }
  0xda   :  { %1137 = vmatpush.bf16.msrb.mxu3 %v6274_v58  ;;  %1163 = vmatpush.bf16.msra.mxu1 %v6284_v47  ;;  %v9490_v47 = vld [vmem:[#allocation12_spill] sm:$0xff]  ;;  %v9502_v58 = vld [vmem:[#allocation34_spill] sm:$0xff] }
  0xdb   :  { %892 = vmatmul.bf16.vlgmr.msra.gmra.mxu0 %v6719_v57  ;;  %918 = vmatmul.bf16.vlgmr.msra.gmra.mxu2 %v6719_v57 }
  0xdc   :  { %940 = vmatpush.bf16.msrb.mxu0 %v6768_v40 }
  0xdd   :  { %997 = vmatpush.bf16.msrb.mxu2 %v5884_v56 }
  0xde   :  { %1138 = vmatpush.bf16.msrb.mxu3 %v6310_v34  ;;  %1164 = vmatpush.bf16.msra.mxu1 %v6320_v9  ;;  %v9489_v9 = vld [vmem:[#allocation36_spill] sm:$0xff]  ;;  %v9501_v34 = vld [vmem:[#allocation78_spill] sm:$0xff] }
  0xe0   :  { %941 = vmatpush.bf16.msrb.mxu0 %v6782_v26 }
  0xe1   :  { %998 = vmatpush.bf16.msrb.mxu2 %v5920_v5 }
  0xe2   :  { %1139 = vmatpush.bf16.msrb.mxu3 %v9485_v38  ;;  %1165 = vmatpush.bf16.msra.mxu1 %v9486_v27  ;;  %v9491_v27 = vld [vmem:[#allocation58_spill] sm:$0xff] }
  0xe3   :  { %v9499_v38 = vld [vmem:[#allocation74_spill] sm:$0xff] }
  0xe4   :  { %942 = vmatpush.bf16.msrb.mxu0 %v6794_v18 }
  0xe5   :  { %999 = vmatpush.bf16.msrb.mxu2 %v9488_v45 }
  0xe6   :  { %1140 = vmatpush.bf16.msrb.mxu3 %v6385_v39  ;;  %1166 = vmatpush.bf16.msra.mxu1 %v6398_v19  ;;  %v856_v19 = vpop.f32.mrf.mxu1  ;;  %v9497_v39 = vld [vmem:[#allocation70_spill] sm:$0xff] }
  0xe8   :  { %943 = vmatpush.bf16.msrb.mxu0 %v6806_v28 }
  0xe9   :  { %1000 = vmatpush.bf16.msrb.mxu2 %v9489_v9 }
  0xea   :  { %1141 = vmatpush.bf16.msrb.mxu3 %v6424_v21  ;;  %1167 = vmatpush.bf16.msra.mxu1 %v6430_v10  ;;  %v9498_v10 = vld [vmem:[#allocation26_spill] sm:$0xff] }
  0xeb   :  { %944 = vmatmul.bf16.vlgmr.msrb.gmra.mxu0 %v6719_v57  ;;  %v6829_v15 = vpop.f32.mrf.mxu3 }
  0xec   :  { %1019 = vmatpush.bf16.msra.mxu0 %v9490_v47  ;;  %1001 = vmatmul.bf16.vlgmr.msrb.gmra.mxu2 %v6719_v57 }
  0xed   :  { %1069 = vmatpush.bf16.msra.mxu2 %v9491_v27 }
  0xee   :  { %v906_v21 = vpop.f32.mrf.mxu1 }
  0xf0   :  { %1020 = vmatpush.bf16.msra.mxu0 %v9492_v20 }
  0xf1   :  { %1070 = vmatpush.bf16.msra.mxu2 %v9493_v30 }
  0xf3   :  { %v934_v19 = vpop.f32.mrf.mxu3 }
  0xf4   :  { %1021 = vmatpush.bf16.msra.mxu0 %v9494_v54 }
  0xf5   :  { %1071 = vmatpush.bf16.msra.mxu2 %v9495_v53 }
  0xf6   :  { %v908_v60 = vpop.f32.mrf.mxu1 }
  0xf7   :  { %v9506_v60 = vld [vmem:[#allocation67_spill] sm:$0xff] }
  0xf8   :  { %1022 = vmatpush.bf16.msra.mxu0 %v9496_v37  ;;  %v9503_v37 = vld [vmem:[#allocation38_spill] sm:$0xff] }
  0xf9   :  { %1072 = vmatpush.bf16.msra.mxu2 %v9497_v39  ;;  %v9504_v39 = vld [vmem:[#allocation59_spill] sm:$0xff] }
  0xfc   :  { %1023 = vmatpush.bf16.msra.mxu0 %v9498_v10 }
  0xfd   :  { %1073 = vmatpush.bf16.msra.mxu2 %v9499_v38 }
 0x100   :  { %1024 = vmatpush.bf16.msra.mxu0 %v9500_v59  ;;  %v9505_v59 = vld [vmem:[#allocation63_spill] sm:$0xff] }
 0x101   :  { %1074 = vmatpush.bf16.msra.mxu2 %v9501_v34 }
 0x104   :  { %1025 = vmatpush.bf16.msra.mxu0 %v9502_v58  ;;  %v6842_v38 = vpop.f32.mrf.mxu1 }
 0x105   :  { %1075 = vmatpush.bf16.msra.mxu2 %v6410_v23 }
 0x108   :  { %1026 = vmatpush.bf16.msra.mxu0 %v9503_v37  ;;  %v9507_v37 = vld [vmem:[#allocation71_spill] sm:$0xff] }
 0x109   :  { %1076 = vmatpush.bf16.msra.mxu2 %v6520_v13  ;;  %v9508_v13 = vld [vmem:[#allocation75_spill] sm:$0xff] }
 0x10b   :  { %1027 = vmatmul.bf16.vlgmr.msra.gmra.mxu0 %v6719_v57  ;;  %v9509_v57 = vld [vmem:[#allocation79_spill] sm:$0xff] }
 0x10c   :  { %1095 = vmatpush.bf16.msrb.mxu0 %v9504_v39  ;;  %v960_v19 = vpop.f32.mrf.mxu1 }
 0x10d   :  { %1121 = vmatpush.bf16.msrb.mxu2 %v6542_v49 }
 0x110   :  { %1096 = vmatpush.bf16.msrb.mxu0 %v9505_v59 }
 0x111   :  { %1122 = vmatpush.bf16.msrb.mxu2 %v6559_v61 }
 0x114   :  { %1097 = vmatpush.bf16.msrb.mxu0 %v9506_v60 }
 0x115   :  { %1123 = vmatpush.bf16.msrb.mxu2 %v6579_v46 }
 0x118   :  { %1098 = vmatpush.bf16.msrb.mxu0 %v9507_v37 }
 0x119   :  { %1124 = vmatpush.bf16.msrb.mxu2 %v6599_v11 }
 0x11c   :  { %1099 = vmatpush.bf16.msrb.mxu0 %v9508_v13 }
 0x11d   :  { %1125 = vmatpush.bf16.msrb.mxu2 %v6619_v50 }
 0x120   :  { %1100 = vmatpush.bf16.msrb.mxu0 %v9509_v57 }
 0x121   :  { %1126 = vmatpush.bf16.msrb.mxu2 %v6639_v62 }
 0x124   :  { %1101 = vmatpush.bf16.msrb.mxu0 %v6421_v63 }
 0x125   :  { %1127 = vmatpush.bf16.msrb.mxu2 %v6659_v48 }
 0x128   :  { %1102 = vmatpush.bf16.msrb.mxu0 %v6532_v25 }
 0x129   :  { %1128 = vmatpush.bf16.msrb.mxu2 %v6681_v12 }
 0x12c   :  { %1147 = vmatpush.bf16.msra.mxu0 %v6548_v8  ;;  %v159_v8 = vld [vmem:[%s9141_s3] sm:$0x1f] }
 0x12d   :  { %v6879_v57 = vperm.slane %v159_v8, 2 }
 0x12f   :  { %9511 = vst [vmem:[#allocation116_spill] sm:$0xff] %v6879_v57 }
 0x130   :  { %1148 = vmatpush.bf16.msra.mxu0 %v6568_v4  ;;  %v6871_v4 = vperm.slane %v159_v8, 1 }
 0x132   :  { %9510 = vst [vmem:[#allocation115_spill] sm:$0xff] %v6871_v4 }
 0x134   :  { %1149 = vmatpush.bf16.msra.mxu0 %v6588_v22  ;;  %v6873_v22 = vperm.slane %v159_v8, 0 }
 0x138   :  { %1150 = vmatpush.bf16.msra.mxu0 %v6608_v36 }
 0x13c   :  { %1151 = vmatpush.bf16.msra.mxu0 %v6628_v52 }
 0x140   :  { %1152 = vmatpush.bf16.msra.mxu0 %v6648_v1 }
 0x144   :  { %1153 = vmatpush.bf16.msra.mxu0 %v6668_v55 }
 0x148   :  { %1154 = vmatpush.bf16.msra.mxu0 %v6693_v43  ;;  %v841_v19 = vpop.f32.mrf.mxu0 }
 0x149   :  { %v842_v55 = vadd.f32 %v841_v19, %v6873_v22 }
 0x14a   :  { %v6869_v12 = vpop.f32.mrf.mxu1 }
 0x14b   :  { %v855_v63 = vadd.f32 %v6812_v0, %v842_v55 }
 0x14d   :  { %v974_v37 = vmul.f32 0.5, %v855_v63 }
 0x14e   :  { %v867_v36 = vpop.f32.mrf.mxu2 }
 0x14f   :  { %v868_v52 = vadd.f32 %v867_v36, %v6871_v4  ;;  %v1015_v25 = vpop.f32.mrf.mxu3  ;;  %v6882_v4 = vperm.slane %v159_v8, 3 }
 0x150   :  { %v843_v1 = vpop.f32.mrf.mxu0 }
 0x151   :  { %v881_v43 = vadd.f32 %v6814_v6, %v868_v52 }
 0x152   :  { %v1043_v48 = vpop.f32.mrf.mxu1 }
 0x153   :  { %v962_v62 = vmul.f32 0.5, %v881_v43 }
 0x155   :  { %5282 = vtanh.f32 %v962_v62  ;;  %v6886_v62 = vperm.slane %v159_v8, 4 }
 0x156   :  { %v869_v50 = vpop.f32.mrf.mxu2  ;;  %5284 = vtanh.f32 %v974_v37 }
 0x157   :  { %v1017_v13 = vpop.f32.mrf.mxu3 }
 0x158   :  { %v893_v11 = vpop.f32.mrf.mxu0 }
 0x159   :  { %v894_v46 = vadd.f32 %v893_v11, %v6879_v57 }
 0x15b   :  { %v907_v36 = vadd.f32 %v906_v21, %v894_v46  ;;  %v5283_v52 = vpop.eup %5282 }
 0x15c   :  { %v964_v50 = vmul.f32 0.5, %v5283_v52  ;;  %v5285_v13 = vpop.eup %5284 }
 0x15d   :  { %v967_v1 = vmul.f32 0.5, %v907_v36  ;;  %v976_v11 = vmul.f32 0.5, %v5285_v13 }
 0x15e   :  { %v919_v19 = vpop.f32.mrf.mxu2  ;;  %v965_v21 = vadd.f32 0.5, %v964_v50 }
 0x15f   :  { %5286 = vtanh.f32 %v967_v1  ;;  %v920_v48 = vadd.f32 %v919_v19, %v6882_v4  ;;  %v977_v57 = vadd.f32 0.5, %v976_v11 }
 0x160   :  { %v895_v43 = vpop.f32.mrf.mxu0  ;;  %v966_v19 = vmul.f32 0.0, %v965_v21 }
 0x161   :  { %v933_v55 = vadd.f32 %v6829_v15, %v920_v48 }
 0x163   :  { %5288 = vtanh.f32 %v933_v55 }
 0x165   :  { %v5287_v63 = vpop.eup %5286 }
 0x166   :  { %v969_v46 = vmul.f32 0.5, %v5287_v63  ;;  %v921_v0 = vpop.f32.mrf.mxu2  ;;  %v5068_v63 = vld [vmem:[%s9138_s0 + $0x28] sm:$0xff] }
 0x167   :  { %v1046_v11 = vadd.f32 %v5068_v63, %v1015_v25  ;;  %v5070_v25 = vld [vmem:[%s9138_s0 + $0x38] sm:$0xff] }
 0x168   :  { %v970_v37 = vadd.f32 0.5, %v969_v46  ;;  %v945_v6 = vpop.f32.mrf.mxu0 }
 0x169   :  { %v5289_v36 = vpop.eup %5288  ;;  %v946_v1 = vadd.f32 %v945_v6, %v6886_v62 }
 0x16a   :  { %v971_v43 = vmul.f32 %v970_v37, %v6708_v41  ;;  %v978_v48 = vmul.f32 %v5289_v36, %v977_v57  ;;  %v5067_v57 = vld [vmem:[%s9138_s0 + $0x20] sm:$0xff]  ;;  %v1055_v36 = vmul.f32 0.5, %v1046_v11  ;;  %v9513_v11 = vld [vmem:[#allocation17_spill] sm:$0xff] }
 0x16b   :  { %v959_v15 = vadd.f32 %v6842_v38, %v946_v1 }
 0x16c   :  { %v972_v52 = vadd.f32 %v971_v43, %v966_v19 }
 0x16d   :  { %v980_v55 = vmul.f32 0.5, %v959_v15  ;;  %v1048_v15 = vadd.f32 %v5070_v25, %v6869_v12  ;;  %v9516_v25 = vld [vmem:[#allocation88_spill] sm:$0xff] }
 0x16e   :  { %v6891_v8 = vadd.f32 %v978_v48, %v972_v52  ;;  %v5069_v52 = vld [vmem:[%s9138_s0 + $0x30] sm:$0xff] }
 0x16f   :  { %5290 = vtanh.f32 %v980_v55  ;;  %v1002_v50 = vpop.f32.mrf.mxu2  ;;  %v1061_v63 = vmul.f32 0.5, %v1048_v15  ;;  %v9517_v15 = vld [vmem:[#allocation25_spill] sm:$0xff] }
 0x170   :  { %987 = vst [vmem:[%s9143_s5] sm:$0xff] %v6891_v8  ;;  %v947_v13 = vpop.f32.mrf.mxu0  ;;  %5292 = vtanh.f32 %v6891_v8  ;;  %v1045_v37 = vadd.f32 %v5067_v57, %v1002_v50  ;;  %v9512_v57 = vld [vmem:[#allocation86_spill] sm:$0xff] }
 0x171   :  { %5294 = vtanh.f32 %v1055_v36 }
 0x172   :  { %v1049_v43 = vmul.f32 0.5, %v1045_v37 }
 0x174   :  { %5296 = vtanh.f32 %v1049_v43 }
 0x175   :  { %v5291_v38 = vpop.eup %5290 }
 0x176   :  { %v982_v21 = vmul.f32 0.5, %v5291_v38  ;;  %v5293_v6 = vpop.eup %5292 }
 0x177   :  { %v1004_v46 = vpop.f32.mrf.mxu2  ;;  %v5295_v48 = vpop.eup %5294 }
 0x178   :  { %v983_v0 = vadd.f32 0.5, %v982_v21  ;;  %v1057_v38 = vmul.f32 0.5, %v5295_v48  ;;  %v9514_v46 = vld [vmem:[#allocation87_spill] sm:$0xff] }
 0x17a   :  { %v985_v1 = vmul.f32 %v5293_v6, %v983_v0  ;;  %v5297_v50 = vpop.eup %5296  ;;  %v1058_v21 = vadd.f32 0.5, %v1057_v38  ;;  %v9515_v0 = vld [vmem:[#allocation21_spill] sm:$0xff] }
 0x17b   :  { %v1051_v12 = vmul.f32 0.5, %v5297_v50  ;;  %v9519_v50 = vld [vmem:[#allocation29_spill] sm:$0xff] }
 0x17c   :  { %986 = vst [vmem:[%s9142_s4] sm:$0xff] %v985_v1  ;;  %v1068_v19 = vpack.c.bf16 %v985_v1, %v985_v1  ;;  %v1059_v1 = vmul.f32 %v1058_v21, %v6708_v41  ;;  %v9521_v38 = vld [vmem:[#allocation33_spill] sm:$0xff] }
 0x17d   :  { %v1052_v37 = vadd.f32 0.5, %v1051_v12 }
 0x17e   :  { %1090 = vmatmul.bf16.vlgmr.msra.gmra.mxu3 %v1068_v19  ;;  %1116 = vmatmul.bf16.vlgmr.msrb.gmra.mxu1 %v1068_v19 }
 0x17f   :  { %1186 = vmatpush.bf16.msra.mxu3 %v6426_v51  ;;  %1245 = vmatpush.bf16.msrb.mxu1 %v5739_v7 }
 0x183   :  { %1187 = vmatpush.bf16.msra.mxu3 %v6441_v42  ;;  %1246 = vmatpush.bf16.msrb.mxu1 %v5768_v17 }
 0x187   :  { %1188 = vmatpush.bf16.msra.mxu3 %v9512_v57  ;;  %1247 = vmatpush.bf16.msrb.mxu1 %v9513_v11 }
 0x188   :  { %v1028_v55 = vpop.f32.mrf.mxu0 }
 0x189   :  { %v1047_v13 = vadd.f32 %v5069_v52, %v1028_v55  ;;  %v9518_v55 = vld [vmem:[#allocation89_spill] sm:$0xff] }
 0x18b   :  { %5298 = vtanh.f32 %v1047_v13  ;;  %1189 = vmatpush.bf16.msra.mxu3 %v9514_v46  ;;  %1248 = vmatpush.bf16.msrb.mxu1 %v9515_v0 }
 0x18c   :  { %5300 = vtanh.f32 %v1061_v63  ;;  %v9520_v63 = vld [vmem:[#allocation90_spill] sm:$0xff] }
 0x18e   :  { %1142 = vmatmul.bf16.vlgmr.msrb.gmra.mxu3 %v1068_v19  ;;  %1168 = vmatmul.bf16.vlgmr.msra.gmra.mxu1 %v1068_v19 }
 0x18f   :  { %1190 = vmatpush.bf16.msra.mxu3 %v9516_v25  ;;  %1249 = vmatpush.bf16.msrb.mxu1 %v9517_v15 }
 0x190   :  { %v1030_v6 = vpop.f32.mrf.mxu0 }
 0x191   :  { %v5299_v36 = vpop.eup %5298  ;;  %v9523_v6 = vld [vmem:[#allocation37_spill] sm:$0xff] }
 0x192   :  { %v1054_v43 = vmul.f32 %v5299_v36, %v1052_v37  ;;  %v5301_v52 = vpop.eup %5300  ;;  %v9522_v37 = vld [vmem:[#allocation91_spill] sm:$0xff] }
 0x193   :  { %1191 = vmatpush.bf16.msra.mxu3 %v9518_v55  ;;  %1250 = vmatpush.bf16.msrb.mxu1 %v9519_v50  ;;  %v1063_v13 = vmul.f32 0.5, %v5301_v52  ;;  %v9526_v52 = vld [vmem:[#allocation15_spill] sm:$0xff] }
 0x194   :  { %v6925_v48 = vadd.f32 %v1059_v1, %v1054_v43  ;;  %v9524_v1 = vld [vmem:[#allocation13_spill] sm:$0xff]  ;;  %v9525_v43 = vld [vmem:[#allocation40_spill] sm:$0xff] }
 0x195   :  { %v1064_v41 = vadd.f32 0.5, %v1063_v13  ;;  %v9527_v13 = vld [vmem:[#allocation42_spill] sm:$0xff] }
 0x196   :  { %5302 = vtanh.f32 %v6925_v48 }
 0x197   :  { %1192 = vmatpush.bf16.msra.mxu3 %v9520_v63  ;;  %1251 = vmatpush.bf16.msrb.mxu1 %v9521_v38 }
 0x19b   :  { %1193 = vmatpush.bf16.msra.mxu3 %v9522_v37  ;;  %1252 = vmatpush.bf16.msrb.mxu1 %v9523_v6 }
 0x19c   :  { %v5303_v12 = vpop.eup %5302 }
 0x19d   :  { %v1066_v21 = vmul.f32 %v5303_v12, %v1064_v41  ;;  %v9528_v41 = vld [vmem:[#allocation19_spill] sm:$0xff]  ;;  %v9529_v12 = vld [vmem:[#allocation44_spill] sm:$0xff] }
 0x19e   :  { %1194 = vmatmul.bf16.vlgmr.msra.gmra.mxu3 %v1068_v19  ;;  %v9530_v19 = vld [vmem:[#allocation23_spill] sm:$0xff] }
 0x19f   :  { %v6934_v36 = vpack.c.bf16 %v1066_v21, %v1066_v21  ;;  %1271 = vmatpush.bf16.msrb.mxu3 %v9524_v1  ;;  %1321 = vmatpush.bf16.msra.mxu1 %v9525_v43  ;;  %v9531_v21 = vld [vmem:[#allocation46_spill] sm:$0xff] }
 0x1a1   :  { %1077 = vmatmul.bf16.vlgmr.msra.gmra.mxu2 %v6934_v36  ;;  %1103 = vmatmul.bf16.vlgmr.msrb.gmra.mxu0 %v6934_v36 }
 0x1a2   :  { %1173 = vmatpush.bf16.msra.mxu2 %v6717_v33  ;;  %1232 = vmatpush.bf16.msrb.mxu0 %v5728_v3 }
 0x1a3   :  { %1253 = vmatmul.bf16.vlgmr.msrb.gmra.mxu1 %v6934_v36  ;;  %1272 = vmatpush.bf16.msrb.mxu3 %v9526_v52 }
 0x1a4   :  { %1322 = vmatpush.bf16.msra.mxu1 %v9527_v13  ;;  %v9532_v13 = vld [vmem:[#allocation27_spill] sm:$0xff] }
 0x1a6   :  { %1174 = vmatpush.bf16.msra.mxu2 %v6731_v32  ;;  %1233 = vmatpush.bf16.msrb.mxu0 %v5766_v16  ;;  %v9533_v32 = vld [vmem:[#allocation48_spill] sm:$0xff] }
 0x1a7   :  { %1273 = vmatpush.bf16.msrb.mxu3 %v9528_v41 }
 0x1a8   :  { %1323 = vmatpush.bf16.msra.mxu1 %v9529_v12 }
 0x1aa   :  { %1175 = vmatpush.bf16.msra.mxu2 %v6744_v14  ;;  %1234 = vmatpush.bf16.msrb.mxu0 %v5803_v29  ;;  %v9534_v29 = vld [vmem:[#allocation31_spill] sm:$0xff] }
 0x1ab   :  { %1274 = vmatpush.bf16.msrb.mxu3 %v9530_v19  ;;  %v9535_v19 = vld [vmem:[#allocation50_spill] sm:$0xff] }
 0x1ac   :  { %1324 = vmatpush.bf16.msra.mxu1 %v9531_v21 }
 0x1ae   :  { %1176 = vmatpush.bf16.msra.mxu2 %v6756_v2  ;;  %1235 = vmatpush.bf16.msrb.mxu0 %v5848_v44  ;;  %v9536_v44 = vld [vmem:[#allocation35_spill] sm:$0xff] }
 0x1af   :  { %1275 = vmatpush.bf16.msrb.mxu3 %v9532_v13  ;;  %v9537_v13 = vld [vmem:[#allocation52_spill] sm:$0xff] }
 0x1b0   :  { %1325 = vmatpush.bf16.msra.mxu1 %v9533_v32  ;;  %v9538_v32 = vld [vmem:[#allocation39_spill] sm:$0xff] }
 0x1b1   :  { %1129 = vmatmul.bf16.vlgmr.msrb.gmra.mxu2 %v6934_v36  ;;  %1155 = vmatmul.bf16.vlgmr.msra.gmra.mxu0 %v6934_v36 }
 0x1b2   :  { %1177 = vmatpush.bf16.msra.mxu2 %v6768_v40  ;;  %1236 = vmatpush.bf16.msrb.mxu0 %v5884_v56  ;;  %v9539_v40 = vld [vmem:[#allocation54_spill] sm:$0xff]  ;;  %v9540_v56 = vld [vmem:[#allocation41_spill] sm:$0xff] }
 0x1b3   :  { %1276 = vmatpush.bf16.msrb.mxu3 %v9534_v29 }
 0x1b4   :  { %1326 = vmatpush.bf16.msra.mxu1 %v9535_v19 }
 0x1b6   :  { %1178 = vmatpush.bf16.msra.mxu2 %v6782_v26  ;;  %1237 = vmatpush.bf16.msrb.mxu0 %v5920_v5 }
 0x1b7   :  { %1277 = vmatpush.bf16.msrb.mxu3 %v9536_v44 }
 0x1b8   :  { %1327 = vmatpush.bf16.msra.mxu1 %v9537_v13 }
 0x1ba   :  { %1179 = vmatpush.bf16.msra.mxu2 %v6794_v18  ;;  %1238 = vmatpush.bf16.msrb.mxu0 %v9488_v45  ;;  %v9541_v45 = vld [vmem:[#allocation43_spill] sm:$0xff] }
 0x1bb   :  { %1278 = vmatpush.bf16.msrb.mxu3 %v9538_v32 }
 0x1bc   :  { %1328 = vmatpush.bf16.msra.mxu1 %v9539_v40 }
 0x1be   :  { %1180 = vmatpush.bf16.msra.mxu2 %v6806_v28  ;;  %1239 = vmatpush.bf16.msrb.mxu0 %v9489_v9  ;;  %v9542_v28 = vld [vmem:[#allocation45_spill] sm:$0xff]  ;;  %v9546_v9 = vld [vmem:[#allocation70_spill] sm:$0xff] }
 0x1bf   :  { %1347 = vmatpush.bf16.msra.mxu3 %v9540_v56 }
 0x1c0   :  { %1373 = vmatpush.bf16.msrb.mxu1 %v6156_v31  ;;  %1279 = vmatmul.bf16.vlgmr.msrb.gmra.mxu3 %v6934_v36 }
 0x1c1   :  { %1181 = vmatmul.bf16.vlgmr.msra.gmra.mxu2 %v6934_v36  ;;  %1240 = vmatmul.bf16.vlgmr.msrb.gmra.mxu0 %v6934_v36 }
 0x1c2   :  { %1258 = vmatpush.bf16.msrb.mxu2 %v9490_v47  ;;  %1308 = vmatpush.bf16.msra.mxu0 %v9491_v27  ;;  %v9543_v27 = vld [vmem:[#allocation47_spill] sm:$0xff]  ;;  %v9544_v47 = vld [vmem:[#allocation68_spill] sm:$0xff] }
 0x1c3   :  { %1348 = vmatpush.bf16.msra.mxu3 %v9541_v45  ;;  %v9545_v45 = vld [vmem:[#allocation22_spill] sm:$0xff] }
 0x1c4   :  { %1374 = vmatpush.bf16.msrb.mxu1 %v6199_v24  ;;  %v9547_v24 = vld [vmem:[#allocation49_spill] sm:$0xff] }
 0x1c6   :  { %1259 = vmatpush.bf16.msrb.mxu2 %v9492_v20  ;;  %1309 = vmatpush.bf16.msra.mxu0 %v9493_v30  ;;  %v9548_v20 = vld [vmem:[#allocation72_spill] sm:$0xff] }
 0x1c7   :  { %1349 = vmatpush.bf16.msra.mxu3 %v9542_v28  ;;  %v9549_v28 = vld [vmem:[#allocation74_spill] sm:$0xff] }
 0x1c8   :  { %1375 = vmatpush.bf16.msrb.mxu1 %v6238_v35  ;;  %v9550_v35 = vld [vmem:[#allocation51_spill] sm:$0xff] }
 0x1ca   :  { %1260 = vmatpush.bf16.msrb.mxu2 %v9494_v54  ;;  %1310 = vmatpush.bf16.msra.mxu0 %v9495_v53  ;;  %v9551_v54 = vld [vmem:[#allocation76_spill] sm:$0xff]  ;;  %v9552_v53 = vld [vmem:[#allocation30_spill] sm:$0xff] }
 0x1cb   :  { %1350 = vmatpush.bf16.msra.mxu3 %v9543_v27 }
 0x1cc   :  { %1376 = vmatpush.bf16.msrb.mxu1 %v9544_v47  ;;  %v9553_v47 = vld [vmem:[#allocation53_spill] sm:$0xff] }
 0x1ce   :  { %1261 = vmatpush.bf16.msrb.mxu2 %v9545_v45  ;;  %1311 = vmatpush.bf16.msra.mxu0 %v9546_v9  ;;  %v9554_v45 = vld [vmem:[#allocation80_spill] sm:$0xff] }
 0x1cf   :  { %1351 = vmatpush.bf16.msra.mxu3 %v9547_v24 }
 0x1d0   :  { %1377 = vmatpush.bf16.msrb.mxu1 %v9548_v20  ;;  %v9555_v20 = vld [vmem:[#allocation56_spill] sm:$0xff] }
 0x1d2   :  { %1262 = vmatpush.bf16.msrb.mxu2 %v9498_v10  ;;  %1312 = vmatpush.bf16.msra.mxu0 %v9549_v28  ;;  %v9556_v10 = vld [vmem:[#allocation57_spill] sm:$0xff]  ;;  %v9557_v28 = vld [vmem:[#allocation84_spill] sm:$0xff] }
 0x1d3   :  { %1352 = vmatpush.bf16.msra.mxu3 %v9550_v35  ;;  %v9558_v35 = vld [vmem:[#allocation38_spill] sm:$0xff] }
 0x1d4   :  { %1378 = vmatpush.bf16.msrb.mxu1 %v9551_v54 }
 0x1d6   :  { %1263 = vmatpush.bf16.msrb.mxu2 %v9552_v53  ;;  %1313 = vmatpush.bf16.msra.mxu0 %v9501_v34  ;;  %v9559_v53 = vld [vmem:[#allocation92_spill] sm:$0xff] }
 0x1d7   :  { %1353 = vmatpush.bf16.msra.mxu3 %v9553_v47 }
 0x1d8   :  { %1379 = vmatpush.bf16.msrb.mxu1 %v9554_v45  ;;  %v9560_v45 = vld [vmem:[#allocation61_spill] sm:$0xff] }
 0x1da   :  { %1264 = vmatpush.bf16.msrb.mxu2 %v9502_v58  ;;  %1314 = vmatpush.bf16.msra.mxu0 %v6410_v23  ;;  %v9583_v23 = vld [vmem:[#allocation105_spill] sm:$0xff] }
 0x1db   :  { %1354 = vmatpush.bf16.msra.mxu3 %v9555_v20  ;;  %v9561_v20 = vld [vmem:[#allocation65_spill] sm:$0xff] }
 0x1dc   :  { %1380 = vmatpush.bf16.msrb.mxu1 %v9557_v28  ;;  %v9562_v28 = vld [vmem:[#allocation98_spill] sm:$0xff]  ;;  %v9585_v58 = vld [vmem:[#allocation109_spill] sm:$0xff] }
 0x1de   :  { %1265 = vmatpush.bf16.msrb.mxu2 %v9558_v35  ;;  %1315 = vmatpush.bf16.msra.mxu0 %v9559_v53  ;;  %v9563_v35 = vld [vmem:[#allocation69_spill] sm:$0xff]  ;;  %v9565_v53 = vld [vmem:[#allocation100_spill] sm:$0xff] }
 0x1df   :  { %1399 = vmatpush.bf16.msrb.mxu3 %v9556_v10  ;;  %v9581_v10 = vld [vmem:[#allocation101_spill] sm:$0xff] }
 0x1e1   :  { %1266 = vmatmul.bf16.vlgmr.msrb.gmra.mxu2 %v6934_v36  ;;  %v9567_v36 = vld [vmem:[#allocation75_spill] sm:$0xff] }
 0x1e2   :  { %1334 = vmatpush.bf16.msra.mxu2 %v9504_v39  ;;  %1360 = vmatpush.bf16.msrb.mxu0 %v6542_v49  ;;  %v9564_v39 = vld [vmem:[#allocation71_spill] sm:$0xff]  ;;  %v9566_v49 = vld [vmem:[#allocation73_spill] sm:$0xff] }
 0x1e3   :  { %1400 = vmatpush.bf16.msrb.mxu3 %v9560_v45  ;;  %v9568_v45 = vld [vmem:[#allocation102_spill] sm:$0xff] }
 0x1e6   :  { %1335 = vmatpush.bf16.msra.mxu2 %v9505_v59  ;;  %1361 = vmatpush.bf16.msrb.mxu0 %v6559_v61  ;;  %v9569_v59 = vld [vmem:[#allocation77_spill] sm:$0xff]  ;;  %v9570_v61 = vld [vmem:[#allocation79_spill] sm:$0xff] }
 0x1e7   :  { %1401 = vmatpush.bf16.msrb.mxu3 %v9561_v20  ;;  %v9571_v20 = vld [vmem:[#allocation104_spill] sm:$0xff] }
 0x1ea   :  { %1336 = vmatpush.bf16.msra.mxu2 %v9506_v60  ;;  %1362 = vmatpush.bf16.msrb.mxu0 %v9562_v28  ;;  %v9572_v60 = vld [vmem:[#allocation81_spill] sm:$0xff]  ;;  %v9573_v28 = vld [vmem:[#allocation83_spill] sm:$0xff] }
 0x1eb   :  { %1402 = vmatpush.bf16.msrb.mxu3 %v9563_v35  ;;  %v9574_v35 = vld [vmem:[#allocation106_spill] sm:$0xff] }
 0x1ee   :  { %1337 = vmatpush.bf16.msra.mxu2 %v9564_v39  ;;  %1363 = vmatpush.bf16.msrb.mxu0 %v9565_v53  ;;  %v9575_v39 = vld [vmem:[#allocation85_spill] sm:$0xff] }
 0x1ef   :  { %1403 = vmatpush.bf16.msrb.mxu3 %v9566_v49  ;;  %v9576_v53 = vld [vmem:[#allocation93_spill] sm:$0xff]  ;;  %v9577_v49 = vld [vmem:[#allocation95_spill] sm:$0xff] }
 0x1f2   :  { %1338 = vmatpush.bf16.msra.mxu2 %v9567_v36  ;;  %1364 = vmatpush.bf16.msrb.mxu0 %v9568_v45  ;;  %v9578_v36 = vld [vmem:[#allocation108_spill] sm:$0xff]  ;;  %v9579_v45 = vld [vmem:[#allocation97_spill] sm:$0xff] }
 0x1f3   :  { %1404 = vmatpush.bf16.msrb.mxu3 %v9569_v59 }
 0x1f6   :  { %1339 = vmatpush.bf16.msra.mxu2 %v9570_v61  ;;  %1365 = vmatpush.bf16.msrb.mxu0 %v9571_v20  ;;  %v9580_v61 = vld [vmem:[#allocation99_spill] sm:$0xff] }
 0x1f7   :  { %1405 = vmatpush.bf16.msrb.mxu3 %v9572_v60 }
 0x1fa   :  { %1340 = vmatpush.bf16.msra.mxu2 %v9573_v28  ;;  %1366 = vmatpush.bf16.msrb.mxu0 %v9574_v35  ;;  %v9582_v28 = vld [vmem:[#allocation103_spill] sm:$0xff] }
 0x1fb   :  { %1406 = vmatpush.bf16.msrb.mxu3 %v9575_v39  ;;  %v1117_v59 = vpop.f32.mrf.mxu1 }
 0x1fe   :  { %1341 = vmatpush.bf16.msra.mxu2 %v9576_v53  ;;  %1367 = vmatpush.bf16.msrb.mxu0 %v9578_v36  ;;  %v9584_v53 = vld [vmem:[#allocation107_spill] sm:$0xff] }
 0x201   :  { %v1091_v20 = vpop.f32.mrf.mxu3 }
 0x202   :  { %1386 = vmatpush.bf16.msrb.mxu2 %v9577_v49 }
 0x203   :  { %v1119_v60 = vpop.f32.mrf.mxu1 }
 0x204   :  { %v9586_v60 = vld [vmem:[#allocation115_spill] sm:$0xff] }
 0x206   :  { %1387 = vmatpush.bf16.msrb.mxu2 %v9579_v45 }
 0x209   :  { %v1093_v35 = vpop.f32.mrf.mxu3 }
 0x20a   :  { %1388 = vmatpush.bf16.msrb.mxu2 %v9580_v61 }
 0x20b   :  { %v1169_v39 = vpop.f32.mrf.mxu1 }
 0x20e   :  { %1389 = vmatpush.bf16.msrb.mxu2 %v9581_v10 }
 0x211   :  { %v1143_v49 = vpop.f32.mrf.mxu3 }
 0x212   :  { %1390 = vmatpush.bf16.msrb.mxu2 %v9582_v28 }
 0x213   :  { %v1171_v36 = vpop.f32.mrf.mxu1 }
 0x216   :  { %1391 = vmatpush.bf16.msrb.mxu2 %v9583_v23 }
 0x219   :  { %v1145_v45 = vpop.f32.mrf.mxu3 }
 0x21a   :  { %1392 = vmatpush.bf16.msrb.mxu2 %v9584_v53  ;;  %v9587_v45 = vld [vmem:[#allocation116_spill] sm:$0xff] }
 0x21e   :  { %1393 = vmatpush.bf16.msrb.mxu2 %v9585_v58  ;;  %v1104_v47 = vpop.f32.mrf.mxu0 }
 0x21f   :  { %v1105_v9 = vadd.f32 %v1104_v47, %v9586_v60 }
 0x220   :  { %v1254_v34 = vpop.f32.mrf.mxu1 }
 0x221   :  { %v1195_v54 = vpop.f32.mrf.mxu3  ;;  %v1118_v35 = vadd.f32 %v1117_v59, %v1105_v9 }
 0x223   :  { %v1199_v53 = vmul.f32 0.5, %v1118_v35 }
 0x224   :  { %v1078_v61 = vpop.f32.mrf.mxu2 }
 0x225   :  { %v1079_v23 = vadd.f32 %v1078_v61, %v6873_v22  ;;  %5304 = vtanh.f32 %v1199_v53 }
 0x226   :  { %v1106_v24 = vpop.f32.mrf.mxu0 }
 0x227   :  { %v1092_v31 = vadd.f32 %v1091_v20, %v1079_v23 }
 0x228   :  { %v1256_v10 = vpop.f32.mrf.mxu1 }
 0x229   :  { %v1197_v27 = vpop.f32.mrf.mxu3  ;;  %v1211_v36 = vmul.f32 0.5, %v1092_v31 }
 0x22b   :  { %5306 = vtanh.f32 %v1211_v36  ;;  %v5305_v47 = vpop.eup %5304 }
 0x22c   :  { %v1080_v28 = vpop.f32.mrf.mxu2  ;;  %v1201_v59 = vmul.f32 0.5, %v5305_v47 }
 0x22e   :  { %v1156_v30 = vpop.f32.mrf.mxu0  ;;  %v1202_v20 = vadd.f32 0.5, %v1201_v59 }
 0x22f   :  { %v1157_v32 = vadd.f32 %v1156_v30, %v6882_v4 }
 0x231   :  { %v1170_v28 = vadd.f32 %v1169_v39, %v1157_v32  ;;  %v5307_v61 = vpop.eup %5306 }
 0x232   :  { %v1213_v53 = vmul.f32 0.5, %v5307_v61 }
 0x234   :  { %v1130_v56 = vpop.f32.mrf.mxu2  ;;  %v1214_v30 = vadd.f32 0.5, %v1213_v53 }
 0x235   :  { %v1131_v58 = vadd.f32 %v1130_v56, %v9587_v45 }
 0x236   :  { %v1158_v40 = vpop.f32.mrf.mxu0 }
 0x237   :  { %v1144_v24 = vadd.f32 %v1143_v49, %v1131_v58  ;;  %v1203_v49 = vmul.f32 %v1202_v20, %v6891_v8  ;;  %v5074_v8 = vld [vmem:[%s9138_s0 + $0x48] sm:$0xff] }
 0x238   :  { %v1285_v61 = vadd.f32 %v5074_v8, %v1254_v34  ;;  %v5076_v34 = vld [vmem:[%s9138_s0 + $0x58] sm:$0xff] }
 0x239   :  { %v1204_v10 = vmul.f32 0.5, %v1144_v24 }
 0x23b   :  { %5308 = vtanh.f32 %v1204_v10 }
 0x23c   :  { %v1132_v9 = vpop.f32.mrf.mxu2  ;;  %5310 = vtanh.f32 %v1170_v28 }
 0x23e   :  { %v1241_v27 = vpop.f32.mrf.mxu0 }
 0x241   :  { %v5309_v23 = vpop.eup %5308 }
 0x242   :  { %v1206_v31 = vmul.f32 0.5, %v5309_v23  ;;  %v5311_v45 = vpop.eup %5310 }
 0x243   :  { %v1280_v35 = vpop.f32.mrf.mxu3  ;;  %v1215_v24 = vmul.f32 %v5311_v45, %v1214_v30  ;;  %v5073_v45 = vld [vmem:[%s9138_s0 + $0x40] sm:$0xff]  ;;  %v5075_v30 = vld [vmem:[%s9138_s0 + $0x50] sm:$0xff] }
 0x244   :  { %v1207_v56 = vadd.f32 0.5, %v1206_v31  ;;  %v1182_v40 = vpop.f32.mrf.mxu2  ;;  %v1284_v20 = vadd.f32 %v5073_v45, %v1241_v27  ;;  %v1287_v27 = vadd.f32 %v5076_v34, %v1280_v35  ;;  %v9589_v34 = vld [vmem:[#allocation110_spill] sm:$0xff] }
 0x245   :  { %v1183_v58 = vadd.f32 %v1182_v40, %v6886_v62 }
 0x246   :  { %v1208_v39 = vmul.f32 %v1207_v56, %v6925_v48  ;;  %v1243_v36 = vpop.f32.mrf.mxu0  ;;  %v1294_v56 = vmul.f32 0.5, %v1285_v61 }
 0x247   :  { %v1196_v32 = vadd.f32 %v1195_v54, %v1183_v58  ;;  %v1288_v58 = vmul.f32 0.5, %v1284_v20 }
 0x248   :  { %v1209_v10 = vadd.f32 %v1208_v39, %v1203_v49 }
 0x249   :  { %v1217_v47 = vmul.f32 0.5, %v1196_v32 }
 0x24a   :  { %v7048_v28 = vadd.f32 %v1215_v24, %v1209_v10 }
 0x24b   :  { %5312 = vtanh.f32 %v1217_v47  ;;  %v1282_v9 = vpop.f32.mrf.mxu3  ;;  %v1300_v47 = vmul.f32 0.5, %v1287_v27  ;;  %v9590_v27 = vld [vmem:[#allocation16_spill] sm:$0xff] }
 0x24c   :  { %5072 = vst [vmem:[%s9143_s5 + $0x8] sm:$0xff] %v7048_v28  ;;  %v1184_v59 = vpop.f32.mrf.mxu2  ;;  %5314 = vtanh.f32 %v7048_v28 }
 0x24d   :  { %5316 = vtanh.f32 %v1294_v56 }
 0x24e   :  { %5318 = vtanh.f32 %v1288_v58  ;;  %v9588_v58 = vld [vmem:[#allocation42_spill] sm:$0xff] }
 0x251   :  { %v5313_v54 = vpop.eup %5312 }
 0x252   :  { %v1219_v23 = vmul.f32 0.5, %v5313_v54  ;;  %v5315_v31 = vpop.eup %5314 }
 0x253   :  { %v5317_v39 = vpop.eup %5316 }
 0x254   :  { %v1220_v53 = vadd.f32 0.5, %v1219_v23  ;;  %v5319_v36 = vpop.eup %5318  ;;  %v1296_v10 = vmul.f32 0.5, %v5317_v39  ;;  %v9593_v39 = vld [vmem:[#allocation27_spill] sm:$0xff] }
 0x255   :  { %v1290_v35 = vmul.f32 0.5, %v5319_v36  ;;  %v9595_v36 = vld [vmem:[#allocation111_spill] sm:$0xff] }
 0x256   :  { %v1222_v40 = vmul.f32 %v5315_v31, %v1220_v53  ;;  %v1297_v9 = vadd.f32 0.5, %v1296_v10  ;;  %v9597_v10 = vld [vmem:[#allocation32_spill] sm:$0xff] }
 0x257   :  { %v1291_v59 = vadd.f32 0.5, %v1290_v35  ;;  %v9599_v35 = vld [vmem:[#allocation54_spill] sm:$0xff] }
 0x258   :  { %5071 = vst [vmem:[%s9142_s4 + $0x8] sm:$0xff] %v1222_v40  ;;  %v1307_v49 = vpack.c.bf16 %v1222_v40, %v1222_v40  ;;  %v1298_v45 = vmul.f32 %v1297_v9, %v6925_v48  ;;  %v9600_v9 = vld [vmem:[#allocation41_spill] sm:$0xff] }
 0x25a   :  { %1329 = vmatmul.bf16.vlgmr.msra.gmra.mxu1 %v1307_v49  ;;  %1355 = vmatmul.bf16.vlgmr.msra.gmra.mxu3 %v1307_v49 }
 0x25b   :  { %1425 = vmatpush.bf16.msra.mxu1 %v6426_v51  ;;  %1484 = vmatpush.bf16.msra.mxu3 %v5739_v7 }
 0x25f   :  { %1426 = vmatpush.bf16.msra.mxu1 %v6441_v42  ;;  %1485 = vmatpush.bf16.msra.mxu3 %v5768_v17 }
 0x263   :  { %1427 = vmatpush.bf16.msra.mxu1 %v9512_v57  ;;  %1486 = vmatpush.bf16.msra.mxu3 %v9513_v11 }
 0x264   :  { %v1267_v32 = vpop.f32.mrf.mxu2 }
 0x265   :  { %v1286_v24 = vadd.f32 %v5075_v30, %v1267_v32  ;;  %v9592_v30 = vld [vmem:[#allocation20_spill] sm:$0xff] }
 0x266   :  { %v9594_v32 = vld [vmem:[#allocation48_spill] sm:$0xff] }
 0x267   :  { %5320 = vtanh.f32 %v1286_v24  ;;  %1428 = vmatpush.bf16.msra.mxu1 %v9514_v46  ;;  %1487 = vmatpush.bf16.msra.mxu3 %v9515_v0  ;;  %v9596_v24 = vld [vmem:[#allocation24_spill] sm:$0xff] }
 0x268   :  { %5322 = vtanh.f32 %v1300_v47  ;;  %v9598_v47 = vld [vmem:[#allocation39_spill] sm:$0xff] }
 0x26a   :  { %1381 = vmatmul.bf16.vlgmr.msrb.gmra.mxu1 %v1307_v49  ;;  %1407 = vmatmul.bf16.vlgmr.msrb.gmra.mxu3 %v1307_v49 }
 0x26b   :  { %1429 = vmatpush.bf16.msra.mxu1 %v9516_v25  ;;  %1488 = vmatpush.bf16.msra.mxu3 %v9517_v15 }
 0x26c   :  { %v1269_v8 = vpop.f32.mrf.mxu2 }
 0x26d   :  { %v5321_v54 = vpop.eup %5320  ;;  %v9602_v8 = vld [vmem:[#allocation114_spill] sm:$0xff] }
 0x26e   :  { %v1293_v61 = vmul.f32 %v5321_v54, %v1291_v59  ;;  %v5323_v23 = vpop.eup %5322  ;;  %v9601_v59 = vld [vmem:[#allocation55_spill] sm:$0xff]  ;;  %v9603_v54 = vld [vmem:[#allocation36_spill] sm:$0xff] }
 0x26f   :  { %1430 = vmatpush.bf16.msra.mxu1 %v9518_v55  ;;  %1489 = vmatpush.bf16.msra.mxu3 %v9519_v50  ;;  %v1302_v53 = vmul.f32 0.5, %v5323_v23  ;;  %v9606_v23 = vld [vmem:[#allocation43_spill] sm:$0xff] }
 0x270   :  { %v7081_v20 = vadd.f32 %v1298_v45, %v1293_v61  ;;  %v9604_v45 = vld [vmem:[#allocation12_spill] sm:$0xff]  ;;  %v9605_v61 = vld [vmem:[#allocation58_spill] sm:$0xff] }
 0x271   :  { %v1303_v48 = vadd.f32 0.5, %v1302_v53  ;;  %v9607_v53 = vld [vmem:[#allocation60_spill] sm:$0xff] }
 0x272   :  { %5324 = vtanh.f32 %v7081_v20 }
 0x273   :  { %1431 = vmatpush.bf16.msra.mxu1 %v9520_v63  ;;  %1490 = vmatpush.bf16.msra.mxu3 %v9521_v38 }
 0x277   :  { %1432 = vmatpush.bf16.msra.mxu1 %v9522_v37  ;;  %1491 = vmatpush.bf16.msra.mxu3 %v9523_v6 }
 0x278   :  { %v5325_v31 = vpop.eup %5324 }
 0x279   :  { %v1305_v56 = vmul.f32 %v5325_v31, %v1303_v48  ;;  %v9608_v48 = vld [vmem:[#allocation14_spill] sm:$0xff] }
 0x27a   :  { %1433 = vmatmul.bf16.vlgmr.msra.gmra.mxu1 %v1307_v49  ;;  %v9591_v49 = vld [vmem:[#allocation23_spill] sm:$0xff]  ;;  %v9609_v31 = vld [vmem:[#allocation62_spill] sm:$0xff] }
 0x27b   :  { %v7090_v40 = vpack.c.bf16 %v1305_v56, %v1305_v56  ;;  %1510 = vmatpush.bf16.msrb.mxu1 %v9524_v1  ;;  %1560 = vmatpush.bf16.msrb.mxu3 %v9525_v43  ;;  %v9610_v56 = vld [vmem:[#allocation45_spill] sm:$0xff] }
 0x27d   :  { %1316 = vmatmul.bf16.vlgmr.msra.gmra.mxu0 %v7090_v40  ;;  %1342 = vmatmul.bf16.vlgmr.msra.gmra.mxu2 %v7090_v40 }
 0x27e   :  { %1412 = vmatpush.bf16.msra.mxu0 %v6717_v33  ;;  %1471 = vmatpush.bf16.msra.mxu2 %v5728_v3 }
 0x27f   :  { %1492 = vmatmul.bf16.vlgmr.msra.gmra.mxu3 %v7090_v40  ;;  %1511 = vmatpush.bf16.msrb.mxu1 %v9526_v52 }
 0x280   :  { %1561 = vmatpush.bf16.msrb.mxu3 %v9588_v58 }
 0x282   :  { %1413 = vmatpush.bf16.msra.mxu0 %v9589_v34  ;;  %1472 = vmatpush.bf16.msra.mxu2 %v5766_v16 }
 0x283   :  { %1512 = vmatpush.bf16.msrb.mxu1 %v9528_v41 }
 0x284   :  { %1562 = vmatpush.bf16.msrb.mxu3 %v9529_v12 }
 0x286   :  { %1414 = vmatpush.bf16.msra.mxu0 %v6744_v14  ;;  %1473 = vmatpush.bf16.msra.mxu2 %v9590_v27 }
 0x287   :  { %1513 = vmatpush.bf16.msrb.mxu1 %v9591_v49 }
 0x288   :  { %1563 = vmatpush.bf16.msrb.mxu3 %v9531_v21 }
 0x28a   :  { %1415 = vmatpush.bf16.msra.mxu0 %v6756_v2  ;;  %1474 = vmatpush.bf16.msra.mxu2 %v9592_v30 }
 0x28b   :  { %1514 = vmatpush.bf16.msrb.mxu1 %v9593_v39 }
 0x28c   :  { %1564 = vmatpush.bf16.msrb.mxu3 %v9594_v32 }
 0x28d   :  { %1368 = vmatmul.bf16.vlgmr.msrb.gmra.mxu0 %v7090_v40  ;;  %1394 = vmatmul.bf16.vlgmr.msrb.gmra.mxu2 %v7090_v40 }
 0x28e   :  { %1416 = vmatpush.bf16.msra.mxu0 %v9595_v36  ;;  %1475 = vmatpush.bf16.msra.mxu2 %v9596_v24 }
 0x28f   :  { %1515 = vmatpush.bf16.msrb.mxu1 %v9534_v29 }
 0x290   :  { %1565 = vmatpush.bf16.msrb.mxu3 %v9535_v19 }
 0x292   :  { %1417 = vmatpush.bf16.msra.mxu0 %v6782_v26  ;;  %1476 = vmatpush.bf16.msra.mxu2 %v5920_v5 }
 0x293   :  { %1516 = vmatpush.bf16.msrb.mxu1 %v9536_v44 }
 0x294   :  { %1566 = vmatpush.bf16.msrb.mxu3 %v9537_v13 }
 0x296   :  { %1418 = vmatpush.bf16.msra.mxu0 %v6794_v18  ;;  %1477 = vmatpush.bf16.msra.mxu2 %v9597_v10 }
 0x297   :  { %1517 = vmatpush.bf16.msrb.mxu1 %v9598_v47  ;;  %v9665_v47 = vld [vmem:[#allocation109_spill] sm:$0xff] }
 0x298   :  { %1567 = vmatpush.bf16.msrb.mxu3 %v9599_v35  ;;  %v9663_v35 = vld [vmem:[#allocation105_spill] sm:$0xff] }
 0x29a   :  { %1419 = vmatpush.bf16.msra.mxu0 %v9602_v8  ;;  %1478 = vmatpush.bf16.msra.mxu2 %v9603_v54  ;;  %v9611_v54 = vld [vmem:[#allocation64_spill] sm:$0xff]  ;;  %v9613_v8 = vld [vmem:[#allocation66_spill] sm:$0xff] }
 0x29b   :  { %1586 = vmatpush.bf16.msra.mxu1 %v9600_v9  ;;  %v9617_v9 = vld [vmem:[#allocation70_spill] sm:$0xff] }
 0x29c   :  { %1612 = vmatpush.bf16.msra.mxu3 %v9601_v59  ;;  %1518 = vmatmul.bf16.vlgmr.msrb.gmra.mxu1 %v7090_v40  ;;  %v9615_v59 = vld [vmem:[#allocation68_spill] sm:$0xff] }
 0x29d   :  { %1420 = vmatmul.bf16.vlgmr.msra.gmra.mxu0 %v7090_v40  ;;  %1479 = vmatmul.bf16.vlgmr.msra.gmra.mxu2 %v7090_v40 }
 0x29e   :  { %1497 = vmatpush.bf16.msrb.mxu0 %v9604_v45  ;;  %1547 = vmatpush.bf16.msrb.mxu2 %v9605_v61  ;;  %v9612_v45 = vld [vmem:[#allocation18_spill] sm:$0xff]  ;;  %v9614_v61 = vld [vmem:[#allocation47_spill] sm:$0xff] }
 0x29f   :  { %1587 = vmatpush.bf16.msra.mxu1 %v9606_v23  ;;  %v9616_v23 = vld [vmem:[#allocation22_spill] sm:$0xff] }
 0x2a0   :  { %1613 = vmatpush.bf16.msra.mxu3 %v9607_v53  ;;  %v9618_v53 = vld [vmem:[#allocation49_spill] sm:$0xff] }
 0x2a2   :  { %1498 = vmatpush.bf16.msrb.mxu0 %v9608_v48  ;;  %1548 = vmatpush.bf16.msrb.mxu2 %v9609_v31  ;;  %v9619_v48 = vld [vmem:[#allocation72_spill] sm:$0xff]  ;;  %v9620_v31 = vld [vmem:[#allocation26_spill] sm:$0xff] }
 0x2a3   :  { %1588 = vmatpush.bf16.msra.mxu1 %v9610_v56  ;;  %v9621_v56 = vld [vmem:[#allocation74_spill] sm:$0xff] }
 0x2a4   :  { %1614 = vmatpush.bf16.msra.mxu3 %v9611_v54  ;;  %v9622_v54 = vld [vmem:[#allocation51_spill] sm:$0xff] }
 0x2a6   :  { %1499 = vmatpush.bf16.msrb.mxu0 %v9612_v45  ;;  %1549 = vmatpush.bf16.msrb.mxu2 %v9613_v8  ;;  %v9623_v45 = vld [vmem:[#allocation76_spill] sm:$0xff]  ;;  %v9624_v8 = vld [vmem:[#allocation30_spill] sm:$0xff] }
 0x2a7   :  { %1589 = vmatpush.bf16.msra.mxu1 %v9614_v61  ;;  %v9625_v61 = vld [vmem:[#allocation78_spill] sm:$0xff] }
 0x2a8   :  { %1615 = vmatpush.bf16.msra.mxu3 %v9615_v59  ;;  %v9626_v59 = vld [vmem:[#allocation53_spill] sm:$0xff] }
 0x2aa   :  { %1500 = vmatpush.bf16.msrb.mxu0 %v9616_v23  ;;  %1550 = vmatpush.bf16.msrb.mxu2 %v9617_v9  ;;  %v9627_v23 = vld [vmem:[#allocation80_spill] sm:$0xff]  ;;  %v9628_v9 = vld [vmem:[#allocation34_spill] sm:$0xff] }
 0x2ab   :  { %1590 = vmatpush.bf16.msra.mxu1 %v9618_v53  ;;  %v9629_v53 = vld [vmem:[#allocation82_spill] sm:$0xff] }
 0x2ac   :  { %1616 = vmatpush.bf16.msra.mxu3 %v9619_v48  ;;  %v9630_v48 = vld [vmem:[#allocation56_spill] sm:$0xff] }
 0x2ae   :  { %1501 = vmatpush.bf16.msrb.mxu0 %v9620_v31  ;;  %1551 = vmatpush.bf16.msrb.mxu2 %v9621_v56  ;;  %v9631_v31 = vld [vmem:[#allocation57_spill] sm:$0xff]  ;;  %v9632_v56 = vld [vmem:[#allocation84_spill] sm:$0xff] }
 0x2af   :  { %1591 = vmatpush.bf16.msra.mxu1 %v9622_v54  ;;  %v9633_v54 = vld [vmem:[#allocation38_spill] sm:$0xff] }
 0x2b0   :  { %1617 = vmatpush.bf16.msra.mxu3 %v9623_v45  ;;  %v9634_v45 = vld [vmem:[#allocation59_spill] sm:$0xff] }
 0x2b2   :  { %1502 = vmatpush.bf16.msrb.mxu0 %v9624_v8  ;;  %1552 = vmatpush.bf16.msrb.mxu2 %v9625_v61  ;;  %v9635_v8 = vld [vmem:[#allocation92_spill] sm:$0xff]  ;;  %v9636_v61 = vld [vmem:[#allocation94_spill] sm:$0xff] }
 0x2b3   :  { %1592 = vmatpush.bf16.msra.mxu1 %v9626_v59  ;;  %v9661_v59 = vld [vmem:[#allocation101_spill] sm:$0xff] }
 0x2b4   :  { %1618 = vmatpush.bf16.msra.mxu3 %v9627_v23  ;;  %v9637_v23 = vld [vmem:[#allocation61_spill] sm:$0xff] }
 0x2b6   :  { %1503 = vmatpush.bf16.msrb.mxu0 %v9628_v9  ;;  %1553 = vmatpush.bf16.msrb.mxu2 %v9629_v53  ;;  %v9638_v9 = vld [vmem:[#allocation63_spill] sm:$0xff]  ;;  %v9639_v53 = vld [vmem:[#allocation96_spill] sm:$0xff] }
 0x2b7   :  { %1593 = vmatpush.bf16.msra.mxu1 %v9630_v48  ;;  %v9640_v48 = vld [vmem:[#allocation65_spill] sm:$0xff] }
 0x2b8   :  { %1619 = vmatpush.bf16.msra.mxu3 %v9632_v56  ;;  %v9642_v56 = vld [vmem:[#allocation98_spill] sm:$0xff] }
 0x2ba   :  { %1504 = vmatpush.bf16.msrb.mxu0 %v9633_v54  ;;  %1554 = vmatpush.bf16.msrb.mxu2 %v9635_v8  ;;  %v9643_v54 = vld [vmem:[#allocation69_spill] sm:$0xff]  ;;  %v9645_v8 = vld [vmem:[#allocation100_spill] sm:$0xff] }
 0x2bb   :  { %1638 = vmatpush.bf16.msrb.mxu1 %v9631_v31  ;;  %v9641_v31 = vld [vmem:[#allocation67_spill] sm:$0xff] }
 0x2bd   :  { %1505 = vmatmul.bf16.vlgmr.msrb.gmra.mxu0 %v7090_v40  ;;  %v9647_v40 = vld [vmem:[#allocation75_spill] sm:$0xff] }
 0x2be   :  { %1573 = vmatpush.bf16.msra.mxu0 %v9634_v45  ;;  %1599 = vmatpush.bf16.msra.mxu2 %v9636_v61  ;;  %v9644_v45 = vld [vmem:[#allocation71_spill] sm:$0xff]  ;;  %v9646_v61 = vld [vmem:[#allocation73_spill] sm:$0xff] }
 0x2bf   :  { %1639 = vmatpush.bf16.msrb.mxu1 %v9637_v23  ;;  %v9648_v23 = vld [vmem:[#allocation102_spill] sm:$0xff] }
 0x2c2   :  { %1574 = vmatpush.bf16.msra.mxu0 %v9638_v9  ;;  %1600 = vmatpush.bf16.msra.mxu2 %v9639_v53  ;;  %v9649_v9 = vld [vmem:[#allocation77_spill] sm:$0xff]  ;;  %v9650_v53 = vld [vmem:[#allocation79_spill] sm:$0xff] }
 0x2c3   :  { %1640 = vmatpush.bf16.msrb.mxu1 %v9640_v48  ;;  %v9651_v48 = vld [vmem:[#allocation104_spill] sm:$0xff] }
 0x2c6   :  { %1575 = vmatpush.bf16.msra.mxu0 %v9641_v31  ;;  %1601 = vmatpush.bf16.msra.mxu2 %v9642_v56  ;;  %v9652_v31 = vld [vmem:[#allocation81_spill] sm:$0xff]  ;;  %v9653_v56 = vld [vmem:[#allocation83_spill] sm:$0xff] }
 0x2c7   :  { %1641 = vmatpush.bf16.msrb.mxu1 %v9643_v54  ;;  %v9654_v54 = vld [vmem:[#allocation106_spill] sm:$0xff] }
 0x2ca   :  { %1576 = vmatpush.bf16.msra.mxu0 %v9644_v45  ;;  %1602 = vmatpush.bf16.msra.mxu2 %v9645_v8  ;;  %v9655_v45 = vld [vmem:[#allocation85_spill] sm:$0xff] }
 0x2cb   :  { %1642 = vmatpush.bf16.msrb.mxu1 %v9646_v61  ;;  %v9656_v8 = vld [vmem:[#allocation93_spill] sm:$0xff]  ;;  %v9657_v61 = vld [vmem:[#allocation95_spill] sm:$0xff] }
 0x2ce   :  { %1577 = vmatpush.bf16.msra.mxu0 %v9647_v40  ;;  %1603 = vmatpush.bf16.msra.mxu2 %v9648_v23  ;;  %v9658_v40 = vld [vmem:[#allocation108_spill] sm:$0xff]  ;;  %v9659_v23 = vld [vmem:[#allocation97_spill] sm:$0xff] }
 0x2cf   :  { %1643 = vmatpush.bf16.msrb.mxu1 %v9649_v9 }
 0x2d2   :  { %1578 = vmatpush.bf16.msra.mxu0 %v9650_v53  ;;  %1604 = vmatpush.bf16.msra.mxu2 %v9651_v48  ;;  %v9660_v53 = vld [vmem:[#allocation99_spill] sm:$0xff] }
 0x2d3   :  { %1644 = vmatpush.bf16.msrb.mxu1 %v9652_v31 }
 0x2d6   :  { %1579 = vmatpush.bf16.msra.mxu0 %v9653_v56  ;;  %1605 = vmatpush.bf16.msra.mxu2 %v9654_v54  ;;  %v9662_v56 = vld [vmem:[#allocation103_spill] sm:$0xff] }
 0x2d7   :  { %1645 = vmatpush.bf16.msrb.mxu1 %v9655_v45  ;;  %v1330_v9 = vpop.f32.mrf.mxu1 }
 0x2da   :  { %1580 = vmatpush.bf16.msra.mxu0 %v9656_v8  ;;  %1606 = vmatpush.bf16.msra.mxu2 %v9658_v40  ;;  %v9664_v8 = vld [vmem:[#allocation107_spill] sm:$0xff] }
 0x2dd   :  { %v1356_v48 = vpop.f32.mrf.mxu3 }
 0x2de   :  { %1625 = vmatpush.bf16.msrb.mxu0 %v9657_v61 }
 0x2df   :  { %v1332_v31 = vpop.f32.mrf.mxu1 }
 0x2e2   :  { %1626 = vmatpush.bf16.msrb.mxu0 %v9659_v23 }
 0x2e5   :  { %v1358_v54 = vpop.f32.mrf.mxu3 }
 0x2e6   :  { %1627 = vmatpush.bf16.msrb.mxu0 %v9660_v53 }
 0x2e7   :  { %v1382_v45 = vpop.f32.mrf.mxu1 }
 0x2ea   :  { %1628 = vmatpush.bf16.msrb.mxu0 %v9661_v59 }
 0x2ed   :  { %v1408_v61 = vpop.f32.mrf.mxu3 }
 0x2ee   :  { %1629 = vmatpush.bf16.msrb.mxu0 %v9662_v56 }
 0x2ef   :  { %v1384_v40 = vpop.f32.mrf.mxu1 }
 0x2f0   :  { %v9666_v40 = vld [vmem:[#allocation116_spill] sm:$0xff] }
 0x2f2   :  { %1630 = vmatpush.bf16.msrb.mxu0 %v9663_v35 }
 0x2f5   :  { %v1410_v23 = vpop.f32.mrf.mxu3 }
 0x2f6   :  { %1631 = vmatpush.bf16.msrb.mxu0 %v9664_v8 }
 0x2f7   :  { %v1434_v18 = vpop.f32.mrf.mxu1 }
 0x2fa   :  { %1632 = vmatpush.bf16.msrb.mxu0 %v9665_v47  ;;  %v1317_v10 = vpop.f32.mrf.mxu0 }
 0x2fb   :  { %v1318_v56 = vadd.f32 %v1317_v10, %v6873_v22 }
 0x2fd   :  { %v1331_v35 = vadd.f32 %v1330_v9, %v1318_v56 }
 0x2ff   :  { %v1436_v44 = vpop.f32.mrf.mxu1  ;;  %v1450_v29 = vmul.f32 0.5, %v1331_v35 }
 0x300   :  { %v1343_v53 = vpop.f32.mrf.mxu2 }
 0x301   :  { %v1344_v13 = vadd.f32 %v1343_v53, %v9586_v60 }
 0x302   :  { %v1493_v59 = vpop.f32.mrf.mxu3  ;;  %v1319_v31 = vpop.f32.mrf.mxu0 }
 0x303   :  { %v1357_v54 = vadd.f32 %v1356_v48, %v1344_v13 }
 0x305   :  { %v1438_v5 = vmul.f32 0.5, %v1357_v54 }
 0x307   :  { %5326 = vtanh.f32 %v1438_v5 }
 0x308   :  { %v1345_v26 = vpop.f32.mrf.mxu2  ;;  %5328 = vtanh.f32 %v1450_v29 }
 0x30a   :  { %v1495_v8 = vpop.f32.mrf.mxu3  ;;  %v1369_v19 = vpop.f32.mrf.mxu0 }
 0x30b   :  { %v1370_v23 = vadd.f32 %v1369_v19, %v9666_v40 }
 0x30d   :  { %v1383_v47 = vadd.f32 %v1382_v45, %v1370_v23  ;;  %v5327_v53 = vpop.eup %5326 }
 0x30e   :  { %v1440_v44 = vmul.f32 0.5, %v5327_v53  ;;  %v5329_v9 = vpop.eup %5328 }
 0x30f   :  { %v1443_v24 = vmul.f32 0.5, %v1383_v47  ;;  %v1452_v8 = vmul.f32 0.5, %v5329_v9 }
 0x310   :  { %v1395_v36 = vpop.f32.mrf.mxu2  ;;  %v1441_v48 = vadd.f32 0.5, %v1440_v44 }
 0x311   :  { %5330 = vtanh.f32 %v1443_v24  ;;  %v1396_v31 = vadd.f32 %v1395_v36, %v6882_v4  ;;  %v1453_v54 = vadd.f32 0.5, %v1452_v8 }
 0x312   :  { %v1371_v10 = vpop.f32.mrf.mxu0  ;;  %v1442_v24 = vmul.f32 %v1441_v48, %v7048_v28  ;;  %v5080_v28 = vld [vmem:[%s9138_s0 + $0x68] sm:$0xff] }
 0x313   :  { %v1409_v13 = vadd.f32 %v1408_v61, %v1396_v31  ;;  %v1524_v8 = vadd.f32 %v5080_v28, %v1493_v59  ;;  %v5082_v59 = vld [vmem:[%s9138_s0 + $0x78] sm:$0xff] }
 0x315   :  { %5332 = vtanh.f32 %v1409_v13 }
 0x317   :  { %v5331_v26 = vpop.eup %5330 }
 0x318   :  { %v1445_v35 = vmul.f32 0.5, %v5331_v26  ;;  %v1397_v5 = vpop.f32.mrf.mxu2  ;;  %v5079_v26 = vld [vmem:[%s9138_s0 + $0x60] sm:$0xff] }
 0x319   :  { %v1519_v56 = vpop.f32.mrf.mxu1 }
 0x31a   :  { %v1446_v19 = vadd.f32 0.5, %v1445_v35  ;;  %v1421_v45 = vpop.f32.mrf.mxu0 }
 0x31b   :  { %v5333_v29 = vpop.eup %5332  ;;  %v1422_v47 = vadd.f32 %v1421_v45, %v6886_v62 }
 0x31c   :  { %v1447_v36 = vmul.f32 %v1446_v19, %v7081_v20  ;;  %v1454_v53 = vmul.f32 %v5333_v29, %v1453_v54  ;;  %v1533_v29 = vmul.f32 0.5, %v1524_v8 }
 0x31d   :  { %v1435_v61 = vadd.f32 %v1434_v18, %v1422_v47 }
 0x31e   :  { %v1448_v23 = vadd.f32 %v1447_v36, %v1442_v24  ;;  %v1526_v36 = vadd.f32 %v5082_v59, %v1519_v56  ;;  %v9668_v59 = vld [vmem:[#allocation24_spill] sm:$0xff] }
 0x31f   :  { %v1456_v31 = vmul.f32 0.5, %v1435_v61  ;;  %v5081_v61 = vld [vmem:[%s9138_s0 + $0x70] sm:$0xff] }
 0x320   :  { %v7204_v10 = vadd.f32 %v1454_v53, %v1448_v23  ;;  %v1480_v44 = vpop.f32.mrf.mxu2 }
 0x321   :  { %5334 = vtanh.f32 %v1456_v31  ;;  %v1521_v13 = vpop.f32.mrf.mxu1  ;;  %v1523_v19 = vadd.f32 %v5079_v26, %v1480_v44 }
 0x322   :  { %5078 = vst [vmem:[%s9143_s5 + $0x10] sm:$0xff] %v7204_v10  ;;  %v1423_v9 = vpop.f32.mrf.mxu0  ;;  %5336 = vtanh.f32 %v7204_v10 }
 0x323   :  { %v1527_v24 = vmul.f32 0.5, %v1523_v19  ;;  %5338 = vtanh.f32 %v1533_v29  ;;  %v1539_v9 = vmul.f32 0.5, %v1526_v36  ;;  %v9669_v36 = vld [vmem:[#allocation31_spill] sm:$0xff] }
 0x325   :  { %5340 = vtanh.f32 %v1527_v24 }
 0x327   :  { %v5335_v18 = vpop.eup %5334 }
 0x328   :  { %v1458_v48 = vmul.f32 0.5, %v5335_v18  ;;  %v1482_v35 = vpop.f32.mrf.mxu2  ;;  %v5337_v45 = vpop.eup %5336 }
 0x329   :  { %v5339_v23 = vpop.eup %5338 }
 0x32a   :  { %v1459_v5 = vadd.f32 0.5, %v1458_v48  ;;  %v1535_v44 = vmul.f32 0.5, %v5339_v23  ;;  %v9671_v23 = vld [vmem:[#allocation112_spill] sm:$0xff] }
 0x32b   :  { %v5341_v31 = vpop.eup %5340 }
 0x32c   :  { %v1461_v47 = vmul.f32 %v5337_v45, %v1459_v5  ;;  %v1529_v56 = vmul.f32 0.5, %v5341_v31  ;;  %v1536_v28 = vadd.f32 0.5, %v1535_v44  ;;  %v9673_v31 = vld [vmem:[#allocation35_spill] sm:$0xff]  ;;  %v9675_v44 = vld [vmem:[#allocation113_spill] sm:$0xff] }
 0x32e   :  { %5077 = vst [vmem:[%s9142_s4 + $0x10] sm:$0xff] %v1461_v47  ;;  %v1546_v54 = vpack.c.bf16 %v1461_v47, %v1461_v47  ;;  %v1530_v18 = vadd.f32 0.5, %v1529_v56  ;;  %v1537_v48 = vmul.f32 %v1536_v28, %v7081_v20  ;;  %v9677_v56 = vld [vmem:[#allocation39_spill] sm:$0xff]  ;;  %v9678_v28 = vld [vmem:[#allocation54_spill] sm:$0xff] }
 0x330   :  { %1568 = vmatmul.bf16.vlgmr.msrb.gmra.mxu3 %v1546_v54  ;;  %1594 = vmatmul.bf16.vlgmr.msra.gmra.mxu1 %v1546_v54 }
 0x331   :  { %1664 = vmatpush.bf16.msrb.mxu3 %v6426_v51  ;;  %1723 = vmatpush.bf16.msra.mxu1 %v5739_v7 }
 0x335   :  { %1665 = vmatpush.bf16.msrb.mxu3 %v6441_v42  ;;  %1724 = vmatpush.bf16.msra.mxu1 %v5768_v17 }
 0x339   :  { %1666 = vmatpush.bf16.msrb.mxu3 %v9512_v57  ;;  %1725 = vmatpush.bf16.msra.mxu1 %v9513_v11 }
 0x33a   :  { %v1506_v53 = vpop.f32.mrf.mxu0 }
 0x33b   :  { %v1525_v13 = vadd.f32 %v5081_v61, %v1506_v53  ;;  %v9670_v61 = vld [vmem:[#allocation50_spill] sm:$0xff]  ;;  %v9672_v53 = vld [vmem:[#allocation28_spill] sm:$0xff] }
 0x33d   :  { %5342 = vtanh.f32 %v1525_v13  ;;  %1667 = vmatpush.bf16.msrb.mxu3 %v9514_v46  ;;  %1726 = vmatpush.bf16.msra.mxu1 %v9515_v0  ;;  %v9674_v13 = vld [vmem:[#allocation52_spill] sm:$0xff] }
 0x33e   :  { %5344 = vtanh.f32 %v1539_v9  ;;  %v9676_v9 = vld [vmem:[#allocation32_spill] sm:$0xff] }
 0x340   :  { %1620 = vmatmul.bf16.vlgmr.msra.gmra.mxu3 %v1546_v54  ;;  %1646 = vmatmul.bf16.vlgmr.msrb.gmra.mxu1 %v1546_v54 }
 0x341   :  { %1668 = vmatpush.bf16.msrb.mxu3 %v9516_v25  ;;  %1727 = vmatpush.bf16.msra.mxu1 %v9517_v15 }
 0x342   :  { %v1508_v26 = vpop.f32.mrf.mxu0 }
 0x343   :  { %v5343_v8 = vpop.eup %5342  ;;  %v9680_v26 = vld [vmem:[#allocation55_spill] sm:$0xff] }
 0x344   :  { %v1532_v35 = vmul.f32 %v5343_v8, %v1530_v18  ;;  %v5345_v5 = vpop.eup %5344  ;;  %v9679_v18 = vld [vmem:[#allocation41_spill] sm:$0xff]  ;;  %v9681_v8 = vld [vmem:[#allocation114_spill] sm:$0xff] }
 0x345   :  { %1669 = vmatpush.bf16.msrb.mxu3 %v9518_v55  ;;  %1728 = vmatpush.bf16.msra.mxu1 %v9519_v50  ;;  %v1541_v45 = vmul.f32 0.5, %v5345_v5  ;;  %v9684_v5 = vld [vmem:[#allocation58_spill] sm:$0xff] }
 0x346   :  { %v7237_v19 = vadd.f32 %v1537_v48, %v1532_v35  ;;  %v9682_v48 = vld [vmem:[#allocation36_spill] sm:$0xff] }
 0x347   :  { %v1542_v20 = vadd.f32 0.5, %v1541_v45  ;;  %v9683_v35 = vld [vmem:[#allocation12_spill] sm:$0xff]  ;;  %v9685_v45 = vld [vmem:[#allocation43_spill] sm:$0xff] }
 0x348   :  { %5346 = vtanh.f32 %v7237_v19 }
 0x349   :  { %1670 = vmatpush.bf16.msrb.mxu3 %v9520_v63  ;;  %1729 = vmatpush.bf16.msra.mxu1 %v9521_v38 }
 0x34d   :  { %1671 = vmatpush.bf16.msrb.mxu3 %v9522_v37  ;;  %1730 = vmatpush.bf16.msra.mxu1 %v9523_v6 }
 0x34e   :  { %v5347_v29 = vpop.eup %5346 }
 0x34f   :  { %v1544_v47 = vmul.f32 %v5347_v29, %v1542_v20  ;;  %v9686_v20 = vld [vmem:[#allocation60_spill] sm:$0xff]  ;;  %v9687_v29 = vld [vmem:[#allocation14_spill] sm:$0xff] }
 0x350   :  { %1672 = vmatmul.bf16.vlgmr.msrb.gmra.mxu3 %v1546_v54  ;;  %v9667_v54 = vld [vmem:[#allocation111_spill] sm:$0xff] }
 0x351   :  { %v7246_v24 = vpack.c.bf16 %v1544_v47, %v1544_v47  ;;  %1749 = vmatpush.bf16.msra.mxu3 %v9524_v1  ;;  %1799 = vmatpush.bf16.msrb.mxu1 %v9525_v43  ;;  %v9688_v47 = vld [vmem:[#allocation62_spill] sm:$0xff] }
 0x353   :  { %1555 = vmatmul.bf16.vlgmr.msrb.gmra.mxu2 %v7246_v24  ;;  %1581 = vmatmul.bf16.vlgmr.msra.gmra.mxu0 %v7246_v24 }
 0x354   :  { %1651 = vmatpush.bf16.msrb.mxu2 %v6717_v33  ;;  %1710 = vmatpush.bf16.msra.mxu0 %v5728_v3 }
 0x355   :  { %1731 = vmatmul.bf16.vlgmr.msra.gmra.mxu1 %v7246_v24  ;;  %1750 = vmatpush.bf16.msra.mxu3 %v9526_v52 }
 0x356   :  { %1800 = vmatpush.bf16.msrb.mxu1 %v9588_v58 }
 0x358   :  { %1652 = vmatpush.bf16.msrb.mxu2 %v9589_v34  ;;  %1711 = vmatpush.bf16.msra.mxu0 %v5766_v16 }
 0x359   :  { %1751 = vmatpush.bf16.msra.mxu3 %v9528_v41 }
 0x35a   :  { %1801 = vmatpush.bf16.msrb.mxu1 %v9529_v12 }
 0x35c   :  { %1653 = vmatpush.bf16.msrb.mxu2 %v6744_v14  ;;  %1712 = vmatpush.bf16.msra.mxu0 %v9590_v27 }
 0x35d   :  { %1752 = vmatpush.bf16.msra.mxu3 %v9591_v49 }
 0x35e   :  { %1802 = vmatpush.bf16.msrb.mxu1 %v9531_v21 }
 0x360   :  { %1654 = vmatpush.bf16.msrb.mxu2 %v6756_v2  ;;  %1713 = vmatpush.bf16.msra.mxu0 %v9592_v30 }
 0x361   :  { %1753 = vmatpush.bf16.msra.mxu3 %v9593_v39 }
 0x362   :  { %1803 = vmatpush.bf16.msrb.mxu1 %v9594_v32 }
 0x363   :  { %1607 = vmatmul.bf16.vlgmr.msra.gmra.mxu2 %v7246_v24  ;;  %1633 = vmatmul.bf16.vlgmr.msrb.gmra.mxu0 %v7246_v24 }
 0x364   :  { %1655 = vmatpush.bf16.msrb.mxu2 %v9667_v54  ;;  %1714 = vmatpush.bf16.msra.mxu0 %v9668_v59 }
 0x365   :  { %1754 = vmatpush.bf16.msra.mxu3 %v9669_v36 }
 0x366   :  { %1804 = vmatpush.bf16.msrb.mxu1 %v9670_v61 }
 0x368   :  { %1656 = vmatpush.bf16.msrb.mxu2 %v9671_v23  ;;  %1715 = vmatpush.bf16.msra.mxu0 %v9672_v53 }
 0x369   :  { %1755 = vmatpush.bf16.msra.mxu3 %v9673_v31 }
 0x36a   :  { %1805 = vmatpush.bf16.msrb.mxu1 %v9674_v13 }
 0x36c   :  { %1657 = vmatpush.bf16.msrb.mxu2 %v9675_v44  ;;  %1716 = vmatpush.bf16.msra.mxu0 %v9676_v9  ;;  %v9744_v9 = vld [vmem:[#allocation109_spill] sm:$0xff] }
 0x36d   :  { %1756 = vmatpush.bf16.msra.mxu3 %v9677_v56  ;;  %v9742_v56 = vld [vmem:[#allocation105_spill] sm:$0xff] }
 0x36e   :  { %1806 = vmatpush.bf16.msrb.mxu1 %v9678_v28  ;;  %v9696_v28 = vld [vmem:[#allocation70_spill] sm:$0xff] }
 0x370   :  { %1658 = vmatpush.bf16.msrb.mxu2 %v9681_v8  ;;  %1717 = vmatpush.bf16.msra.mxu0 %v9682_v48  ;;  %v9689_v8 = vld [vmem:[#allocation45_spill] sm:$0xff]  ;;  %v9690_v48 = vld [vmem:[#allocation64_spill] sm:$0xff] }
 0x371   :  { %1825 = vmatpush.bf16.msrb.mxu3 %v9679_v18  ;;  %v9694_v18 = vld [vmem:[#allocation68_spill] sm:$0xff] }
 0x372   :  { %1851 = vmatpush.bf16.msra.mxu1 %v9680_v26  ;;  %1757 = vmatmul.bf16.vlgmr.msra.gmra.mxu3 %v7246_v24  ;;  %v9692_v26 = vld [vmem:[#allocation66_spill] sm:$0xff] }
 0x373   :  { %1659 = vmatmul.bf16.vlgmr.msrb.gmra.mxu2 %v7246_v24  ;;  %1718 = vmatmul.bf16.vlgmr.msra.gmra.mxu0 %v7246_v24 }
 0x374   :  { %1736 = vmatpush.bf16.msra.mxu2 %v9683_v35  ;;  %1786 = vmatpush.bf16.msrb.mxu0 %v9684_v5  ;;  %v9691_v35 = vld [vmem:[#allocation18_spill] sm:$0xff]  ;;  %v9693_v5 = vld [vmem:[#allocation47_spill] sm:$0xff] }
 0x375   :  { %1826 = vmatpush.bf16.msrb.mxu3 %v9685_v45  ;;  %v9695_v45 = vld [vmem:[#allocation22_spill] sm:$0xff] }
 0x376   :  { %1852 = vmatpush.bf16.msra.mxu1 %v9686_v20  ;;  %v9697_v20 = vld [vmem:[#allocation49_spill] sm:$0xff] }
 0x378   :  { %1737 = vmatpush.bf16.msra.mxu2 %v9687_v29  ;;  %1787 = vmatpush.bf16.msrb.mxu0 %v9688_v47  ;;  %v9698_v29 = vld [vmem:[#allocation72_spill] sm:$0xff]  ;;  %v9699_v47 = vld [vmem:[#allocation26_spill] sm:$0xff] }
 0x379   :  { %1827 = vmatpush.bf16.msrb.mxu3 %v9689_v8  ;;  %v9700_v8 = vld [vmem:[#allocation74_spill] sm:$0xff] }
 0x37a   :  { %1853 = vmatpush.bf16.msra.mxu1 %v9690_v48  ;;  %v9701_v48 = vld [vmem:[#allocation51_spill] sm:$0xff] }
 0x37c   :  { %1738 = vmatpush.bf16.msra.mxu2 %v9691_v35  ;;  %1788 = vmatpush.bf16.msrb.mxu0 %v9692_v26  ;;  %v9702_v35 = vld [vmem:[#allocation76_spill] sm:$0xff]  ;;  %v9703_v26 = vld [vmem:[#allocation30_spill] sm:$0xff] }
 0x37d   :  { %1828 = vmatpush.bf16.msrb.mxu3 %v9693_v5  ;;  %v9704_v5 = vld [vmem:[#allocation78_spill] sm:$0xff] }
 0x37e   :  { %1854 = vmatpush.bf16.msra.mxu1 %v9694_v18  ;;  %v9705_v18 = vld [vmem:[#allocation53_spill] sm:$0xff] }
 0x380   :  { %1739 = vmatpush.bf16.msra.mxu2 %v9695_v45  ;;  %1789 = vmatpush.bf16.msrb.mxu0 %v9696_v28  ;;  %v9706_v45 = vld [vmem:[#allocation80_spill] sm:$0xff]  ;;  %v9707_v28 = vld [vmem:[#allocation34_spill] sm:$0xff] }
 0x381   :  { %1829 = vmatpush.bf16.msrb.mxu3 %v9697_v20  ;;  %v9708_v20 = vld [vmem:[#allocation82_spill] sm:$0xff] }
 0x382   :  { %1855 = vmatpush.bf16.msra.mxu1 %v9698_v29  ;;  %v9709_v29 = vld [vmem:[#allocation56_spill] sm:$0xff] }
 0x384   :  { %1740 = vmatpush.bf16.msra.mxu2 %v9699_v47  ;;  %1790 = vmatpush.bf16.msrb.mxu0 %v9700_v8  ;;  %v9710_v47 = vld [vmem:[#allocation57_spill] sm:$0xff]  ;;  %v9711_v8 = vld [vmem:[#allocation84_spill] sm:$0xff] }
 0x385   :  { %1830 = vmatpush.bf16.msrb.mxu3 %v9701_v48  ;;  %v9712_v48 = vld [vmem:[#allocation38_spill] sm:$0xff] }
 0x386   :  { %1856 = vmatpush.bf16.msra.mxu1 %v9702_v35  ;;  %v9713_v35 = vld [vmem:[#allocation59_spill] sm:$0xff] }
 0x388   :  { %1741 = vmatpush.bf16.msra.mxu2 %v9703_v26  ;;  %1791 = vmatpush.bf16.msrb.mxu0 %v9704_v5  ;;  %v9714_v26 = vld [vmem:[#allocation92_spill] sm:$0xff]  ;;  %v9715_v5 = vld [vmem:[#allocation94_spill] sm:$0xff] }
 0x389   :  { %1831 = vmatpush.bf16.msrb.mxu3 %v9705_v18  ;;  %v9740_v18 = vld [vmem:[#allocation101_spill] sm:$0xff] }
 0x38a   :  { %1857 = vmatpush.bf16.msra.mxu1 %v9706_v45  ;;  %v9716_v45 = vld [vmem:[#allocation61_spill] sm:$0xff] }
 0x38c   :  { %1742 = vmatpush.bf16.msra.mxu2 %v9707_v28  ;;  %1792 = vmatpush.bf16.msrb.mxu0 %v9708_v20  ;;  %v9717_v28 = vld [vmem:[#allocation63_spill] sm:$0xff]  ;;  %v9718_v20 = vld [vmem:[#allocation96_spill] sm:$0xff] }
 0x38d   :  { %1832 = vmatpush.bf16.msrb.mxu3 %v9709_v29  ;;  %v9719_v29 = vld [vmem:[#allocation65_spill] sm:$0xff] }
 0x38e   :  { %1858 = vmatpush.bf16.msra.mxu1 %v9711_v8  ;;  %v9721_v8 = vld [vmem:[#allocation98_spill] sm:$0xff] }
 0x390   :  { %1743 = vmatpush.bf16.msra.mxu2 %v9712_v48  ;;  %1793 = vmatpush.bf16.msrb.mxu0 %v9714_v26  ;;  %v9722_v48 = vld [vmem:[#allocation69_spill] sm:$0xff]  ;;  %v9724_v26 = vld [vmem:[#allocation100_spill] sm:$0xff] }
 0x391   :  { %1877 = vmatpush.bf16.msra.mxu3 %v9710_v47  ;;  %v9720_v47 = vld [vmem:[#allocation67_spill] sm:$0xff] }
 0x393   :  { %1744 = vmatmul.bf16.vlgmr.msra.gmra.mxu2 %v7246_v24  ;;  %v9726_v24 = vld [vmem:[#allocation75_spill] sm:$0xff] }
 0x394   :  { %1812 = vmatpush.bf16.msrb.mxu2 %v9713_v35  ;;  %1838 = vmatpush.bf16.msra.mxu0 %v9715_v5  ;;  %v9723_v35 = vld [vmem:[#allocation71_spill] sm:$0xff]  ;;  %v9725_v5 = vld [vmem:[#allocation73_spill] sm:$0xff] }
 0x395   :  { %1878 = vmatpush.bf16.msra.mxu3 %v9716_v45  ;;  %v9727_v45 = vld [vmem:[#allocation102_spill] sm:$0xff] }
 0x398   :  { %1813 = vmatpush.bf16.msrb.mxu2 %v9717_v28  ;;  %1839 = vmatpush.bf16.msra.mxu0 %v9718_v20  ;;  %v9728_v28 = vld [vmem:[#allocation77_spill] sm:$0xff]  ;;  %v9729_v20 = vld [vmem:[#allocation79_spill] sm:$0xff] }
 0x399   :  { %1879 = vmatpush.bf16.msra.mxu3 %v9719_v29  ;;  %v9730_v29 = vld [vmem:[#allocation104_spill] sm:$0xff] }
 0x39c   :  { %1814 = vmatpush.bf16.msrb.mxu2 %v9720_v47  ;;  %1840 = vmatpush.bf16.msra.mxu0 %v9721_v8  ;;  %v9731_v47 = vld [vmem:[#allocation81_spill] sm:$0xff]  ;;  %v9732_v8 = vld [vmem:[#allocation83_spill] sm:$0xff] }
 0x39d   :  { %1880 = vmatpush.bf16.msra.mxu3 %v9722_v48  ;;  %v9733_v48 = vld [vmem:[#allocation106_spill] sm:$0xff] }
 0x3a0   :  { %1815 = vmatpush.bf16.msrb.mxu2 %v9723_v35  ;;  %1841 = vmatpush.bf16.msra.mxu0 %v9724_v26  ;;  %v9734_v35 = vld [vmem:[#allocation85_spill] sm:$0xff] }
 0x3a1   :  { %1881 = vmatpush.bf16.msra.mxu3 %v9725_v5  ;;  %v9735_v26 = vld [vmem:[#allocation93_spill] sm:$0xff]  ;;  %v9736_v5 = vld [vmem:[#allocation95_spill] sm:$0xff] }
 0x3a4   :  { %1816 = vmatpush.bf16.msrb.mxu2 %v9726_v24  ;;  %1842 = vmatpush.bf16.msra.mxu0 %v9727_v45  ;;  %v9737_v24 = vld [vmem:[#allocation108_spill] sm:$0xff]  ;;  %v9738_v45 = vld [vmem:[#allocation97_spill] sm:$0xff] }
 0x3a5   :  { %1882 = vmatpush.bf16.msra.mxu3 %v9728_v28 }
 0x3a8   :  { %1817 = vmatpush.bf16.msrb.mxu2 %v9729_v20  ;;  %1843 = vmatpush.bf16.msra.mxu0 %v9730_v29  ;;  %v9739_v20 = vld [vmem:[#allocation99_spill] sm:$0xff] }
 0x3a9   :  { %1883 = vmatpush.bf16.msra.mxu3 %v9731_v47 }
 0x3ac   :  { %1818 = vmatpush.bf16.msrb.mxu2 %v9732_v8  ;;  %1844 = vmatpush.bf16.msra.mxu0 %v9733_v48  ;;  %v9741_v8 = vld [vmem:[#allocation103_spill] sm:$0xff] }
 0x3ad   :  { %1884 = vmatpush.bf16.msra.mxu3 %v9734_v35  ;;  %v1595_v28 = vpop.f32.mrf.mxu1 }
 0x3b0   :  { %1819 = vmatpush.bf16.msrb.mxu2 %v9735_v26  ;;  %1845 = vmatpush.bf16.msra.mxu0 %v9737_v24  ;;  %v9743_v26 = vld [vmem:[#allocation107_spill] sm:$0xff] }
 0x3b3   :  { %v1569_v29 = vpop.f32.mrf.mxu3 }
 0x3b4   :  { %1864 = vmatpush.bf16.msra.mxu2 %v9736_v5 }
 0x3b5   :  { %v1597_v47 = vpop.f32.mrf.mxu1 }
 0x3b8   :  { %1865 = vmatpush.bf16.msra.mxu2 %v9738_v45 }
 0x3bb   :  { %v1571_v48 = vpop.f32.mrf.mxu3 }
 0x3bc   :  { %1866 = vmatpush.bf16.msra.mxu2 %v9739_v20 }
 0x3bd   :  { %v1647_v35 = vpop.f32.mrf.mxu1 }
 0x3c0   :  { %1867 = vmatpush.bf16.msra.mxu2 %v9740_v18 }
 0x3c3   :  { %v1621_v5 = vpop.f32.mrf.mxu3 }
 0x3c4   :  { %1868 = vmatpush.bf16.msra.mxu2 %v9741_v8 }
 0x3c5   :  { %v1649_v24 = vpop.f32.mrf.mxu1 }
 0x3c8   :  { %1869 = vmatpush.bf16.msra.mxu2 %v9742_v56 }
 0x3cb   :  { %v1623_v45 = vpop.f32.mrf.mxu3 }
 0x3cc   :  { %1870 = vmatpush.bf16.msra.mxu2 %v9743_v26 }
 0x3d0   :  { %1871 = vmatpush.bf16.msra.mxu2 %v9744_v9  ;;  %v1582_v44 = vpop.f32.mrf.mxu0 }
 0x3d1   :  { %v1583_v47 = vadd.f32 %v1582_v44, %v9586_v60 }
 0x3d2   :  { %v1732_v13 = vpop.f32.mrf.mxu1 }
 0x3d3   :  { %v1673_v31 = vpop.f32.mrf.mxu3  ;;  %v1596_v48 = vadd.f32 %v1595_v28, %v1583_v47 }
 0x3d5   :  { %v1677_v26 = vmul.f32 0.5, %v1596_v48 }
 0x3d6   :  { %v1556_v20 = vpop.f32.mrf.mxu2 }
 0x3d7   :  { %v1557_v56 = vadd.f32 %v1556_v20, %v6873_v22  ;;  %5348 = vtanh.f32 %v1677_v26 }
 0x3d8   :  { %v1584_v53 = vpop.f32.mrf.mxu0 }
 0x3d9   :  { %v1570_v36 = vadd.f32 %v1569_v29, %v1557_v56 }
 0x3da   :  { %v1734_v18 = vpop.f32.mrf.mxu1 }
 0x3db   :  { %v1675_v23 = vpop.f32.mrf.mxu3  ;;  %v1689_v24 = vmul.f32 0.5, %v1570_v36 }
 0x3dd   :  { %5350 = vtanh.f32 %v1689_v24  ;;  %v5349_v44 = vpop.eup %5348 }
 0x3de   :  { %v1558_v8 = vpop.f32.mrf.mxu2  ;;  %v1679_v20 = vmul.f32 0.5, %v5349_v44 }
 0x3e0   :  { %v1634_v61 = vpop.f32.mrf.mxu0  ;;  %v1680_v29 = vadd.f32 0.5, %v1679_v20 }
 0x3e1   :  { %v1635_v54 = vadd.f32 %v1634_v61, %v6882_v4 }
 0x3e3   :  { %v1648_v8 = vadd.f32 %v1647_v35, %v1635_v54  ;;  %v5351_v23 = vpop.eup %5350 }
 0x3e4   :  { %v1691_v26 = vmul.f32 0.5, %v5351_v23 }
 0x3e6   :  { %v1608_v59 = vpop.f32.mrf.mxu2  ;;  %v1692_v24 = vadd.f32 0.5, %v1691_v26 }
 0x3e7   :  { %v1609_v45 = vadd.f32 %v1608_v59, %v9666_v40 }
 0x3e8   :  { %v1636_v9 = vpop.f32.mrf.mxu0 }
 0x3e9   :  { %v1622_v53 = vadd.f32 %v1621_v5, %v1609_v45  ;;  %v1681_v5 = vmul.f32 %v1680_v29, %v7204_v10  ;;  %v5086_v10 = vld [vmem:[%s9138_s0 + $0x88] sm:$0xff] }
 0x3ea   :  { %v1763_v23 = vadd.f32 %v5086_v10, %v1732_v13  ;;  %v5088_v13 = vld [vmem:[%s9138_s0 + $0x98] sm:$0xff] }
 0x3eb   :  { %v1682_v18 = vmul.f32 0.5, %v1622_v53 }
 0x3ed   :  { %5352 = vtanh.f32 %v1682_v18 }
 0x3ee   :  { %v1610_v28 = vpop.f32.mrf.mxu2  ;;  %5354 = vtanh.f32 %v1648_v8 }
 0x3f0   :  { %v1719_v47 = vpop.f32.mrf.mxu0 }
 0x3f3   :  { %v5353_v56 = vpop.eup %5352 }
 0x3f4   :  { %v1684_v36 = vmul.f32 0.5, %v5353_v56  ;;  %v5355_v40 = vpop.eup %5354 }
 0x3f5   :  { %v1758_v48 = vpop.f32.mrf.mxu3  ;;  %v1693_v53 = vmul.f32 %v5355_v40, %v1692_v24  ;;  %v5085_v40 = vld [vmem:[%s9138_s0 + $0x80] sm:$0xff]  ;;  %v5087_v24 = vld [vmem:[%s9138_s0 + $0x90] sm:$0xff] }
 0x3f6   :  { %v1685_v59 = vadd.f32 0.5, %v1684_v36  ;;  %v1660_v9 = vpop.f32.mrf.mxu2  ;;  %v1762_v29 = vadd.f32 %v5085_v40, %v1719_v47  ;;  %v1765_v47 = vadd.f32 %v5088_v13, %v1758_v48  ;;  %v9747_v13 = vld [vmem:[#allocation31_spill] sm:$0xff] }
 0x3f7   :  { %v1661_v61 = vadd.f32 %v1660_v9, %v6886_v62 }
 0x3f8   :  { %v1686_v54 = vmul.f32 %v1685_v59, %v7237_v19  ;;  %v1721_v45 = vpop.f32.mrf.mxu0  ;;  %v1772_v59 = vmul.f32 0.5, %v1763_v23 }
 0x3f9   :  { %v1674_v35 = vadd.f32 %v1673_v31, %v1661_v61  ;;  %v1766_v61 = vmul.f32 0.5, %v1762_v29 }
 0x3fa   :  { %v1687_v18 = vadd.f32 %v1686_v54, %v1681_v5 }
 0x3fb   :  { %v1695_v44 = vmul.f32 0.5, %v1674_v35 }
 0x3fc   :  { %v7360_v8 = vadd.f32 %v1693_v53, %v1687_v18 }
 0x3fd   :  { %5356 = vtanh.f32 %v1695_v44  ;;  %v1760_v28 = vpop.f32.mrf.mxu3  ;;  %v1778_v44 = vmul.f32 0.5, %v1765_v47  ;;  %v9748_v47 = vld [vmem:[#allocation50_spill] sm:$0xff] }
 0x3fe   :  { %5084 = vst [vmem:[%s9143_s5 + $0x18] sm:$0xff] %v7360_v8  ;;  %v1662_v20 = vpop.f32.mrf.mxu2  ;;  %5358 = vtanh.f32 %v7360_v8 }
 0x3ff   :  { %5360 = vtanh.f32 %v1772_v59 }
 0x400   :  { %5362 = vtanh.f32 %v1766_v61  ;;  %v9745_v61 = vld [vmem:[#allocation111_spill] sm:$0xff] }
 0x403   :  { %v5357_v31 = vpop.eup %5356 }
 0x404   :  { %v1697_v56 = vmul.f32 0.5, %v5357_v31  ;;  %v5359_v36 = vpop.eup %5358 }
 0x405   :  { %v5361_v54 = vpop.eup %5360 }
 0x406   :  { %v1698_v26 = vadd.f32 0.5, %v1697_v56  ;;  %v5363_v45 = vpop.eup %5362  ;;  %v1774_v18 = vmul.f32 0.5, %v5361_v54  ;;  %v9750_v54 = vld [vmem:[#allocation28_spill] sm:$0xff] }
 0x407   :  { %v1768_v48 = vmul.f32 0.5, %v5363_v45  ;;  %v9752_v45 = vld [vmem:[#allocation52_spill] sm:$0xff] }
 0x408   :  { %v1700_v9 = vmul.f32 %v5359_v36, %v1698_v26  ;;  %v1775_v28 = vadd.f32 0.5, %v1774_v18  ;;  %v9754_v18 = vld [vmem:[#allocation32_spill] sm:$0xff] }
 0x409   :  { %v1769_v20 = vadd.f32 0.5, %v1768_v48  ;;  %v9756_v48 = vld [vmem:[#allocation54_spill] sm:$0xff] }
 0x40a   :  { %5083 = vst [vmem:[%s9142_s4 + $0x18] sm:$0xff] %v1700_v9  ;;  %v1785_v5 = vpack.c.bf16 %v1700_v9, %v1700_v9  ;;  %v1776_v40 = vmul.f32 %v1775_v28, %v7237_v19  ;;  %v9757_v28 = vld [vmem:[#allocation41_spill] sm:$0xff] }
 0x40c   :  { %1807 = vmatmul.bf16.vlgmr.msrb.gmra.mxu1 %v1785_v5  ;;  %1833 = vmatmul.bf16.vlgmr.msrb.gmra.mxu3 %v1785_v5 }
 0x40d   :  { %1903 = vmatpush.bf16.msrb.mxu1 %v6426_v51  ;;  %1962 = vmatpush.bf16.msrb.mxu3 %v5739_v7 }
 0x411   :  { %1904 = vmatpush.bf16.msrb.mxu1 %v6441_v42  ;;  %1963 = vmatpush.bf16.msrb.mxu3 %v5768_v17 }
 0x415   :  { %1905 = vmatpush.bf16.msrb.mxu1 %v9512_v57  ;;  %1964 = vmatpush.bf16.msrb.mxu3 %v9513_v11 }
 0x416   :  { %v1745_v35 = vpop.f32.mrf.mxu2 }
 0x417   :  { %v1764_v53 = vadd.f32 %v5087_v24, %v1745_v35  ;;  %v9749_v24 = vld [vmem:[#allocation112_spill] sm:$0xff]  ;;  %v9751_v35 = vld [vmem:[#allocation35_spill] sm:$0xff] }
 0x419   :  { %5364 = vtanh.f32 %v1764_v53  ;;  %1906 = vmatpush.bf16.msrb.mxu1 %v9514_v46  ;;  %1965 = vmatpush.bf16.msrb.mxu3 %v9515_v0  ;;  %v9753_v53 = vld [vmem:[#allocation113_spill] sm:$0xff] }
 0x41a   :  { %5366 = vtanh.f32 %v1778_v44  ;;  %v9755_v44 = vld [vmem:[#allocation39_spill] sm:$0xff] }
 0x41c   :  { %1859 = vmatmul.bf16.vlgmr.msra.gmra.mxu1 %v1785_v5  ;;  %1885 = vmatmul.bf16.vlgmr.msra.gmra.mxu3 %v1785_v5 }
 0x41d   :  { %1907 = vmatpush.bf16.msrb.mxu1 %v9516_v25  ;;  %1966 = vmatpush.bf16.msrb.mxu3 %v9517_v15 }
 0x41e   :  { %v1747_v10 = vpop.f32.mrf.mxu2 }
 0x41f   :  { %v5365_v31 = vpop.eup %5364  ;;  %v9759_v10 = vld [vmem:[#allocation114_spill] sm:$0xff] }
 0x420   :  { %v1771_v23 = vmul.f32 %v5365_v31, %v1769_v20  ;;  %v5367_v56 = vpop.eup %5366  ;;  %v9758_v20 = vld [vmem:[#allocation55_spill] sm:$0xff]  ;;  %v9760_v31 = vld [vmem:[#allocation36_spill] sm:$0xff] }
 0x421   :  { %1908 = vmatpush.bf16.msrb.mxu1 %v9518_v55  ;;  %1967 = vmatpush.bf16.msrb.mxu3 %v9519_v50  ;;  %v1780_v26 = vmul.f32 0.5, %v5367_v56  ;;  %v9763_v56 = vld [vmem:[#allocation43_spill] sm:$0xff] }
 0x422   :  { %v7393_v29 = vadd.f32 %v1776_v40, %v1771_v23  ;;  %v9761_v40 = vld [vmem:[#allocation12_spill] sm:$0xff]  ;;  %v9762_v23 = vld [vmem:[#allocation58_spill] sm:$0xff] }
 0x423   :  { %v1781_v19 = vadd.f32 0.5, %v1780_v26  ;;  %v9764_v26 = vld [vmem:[#allocation60_spill] sm:$0xff] }
 0x424   :  { %5368 = vtanh.f32 %v7393_v29 }
 0x425   :  { %1909 = vmatpush.bf16.msrb.mxu1 %v9520_v63  ;;  %1968 = vmatpush.bf16.msrb.mxu3 %v9521_v38 }
 0x429   :  { %1910 = vmatpush.bf16.msrb.mxu1 %v9522_v37  ;;  %1969 = vmatpush.bf16.msrb.mxu3 %v9523_v6 }
 0x42a   :  { %v5369_v36 = vpop.eup %5368 }
 0x42b   :  { %v1783_v59 = vmul.f32 %v5369_v36, %v1781_v19  ;;  %v9765_v19 = vld [vmem:[#allocation14_spill] sm:$0xff] }
 0x42c   :  { %1911 = vmatmul.bf16.vlgmr.msrb.gmra.mxu1 %v1785_v5  ;;  %v9746_v5 = vld [vmem:[#allocation24_spill] sm:$0xff]  ;;  %v9766_v36 = vld [vmem:[#allocation62_spill] sm:$0xff] }
 0x42d   :  { %v7402_v9 = vpack.c.bf16 %v1783_v59, %v1783_v59  ;;  %1988 = vmatpush.bf16.msra.mxu1 %v9524_v1  ;;  %2038 = vmatpush.bf16.msra.mxu3 %v9525_v43  ;;  %v9767_v59 = vld [vmem:[#allocation45_spill] sm:$0xff] }
 0x42f   :  { %1794 = vmatmul.bf16.vlgmr.msrb.gmra.mxu0 %v7402_v9  ;;  %1820 = vmatmul.bf16.vlgmr.msrb.gmra.mxu2 %v7402_v9 }
 0x430   :  { %1890 = vmatpush.bf16.msrb.mxu0 %v6717_v33  ;;  %1949 = vmatpush.bf16.msrb.mxu2 %v5728_v3 }
 0x431   :  { %1970 = vmatmul.bf16.vlgmr.msrb.gmra.mxu3 %v7402_v9  ;;  %1989 = vmatpush.bf16.msra.mxu1 %v9526_v52 }
 0x432   :  { %2039 = vmatpush.bf16.msra.mxu3 %v9588_v58 }
 0x434   :  { %1891 = vmatpush.bf16.msrb.mxu0 %v9589_v34  ;;  %1950 = vmatpush.bf16.msrb.mxu2 %v5766_v16 }
 0x435   :  { %1990 = vmatpush.bf16.msra.mxu1 %v9528_v41 }
 0x436   :  { %2040 = vmatpush.bf16.msra.mxu3 %v9529_v12 }
 0x438   :  { %1892 = vmatpush.bf16.msrb.mxu0 %v6744_v14  ;;  %1951 = vmatpush.bf16.msrb.mxu2 %v9590_v27 }
 0x439   :  { %1991 = vmatpush.bf16.msra.mxu1 %v9591_v49 }
 0x43a   :  { %2041 = vmatpush.bf16.msra.mxu3 %v9531_v21 }
 0x43c   :  { %1893 = vmatpush.bf16.msrb.mxu0 %v6756_v2  ;;  %1952 = vmatpush.bf16.msrb.mxu2 %v9592_v30 }
 0x43d   :  { %1992 = vmatpush.bf16.msra.mxu1 %v9593_v39 }
 0x43e   :  { %2042 = vmatpush.bf16.msra.mxu3 %v9594_v32 }
 0x43f   :  { %1846 = vmatmul.bf16.vlgmr.msra.gmra.mxu0 %v7402_v9  ;;  %1872 = vmatmul.bf16.vlgmr.msra.gmra.mxu2 %v7402_v9 }
 0x440   :  { %1894 = vmatpush.bf16.msrb.mxu0 %v9745_v61  ;;  %1953 = vmatpush.bf16.msrb.mxu2 %v9746_v5 }
 0x441   :  { %1993 = vmatpush.bf16.msra.mxu1 %v9747_v13 }
 0x442   :  { %2043 = vmatpush.bf16.msra.mxu3 %v9748_v47 }
 0x444   :  { %1895 = vmatpush.bf16.msrb.mxu0 %v9749_v24  ;;  %1954 = vmatpush.bf16.msrb.mxu2 %v9750_v54 }
 0x445   :  { %1994 = vmatpush.bf16.msra.mxu1 %v9751_v35 }
 0x446   :  { %2044 = vmatpush.bf16.msra.mxu3 %v9752_v45 }
 0x448   :  { %1896 = vmatpush.bf16.msrb.mxu0 %v9753_v53  ;;  %1955 = vmatpush.bf16.msrb.mxu2 %v9754_v18 }
 0x449   :  { %1995 = vmatpush.bf16.msra.mxu1 %v9755_v44  ;;  %v9822_v44 = vld [vmem:[#allocation109_spill] sm:$0xff] }
 0x44a   :  { %2045 = vmatpush.bf16.msra.mxu3 %v9756_v48  ;;  %v9820_v48 = vld [vmem:[#allocation105_spill] sm:$0xff] }
 0x44c   :  { %1897 = vmatpush.bf16.msrb.mxu0 %v9759_v10  ;;  %1956 = vmatpush.bf16.msrb.mxu2 %v9760_v31  ;;  %v9768_v31 = vld [vmem:[#allocation64_spill] sm:$0xff]  ;;  %v9770_v10 = vld [vmem:[#allocation66_spill] sm:$0xff] }
 0x44d   :  { %2064 = vmatpush.bf16.msrb.mxu1 %v9757_v28  ;;  %v9774_v28 = vld [vmem:[#allocation70_spill] sm:$0xff] }
 0x44e   :  { %2090 = vmatpush.bf16.msrb.mxu3 %v9758_v20  ;;  %1996 = vmatmul.bf16.vlgmr.msra.gmra.mxu1 %v7402_v9  ;;  %v9772_v20 = vld [vmem:[#allocation68_spill] sm:$0xff] }
 0x44f   :  { %1898 = vmatmul.bf16.vlgmr.msrb.gmra.mxu0 %v7402_v9  ;;  %1957 = vmatmul.bf16.vlgmr.msrb.gmra.mxu2 %v7402_v9 }
 0x450   :  { %1975 = vmatpush.bf16.msra.mxu0 %v9761_v40  ;;  %2025 = vmatpush.bf16.msra.mxu2 %v9762_v23  ;;  %v9769_v40 = vld [vmem:[#allocation18_spill] sm:$0xff]  ;;  %v9771_v23 = vld [vmem:[#allocation47_spill] sm:$0xff] }
 0x451   :  { %2065 = vmatpush.bf16.msrb.mxu1 %v9763_v56  ;;  %v9773_v56 = vld [vmem:[#allocation22_spill] sm:$0xff] }
 0x452   :  { %2091 = vmatpush.bf16.msrb.mxu3 %v9764_v26  ;;  %v9775_v26 = vld [vmem:[#allocation49_spill] sm:$0xff] }
 0x454   :  { %1976 = vmatpush.bf16.msra.mxu0 %v9765_v19  ;;  %2026 = vmatpush.bf16.msra.mxu2 %v9766_v36  ;;  %v9776_v19 = vld [vmem:[#allocation72_spill] sm:$0xff]  ;;  %v9777_v36 = vld [vmem:[#allocation26_spill] sm:$0xff] }
 0x455   :  { %2066 = vmatpush.bf16.msrb.mxu1 %v9767_v59  ;;  %v9778_v59 = vld [vmem:[#allocation74_spill] sm:$0xff] }
 0x456   :  { %2092 = vmatpush.bf16.msrb.mxu3 %v9768_v31  ;;  %v9779_v31 = vld [vmem:[#allocation51_spill] sm:$0xff] }
 0x458   :  { %1977 = vmatpush.bf16.msra.mxu0 %v9769_v40  ;;  %2027 = vmatpush.bf16.msra.mxu2 %v9770_v10  ;;  %v9780_v40 = vld [vmem:[#allocation76_spill] sm:$0xff]  ;;  %v9781_v10 = vld [vmem:[#allocation30_spill] sm:$0xff] }
 0x459   :  { %2067 = vmatpush.bf16.msrb.mxu1 %v9771_v23  ;;  %v9782_v23 = vld [vmem:[#allocation78_spill] sm:$0xff] }
 0x45a   :  { %2093 = vmatpush.bf16.msrb.mxu3 %v9772_v20  ;;  %v9783_v20 = vld [vmem:[#allocation53_spill] sm:$0xff] }
 0x45c   :  { %1978 = vmatpush.bf16.msra.mxu0 %v9773_v56  ;;  %2028 = vmatpush.bf16.msra.mxu2 %v9774_v28  ;;  %v9784_v56 = vld [vmem:[#allocation80_spill] sm:$0xff]  ;;  %v9785_v28 = vld [vmem:[#allocation34_spill] sm:$0xff] }
 0x45d   :  { %2068 = vmatpush.bf16.msrb.mxu1 %v9775_v26  ;;  %v9786_v26 = vld [vmem:[#allocation82_spill] sm:$0xff] }
 0x45e   :  { %2094 = vmatpush.bf16.msrb.mxu3 %v9776_v19  ;;  %v9787_v19 = vld [vmem:[#allocation56_spill] sm:$0xff] }
 0x460   :  { %1979 = vmatpush.bf16.msra.mxu0 %v9777_v36  ;;  %2029 = vmatpush.bf16.msra.mxu2 %v9778_v59  ;;  %v9788_v36 = vld [vmem:[#allocation57_spill] sm:$0xff]  ;;  %v9789_v59 = vld [vmem:[#allocation84_spill] sm:$0xff] }
 0x461   :  { %2069 = vmatpush.bf16.msrb.mxu1 %v9779_v31  ;;  %v9790_v31 = vld [vmem:[#allocation38_spill] sm:$0xff] }
 0x462   :  { %2095 = vmatpush.bf16.msrb.mxu3 %v9780_v40  ;;  %v9791_v40 = vld [vmem:[#allocation59_spill] sm:$0xff] }
 0x464   :  { %1980 = vmatpush.bf16.msra.mxu0 %v9781_v10  ;;  %2030 = vmatpush.bf16.msra.mxu2 %v9782_v23  ;;  %v9792_v10 = vld [vmem:[#allocation92_spill] sm:$0xff]  ;;  %v9793_v23 = vld [vmem:[#allocation94_spill] sm:$0xff] }
 0x465   :  { %2070 = vmatpush.bf16.msrb.mxu1 %v9783_v20  ;;  %v9818_v20 = vld [vmem:[#allocation101_spill] sm:$0xff] }
 0x466   :  { %2096 = vmatpush.bf16.msrb.mxu3 %v9784_v56  ;;  %v9794_v56 = vld [vmem:[#allocation61_spill] sm:$0xff] }
 0x468   :  { %1981 = vmatpush.bf16.msra.mxu0 %v9785_v28  ;;  %2031 = vmatpush.bf16.msra.mxu2 %v9786_v26  ;;  %v9795_v28 = vld [vmem:[#allocation63_spill] sm:$0xff]  ;;  %v9796_v26 = vld [vmem:[#allocation96_spill] sm:$0xff] }
 0x469   :  { %2071 = vmatpush.bf16.msrb.mxu1 %v9787_v19  ;;  %v9797_v19 = vld [vmem:[#allocation65_spill] sm:$0xff] }
 0x46a   :  { %2097 = vmatpush.bf16.msrb.mxu3 %v9789_v59  ;;  %v9799_v59 = vld [vmem:[#allocation98_spill] sm:$0xff] }
 0x46c   :  { %1982 = vmatpush.bf16.msra.mxu0 %v9790_v31  ;;  %2032 = vmatpush.bf16.msra.mxu2 %v9792_v10  ;;  %v9800_v31 = vld [vmem:[#allocation69_spill] sm:$0xff]  ;;  %v9802_v10 = vld [vmem:[#allocation100_spill] sm:$0xff] }
 0x46d   :  { %2116 = vmatpush.bf16.msra.mxu1 %v9788_v36  ;;  %v9798_v36 = vld [vmem:[#allocation67_spill] sm:$0xff] }
 0x46f   :  { %1983 = vmatmul.bf16.vlgmr.msra.gmra.mxu0 %v7402_v9  ;;  %v9804_v9 = vld [vmem:[#allocation75_spill] sm:$0xff] }
 0x470   :  { %2051 = vmatpush.bf16.msrb.mxu0 %v9791_v40  ;;  %2077 = vmatpush.bf16.msrb.mxu2 %v9793_v23  ;;  %v9801_v40 = vld [vmem:[#allocation71_spill] sm:$0xff]  ;;  %v9803_v23 = vld [vmem:[#allocation73_spill] sm:$0xff] }
 0x471   :  { %2117 = vmatpush.bf16.msra.mxu1 %v9794_v56  ;;  %v9805_v56 = vld [vmem:[#allocation102_spill] sm:$0xff] }
 0x474   :  { %2052 = vmatpush.bf16.msrb.mxu0 %v9795_v28  ;;  %2078 = vmatpush.bf16.msrb.mxu2 %v9796_v26  ;;  %v9806_v28 = vld [vmem:[#allocation77_spill] sm:$0xff]  ;;  %v9807_v26 = vld [vmem:[#allocation79_spill] sm:$0xff] }
 0x475   :  { %2118 = vmatpush.bf16.msra.mxu1 %v9797_v19  ;;  %v9808_v19 = vld [vmem:[#allocation104_spill] sm:$0xff] }
 0x478   :  { %2053 = vmatpush.bf16.msrb.mxu0 %v9798_v36  ;;  %2079 = vmatpush.bf16.msrb.mxu2 %v9799_v59  ;;  %v9809_v36 = vld [vmem:[#allocation81_spill] sm:$0xff]  ;;  %v9810_v59 = vld [vmem:[#allocation83_spill] sm:$0xff] }
 0x479   :  { %2119 = vmatpush.bf16.msra.mxu1 %v9800_v31  ;;  %v9811_v31 = vld [vmem:[#allocation106_spill] sm:$0xff] }
 0x47c   :  { %2054 = vmatpush.bf16.msrb.mxu0 %v9801_v40  ;;  %2080 = vmatpush.bf16.msrb.mxu2 %v9802_v10  ;;  %v9812_v40 = vld [vmem:[#allocation85_spill] sm:$0xff] }
 0x47d   :  { %2120 = vmatpush.bf16.msra.mxu1 %v9803_v23  ;;  %v9813_v10 = vld [vmem:[#allocation93_spill] sm:$0xff]  ;;  %v9814_v23 = vld [vmem:[#allocation95_spill] sm:$0xff] }
 0x480   :  { %2055 = vmatpush.bf16.msrb.mxu0 %v9804_v9  ;;  %2081 = vmatpush.bf16.msrb.mxu2 %v9805_v56  ;;  %v9815_v9 = vld [vmem:[#allocation108_spill] sm:$0xff]  ;;  %v9816_v56 = vld [vmem:[#allocation97_spill] sm:$0xff] }
 0x481   :  { %2121 = vmatpush.bf16.msra.mxu1 %v9806_v28 }
 0x484   :  { %2056 = vmatpush.bf16.msrb.mxu0 %v9807_v26  ;;  %2082 = vmatpush.bf16.msrb.mxu2 %v9808_v19  ;;  %v9817_v26 = vld [vmem:[#allocation99_spill] sm:$0xff] }
 0x485   :  { %2122 = vmatpush.bf16.msra.mxu1 %v9809_v36 }
 0x488   :  { %2057 = vmatpush.bf16.msrb.mxu0 %v9810_v59  ;;  %2083 = vmatpush.bf16.msrb.mxu2 %v9811_v31  ;;  %v9819_v59 = vld [vmem:[#allocation103_spill] sm:$0xff] }
 0x489   :  { %2123 = vmatpush.bf16.msra.mxu1 %v9812_v40  ;;  %v1808_v28 = vpop.f32.mrf.mxu1 }
 0x48c   :  { %2058 = vmatpush.bf16.msrb.mxu0 %v9813_v10  ;;  %2084 = vmatpush.bf16.msrb.mxu2 %v9815_v9  ;;  %v9821_v10 = vld [vmem:[#allocation107_spill] sm:$0xff] }
 0x48f   :  { %v1834_v19 = vpop.f32.mrf.mxu3 }
 0x490   :  { %2103 = vmatpush.bf16.msra.mxu0 %v9814_v23 }
 0x491   :  { %v1810_v36 = vpop.f32.mrf.mxu1 }
 0x494   :  { %2104 = vmatpush.bf16.msra.mxu0 %v9816_v56 }
 0x497   :  { %v1836_v31 = vpop.f32.mrf.mxu3 }
 0x498   :  { %2105 = vmatpush.bf16.msra.mxu0 %v9817_v26 }
 0x499   :  { %v1860_v40 = vpop.f32.mrf.mxu1 }
 0x49c   :  { %2106 = vmatpush.bf16.msra.mxu0 %v9818_v20 }
 0x49f   :  { %v1886_v23 = vpop.f32.mrf.mxu3 }
 0x4a0   :  { %2107 = vmatpush.bf16.msra.mxu0 %v9819_v59 }
 0x4a1   :  { %v1862_v9 = vpop.f32.mrf.mxu1 }
 0x4a2   :  { %v9823_v9 = vld [vmem:[#allocation116_spill] sm:$0xff] }
 0x4a4   :  { %2108 = vmatpush.bf16.msra.mxu0 %v9820_v48 }
 0x4a7   :  { %v1888_v56 = vpop.f32.mrf.mxu3 }
 0x4a8   :  { %2109 = vmatpush.bf16.msra.mxu0 %v9821_v10 }
 0x4a9   :  { %v1912_v53 = vpop.f32.mrf.mxu1 }
 0x4ac   :  { %2110 = vmatpush.bf16.msra.mxu0 %v9822_v44  ;;  %v1795_v18 = vpop.f32.mrf.mxu0 }
 0x4ad   :  { %v1796_v59 = vadd.f32 %v1795_v18, %v6873_v22 }
 0x4af   :  { %v1809_v48 = vadd.f32 %v1808_v28, %v1796_v59 }
 0x4b1   :  { %v1914_v35 = vpop.f32.mrf.mxu1  ;;  %v1928_v13 = vmul.f32 0.5, %v1809_v48 }
 0x4b2   :  { %v1821_v26 = vpop.f32.mrf.mxu2 }
 0x4b3   :  { %v1822_v45 = vadd.f32 %v1821_v26, %v9586_v60 }
 0x4b4   :  { %v1971_v20 = vpop.f32.mrf.mxu3  ;;  %v1797_v36 = vpop.f32.mrf.mxu0 }
 0x4b5   :  { %v1835_v31 = vadd.f32 %v1834_v19, %v1822_v45 }
 0x4b7   :  { %v1916_v54 = vmul.f32 0.5, %v1835_v31 }
 0x4b9   :  { %5370 = vtanh.f32 %v1916_v54 }
 0x4ba   :  { %v1823_v24 = vpop.f32.mrf.mxu2  ;;  %5372 = vtanh.f32 %v1928_v13 }
 0x4bc   :  { %v1973_v10 = vpop.f32.mrf.mxu3  ;;  %v1847_v47 = vpop.f32.mrf.mxu0 }
 0x4bd   :  { %v1848_v56 = vadd.f32 %v1847_v47, %v9823_v9 }
 0x4bf   :  { %v1861_v44 = vadd.f32 %v1860_v40, %v1848_v56  ;;  %v5371_v26 = vpop.eup %5370 }
 0x4c0   :  { %v1918_v35 = vmul.f32 0.5, %v5371_v26  ;;  %v5373_v28 = vpop.eup %5372 }
 0x4c1   :  { %v1921_v5 = vmul.f32 0.5, %v1861_v44  ;;  %v1930_v10 = vmul.f32 0.5, %v5373_v28 }
 0x4c2   :  { %v1873_v61 = vpop.f32.mrf.mxu2  ;;  %v1919_v19 = vadd.f32 0.5, %v1918_v35 }
 0x4c3   :  { %5374 = vtanh.f32 %v1921_v5  ;;  %v1874_v36 = vadd.f32 %v1873_v61, %v6882_v4  ;;  %v1931_v31 = vadd.f32 0.5, %v1930_v10 }
 0x4c4   :  { %v1849_v18 = vpop.f32.mrf.mxu0  ;;  %v1920_v5 = vmul.f32 %v1919_v19, %v7360_v8  ;;  %v5092_v8 = vld [vmem:[%s9138_s0 + $0xa8] sm:$0xff] }
 0x4c5   :  { %v1887_v45 = vadd.f32 %v1886_v23, %v1874_v36  ;;  %v2002_v10 = vadd.f32 %v5092_v8, %v1971_v20  ;;  %v5094_v20 = vld [vmem:[%s9138_s0 + $0xb8] sm:$0xff] }
 0x4c7   :  { %5376 = vtanh.f32 %v1887_v45 }
 0x4c9   :  { %v5375_v24 = vpop.eup %5374 }
 0x4ca   :  { %v1923_v48 = vmul.f32 0.5, %v5375_v24  ;;  %v1875_v54 = vpop.f32.mrf.mxu2  ;;  %v5091_v24 = vld [vmem:[%s9138_s0 + $0xa0] sm:$0xff] }
 0x4cb   :  { %v1997_v59 = vpop.f32.mrf.mxu1 }
 0x4cc   :  { %v1924_v47 = vadd.f32 0.5, %v1923_v48  ;;  %v1899_v40 = vpop.f32.mrf.mxu0 }
 0x4cd   :  { %v5377_v13 = vpop.eup %5376  ;;  %v1900_v44 = vadd.f32 %v1899_v40, %v6886_v62 }
 0x4ce   :  { %v1925_v61 = vmul.f32 %v1924_v47, %v7393_v29  ;;  %v1932_v26 = vmul.f32 %v5377_v13, %v1931_v31  ;;  %v2011_v13 = vmul.f32 0.5, %v2002_v10 }
 0x4cf   :  { %v1913_v23 = vadd.f32 %v1912_v53, %v1900_v44 }
 0x4d0   :  { %v1926_v56 = vadd.f32 %v1925_v61, %v1920_v5  ;;  %v2004_v61 = vadd.f32 %v5094_v20, %v1997_v59  ;;  %v9825_v20 = vld [vmem:[#allocation24_spill] sm:$0xff] }
 0x4d1   :  { %v1934_v36 = vmul.f32 0.5, %v1913_v23  ;;  %v5093_v23 = vld [vmem:[%s9138_s0 + $0xb0] sm:$0xff] }
 0x4d2   :  { %v7516_v18 = vadd.f32 %v1932_v26, %v1926_v56  ;;  %v1958_v35 = vpop.f32.mrf.mxu2 }
 0x4d3   :  { %5378 = vtanh.f32 %v1934_v36  ;;  %v1999_v45 = vpop.f32.mrf.mxu1  ;;  %v2001_v47 = vadd.f32 %v5091_v24, %v1958_v35 }
 0x4d4   :  { %5090 = vst [vmem:[%s9143_s5 + $0x20] sm:$0xff] %v7516_v18  ;;  %v1901_v28 = vpop.f32.mrf.mxu0  ;;  %5380 = vtanh.f32 %v7516_v18 }
 0x4d5   :  { %v2005_v5 = vmul.f32 0.5, %v2001_v47  ;;  %5382 = vtanh.f32 %v2011_v13  ;;  %v2017_v28 = vmul.f32 0.5, %v2004_v61  ;;  %v9826_v61 = vld [vmem:[#allocation31_spill] sm:$0xff] }
 0x4d7   :  { %5384 = vtanh.f32 %v2005_v5 }
 0x4d9   :  { %v5379_v53 = vpop.eup %5378 }
 0x4da   :  { %v1936_v19 = vmul.f32 0.5, %v5379_v53  ;;  %v1960_v48 = vpop.f32.mrf.mxu2  ;;  %v5381_v40 = vpop.eup %5380 }
 0x4db   :  { %v5383_v56 = vpop.eup %5382 }
 0x4dc   :  { %v1937_v54 = vadd.f32 0.5, %v1936_v19  ;;  %v2013_v35 = vmul.f32 0.5, %v5383_v56  ;;  %v9828_v56 = vld [vmem:[#allocation112_spill] sm:$0xff] }
 0x4dd   :  { %v5385_v36 = vpop.eup %5384 }
 0x4de   :  { %v1939_v44 = vmul.f32 %v5381_v40, %v1937_v54  ;;  %v2007_v59 = vmul.f32 0.5, %v5385_v36  ;;  %v2014_v8 = vadd.f32 0.5, %v2013_v35  ;;  %v9830_v36 = vld [vmem:[#allocation35_spill] sm:$0xff]  ;;  %v9832_v35 = vld [vmem:[#allocation113_spill] sm:$0xff] }
 0x4e0   :  { %5089 = vst [vmem:[%s9142_s4 + $0x20] sm:$0xff] %v1939_v44  ;;  %v2024_v31 = vpack.c.bf16 %v1939_v44, %v1939_v44  ;;  %v2008_v53 = vadd.f32 0.5, %v2007_v59  ;;  %v2015_v19 = vmul.f32 %v2014_v8, %v7393_v29  ;;  %v9834_v59 = vld [vmem:[#allocation39_spill] sm:$0xff]  ;;  %v9835_v8 = vld [vmem:[#allocation54_spill] sm:$0xff] }
 0x4e2   :  { %2046 = vmatmul.bf16.vlgmr.msra.gmra.mxu3 %v2024_v31  ;;  %2072 = vmatmul.bf16.vlgmr.msrb.gmra.mxu1 %v2024_v31 }
 0x4e3   :  { %2142 = vmatpush.bf16.msra.mxu3 %v6426_v51  ;;  %2201 = vmatpush.bf16.msrb.mxu1 %v5739_v7 }
 0x4e7   :  { %2143 = vmatpush.bf16.msra.mxu3 %v6441_v42  ;;  %2202 = vmatpush.bf16.msrb.mxu1 %v5768_v17 }
 0x4eb   :  { %2144 = vmatpush.bf16.msra.mxu3 %v9512_v57  ;;  %2203 = vmatpush.bf16.msrb.mxu1 %v9513_v11 }
 0x4ec   :  { %v1984_v26 = vpop.f32.mrf.mxu0 }
 0x4ed   :  { %v2003_v45 = vadd.f32 %v5093_v23, %v1984_v26  ;;  %v9827_v23 = vld [vmem:[#allocation50_spill] sm:$0xff]  ;;  %v9829_v26 = vld [vmem:[#allocation28_spill] sm:$0xff] }
 0x4ef   :  { %5386 = vtanh.f32 %v2003_v45  ;;  %2145 = vmatpush.bf16.msra.mxu3 %v9514_v46  ;;  %2204 = vmatpush.bf16.msrb.mxu1 %v9515_v0  ;;  %v9831_v45 = vld [vmem:[#allocation52_spill] sm:$0xff] }
 0x4f0   :  { %5388 = vtanh.f32 %v2017_v28  ;;  %v9833_v28 = vld [vmem:[#allocation32_spill] sm:$0xff] }
 0x4f2   :  { %2098 = vmatmul.bf16.vlgmr.msrb.gmra.mxu3 %v2024_v31  ;;  %2124 = vmatmul.bf16.vlgmr.msra.gmra.mxu1 %v2024_v31 }
 0x4f3   :  { %2146 = vmatpush.bf16.msra.mxu3 %v9516_v25  ;;  %2205 = vmatpush.bf16.msrb.mxu1 %v9517_v15 }
 0x4f4   :  { %v1986_v24 = vpop.f32.mrf.mxu0 }
 0x4f5   :  { %v5387_v10 = vpop.eup %5386  ;;  %v9837_v24 = vld [vmem:[#allocation55_spill] sm:$0xff] }
 0x4f6   :  { %v2010_v48 = vmul.f32 %v5387_v10, %v2008_v53  ;;  %v5389_v54 = vpop.eup %5388  ;;  %v9836_v53 = vld [vmem:[#allocation41_spill] sm:$0xff]  ;;  %v9838_v10 = vld [vmem:[#allocation114_spill] sm:$0xff] }
 0x4f7   :  { %2147 = vmatpush.bf16.msra.mxu3 %v9518_v55  ;;  %2206 = vmatpush.bf16.msrb.mxu1 %v9519_v50  ;;  %v2019_v40 = vmul.f32 0.5, %v5389_v54  ;;  %v9841_v54 = vld [vmem:[#allocation58_spill] sm:$0xff] }
 0x4f8   :  { %v7549_v47 = vadd.f32 %v2015_v19, %v2010_v48  ;;  %v9839_v19 = vld [vmem:[#allocation36_spill] sm:$0xff] }
 0x4f9   :  { %v2020_v29 = vadd.f32 0.5, %v2019_v40  ;;  %v9840_v48 = vld [vmem:[#allocation12_spill] sm:$0xff]  ;;  %v9842_v40 = vld [vmem:[#allocation43_spill] sm:$0xff] }
 0x4fa   :  { %5390 = vtanh.f32 %v7549_v47 }
 0x4fb   :  { %2148 = vmatpush.bf16.msra.mxu3 %v9520_v63  ;;  %2207 = vmatpush.bf16.msrb.mxu1 %v9521_v38 }
 0x4ff   :  { %2149 = vmatpush.bf16.msra.mxu3 %v9522_v37  ;;  %2208 = vmatpush.bf16.msrb.mxu1 %v9523_v6 }
 0x500   :  { %v5391_v13 = vpop.eup %5390 }
 0x501   :  { %v2022_v44 = vmul.f32 %v5391_v13, %v2020_v29  ;;  %v9843_v29 = vld [vmem:[#allocation60_spill] sm:$0xff]  ;;  %v9844_v13 = vld [vmem:[#allocation14_spill] sm:$0xff] }
 0x502   :  { %2150 = vmatmul.bf16.vlgmr.msra.gmra.mxu3 %v2024_v31  ;;  %v9824_v31 = vld [vmem:[#allocation111_spill] sm:$0xff] }
 0x503   :  { %v7558_v5 = vpack.c.bf16 %v2022_v44, %v2022_v44  ;;  %2227 = vmatpush.bf16.msrb.mxu3 %v9524_v1  ;;  %2277 = vmatpush.bf16.msra.mxu1 %v9525_v43  ;;  %v9845_v44 = vld [vmem:[#allocation62_spill] sm:$0xff] }
 0x505   :  { %2033 = vmatmul.bf16.vlgmr.msra.gmra.mxu2 %v7558_v5  ;;  %2059 = vmatmul.bf16.vlgmr.msrb.gmra.mxu0 %v7558_v5 }
 0x506   :  { %2129 = vmatpush.bf16.msra.mxu2 %v6717_v33  ;;  %2188 = vmatpush.bf16.msrb.mxu0 %v5728_v3 }
 0x507   :  { %2209 = vmatmul.bf16.vlgmr.msrb.gmra.mxu1 %v7558_v5  ;;  %2228 = vmatpush.bf16.msrb.mxu3 %v9526_v52 }
 0x508   :  { %2278 = vmatpush.bf16.msra.mxu1 %v9588_v58 }
 0x50a   :  { %2130 = vmatpush.bf16.msra.mxu2 %v9589_v34  ;;  %2189 = vmatpush.bf16.msrb.mxu0 %v5766_v16 }
 0x50b   :  { %2229 = vmatpush.bf16.msrb.mxu3 %v9528_v41 }
 0x50c   :  { %2279 = vmatpush.bf16.msra.mxu1 %v9529_v12 }
 0x50e   :  { %2131 = vmatpush.bf16.msra.mxu2 %v6744_v14  ;;  %2190 = vmatpush.bf16.msrb.mxu0 %v9590_v27 }
 0x50f   :  { %2230 = vmatpush.bf16.msrb.mxu3 %v9591_v49 }
 0x510   :  { %2280 = vmatpush.bf16.msra.mxu1 %v9531_v21 }
 0x512   :  { %2132 = vmatpush.bf16.msra.mxu2 %v6756_v2  ;;  %2191 = vmatpush.bf16.msrb.mxu0 %v9592_v30 }
 0x513   :  { %2231 = vmatpush.bf16.msrb.mxu3 %v9593_v39 }
 0x514   :  { %2281 = vmatpush.bf16.msra.mxu1 %v9594_v32 }
 0x515   :  { %2085 = vmatmul.bf16.vlgmr.msrb.gmra.mxu2 %v7558_v5  ;;  %2111 = vmatmul.bf16.vlgmr.msra.gmra.mxu0 %v7558_v5 }
 0x516   :  { %2133 = vmatpush.bf16.msra.mxu2 %v9824_v31  ;;  %2192 = vmatpush.bf16.msrb.mxu0 %v9825_v20 }
 0x517   :  { %2232 = vmatpush.bf16.msrb.mxu3 %v9826_v61 }
 0x518   :  { %2282 = vmatpush.bf16.msra.mxu1 %v9827_v23 }
 0x51a   :  { %2134 = vmatpush.bf16.msra.mxu2 %v9828_v56  ;;  %2193 = vmatpush.bf16.msrb.mxu0 %v9829_v26 }
 0x51b   :  { %2233 = vmatpush.bf16.msrb.mxu3 %v9830_v36 }
 0x51c   :  { %2283 = vmatpush.bf16.msra.mxu1 %v9831_v45 }
 0x51e   :  { %2135 = vmatpush.bf16.msra.mxu2 %v9832_v35  ;;  %2194 = vmatpush.bf16.msrb.mxu0 %v9833_v28  ;;  %v9901_v28 = vld [vmem:[#allocation109_spill] sm:$0xff] }
 0x51f   :  { %2234 = vmatpush.bf16.msrb.mxu3 %v9834_v59  ;;  %v9899_v59 = vld [vmem:[#allocation105_spill] sm:$0xff] }
 0x520   :  { %2284 = vmatpush.bf16.msra.mxu1 %v9835_v8  ;;  %v9853_v8 = vld [vmem:[#allocation70_spill] sm:$0xff] }
 0x522   :  { %2136 = vmatpush.bf16.msra.mxu2 %v9838_v10  ;;  %2195 = vmatpush.bf16.msrb.mxu0 %v9839_v19  ;;  %v9846_v10 = vld [vmem:[#allocation45_spill] sm:$0xff]  ;;  %v9847_v19 = vld [vmem:[#allocation64_spill] sm:$0xff] }
 0x523   :  { %2303 = vmatpush.bf16.msra.mxu3 %v9836_v53  ;;  %v9851_v53 = vld [vmem:[#allocation68_spill] sm:$0xff] }
 0x524   :  { %2329 = vmatpush.bf16.msrb.mxu1 %v9837_v24  ;;  %2235 = vmatmul.bf16.vlgmr.msrb.gmra.mxu3 %v7558_v5  ;;  %v9849_v24 = vld [vmem:[#allocation66_spill] sm:$0xff] }
 0x525   :  { %2137 = vmatmul.bf16.vlgmr.msra.gmra.mxu2 %v7558_v5  ;;  %2196 = vmatmul.bf16.vlgmr.msrb.gmra.mxu0 %v7558_v5 }
 0x526   :  { %2214 = vmatpush.bf16.msrb.mxu2 %v9840_v48  ;;  %2264 = vmatpush.bf16.msra.mxu0 %v9841_v54  ;;  %v9848_v48 = vld [vmem:[#allocation18_spill] sm:$0xff]  ;;  %v9850_v54 = vld [vmem:[#allocation47_spill] sm:$0xff] }
 0x527   :  { %2304 = vmatpush.bf16.msra.mxu3 %v9842_v40  ;;  %v9852_v40 = vld [vmem:[#allocation22_spill] sm:$0xff] }
 0x528   :  { %2330 = vmatpush.bf16.msrb.mxu1 %v9843_v29  ;;  %v9854_v29 = vld [vmem:[#allocation49_spill] sm:$0xff] }
 0x52a   :  { %2215 = vmatpush.bf16.msrb.mxu2 %v9844_v13  ;;  %2265 = vmatpush.bf16.msra.mxu0 %v9845_v44  ;;  %v9855_v13 = vld [vmem:[#allocation72_spill] sm:$0xff]  ;;  %v9856_v44 = vld [vmem:[#allocation26_spill] sm:$0xff] }
 0x52b   :  { %2305 = vmatpush.bf16.msra.mxu3 %v9846_v10  ;;  %v9857_v10 = vld [vmem:[#allocation74_spill] sm:$0xff] }
 0x52c   :  { %2331 = vmatpush.bf16.msrb.mxu1 %v9847_v19  ;;  %v9858_v19 = vld [vmem:[#allocation51_spill] sm:$0xff] }
 0x52e   :  { %2216 = vmatpush.bf16.msrb.mxu2 %v9848_v48  ;;  %2266 = vmatpush.bf16.msra.mxu0 %v9849_v24  ;;  %v9859_v48 = vld [vmem:[#allocation76_spill] sm:$0xff]  ;;  %v9860_v24 = vld [vmem:[#allocation30_spill] sm:$0xff] }
 0x52f   :  { %2306 = vmatpush.bf16.msra.mxu3 %v9850_v54  ;;  %v9861_v54 = vld [vmem:[#allocation78_spill] sm:$0xff] }
 0x530   :  { %2332 = vmatpush.bf16.msrb.mxu1 %v9851_v53  ;;  %v9862_v53 = vld [vmem:[#allocation53_spill] sm:$0xff] }
 0x532   :  { %2217 = vmatpush.bf16.msrb.mxu2 %v9852_v40  ;;  %2267 = vmatpush.bf16.msra.mxu0 %v9853_v8  ;;  %v9863_v40 = vld [vmem:[#allocation80_spill] sm:$0xff]  ;;  %v9864_v8 = vld [vmem:[#allocation34_spill] sm:$0xff] }
 0x533   :  { %2307 = vmatpush.bf16.msra.mxu3 %v9854_v29  ;;  %v9865_v29 = vld [vmem:[#allocation82_spill] sm:$0xff] }
 0x534   :  { %2333 = vmatpush.bf16.msrb.mxu1 %v9855_v13  ;;  %v9866_v13 = vld [vmem:[#allocation56_spill] sm:$0xff] }
 0x536   :  { %2218 = vmatpush.bf16.msrb.mxu2 %v9856_v44  ;;  %2268 = vmatpush.bf16.msra.mxu0 %v9857_v10  ;;  %v9867_v44 = vld [vmem:[#allocation57_spill] sm:$0xff]  ;;  %v9868_v10 = vld [vmem:[#allocation84_spill] sm:$0xff] }
 0x537   :  { %2308 = vmatpush.bf16.msra.mxu3 %v9858_v19  ;;  %v9869_v19 = vld [vmem:[#allocation38_spill] sm:$0xff] }
 0x538   :  { %2334 = vmatpush.bf16.msrb.mxu1 %v9859_v48  ;;  %v9870_v48 = vld [vmem:[#allocation59_spill] sm:$0xff] }
 0x53a   :  { %2219 = vmatpush.bf16.msrb.mxu2 %v9860_v24  ;;  %2269 = vmatpush.bf16.msra.mxu0 %v9861_v54  ;;  %v9871_v24 = vld [vmem:[#allocation92_spill] sm:$0xff]  ;;  %v9872_v54 = vld [vmem:[#allocation94_spill] sm:$0xff] }
 0x53b   :  { %2309 = vmatpush.bf16.msra.mxu3 %v9862_v53  ;;  %v9897_v53 = vld [vmem:[#allocation101_spill] sm:$0xff] }
 0x53c   :  { %2335 = vmatpush.bf16.msrb.mxu1 %v9863_v40  ;;  %v9873_v40 = vld [vmem:[#allocation61_spill] sm:$0xff] }
 0x53e   :  { %2220 = vmatpush.bf16.msrb.mxu2 %v9864_v8  ;;  %2270 = vmatpush.bf16.msra.mxu0 %v9865_v29  ;;  %v9874_v8 = vld [vmem:[#allocation63_spill] sm:$0xff]  ;;  %v9875_v29 = vld [vmem:[#allocation96_spill] sm:$0xff] }
 0x53f   :  { %2310 = vmatpush.bf16.msra.mxu3 %v9866_v13  ;;  %v9876_v13 = vld [vmem:[#allocation65_spill] sm:$0xff] }
 0x540   :  { %2336 = vmatpush.bf16.msrb.mxu1 %v9868_v10  ;;  %v9878_v10 = vld [vmem:[#allocation98_spill] sm:$0xff] }
 0x542   :  { %2221 = vmatpush.bf16.msrb.mxu2 %v9869_v19  ;;  %2271 = vmatpush.bf16.msra.mxu0 %v9871_v24  ;;  %v9879_v19 = vld [vmem:[#allocation69_spill] sm:$0xff]  ;;  %v9881_v24 = vld [vmem:[#allocation100_spill] sm:$0xff] }
 0x543   :  { %2355 = vmatpush.bf16.msrb.mxu3 %v9867_v44  ;;  %v9877_v44 = vld [vmem:[#allocation67_spill] sm:$0xff] }
 0x545   :  { %2222 = vmatmul.bf16.vlgmr.msrb.gmra.mxu2 %v7558_v5  ;;  %v9883_v5 = vld [vmem:[#allocation75_spill] sm:$0xff] }
 0x546   :  { %2290 = vmatpush.bf16.msra.mxu2 %v9870_v48  ;;  %2316 = vmatpush.bf16.msrb.mxu0 %v9872_v54  ;;  %v9880_v48 = vld [vmem:[#allocation71_spill] sm:$0xff]  ;;  %v9882_v54 = vld [vmem:[#allocation73_spill] sm:$0xff] }
 0x547   :  { %2356 = vmatpush.bf16.msrb.mxu3 %v9873_v40  ;;  %v9884_v40 = vld [vmem:[#allocation102_spill] sm:$0xff] }
 0x54a   :  { %2291 = vmatpush.bf16.msra.mxu2 %v9874_v8  ;;  %2317 = vmatpush.bf16.msrb.mxu0 %v9875_v29  ;;  %v9885_v8 = vld [vmem:[#allocation77_spill] sm:$0xff]  ;;  %v9886_v29 = vld [vmem:[#allocation79_spill] sm:$0xff] }
 0x54b   :  { %2357 = vmatpush.bf16.msrb.mxu3 %v9876_v13  ;;  %v9887_v13 = vld [vmem:[#allocation104_spill] sm:$0xff] }
 0x54e   :  { %2292 = vmatpush.bf16.msra.mxu2 %v9877_v44  ;;  %2318 = vmatpush.bf16.msrb.mxu0 %v9878_v10  ;;  %v9888_v44 = vld [vmem:[#allocation81_spill] sm:$0xff]  ;;  %v9889_v10 = vld [vmem:[#allocation83_spill] sm:$0xff] }
 0x54f   :  { %2358 = vmatpush.bf16.msrb.mxu3 %v9879_v19  ;;  %v9890_v19 = vld [vmem:[#allocation106_spill] sm:$0xff] }
 0x552   :  { %2293 = vmatpush.bf16.msra.mxu2 %v9880_v48  ;;  %2319 = vmatpush.bf16.msrb.mxu0 %v9881_v24  ;;  %v9891_v48 = vld [vmem:[#allocation85_spill] sm:$0xff] }
 0x553   :  { %2359 = vmatpush.bf16.msrb.mxu3 %v9882_v54  ;;  %v9892_v24 = vld [vmem:[#allocation93_spill] sm:$0xff]  ;;  %v9893_v54 = vld [vmem:[#allocation95_spill] sm:$0xff] }
 0x556   :  { %2294 = vmatpush.bf16.msra.mxu2 %v9883_v5  ;;  %2320 = vmatpush.bf16.msrb.mxu0 %v9884_v40  ;;  %v9894_v5 = vld [vmem:[#allocation108_spill] sm:$0xff]  ;;  %v9895_v40 = vld [vmem:[#allocation97_spill] sm:$0xff] }
 0x557   :  { %2360 = vmatpush.bf16.msrb.mxu3 %v9885_v8 }
 0x55a   :  { %2295 = vmatpush.bf16.msra.mxu2 %v9886_v29  ;;  %2321 = vmatpush.bf16.msrb.mxu0 %v9887_v13  ;;  %v9896_v29 = vld [vmem:[#allocation99_spill] sm:$0xff] }
 0x55b   :  { %2361 = vmatpush.bf16.msrb.mxu3 %v9888_v44 }
 0x55e   :  { %2296 = vmatpush.bf16.msra.mxu2 %v9889_v10  ;;  %2322 = vmatpush.bf16.msrb.mxu0 %v9890_v19  ;;  %v9898_v10 = vld [vmem:[#allocation103_spill] sm:$0xff] }
 0x55f   :  { %2362 = vmatpush.bf16.msrb.mxu3 %v9891_v48  ;;  %v2073_v8 = vpop.f32.mrf.mxu1 }
 0x562   :  { %2297 = vmatpush.bf16.msra.mxu2 %v9892_v24  ;;  %2323 = vmatpush.bf16.msrb.mxu0 %v9894_v5  ;;  %v9900_v24 = vld [vmem:[#allocation107_spill] sm:$0xff] }
 0x565   :  { %v2047_v13 = vpop.f32.mrf.mxu3 }
 0x566   :  { %2342 = vmatpush.bf16.msrb.mxu2 %v9893_v54 }
 0x567   :  { %v2075_v44 = vpop.f32.mrf.mxu1 }
 0x56a   :  { %2343 = vmatpush.bf16.msrb.mxu2 %v9895_v40 }
 0x56d   :  { %v2049_v19 = vpop.f32.mrf.mxu3 }
 0x56e   :  { %2344 = vmatpush.bf16.msrb.mxu2 %v9896_v29 }
 0x56f   :  { %v2125_v48 = vpop.f32.mrf.mxu1 }
 0x572   :  { %2345 = vmatpush.bf16.msrb.mxu2 %v9897_v53 }
 0x575   :  { %v2099_v54 = vpop.f32.mrf.mxu3 }
 0x576   :  { %2346 = vmatpush.bf16.msrb.mxu2 %v9898_v10 }
 0x577   :  { %v2127_v5 = vpop.f32.mrf.mxu1 }
 0x57a   :  { %2347 = vmatpush.bf16.msrb.mxu2 %v9899_v59 }
 0x57d   :  { %v2101_v40 = vpop.f32.mrf.mxu3 }
 0x57e   :  { %2348 = vmatpush.bf16.msrb.mxu2 %v9900_v24 }
 0x582   :  { %2349 = vmatpush.bf16.msrb.mxu2 %v9901_v28  ;;  %v2060_v35 = vpop.f32.mrf.mxu0 }
 0x583   :  { %v2061_v44 = vadd.f32 %v2060_v35, %v9586_v60 }
 0x584   :  { %v2210_v45 = vpop.f32.mrf.mxu1 }
 0x585   :  { %v2151_v36 = vpop.f32.mrf.mxu3  ;;  %v2074_v19 = vadd.f32 %v2073_v8, %v2061_v44 }
 0x587   :  { %v2155_v24 = vmul.f32 0.5, %v2074_v19 }
 0x588   :  { %v2034_v29 = vpop.f32.mrf.mxu2 }
 0x589   :  { %v2035_v59 = vadd.f32 %v2034_v29, %v6873_v22  ;;  %5392 = vtanh.f32 %v2155_v24 }
 0x58a   :  { %v2062_v26 = vpop.f32.mrf.mxu0 }
 0x58b   :  { %v2048_v61 = vadd.f32 %v2047_v13, %v2035_v59 }
 0x58c   :  { %v2212_v53 = vpop.f32.mrf.mxu1 }
 0x58d   :  { %v2153_v56 = vpop.f32.mrf.mxu3  ;;  %v2167_v5 = vmul.f32 0.5, %v2048_v61 }
 0x58f   :  { %5394 = vtanh.f32 %v2167_v5  ;;  %v5393_v35 = vpop.eup %5392 }
 0x590   :  { %v2036_v10 = vpop.f32.mrf.mxu2  ;;  %v2157_v29 = vmul.f32 0.5, %v5393_v35 }
 0x592   :  { %v2112_v23 = vpop.f32.mrf.mxu0  ;;  %v2158_v13 = vadd.f32 0.5, %v2157_v29 }
 0x593   :  { %v2113_v31 = vadd.f32 %v2112_v23, %v6882_v4 }
 0x595   :  { %v2126_v10 = vadd.f32 %v2125_v48, %v2113_v31  ;;  %v5395_v56 = vpop.eup %5394 }
 0x596   :  { %v2169_v24 = vmul.f32 0.5, %v5395_v56 }
 0x598   :  { %v2086_v20 = vpop.f32.mrf.mxu2  ;;  %v2170_v5 = vadd.f32 0.5, %v2169_v24 }
 0x599   :  { %v2087_v40 = vadd.f32 %v2086_v20, %v9823_v9 }
 0x59a   :  { %v2114_v28 = vpop.f32.mrf.mxu0 }
 0x59b   :  { %v2100_v26 = vadd.f32 %v2099_v54, %v2087_v40  ;;  %v2159_v54 = vmul.f32 %v2158_v13, %v7516_v18  ;;  %v5098_v18 = vld [vmem:[%s9138_s0 + $0xc8] sm:$0xff] }
 0x59c   :  { %v2241_v56 = vadd.f32 %v5098_v18, %v2210_v45  ;;  %v5100_v45 = vld [vmem:[%s9138_s0 + $0xd8] sm:$0xff] }
 0x59d   :  { %v2160_v53 = vmul.f32 0.5, %v2100_v26 }
 0x59f   :  { %5396 = vtanh.f32 %v2160_v53 }
 0x5a0   :  { %v2088_v8 = vpop.f32.mrf.mxu2  ;;  %5398 = vtanh.f32 %v2126_v10 }
 0x5a2   :  { %v2197_v44 = vpop.f32.mrf.mxu0 }
 0x5a5   :  { %v5397_v59 = vpop.eup %5396 }
 0x5a6   :  { %v2162_v61 = vmul.f32 0.5, %v5397_v59  ;;  %v5399_v9 = vpop.eup %5398 }
 0x5a7   :  { %v2236_v19 = vpop.f32.mrf.mxu3  ;;  %v2171_v26 = vmul.f32 %v5399_v9, %v2170_v5  ;;  %v5097_v9 = vld [vmem:[%s9138_s0 + $0xc0] sm:$0xff]  ;;  %v5099_v5 = vld [vmem:[%s9138_s0 + $0xd0] sm:$0xff] }
 0x5a8   :  { %v2163_v20 = vadd.f32 0.5, %v2162_v61  ;;  %v2138_v28 = vpop.f32.mrf.mxu2  ;;  %v2240_v13 = vadd.f32 %v5097_v9, %v2197_v44  ;;  %v2243_v44 = vadd.f32 %v5100_v45, %v2236_v19  ;;  %v9904_v45 = vld [vmem:[#allocation31_spill] sm:$0xff] }
 0x5a9   :  { %v2139_v23 = vadd.f32 %v2138_v28, %v6886_v62 }
 0x5aa   :  { %v2164_v31 = vmul.f32 %v2163_v20, %v7549_v47  ;;  %v2199_v40 = vpop.f32.mrf.mxu0  ;;  %v2250_v20 = vmul.f32 0.5, %v2241_v56 }
 0x5ab   :  { %v2152_v48 = vadd.f32 %v2151_v36, %v2139_v23  ;;  %v2244_v23 = vmul.f32 0.5, %v2240_v13 }
 0x5ac   :  { %v2165_v53 = vadd.f32 %v2164_v31, %v2159_v54 }
 0x5ad   :  { %v2173_v35 = vmul.f32 0.5, %v2152_v48 }
 0x5ae   :  { %v7672_v10 = vadd.f32 %v2171_v26, %v2165_v53 }
 0x5af   :  { %5400 = vtanh.f32 %v2173_v35  ;;  %v2238_v8 = vpop.f32.mrf.mxu3  ;;  %v2256_v35 = vmul.f32 0.5, %v2243_v44  ;;  %v9905_v44 = vld [vmem:[#allocation50_spill] sm:$0xff] }
 0x5b0   :  { %5096 = vst [vmem:[%s9143_s5 + $0x28] sm:$0xff] %v7672_v10  ;;  %v2140_v29 = vpop.f32.mrf.mxu2  ;;  %5402 = vtanh.f32 %v7672_v10 }
 0x5b1   :  { %5404 = vtanh.f32 %v2250_v20 }
 0x5b2   :  { %5406 = vtanh.f32 %v2244_v23  ;;  %v9902_v23 = vld [vmem:[#allocation111_spill] sm:$0xff] }
 0x5b5   :  { %v5401_v36 = vpop.eup %5400 }
 0x5b6   :  { %v2175_v59 = vmul.f32 0.5, %v5401_v36  ;;  %v5403_v61 = vpop.eup %5402 }
 0x5b7   :  { %v5405_v31 = vpop.eup %5404 }
 0x5b8   :  { %v2176_v24 = vadd.f32 0.5, %v2175_v59  ;;  %v5407_v40 = vpop.eup %5406  ;;  %v2252_v53 = vmul.f32 0.5, %v5405_v31  ;;  %v9907_v31 = vld [vmem:[#allocation28_spill] sm:$0xff] }
 0x5b9   :  { %v2246_v19 = vmul.f32 0.5, %v5407_v40  ;;  %v9909_v40 = vld [vmem:[#allocation52_spill] sm:$0xff] }
 0x5ba   :  { %v2178_v28 = vmul.f32 %v5403_v61, %v2176_v24  ;;  %v2253_v8 = vadd.f32 0.5, %v2252_v53  ;;  %v9911_v53 = vld [vmem:[#allocation32_spill] sm:$0xff] }
 0x5bb   :  { %v2247_v29 = vadd.f32 0.5, %v2246_v19  ;;  %v9913_v19 = vld [vmem:[#allocation54_spill] sm:$0xff] }
 0x5bc   :  { %5095 = vst [vmem:[%s9142_s4 + $0x28] sm:$0xff] %v2178_v28  ;;  %v2263_v54 = vpack.c.bf16 %v2178_v28, %v2178_v28  ;;  %v2254_v9 = vmul.f32 %v2253_v8, %v7549_v47  ;;  %v9914_v8 = vld [vmem:[#allocation41_spill] sm:$0xff] }
 0x5be   :  { %2285 = vmatmul.bf16.vlgmr.msra.gmra.mxu1 %v2263_v54  ;;  %2311 = vmatmul.bf16.vlgmr.msra.gmra.mxu3 %v2263_v54 }
 0x5bf   :  { %2381 = vmatpush.bf16.msra.mxu1 %v6426_v51  ;;  %2440 = vmatpush.bf16.msra.mxu3 %v5739_v7 }
 0x5c3   :  { %2382 = vmatpush.bf16.msra.mxu1 %v6441_v42  ;;  %2441 = vmatpush.bf16.msra.mxu3 %v5768_v17 }
 0x5c7   :  { %2383 = vmatpush.bf16.msra.mxu1 %v9512_v57  ;;  %2442 = vmatpush.bf16.msra.mxu3 %v9513_v11 }
 0x5c8   :  { %v2223_v48 = vpop.f32.mrf.mxu2 }
 0x5c9   :  { %v2242_v26 = vadd.f32 %v5099_v5, %v2223_v48  ;;  %v9906_v5 = vld [vmem:[#allocation112_spill] sm:$0xff]  ;;  %v9908_v48 = vld [vmem:[#allocation35_spill] sm:$0xff] }
 0x5cb   :  { %5408 = vtanh.f32 %v2242_v26  ;;  %2384 = vmatpush.bf16.msra.mxu1 %v9514_v46  ;;  %2443 = vmatpush.bf16.msra.mxu3 %v9515_v0  ;;  %v9910_v26 = vld [vmem:[#allocation113_spill] sm:$0xff] }
 0x5cc   :  { %5410 = vtanh.f32 %v2256_v35  ;;  %v9912_v35 = vld [vmem:[#allocation39_spill] sm:$0xff] }
 0x5ce   :  { %2337 = vmatmul.bf16.vlgmr.msrb.gmra.mxu1 %v2263_v54  ;;  %2363 = vmatmul.bf16.vlgmr.msrb.gmra.mxu3 %v2263_v54 }
 0x5cf   :  { %2385 = vmatpush.bf16.msra.mxu1 %v9516_v25  ;;  %2444 = vmatpush.bf16.msra.mxu3 %v9517_v15 }
 0x5d0   :  { %v2225_v18 = vpop.f32.mrf.mxu2 }
 0x5d1   :  { %v5409_v36 = vpop.eup %5408  ;;  %v9916_v18 = vld [vmem:[#allocation114_spill] sm:$0xff] }
 0x5d2   :  { %v2249_v56 = vmul.f32 %v5409_v36, %v2247_v29  ;;  %v5411_v59 = vpop.eup %5410  ;;  %v9915_v29 = vld [vmem:[#allocation55_spill] sm:$0xff]  ;;  %v9917_v36 = vld [vmem:[#allocation36_spill] sm:$0xff] }
 0x5d3   :  { %2386 = vmatpush.bf16.msra.mxu1 %v9518_v55  ;;  %2445 = vmatpush.bf16.msra.mxu3 %v9519_v50  ;;  %v2258_v24 = vmul.f32 0.5, %v5411_v59  ;;  %v9920_v59 = vld [vmem:[#allocation43_spill] sm:$0xff] }
 0x5d4   :  { %v7705_v13 = vadd.f32 %v2254_v9, %v2249_v56  ;;  %v9918_v9 = vld [vmem:[#allocation12_spill] sm:$0xff]  ;;  %v9919_v56 = vld [vmem:[#allocation58_spill] sm:$0xff] }
 0x5d5   :  { %v2259_v47 = vadd.f32 0.5, %v2258_v24  ;;  %v9921_v24 = vld [vmem:[#allocation60_spill] sm:$0xff] }
 0x5d6   :  { %5412 = vtanh.f32 %v7705_v13 }
 0x5d7   :  { %2387 = vmatpush.bf16.msra.mxu1 %v9520_v63  ;;  %2446 = vmatpush.bf16.msra.mxu3 %v9521_v38 }
 0x5db   :  { %2388 = vmatpush.bf16.msra.mxu1 %v9522_v37  ;;  %2447 = vmatpush.bf16.msra.mxu3 %v9523_v6 }
 0x5dc   :  { %v5413_v61 = vpop.eup %5412 }
 0x5dd   :  { %v2261_v20 = vmul.f32 %v5413_v61, %v2259_v47  ;;  %v9922_v47 = vld [vmem:[#allocation14_spill] sm:$0xff] }
 0x5de   :  { %2389 = vmatmul.bf16.vlgmr.msra.gmra.mxu1 %v2263_v54  ;;  %v9903_v54 = vld [vmem:[#allocation24_spill] sm:$0xff]  ;;  %v9923_v61 = vld [vmem:[#allocation62_spill] sm:$0xff] }
 0x5df   :  { %v7714_v28 = vpack.c.bf16 %v2261_v20, %v2261_v20  ;;  %2466 = vmatpush.bf16.msrb.mxu1 %v9524_v1  ;;  %2516 = vmatpush.bf16.msrb.mxu3 %v9525_v43  ;;  %v9924_v20 = vld [vmem:[#allocation45_spill] sm:$0xff] }
 0x5e1   :  { %2272 = vmatmul.bf16.vlgmr.msra.gmra.mxu0 %v7714_v28  ;;  %2298 = vmatmul.bf16.vlgmr.msra.gmra.mxu2 %v7714_v28 }
 0x5e2   :  { %2368 = vmatpush.bf16.msra.mxu0 %v6717_v33  ;;  %2427 = vmatpush.bf16.msra.mxu2 %v5728_v3 }
 0x5e3   :  { %2448 = vmatmul.bf16.vlgmr.msra.gmra.mxu3 %v7714_v28  ;;  %2467 = vmatpush.bf16.msrb.mxu1 %v9526_v52 }
 0x5e4   :  { %2517 = vmatpush.bf16.msrb.mxu3 %v9588_v58 }
 0x5e6   :  { %2369 = vmatpush.bf16.msra.mxu0 %v9589_v34  ;;  %2428 = vmatpush.bf16.msra.mxu2 %v5766_v16 }
 0x5e7   :  { %2468 = vmatpush.bf16.msrb.mxu1 %v9528_v41 }
 0x5e8   :  { %2518 = vmatpush.bf16.msrb.mxu3 %v9529_v12 }
 0x5ea   :  { %2370 = vmatpush.bf16.msra.mxu0 %v6744_v14  ;;  %2429 = vmatpush.bf16.msra.mxu2 %v9590_v27 }
 0x5eb   :  { %2469 = vmatpush.bf16.msrb.mxu1 %v9591_v49 }
 0x5ec   :  { %2519 = vmatpush.bf16.msrb.mxu3 %v9531_v21 }
 0x5ee   :  { %2371 = vmatpush.bf16.msra.mxu0 %v6756_v2  ;;  %2430 = vmatpush.bf16.msra.mxu2 %v9592_v30 }
 0x5ef   :  { %2470 = vmatpush.bf16.msrb.mxu1 %v9593_v39 }
 0x5f0   :  { %2520 = vmatpush.bf16.msrb.mxu3 %v9594_v32 }
 0x5f1   :  { %2324 = vmatmul.bf16.vlgmr.msrb.gmra.mxu0 %v7714_v28  ;;  %2350 = vmatmul.bf16.vlgmr.msrb.gmra.mxu2 %v7714_v28 }
 0x5f2   :  { %2372 = vmatpush.bf16.msra.mxu0 %v9902_v23  ;;  %2431 = vmatpush.bf16.msra.mxu2 %v9903_v54 }
 0x5f3   :  { %2471 = vmatpush.bf16.msrb.mxu1 %v9904_v45 }
 0x5f4   :  { %2521 = vmatpush.bf16.msrb.mxu3 %v9905_v44 }
 0x5f6   :  { %2373 = vmatpush.bf16.msra.mxu0 %v9906_v5  ;;  %2432 = vmatpush.bf16.msra.mxu2 %v9907_v31 }
 0x5f7   :  { %2472 = vmatpush.bf16.msrb.mxu1 %v9908_v48 }
 0x5f8   :  { %2522 = vmatpush.bf16.msrb.mxu3 %v9909_v40 }
 0x5fa   :  { %2374 = vmatpush.bf16.msra.mxu0 %v9910_v26  ;;  %2433 = vmatpush.bf16.msra.mxu2 %v9911_v53 }
 0x5fb   :  { %2473 = vmatpush.bf16.msrb.mxu1 %v9912_v35  ;;  %v9979_v35 = vld [vmem:[#allocation109_spill] sm:$0xff] }
 0x5fc   :  { %2523 = vmatpush.bf16.msrb.mxu3 %v9913_v19  ;;  %v9977_v19 = vld [vmem:[#allocation105_spill] sm:$0xff] }
 0x5fe   :  { %2375 = vmatpush.bf16.msra.mxu0 %v9916_v18  ;;  %2434 = vmatpush.bf16.msra.mxu2 %v9917_v36  ;;  %v9925_v36 = vld [vmem:[#allocation64_spill] sm:$0xff]  ;;  %v9927_v18 = vld [vmem:[#allocation66_spill] sm:$0xff] }
 0x5ff   :  { %2542 = vmatpush.bf16.msra.mxu1 %v9914_v8  ;;  %v9931_v8 = vld [vmem:[#allocation70_spill] sm:$0xff] }
 0x600   :  { %2568 = vmatpush.bf16.msra.mxu3 %v9915_v29  ;;  %2474 = vmatmul.bf16.vlgmr.msrb.gmra.mxu1 %v7714_v28  ;;  %v9929_v29 = vld [vmem:[#allocation68_spill] sm:$0xff] }
 0x601   :  { %2376 = vmatmul.bf16.vlgmr.msra.gmra.mxu0 %v7714_v28  ;;  %2435 = vmatmul.bf16.vlgmr.msra.gmra.mxu2 %v7714_v28 }
 0x602   :  { %2453 = vmatpush.bf16.msrb.mxu0 %v9918_v9  ;;  %2503 = vmatpush.bf16.msrb.mxu2 %v9919_v56  ;;  %v9926_v9 = vld [vmem:[#allocation18_spill] sm:$0xff]  ;;  %v9928_v56 = vld [vmem:[#allocation47_spill] sm:$0xff] }
 0x603   :  { %2543 = vmatpush.bf16.msra.mxu1 %v9920_v59  ;;  %v9930_v59 = vld [vmem:[#allocation22_spill] sm:$0xff] }
 0x604   :  { %2569 = vmatpush.bf16.msra.mxu3 %v9921_v24  ;;  %v9932_v24 = vld [vmem:[#allocation49_spill] sm:$0xff] }
 0x606   :  { %2454 = vmatpush.bf16.msrb.mxu0 %v9922_v47  ;;  %2504 = vmatpush.bf16.msrb.mxu2 %v9923_v61  ;;  %v9933_v47 = vld [vmem:[#allocation72_spill] sm:$0xff]  ;;  %v9934_v61 = vld [vmem:[#allocation26_spill] sm:$0xff] }
 0x607   :  { %2544 = vmatpush.bf16.msra.mxu1 %v9924_v20  ;;  %v9935_v20 = vld [vmem:[#allocation74_spill] sm:$0xff] }
 0x608   :  { %2570 = vmatpush.bf16.msra.mxu3 %v9925_v36  ;;  %v9936_v36 = vld [vmem:[#allocation51_spill] sm:$0xff] }
 0x60a   :  { %2455 = vmatpush.bf16.msrb.mxu0 %v9926_v9  ;;  %2505 = vmatpush.bf16.msrb.mxu2 %v9927_v18  ;;  %v9937_v9 = vld [vmem:[#allocation76_spill] sm:$0xff]  ;;  %v9938_v18 = vld [vmem:[#allocation30_spill] sm:$0xff] }
 0x60b   :  { %2545 = vmatpush.bf16.msra.mxu1 %v9928_v56  ;;  %v9939_v56 = vld [vmem:[#allocation78_spill] sm:$0xff] }
 0x60c   :  { %2571 = vmatpush.bf16.msra.mxu3 %v9929_v29  ;;  %v9940_v29 = vld [vmem:[#allocation53_spill] sm:$0xff] }
 0x60e   :  { %2456 = vmatpush.bf16.msrb.mxu0 %v9930_v59  ;;  %2506 = vmatpush.bf16.msrb.mxu2 %v9931_v8  ;;  %v9941_v59 = vld [vmem:[#allocation80_spill] sm:$0xff]  ;;  %v9942_v8 = vld [vmem:[#allocation34_spill] sm:$0xff] }
 0x60f   :  { %2546 = vmatpush.bf16.msra.mxu1 %v9932_v24  ;;  %v9943_v24 = vld [vmem:[#allocation82_spill] sm:$0xff] }
 0x610   :  { %2572 = vmatpush.bf16.msra.mxu3 %v9933_v47  ;;  %v9944_v47 = vld [vmem:[#allocation56_spill] sm:$0xff] }
 0x612   :  { %2457 = vmatpush.bf16.msrb.mxu0 %v9934_v61  ;;  %2507 = vmatpush.bf16.msrb.mxu2 %v9935_v20  ;;  %v9945_v61 = vld [vmem:[#allocation57_spill] sm:$0xff]  ;;  %v9946_v20 = vld [vmem:[#allocation84_spill] sm:$0xff] }
 0x613   :  { %2547 = vmatpush.bf16.msra.mxu1 %v9936_v36  ;;  %v9947_v36 = vld [vmem:[#allocation38_spill] sm:$0xff] }
 0x614   :  { %2573 = vmatpush.bf16.msra.mxu3 %v9937_v9  ;;  %v9948_v9 = vld [vmem:[#allocation59_spill] sm:$0xff] }
 0x616   :  { %2458 = vmatpush.bf16.msrb.mxu0 %v9938_v18  ;;  %2508 = vmatpush.bf16.msrb.mxu2 %v9939_v56  ;;  %v9949_v18 = vld [vmem:[#allocation92_spill] sm:$0xff]  ;;  %v9950_v56 = vld [vmem:[#allocation94_spill] sm:$0xff] }
 0x617   :  { %2548 = vmatpush.bf16.msra.mxu1 %v9940_v29  ;;  %v9975_v29 = vld [vmem:[#allocation101_spill] sm:$0xff] }
 0x618   :  { %2574 = vmatpush.bf16.msra.mxu3 %v9941_v59  ;;  %v9951_v59 = vld [vmem:[#allocation61_spill] sm:$0xff] }
 0x61a   :  { %2459 = vmatpush.bf16.msrb.mxu0 %v9942_v8  ;;  %2509 = vmatpush.bf16.msrb.mxu2 %v9943_v24  ;;  %v9952_v8 = vld [vmem:[#allocation63_spill] sm:$0xff]  ;;  %v9953_v24 = vld [vmem:[#allocation96_spill] sm:$0xff] }
 0x61b   :  { %2549 = vmatpush.bf16.msra.mxu1 %v9944_v47  ;;  %v9954_v47 = vld [vmem:[#allocation65_spill] sm:$0xff] }
 0x61c   :  { %2575 = vmatpush.bf16.msra.mxu3 %v9946_v20  ;;  %v9956_v20 = vld [vmem:[#allocation98_spill] sm:$0xff] }
 0x61e   :  { %2460 = vmatpush.bf16.msrb.mxu0 %v9947_v36  ;;  %2510 = vmatpush.bf16.msrb.mxu2 %v9949_v18  ;;  %v9957_v36 = vld [vmem:[#allocation69_spill] sm:$0xff]  ;;  %v9959_v18 = vld [vmem:[#allocation100_spill] sm:$0xff] }
 0x61f   :  { %2594 = vmatpush.bf16.msrb.mxu1 %v9945_v61  ;;  %v9955_v61 = vld [vmem:[#allocation67_spill] sm:$0xff] }
 0x621   :  { %2461 = vmatmul.bf16.vlgmr.msrb.gmra.mxu0 %v7714_v28  ;;  %v9961_v28 = vld [vmem:[#allocation75_spill] sm:$0xff] }
 0x622   :  { %2529 = vmatpush.bf16.msra.mxu0 %v9948_v9  ;;  %2555 = vmatpush.bf16.msra.mxu2 %v9950_v56  ;;  %v9958_v9 = vld [vmem:[#allocation71_spill] sm:$0xff]  ;;  %v9960_v56 = vld [vmem:[#allocation73_spill] sm:$0xff] }
 0x623   :  { %2595 = vmatpush.bf16.msrb.mxu1 %v9951_v59  ;;  %v9962_v59 = vld [vmem:[#allocation102_spill] sm:$0xff] }
 0x626   :  { %2530 = vmatpush.bf16.msra.mxu0 %v9952_v8  ;;  %2556 = vmatpush.bf16.msra.mxu2 %v9953_v24  ;;  %v9963_v8 = vld [vmem:[#allocation77_spill] sm:$0xff]  ;;  %v9964_v24 = vld [vmem:[#allocation79_spill] sm:$0xff] }
 0x627   :  { %2596 = vmatpush.bf16.msrb.mxu1 %v9954_v47  ;;  %v9965_v47 = vld [vmem:[#allocation104_spill] sm:$0xff] }
 0x62a   :  { %2531 = vmatpush.bf16.msra.mxu0 %v9955_v61  ;;  %2557 = vmatpush.bf16.msra.mxu2 %v9956_v20  ;;  %v9966_v61 = vld [vmem:[#allocation81_spill] sm:$0xff]  ;;  %v9967_v20 = vld [vmem:[#allocation83_spill] sm:$0xff] }
 0x62b   :  { %2597 = vmatpush.bf16.msrb.mxu1 %v9957_v36  ;;  %v9968_v36 = vld [vmem:[#allocation106_spill] sm:$0xff] }
 0x62e   :  { %2532 = vmatpush.bf16.msra.mxu0 %v9958_v9  ;;  %2558 = vmatpush.bf16.msra.mxu2 %v9959_v18  ;;  %v9969_v9 = vld [vmem:[#allocation85_spill] sm:$0xff] }
 0x62f   :  { %2598 = vmatpush.bf16.msrb.mxu1 %v9960_v56  ;;  %v9970_v18 = vld [vmem:[#allocation93_spill] sm:$0xff]  ;;  %v9971_v56 = vld [vmem:[#allocation95_spill] sm:$0xff] }
 0x632   :  { %2533 = vmatpush.bf16.msra.mxu0 %v9961_v28  ;;  %2559 = vmatpush.bf16.msra.mxu2 %v9962_v59  ;;  %v9972_v28 = vld [vmem:[#allocation108_spill] sm:$0xff]  ;;  %v9973_v59 = vld [vmem:[#allocation97_spill] sm:$0xff] }
 0x633   :  { %2599 = vmatpush.bf16.msrb.mxu1 %v9963_v8 }
 0x636   :  { %2534 = vmatpush.bf16.msra.mxu0 %v9964_v24  ;;  %2560 = vmatpush.bf16.msra.mxu2 %v9965_v47  ;;  %v9974_v24 = vld [vmem:[#allocation99_spill] sm:$0xff] }
 0x637   :  { %2600 = vmatpush.bf16.msrb.mxu1 %v9966_v61 }
 0x63a   :  { %2535 = vmatpush.bf16.msra.mxu0 %v9967_v20  ;;  %2561 = vmatpush.bf16.msra.mxu2 %v9968_v36  ;;  %v9976_v20 = vld [vmem:[#allocation103_spill] sm:$0xff] }
 0x63b   :  { %2601 = vmatpush.bf16.msrb.mxu1 %v9969_v9  ;;  %v2286_v8 = vpop.f32.mrf.mxu1 }
 0x63e   :  { %2536 = vmatpush.bf16.msra.mxu0 %v9970_v18  ;;  %2562 = vmatpush.bf16.msra.mxu2 %v9972_v28  ;;  %v9978_v18 = vld [vmem:[#allocation107_spill] sm:$0xff] }
 0x641   :  { %v2312_v47 = vpop.f32.mrf.mxu3 }
 0x642   :  { %2581 = vmatpush.bf16.msrb.mxu0 %v9971_v56 }
 0x643   :  { %v2288_v61 = vpop.f32.mrf.mxu1 }
 0x646   :  { %2582 = vmatpush.bf16.msrb.mxu0 %v9973_v59 }
 0x649   :  { %v2314_v36 = vpop.f32.mrf.mxu3 }
 0x64a   :  { %2583 = vmatpush.bf16.msrb.mxu0 %v9974_v24 }
 0x64b   :  { %v2338_v9 = vpop.f32.mrf.mxu1 }
 0x64e   :  { %2584 = vmatpush.bf16.msrb.mxu0 %v9975_v29 }
 0x651   :  { %v2364_v56 = vpop.f32.mrf.mxu3 }
 0x652   :  { %2585 = vmatpush.bf16.msrb.mxu0 %v9976_v20 }
 0x653   :  { %v2340_v28 = vpop.f32.mrf.mxu1 }
 0x654   :  { %v9980_v28 = vld [vmem:[#allocation116_spill] sm:$0xff] }
 0x656   :  { %2586 = vmatpush.bf16.msrb.mxu0 %v9977_v19 }
 0x659   :  { %v2366_v59 = vpop.f32.mrf.mxu3 }
 0x65a   :  { %2587 = vmatpush.bf16.msrb.mxu0 %v9978_v18 }
 0x65b   :  { %v2390_v26 = vpop.f32.mrf.mxu1 }
 0x65e   :  { %2588 = vmatpush.bf16.msrb.mxu0 %v9979_v35  ;;  %v2273_v53 = vpop.f32.mrf.mxu0 }
 0x65f   :  { %v2274_v20 = vadd.f32 %v2273_v53, %v6873_v22 }
 0x661   :  { %v2287_v19 = vadd.f32 %v2286_v8, %v2274_v20 }
 0x663   :  { %v2392_v48 = vpop.f32.mrf.mxu1  ;;  %v2406_v45 = vmul.f32 0.5, %v2287_v19 }
 0x664   :  { %v2299_v24 = vpop.f32.mrf.mxu2 }
 0x665   :  { %v2300_v40 = vadd.f32 %v2299_v24, %v9586_v60 }
 0x666   :  { %v2449_v29 = vpop.f32.mrf.mxu3  ;;  %v2275_v61 = vpop.f32.mrf.mxu0 }
 0x667   :  { %v2313_v36 = vadd.f32 %v2312_v47, %v2300_v40 }
 0x669   :  { %v2394_v31 = vmul.f32 0.5, %v2313_v36 }
 0x66b   :  { %5414 = vtanh.f32 %v2394_v31 }
 0x66c   :  { %v2301_v5 = vpop.f32.mrf.mxu2  ;;  %5416 = vtanh.f32 %v2406_v45 }
 0x66e   :  { %v2451_v18 = vpop.f32.mrf.mxu3  ;;  %v2325_v44 = vpop.f32.mrf.mxu0 }
 0x66f   :  { %v2326_v59 = vadd.f32 %v2325_v44, %v9980_v28 }
 0x671   :  { %v2339_v35 = vadd.f32 %v2338_v9, %v2326_v59  ;;  %v5415_v24 = vpop.eup %5414 }
 0x672   :  { %v2396_v48 = vmul.f32 0.5, %v5415_v24  ;;  %v5417_v8 = vpop.eup %5416 }
 0x673   :  { %v2399_v54 = vmul.f32 0.5, %v2339_v35  ;;  %v2408_v18 = vmul.f32 0.5, %v5417_v8 }
 0x674   :  { %v2351_v23 = vpop.f32.mrf.mxu2  ;;  %v2397_v47 = vadd.f32 0.5, %v2396_v48 }
 0x675   :  { %5418 = vtanh.f32 %v2399_v54  ;;  %v2352_v61 = vadd.f32 %v2351_v23, %v6882_v4  ;;  %v2409_v36 = vadd.f32 0.5, %v2408_v18 }
 0x676   :  { %v2327_v53 = vpop.f32.mrf.mxu0  ;;  %v2398_v54 = vmul.f32 %v2397_v47, %v7672_v10  ;;  %v5104_v10 = vld [vmem:[%s9138_s0 + $0xe8] sm:$0xff] }
 0x677   :  { %v2365_v40 = vadd.f32 %v2364_v56, %v2352_v61  ;;  %v2480_v18 = vadd.f32 %v5104_v10, %v2449_v29  ;;  %v5106_v29 = vld [vmem:[%s9138_s0 + $0xf8] sm:$0xff] }
 0x679   :  { %5420 = vtanh.f32 %v2365_v40 }
 0x67b   :  { %v5419_v5 = vpop.eup %5418 }
 0x67c   :  { %v2401_v19 = vmul.f32 0.5, %v5419_v5  ;;  %v2353_v31 = vpop.f32.mrf.mxu2  ;;  %v5103_v5 = vld [vmem:[%s9138_s0 + $0xe0] sm:$0xff] }
 0x67d   :  { %v2475_v20 = vpop.f32.mrf.mxu1 }
 0x67e   :  { %v2402_v44 = vadd.f32 0.5, %v2401_v19  ;;  %v2377_v9 = vpop.f32.mrf.mxu0 }
 0x67f   :  { %v5421_v45 = vpop.eup %5420  ;;  %v2378_v35 = vadd.f32 %v2377_v9, %v6886_v62 }
 0x680   :  { %v2403_v23 = vmul.f32 %v2402_v44, %v7705_v13  ;;  %v2410_v24 = vmul.f32 %v5421_v45, %v2409_v36  ;;  %v2489_v45 = vmul.f32 0.5, %v2480_v18 }
 0x681   :  { %v2391_v56 = vadd.f32 %v2390_v26, %v2378_v35 }
 0x682   :  { %v2404_v59 = vadd.f32 %v2403_v23, %v2398_v54  ;;  %v2482_v23 = vadd.f32 %v5106_v29, %v2475_v20  ;;  %v9982_v29 = vld [vmem:[#allocation24_spill] sm:$0xff] }
 0x683   :  { %v2412_v61 = vmul.f32 0.5, %v2391_v56  ;;  %v5105_v56 = vld [vmem:[%s9138_s0 + $0xf0] sm:$0xff] }
 0x684   :  { %v7828_v53 = vadd.f32 %v2410_v24, %v2404_v59  ;;  %v2436_v48 = vpop.f32.mrf.mxu2 }
 0x685   :  { %5422 = vtanh.f32 %v2412_v61  ;;  %v2477_v40 = vpop.f32.mrf.mxu1  ;;  %v2479_v44 = vadd.f32 %v5103_v5, %v2436_v48 }
 0x686   :  { %5102 = vst [vmem:[%s9143_s5 + $0x30] sm:$0xff] %v7828_v53  ;;  %v2379_v8 = vpop.f32.mrf.mxu0  ;;  %5424 = vtanh.f32 %v7828_v53 }
 0x687   :  { %v2483_v54 = vmul.f32 0.5, %v2479_v44  ;;  %5426 = vtanh.f32 %v2489_v45  ;;  %v2495_v8 = vmul.f32 0.5, %v2482_v23  ;;  %v9983_v23 = vld [vmem:[#allocation31_spill] sm:$0xff] }
 0x689   :  { %5428 = vtanh.f32 %v2483_v54 }
 0x68b   :  { %v5423_v26 = vpop.eup %5422 }
 0x68c   :  { %v2414_v47 = vmul.f32 0.5, %v5423_v26  ;;  %v2438_v19 = vpop.f32.mrf.mxu2  ;;  %v5425_v9 = vpop.eup %5424 }
 0x68d   :  { %v5427_v59 = vpop.eup %5426 }
 0x68e   :  { %v2415_v31 = vadd.f32 0.5, %v2414_v47  ;;  %v2491_v48 = vmul.f32 0.5, %v5427_v59  ;;  %v9985_v59 = vld [vmem:[#allocation112_spill] sm:$0xff] }
 0x68f   :  { %v5429_v61 = vpop.eup %5428 }
 0x690   :  { %v2417_v35 = vmul.f32 %v5425_v9, %v2415_v31  ;;  %v2485_v20 = vmul.f32 0.5, %v5429_v61  ;;  %v2492_v10 = vadd.f32 0.5, %v2491_v48  ;;  %v9987_v61 = vld [vmem:[#allocation35_spill] sm:$0xff]  ;;  %v9989_v48 = vld [vmem:[#allocation113_spill] sm:$0xff] }
 0x692   :  { %5101 = vst [vmem:[%s9142_s4 + $0x30] sm:$0xff] %v2417_v35  ;;  %v2502_v36 = vpack.c.bf16 %v2417_v35, %v2417_v35  ;;  %v2486_v26 = vadd.f32 0.5, %v2485_v20  ;;  %v2493_v47 = vmul.f32 %v2492_v10, %v7705_v13  ;;  %v9991_v20 = vld [vmem:[#allocation39_spill] sm:$0xff]  ;;  %v9992_v10 = vld [vmem:[#allocation54_spill] sm:$0xff] }
 0x694   :  { %2524 = vmatmul.bf16.vlgmr.msrb.gmra.mxu3 %v2502_v36  ;;  %2550 = vmatmul.bf16.vlgmr.msra.gmra.mxu1 %v2502_v36 }
 0x695   :  { %2620 = vmatpush.bf16.msrb.mxu3 %v6426_v51  ;;  %2679 = vmatpush.bf16.msra.mxu1 %v5739_v7 }
 0x699   :  { %2621 = vmatpush.bf16.msrb.mxu3 %v6441_v42  ;;  %2680 = vmatpush.bf16.msra.mxu1 %v5768_v17 }
 0x69d   :  { %2622 = vmatpush.bf16.msrb.mxu3 %v9512_v57  ;;  %2681 = vmatpush.bf16.msra.mxu1 %v9513_v11 }
 0x69e   :  { %v2462_v24 = vpop.f32.mrf.mxu0 }
 0x69f   :  { %v2481_v40 = vadd.f32 %v5105_v56, %v2462_v24  ;;  %v9984_v56 = vld [vmem:[#allocation50_spill] sm:$0xff]  ;;  %v9986_v24 = vld [vmem:[#allocation28_spill] sm:$0xff] }
 0x6a1   :  { %5430 = vtanh.f32 %v2481_v40  ;;  %2623 = vmatpush.bf16.msrb.mxu3 %v9514_v46  ;;  %2682 = vmatpush.bf16.msra.mxu1 %v9515_v0  ;;  %v9988_v40 = vld [vmem:[#allocation52_spill] sm:$0xff] }
 0x6a2   :  { %5432 = vtanh.f32 %v2495_v8  ;;  %v9990_v8 = vld [vmem:[#allocation32_spill] sm:$0xff] }
 0x6a4   :  { %2576 = vmatmul.bf16.vlgmr.msra.gmra.mxu3 %v2502_v36  ;;  %2602 = vmatmul.bf16.vlgmr.msrb.gmra.mxu1 %v2502_v36 }
 0x6a5   :  { %2624 = vmatpush.bf16.msrb.mxu3 %v9516_v25  ;;  %2683 = vmatpush.bf16.msra.mxu1 %v9517_v15 }
 0x6a6   :  { %v2464_v5 = vpop.f32.mrf.mxu0 }
 0x6a7   :  { %v5431_v18 = vpop.eup %5430  ;;  %v9994_v5 = vld [vmem:[#allocation55_spill] sm:$0xff] }
 0x6a8   :  { %v2488_v19 = vmul.f32 %v5431_v18, %v2486_v26  ;;  %v5433_v31 = vpop.eup %5432  ;;  %v9993_v26 = vld [vmem:[#allocation41_spill] sm:$0xff]  ;;  %v9995_v18 = vld [vmem:[#allocation114_spill] sm:$0xff] }
 0x6a9   :  { %2625 = vmatpush.bf16.msrb.mxu3 %v9518_v55  ;;  %2684 = vmatpush.bf16.msra.mxu1 %v9519_v50  ;;  %v2497_v9 = vmul.f32 0.5, %v5433_v31  ;;  %v9998_v31 = vld [vmem:[#allocation58_spill] sm:$0xff] }
 0x6aa   :  { %v7861_v44 = vadd.f32 %v2493_v47, %v2488_v19  ;;  %v9996_v47 = vld [vmem:[#allocation36_spill] sm:$0xff] }
 0x6ab   :  { %v2498_v13 = vadd.f32 0.5, %v2497_v9  ;;  %v9997_v19 = vld [vmem:[#allocation12_spill] sm:$0xff]  ;;  %v9999_v9 = vld [vmem:[#allocation43_spill] sm:$0xff] }
 0x6ac   :  { %5434 = vtanh.f32 %v7861_v44 }
 0x6ad   :  { %2626 = vmatpush.bf16.msrb.mxu3 %v9520_v63  ;;  %2685 = vmatpush.bf16.msra.mxu1 %v9521_v38 }
 0x6b1   :  { %2627 = vmatpush.bf16.msrb.mxu3 %v9522_v37  ;;  %2686 = vmatpush.bf16.msra.mxu1 %v9523_v6 }
 0x6b2   :  { %v5435_v45 = vpop.eup %5434 }
 0x6b3   :  { %v2500_v35 = vmul.f32 %v5435_v45, %v2498_v13  ;;  %v10000_v13 = vld [vmem:[#allocation60_spill] sm:$0xff]  ;;  %v10001_v45 = vld [vmem:[#allocation14_spill] sm:$0xff] }
 0x6b4   :  { %2628 = vmatmul.bf16.vlgmr.msrb.gmra.mxu3 %v2502_v36  ;;  %v9981_v36 = vld [vmem:[#allocation111_spill] sm:$0xff] }
 0x6b5   :  { %v7870_v54 = vpack.c.bf16 %v2500_v35, %v2500_v35  ;;  %2705 = vmatpush.bf16.msra.mxu3 %v9524_v1  ;;  %2755 = vmatpush.bf16.msrb.mxu1 %v9525_v43  ;;  %v10002_v35 = vld [vmem:[#allocation62_spill] sm:$0xff] }
 0x6b7   :  { %2511 = vmatmul.bf16.vlgmr.msrb.gmra.mxu2 %v7870_v54  ;;  %2537 = vmatmul.bf16.vlgmr.msra.gmra.mxu0 %v7870_v54 }
 0x6b8   :  { %2607 = vmatpush.bf16.msrb.mxu2 %v6717_v33  ;;  %2666 = vmatpush.bf16.msra.mxu0 %v5728_v3 }
 0x6b9   :  { %2687 = vmatmul.bf16.vlgmr.msra.gmra.mxu1 %v7870_v54  ;;  %2706 = vmatpush.bf16.msra.mxu3 %v9526_v52 }
 0x6ba   :  { %2756 = vmatpush.bf16.msrb.mxu1 %v9588_v58 }
 0x6bc   :  { %2608 = vmatpush.bf16.msrb.mxu2 %v9589_v34  ;;  %2667 = vmatpush.bf16.msra.mxu0 %v5766_v16 }
 0x6bd   :  { %2707 = vmatpush.bf16.msra.mxu3 %v9528_v41 }
 0x6be   :  { %2757 = vmatpush.bf16.msrb.mxu1 %v9529_v12 }
 0x6c0   :  { %2609 = vmatpush.bf16.msrb.mxu2 %v6744_v14  ;;  %2668 = vmatpush.bf16.msra.mxu0 %v9590_v27 }
 0x6c1   :  { %2708 = vmatpush.bf16.msra.mxu3 %v9591_v49 }
 0x6c2   :  { %2758 = vmatpush.bf16.msrb.mxu1 %v9531_v21 }
 0x6c4   :  { %2610 = vmatpush.bf16.msrb.mxu2 %v6756_v2  ;;  %2669 = vmatpush.bf16.msra.mxu0 %v9592_v30 }
 0x6c5   :  { %2709 = vmatpush.bf16.msra.mxu3 %v9593_v39 }
 0x6c6   :  { %2759 = vmatpush.bf16.msrb.mxu1 %v9594_v32 }
 0x6c7   :  { %2563 = vmatmul.bf16.vlgmr.msra.gmra.mxu2 %v7870_v54  ;;  %2589 = vmatmul.bf16.vlgmr.msrb.gmra.mxu0 %v7870_v54 }
 0x6c8   :  { %2611 = vmatpush.bf16.msrb.mxu2 %v9981_v36  ;;  %2670 = vmatpush.bf16.msra.mxu0 %v9982_v29 }
 0x6c9   :  { %2710 = vmatpush.bf16.msra.mxu3 %v9983_v23 }
 0x6ca   :  { %2760 = vmatpush.bf16.msrb.mxu1 %v9984_v56 }
 0x6cc   :  { %2612 = vmatpush.bf16.msrb.mxu2 %v9985_v59  ;;  %2671 = vmatpush.bf16.msra.mxu0 %v9986_v24 }
 0x6cd   :  { %2711 = vmatpush.bf16.msra.mxu3 %v9987_v61 }
 0x6ce   :  { %2761 = vmatpush.bf16.msrb.mxu1 %v9988_v40 }
 0x6d0   :  { %2613 = vmatpush.bf16.msrb.mxu2 %v9989_v48  ;;  %2672 = vmatpush.bf16.msra.mxu0 %v9990_v8  ;;  %v10058_v8 = vld [vmem:[#allocation109_spill] sm:$0xff] }
 0x6d1   :  { %2712 = vmatpush.bf16.msra.mxu3 %v9991_v20  ;;  %v10056_v20 = vld [vmem:[#allocation105_spill] sm:$0xff] }
 0x6d2   :  { %2762 = vmatpush.bf16.msrb.mxu1 %v9992_v10  ;;  %v10010_v10 = vld [vmem:[#allocation70_spill] sm:$0xff] }
 0x6d4   :  { %2614 = vmatpush.bf16.msrb.mxu2 %v9995_v18  ;;  %2673 = vmatpush.bf16.msra.mxu0 %v9996_v47  ;;  %v10003_v18 = vld [vmem:[#allocation45_spill] sm:$0xff]  ;;  %v10004_v47 = vld [vmem:[#allocation64_spill] sm:$0xff] }
 0x6d5   :  { %2781 = vmatpush.bf16.msrb.mxu3 %v9993_v26  ;;  %v10008_v26 = vld [vmem:[#allocation68_spill] sm:$0xff] }
 0x6d6   :  { %2807 = vmatpush.bf16.msra.mxu1 %v9994_v5  ;;  %2713 = vmatmul.bf16.vlgmr.msra.gmra.mxu3 %v7870_v54  ;;  %v10006_v5 = vld [vmem:[#allocation66_spill] sm:$0xff] }
 0x6d7   :  { %2615 = vmatmul.bf16.vlgmr.msrb.gmra.mxu2 %v7870_v54  ;;  %2674 = vmatmul.bf16.vlgmr.msra.gmra.mxu0 %v7870_v54 }
 0x6d8   :  { %2692 = vmatpush.bf16.msra.mxu2 %v9997_v19  ;;  %2742 = vmatpush.bf16.msrb.mxu0 %v9998_v31  ;;  %v10005_v19 = vld [vmem:[#allocation18_spill] sm:$0xff]  ;;  %v10007_v31 = vld [vmem:[#allocation47_spill] sm:$0xff] }
 0x6d9   :  { %2782 = vmatpush.bf16.msrb.mxu3 %v9999_v9  ;;  %v10009_v9 = vld [vmem:[#allocation22_spill] sm:$0xff] }
 0x6da   :  { %2808 = vmatpush.bf16.msra.mxu1 %v10000_v13  ;;  %v10011_v13 = vld [vmem:[#allocation49_spill] sm:$0xff] }
 0x6dc   :  { %2693 = vmatpush.bf16.msra.mxu2 %v10001_v45  ;;  %2743 = vmatpush.bf16.msrb.mxu0 %v10002_v35  ;;  %v10012_v45 = vld [vmem:[#allocation72_spill] sm:$0xff]  ;;  %v10013_v35 = vld [vmem:[#allocation26_spill] sm:$0xff] }
 0x6dd   :  { %2783 = vmatpush.bf16.msrb.mxu3 %v10003_v18  ;;  %v10014_v18 = vld [vmem:[#allocation74_spill] sm:$0xff] }
 0x6de   :  { %2809 = vmatpush.bf16.msra.mxu1 %v10004_v47  ;;  %v10015_v47 = vld [vmem:[#allocation51_spill] sm:$0xff] }
 0x6e0   :  { %2694 = vmatpush.bf16.msra.mxu2 %v10005_v19  ;;  %2744 = vmatpush.bf16.msrb.mxu0 %v10006_v5  ;;  %v10016_v19 = vld [vmem:[#allocation76_spill] sm:$0xff]  ;;  %v10017_v5 = vld [vmem:[#allocation30_spill] sm:$0xff] }
 0x6e1   :  { %2784 = vmatpush.bf16.msrb.mxu3 %v10007_v31  ;;  %v10018_v31 = vld [vmem:[#allocation78_spill] sm:$0xff] }
 0x6e2   :  { %2810 = vmatpush.bf16.msra.mxu1 %v10008_v26  ;;  %v10019_v26 = vld [vmem:[#allocation53_spill] sm:$0xff] }
 0x6e4   :  { %2695 = vmatpush.bf16.msra.mxu2 %v10009_v9  ;;  %2745 = vmatpush.bf16.msrb.mxu0 %v10010_v10  ;;  %v10020_v9 = vld [vmem:[#allocation80_spill] sm:$0xff]  ;;  %v10021_v10 = vld [vmem:[#allocation34_spill] sm:$0xff] }
 0x6e5   :  { %2785 = vmatpush.bf16.msrb.mxu3 %v10011_v13  ;;  %v10022_v13 = vld [vmem:[#allocation82_spill] sm:$0xff] }
 0x6e6   :  { %2811 = vmatpush.bf16.msra.mxu1 %v10012_v45  ;;  %v10023_v45 = vld [vmem:[#allocation56_spill] sm:$0xff] }
 0x6e8   :  { %2696 = vmatpush.bf16.msra.mxu2 %v10013_v35  ;;  %2746 = vmatpush.bf16.msrb.mxu0 %v10014_v18  ;;  %v10024_v35 = vld [vmem:[#allocation57_spill] sm:$0xff]  ;;  %v10025_v18 = vld [vmem:[#allocation84_spill] sm:$0xff] }
 0x6e9   :  { %2786 = vmatpush.bf16.msrb.mxu3 %v10015_v47  ;;  %v10026_v47 = vld [vmem:[#allocation38_spill] sm:$0xff] }
 0x6ea   :  { %2812 = vmatpush.bf16.msra.mxu1 %v10016_v19  ;;  %v10027_v19 = vld [vmem:[#allocation59_spill] sm:$0xff] }
 0x6ec   :  { %2697 = vmatpush.bf16.msra.mxu2 %v10017_v5  ;;  %2747 = vmatpush.bf16.msrb.mxu0 %v10018_v31  ;;  %v10028_v5 = vld [vmem:[#allocation92_spill] sm:$0xff]  ;;  %v10029_v31 = vld [vmem:[#allocation94_spill] sm:$0xff] }
 0x6ed   :  { %2787 = vmatpush.bf16.msrb.mxu3 %v10019_v26  ;;  %v10054_v26 = vld [vmem:[#allocation101_spill] sm:$0xff] }
 0x6ee   :  { %2813 = vmatpush.bf16.msra.mxu1 %v10020_v9  ;;  %v10030_v9 = vld [vmem:[#allocation61_spill] sm:$0xff] }
 0x6f0   :  { %2698 = vmatpush.bf16.msra.mxu2 %v10021_v10  ;;  %2748 = vmatpush.bf16.msrb.mxu0 %v10022_v13  ;;  %v10031_v10 = vld [vmem:[#allocation63_spill] sm:$0xff]  ;;  %v10032_v13 = vld [vmem:[#allocation96_spill] sm:$0xff] }
 0x6f1   :  { %2788 = vmatpush.bf16.msrb.mxu3 %v10023_v45  ;;  %v10033_v45 = vld [vmem:[#allocation65_spill] sm:$0xff] }
 0x6f2   :  { %2814 = vmatpush.bf16.msra.mxu1 %v10025_v18  ;;  %v10035_v18 = vld [vmem:[#allocation98_spill] sm:$0xff] }
 0x6f4   :  { %2699 = vmatpush.bf16.msra.mxu2 %v10026_v47  ;;  %2749 = vmatpush.bf16.msrb.mxu0 %v10028_v5  ;;  %v10036_v47 = vld [vmem:[#allocation69_spill] sm:$0xff]  ;;  %v10038_v5 = vld [vmem:[#allocation100_spill] sm:$0xff] }
 0x6f5   :  { %2833 = vmatpush.bf16.msra.mxu3 %v10024_v35  ;;  %v10034_v35 = vld [vmem:[#allocation67_spill] sm:$0xff] }
 0x6f7   :  { %2700 = vmatmul.bf16.vlgmr.msra.gmra.mxu2 %v7870_v54  ;;  %v10040_v54 = vld [vmem:[#allocation75_spill] sm:$0xff] }
 0x6f8   :  { %2768 = vmatpush.bf16.msrb.mxu2 %v10027_v19  ;;  %2794 = vmatpush.bf16.msra.mxu0 %v10029_v31  ;;  %v10037_v19 = vld [vmem:[#allocation71_spill] sm:$0xff]  ;;  %v10039_v31 = vld [vmem:[#allocation73_spill] sm:$0xff] }
 0x6f9   :  { %2834 = vmatpush.bf16.msra.mxu3 %v10030_v9  ;;  %v10041_v9 = vld [vmem:[#allocation102_spill] sm:$0xff] }
 0x6fc   :  { %2769 = vmatpush.bf16.msrb.mxu2 %v10031_v10  ;;  %2795 = vmatpush.bf16.msra.mxu0 %v10032_v13  ;;  %v10042_v10 = vld [vmem:[#allocation77_spill] sm:$0xff]  ;;  %v10043_v13 = vld [vmem:[#allocation79_spill] sm:$0xff] }
 0x6fd   :  { %2835 = vmatpush.bf16.msra.mxu3 %v10033_v45  ;;  %v10044_v45 = vld [vmem:[#allocation104_spill] sm:$0xff] }
 0x700   :  { %2770 = vmatpush.bf16.msrb.mxu2 %v10034_v35  ;;  %2796 = vmatpush.bf16.msra.mxu0 %v10035_v18  ;;  %v10045_v35 = vld [vmem:[#allocation81_spill] sm:$0xff]  ;;  %v10046_v18 = vld [vmem:[#allocation83_spill] sm:$0xff] }
 0x701   :  { %2836 = vmatpush.bf16.msra.mxu3 %v10036_v47  ;;  %v10047_v47 = vld [vmem:[#allocation106_spill] sm:$0xff] }
 0x704   :  { %2771 = vmatpush.bf16.msrb.mxu2 %v10037_v19  ;;  %2797 = vmatpush.bf16.msra.mxu0 %v10038_v5  ;;  %v10048_v19 = vld [vmem:[#allocation85_spill] sm:$0xff] }
 0x705   :  { %2837 = vmatpush.bf16.msra.mxu3 %v10039_v31  ;;  %v10049_v5 = vld [vmem:[#allocation93_spill] sm:$0xff]  ;;  %v10050_v31 = vld [vmem:[#allocation95_spill] sm:$0xff] }
 0x708   :  { %2772 = vmatpush.bf16.msrb.mxu2 %v10040_v54  ;;  %2798 = vmatpush.bf16.msra.mxu0 %v10041_v9  ;;  %v10051_v54 = vld [vmem:[#allocation108_spill] sm:$0xff]  ;;  %v10052_v9 = vld [vmem:[#allocation97_spill] sm:$0xff] }
 0x709   :  { %2838 = vmatpush.bf16.msra.mxu3 %v10042_v10 }
 0x70c   :  { %2773 = vmatpush.bf16.msrb.mxu2 %v10043_v13  ;;  %2799 = vmatpush.bf16.msra.mxu0 %v10044_v45  ;;  %v10053_v13 = vld [vmem:[#allocation99_spill] sm:$0xff] }
 0x70d   :  { %2839 = vmatpush.bf16.msra.mxu3 %v10045_v35 }
 0x710   :  { %2774 = vmatpush.bf16.msrb.mxu2 %v10046_v18  ;;  %2800 = vmatpush.bf16.msra.mxu0 %v10047_v47  ;;  %v10055_v18 = vld [vmem:[#allocation103_spill] sm:$0xff] }
 0x711   :  { %2840 = vmatpush.bf16.msra.mxu3 %v10048_v19  ;;  %v2551_v10 = vpop.f32.mrf.mxu1 }
 0x714   :  { %2775 = vmatpush.bf16.msrb.mxu2 %v10049_v5  ;;  %2801 = vmatpush.bf16.msra.mxu0 %v10051_v54  ;;  %v10057_v5 = vld [vmem:[#allocation107_spill] sm:$0xff] }
 0x717   :  { %v2525_v45 = vpop.f32.mrf.mxu3 }
 0x718   :  { %2820 = vmatpush.bf16.msra.mxu2 %v10050_v31 }
 0x719   :  { %v2553_v35 = vpop.f32.mrf.mxu1 }
 0x71c   :  { %2821 = vmatpush.bf16.msra.mxu2 %v10052_v9 }
 0x71f   :  { %v2527_v47 = vpop.f32.mrf.mxu3 }
 0x720   :  { %2822 = vmatpush.bf16.msra.mxu2 %v10053_v13 }
 0x721   :  { %v2603_v19 = vpop.f32.mrf.mxu1 }
 0x724   :  { %2823 = vmatpush.bf16.msra.mxu2 %v10054_v26 }
 0x727   :  { %v2577_v31 = vpop.f32.mrf.mxu3 }
 0x728   :  { %2824 = vmatpush.bf16.msra.mxu2 %v10055_v18 }
 0x729   :  { %v2605_v54 = vpop.f32.mrf.mxu1 }
 0x72c   :  { %2825 = vmatpush.bf16.msra.mxu2 %v10056_v20 }
 0x72f   :  { %v2579_v9 = vpop.f32.mrf.mxu3 }
 0x730   :  { %2826 = vmatpush.bf16.msra.mxu2 %v10057_v5 }
 0x734   :  { %2827 = vmatpush.bf16.msra.mxu2 %v10058_v8  ;;  %v2538_v48 = vpop.f32.mrf.mxu0 }
 0x735   :  { %v2539_v35 = vadd.f32 %v2538_v48, %v9586_v60 }
 0x736   :  { %v2688_v40 = vpop.f32.mrf.mxu1 }
 0x737   :  { %v2629_v61 = vpop.f32.mrf.mxu3  ;;  %v2552_v47 = vadd.f32 %v2551_v10, %v2539_v35 }
 0x739   :  { %v2633_v5 = vmul.f32 0.5, %v2552_v47 }
 0x73a   :  { %v2512_v13 = vpop.f32.mrf.mxu2 }
 0x73b   :  { %v2513_v20 = vadd.f32 %v2512_v13, %v6873_v22  ;;  %5436 = vtanh.f32 %v2633_v5 }
 0x73c   :  { %v2540_v24 = vpop.f32.mrf.mxu0 }
 0x73d   :  { %v2526_v23 = vadd.f32 %v2525_v45, %v2513_v20 }
 0x73e   :  { %v2690_v26 = vpop.f32.mrf.mxu1 }
 0x73f   :  { %v2631_v59 = vpop.f32.mrf.mxu3  ;;  %v2645_v54 = vmul.f32 0.5, %v2526_v23 }
 0x741   :  { %5438 = vtanh.f32 %v2645_v54  ;;  %v5437_v48 = vpop.eup %5436 }
 0x742   :  { %v2514_v18 = vpop.f32.mrf.mxu2  ;;  %v2635_v13 = vmul.f32 0.5, %v5437_v48 }
 0x744   :  { %v2590_v56 = vpop.f32.mrf.mxu0  ;;  %v2636_v45 = vadd.f32 0.5, %v2635_v13 }
 0x745   :  { %v2591_v36 = vadd.f32 %v2590_v56, %v6882_v4 }
 0x747   :  { %v2604_v18 = vadd.f32 %v2603_v19, %v2591_v36  ;;  %v5439_v59 = vpop.eup %5438 }
 0x748   :  { %v2647_v5 = vmul.f32 0.5, %v5439_v59 }
 0x74a   :  { %v2564_v29 = vpop.f32.mrf.mxu2  ;;  %v2648_v54 = vadd.f32 0.5, %v2647_v5 }
 0x74b   :  { %v2565_v9 = vadd.f32 %v2564_v29, %v9980_v28 }
 0x74c   :  { %v2592_v8 = vpop.f32.mrf.mxu0 }
 0x74d   :  { %v2578_v24 = vadd.f32 %v2577_v31, %v2565_v9  ;;  %v2637_v31 = vmul.f32 %v2636_v45, %v7828_v53  ;;  %v5110_v53 = vld [vmem:[%s9138_s0 + $0x108] sm:$0xff] }
 0x74e   :  { %v2719_v59 = vadd.f32 %v5110_v53, %v2688_v40  ;;  %v5112_v40 = vld [vmem:[%s9138_s0 + $0x118] sm:$0xff] }
 0x74f   :  { %v2638_v26 = vmul.f32 0.5, %v2578_v24 }
 0x751   :  { %5440 = vtanh.f32 %v2638_v26 }
 0x752   :  { %v2566_v10 = vpop.f32.mrf.mxu2  ;;  %5442 = vtanh.f32 %v2604_v18 }
 0x754   :  { %v2675_v35 = vpop.f32.mrf.mxu0 }
 0x757   :  { %v5441_v20 = vpop.eup %5440 }
 0x758   :  { %v2640_v23 = vmul.f32 0.5, %v5441_v20  ;;  %v5443_v28 = vpop.eup %5442 }
 0x759   :  { %v2714_v47 = vpop.f32.mrf.mxu3  ;;  %v2649_v24 = vmul.f32 %v5443_v28, %v2648_v54  ;;  %v5109_v28 = vld [vmem:[%s9138_s0 + $0x100] sm:$0xff]  ;;  %v5111_v54 = vld [vmem:[%s9138_s0 + $0x110] sm:$0xff] }
 0x75a   :  { %v2641_v29 = vadd.f32 0.5, %v2640_v23  ;;  %v2616_v8 = vpop.f32.mrf.mxu2  ;;  %v2718_v45 = vadd.f32 %v5109_v28, %v2675_v35  ;;  %v2721_v35 = vadd.f32 %v5112_v40, %v2714_v47  ;;  %v10061_v40 = vld [vmem:[#allocation31_spill] sm:$0xff] }
 0x75b   :  { %v2617_v56 = vadd.f32 %v2616_v8, %v6886_v62 }
 0x75c   :  { %v2642_v36 = vmul.f32 %v2641_v29, %v7861_v44  ;;  %v2677_v9 = vpop.f32.mrf.mxu0  ;;  %v2728_v29 = vmul.f32 0.5, %v2719_v59 }
 0x75d   :  { %v2630_v19 = vadd.f32 %v2629_v61, %v2617_v56  ;;  %v2722_v56 = vmul.f32 0.5, %v2718_v45 }
 0x75e   :  { %v2643_v26 = vadd.f32 %v2642_v36, %v2637_v31 }
 0x75f   :  { %v2651_v48 = vmul.f32 0.5, %v2630_v19 }
 0x760   :  { %v7984_v18 = vadd.f32 %v2649_v24, %v2643_v26 }
 0x761   :  { %5444 = vtanh.f32 %v2651_v48  ;;  %v2716_v10 = vpop.f32.mrf.mxu3  ;;  %v2734_v48 = vmul.f32 0.5, %v2721_v35  ;;  %v10062_v35 = vld [vmem:[#allocation50_spill] sm:$0xff] }
 0x762   :  { %5108 = vst [vmem:[%s9143_s5 + $0x38] sm:$0xff] %v7984_v18  ;;  %v2618_v13 = vpop.f32.mrf.mxu2  ;;  %5446 = vtanh.f32 %v7984_v18 }
 0x763   :  { %5448 = vtanh.f32 %v2728_v29 }
 0x764   :  { %5450 = vtanh.f32 %v2722_v56  ;;  %v10059_v56 = vld [vmem:[#allocation111_spill] sm:$0xff] }
 0x767   :  { %v5445_v61 = vpop.eup %5444 }
 0x768   :  { %v2653_v20 = vmul.f32 0.5, %v5445_v61  ;;  %v5447_v23 = vpop.eup %5446 }
 0x769   :  { %v5449_v36 = vpop.eup %5448 }
 0x76a   :  { %v2654_v5 = vadd.f32 0.5, %v2653_v20  ;;  %v5451_v9 = vpop.eup %5450  ;;  %v2730_v26 = vmul.f32 0.5, %v5449_v36  ;;  %v10064_v36 = vld [vmem:[#allocation28_spill] sm:$0xff] }
 0x76b   :  { %v2724_v47 = vmul.f32 0.5, %v5451_v9  ;;  %v10066_v9 = vld [vmem:[#allocation52_spill] sm:$0xff] }
 0x76c   :  { %v2656_v8 = vmul.f32 %v5447_v23, %v2654_v5  ;;  %v2731_v10 = vadd.f32 0.5, %v2730_v26  ;;  %v10068_v26 = vld [vmem:[#allocation32_spill] sm:$0xff] }
 0x76d   :  { %v2725_v13 = vadd.f32 0.5, %v2724_v47  ;;  %v10070_v47 = vld [vmem:[#allocation54_spill] sm:$0xff] }
 0x76e   :  { %5107 = vst [vmem:[%s9142_s4 + $0x38] sm:$0xff] %v2656_v8  ;;  %v2741_v31 = vpack.c.bf16 %v2656_v8, %v2656_v8  ;;  %v2732_v28 = vmul.f32 %v2731_v10, %v7861_v44  ;;  %v10071_v10 = vld [vmem:[#allocation41_spill] sm:$0xff] }
 0x770   :  { %2763 = vmatmul.bf16.vlgmr.msrb.gmra.mxu1 %v2741_v31  ;;  %2789 = vmatmul.bf16.vlgmr.msrb.gmra.mxu3 %v2741_v31 }
 0x771   :  { %2859 = vmatpush.bf16.msrb.mxu1 %v6426_v51  ;;  %2918 = vmatpush.bf16.msrb.mxu3 %v5739_v7 }
 0x775   :  { %2860 = vmatpush.bf16.msrb.mxu1 %v6441_v42  ;;  %2919 = vmatpush.bf16.msrb.mxu3 %v5768_v17 }
 0x779   :  { %2861 = vmatpush.bf16.msrb.mxu1 %v9512_v57  ;;  %2920 = vmatpush.bf16.msrb.mxu3 %v9513_v11 }
 0x77a   :  { %v2701_v19 = vpop.f32.mrf.mxu2 }
 0x77b   :  { %v2720_v24 = vadd.f32 %v5111_v54, %v2701_v19  ;;  %v10063_v54 = vld [vmem:[#allocation112_spill] sm:$0xff]  ;;  %v10065_v19 = vld [vmem:[#allocation35_spill] sm:$0xff] }
 0x77d   :  { %5452 = vtanh.f32 %v2720_v24  ;;  %2862 = vmatpush.bf16.msrb.mxu1 %v9514_v46  ;;  %2921 = vmatpush.bf16.msrb.mxu3 %v9515_v0  ;;  %v10067_v24 = vld [vmem:[#allocation113_spill] sm:$0xff] }
 0x77e   :  { %5454 = vtanh.f32 %v2734_v48  ;;  %v10069_v48 = vld [vmem:[#allocation39_spill] sm:$0xff] }
 0x780   :  { %2815 = vmatmul.bf16.vlgmr.msra.gmra.mxu1 %v2741_v31  ;;  %2841 = vmatmul.bf16.vlgmr.msra.gmra.mxu3 %v2741_v31 }
 0x781   :  { %2863 = vmatpush.bf16.msrb.mxu1 %v9516_v25  ;;  %2922 = vmatpush.bf16.msrb.mxu3 %v9517_v15 }
 0x782   :  { %v2703_v53 = vpop.f32.mrf.mxu2 }
 0x783   :  { %v5453_v61 = vpop.eup %5452  ;;  %v10073_v53 = vld [vmem:[#allocation114_spill] sm:$0xff] }
 0x784   :  { %v2727_v59 = vmul.f32 %v5453_v61, %v2725_v13  ;;  %v5455_v20 = vpop.eup %5454  ;;  %v10072_v13 = vld [vmem:[#allocation55_spill] sm:$0xff]  ;;  %v10074_v61 = vld [vmem:[#allocation36_spill] sm:$0xff] }
 0x785   :  { %2864 = vmatpush.bf16.msrb.mxu1 %v9518_v55  ;;  %2923 = vmatpush.bf16.msrb.mxu3 %v9519_v50  ;;  %v2736_v5 = vmul.f32 0.5, %v5455_v20  ;;  %v10077_v20 = vld [vmem:[#allocation43_spill] sm:$0xff] }
 0x786   :  { %v8017_v45 = vadd.f32 %v2732_v28, %v2727_v59  ;;  %v10075_v28 = vld [vmem:[#allocation12_spill] sm:$0xff]  ;;  %v10076_v59 = vld [vmem:[#allocation58_spill] sm:$0xff] }
 0x787   :  { %v2737_v44 = vadd.f32 0.5, %v2736_v5  ;;  %v10078_v5 = vld [vmem:[#allocation60_spill] sm:$0xff] }
 0x788   :  { %5456 = vtanh.f32 %v8017_v45 }
 0x789   :  { %2865 = vmatpush.bf16.msrb.mxu1 %v9520_v63  ;;  %2924 = vmatpush.bf16.msrb.mxu3 %v9521_v38 }
 0x78d   :  { %2866 = vmatpush.bf16.msrb.mxu1 %v9522_v37  ;;  %2925 = vmatpush.bf16.msrb.mxu3 %v9523_v6 }
 0x78e   :  { %v5457_v23 = vpop.eup %5456 }
 0x78f   :  { %v2739_v29 = vmul.f32 %v5457_v23, %v2737_v44  ;;  %v10079_v44 = vld [vmem:[#allocation14_spill] sm:$0xff] }
 0x790   :  { %2867 = vmatmul.bf16.vlgmr.msrb.gmra.mxu1 %v2741_v31  ;;  %v10060_v31 = vld [vmem:[#allocation24_spill] sm:$0xff]  ;;  %v10080_v23 = vld [vmem:[#allocation62_spill] sm:$0xff] }
 0x791   :  { %v8026_v8 = vpack.c.bf16 %v2739_v29, %v2739_v29  ;;  %2944 = vmatpush.bf16.msra.mxu1 %v9524_v1  ;;  %2994 = vmatpush.bf16.msra.mxu3 %v9525_v43  ;;  %v10081_v29 = vld [vmem:[#allocation45_spill] sm:$0xff] }
 0x793   :  { %2750 = vmatmul.bf16.vlgmr.msrb.gmra.mxu0 %v8026_v8  ;;  %2776 = vmatmul.bf16.vlgmr.msrb.gmra.mxu2 %v8026_v8 }
 0x794   :  { %2846 = vmatpush.bf16.msrb.mxu0 %v6717_v33  ;;  %2905 = vmatpush.bf16.msrb.mxu2 %v5728_v3 }
 0x795   :  { %2926 = vmatmul.bf16.vlgmr.msrb.gmra.mxu3 %v8026_v8  ;;  %2945 = vmatpush.bf16.msra.mxu1 %v9526_v52 }
 0x796   :  { %2995 = vmatpush.bf16.msra.mxu3 %v9588_v58 }
 0x798   :  { %2847 = vmatpush.bf16.msrb.mxu0 %v9589_v34  ;;  %2906 = vmatpush.bf16.msrb.mxu2 %v5766_v16 }
 0x799   :  { %2946 = vmatpush.bf16.msra.mxu1 %v9528_v41 }
 0x79a   :  { %2996 = vmatpush.bf16.msra.mxu3 %v9529_v12 }
 0x79c   :  { %2848 = vmatpush.bf16.msrb.mxu0 %v6744_v14  ;;  %2907 = vmatpush.bf16.msrb.mxu2 %v9590_v27 }
 0x79d   :  { %2947 = vmatpush.bf16.msra.mxu1 %v9591_v49 }
 0x79e   :  { %2997 = vmatpush.bf16.msra.mxu3 %v9531_v21 }
 0x7a0   :  { %2849 = vmatpush.bf16.msrb.mxu0 %v6756_v2  ;;  %2908 = vmatpush.bf16.msrb.mxu2 %v9592_v30 }
 0x7a1   :  { %2948 = vmatpush.bf16.msra.mxu1 %v9593_v39 }
 0x7a2   :  { %2998 = vmatpush.bf16.msra.mxu3 %v9594_v32 }
 0x7a3   :  { %2802 = vmatmul.bf16.vlgmr.msra.gmra.mxu0 %v8026_v8  ;;  %2828 = vmatmul.bf16.vlgmr.msra.gmra.mxu2 %v8026_v8 }
 0x7a4   :  { %2850 = vmatpush.bf16.msrb.mxu0 %v10059_v56  ;;  %2909 = vmatpush.bf16.msrb.mxu2 %v10060_v31 }
 0x7a5   :  { %2949 = vmatpush.bf16.msra.mxu1 %v10061_v40 }
 0x7a6   :  { %2999 = vmatpush.bf16.msra.mxu3 %v10062_v35 }
 0x7a8   :  { %2851 = vmatpush.bf16.msrb.mxu0 %v10063_v54  ;;  %2910 = vmatpush.bf16.msrb.mxu2 %v10064_v36 }
 0x7a9   :  { %2950 = vmatpush.bf16.msra.mxu1 %v10065_v19 }
 0x7aa   :  { %3000 = vmatpush.bf16.msra.mxu3 %v10066_v9 }
 0x7ac   :  { %2852 = vmatpush.bf16.msrb.mxu0 %v10067_v24  ;;  %2911 = vmatpush.bf16.msrb.mxu2 %v10068_v26 }
 0x7ad   :  { %2951 = vmatpush.bf16.msra.mxu1 %v10069_v48  ;;  %v10136_v48 = vld [vmem:[#allocation109_spill] sm:$0xff] }
 0x7ae   :  { %3001 = vmatpush.bf16.msra.mxu3 %v10070_v47  ;;  %v10134_v47 = vld [vmem:[#allocation105_spill] sm:$0xff] }
 0x7b0   :  { %2853 = vmatpush.bf16.msrb.mxu0 %v10073_v53  ;;  %2912 = vmatpush.bf16.msrb.mxu2 %v10074_v61  ;;  %v10082_v61 = vld [vmem:[#allocation64_spill] sm:$0xff]  ;;  %v10084_v53 = vld [vmem:[#allocation66_spill] sm:$0xff] }
 0x7b1   :  { %3020 = vmatpush.bf16.msrb.mxu1 %v10071_v10  ;;  %v10088_v10 = vld [vmem:[#allocation70_spill] sm:$0xff] }
 0x7b2   :  { %3046 = vmatpush.bf16.msrb.mxu3 %v10072_v13  ;;  %2952 = vmatmul.bf16.vlgmr.msra.gmra.mxu1 %v8026_v8  ;;  %v10086_v13 = vld [vmem:[#allocation68_spill] sm:$0xff] }
 0x7b3   :  { %2854 = vmatmul.bf16.vlgmr.msrb.gmra.mxu0 %v8026_v8  ;;  %2913 = vmatmul.bf16.vlgmr.msrb.gmra.mxu2 %v8026_v8 }
 0x7b4   :  { %2931 = vmatpush.bf16.msra.mxu0 %v10075_v28  ;;  %2981 = vmatpush.bf16.msra.mxu2 %v10076_v59  ;;  %v10083_v28 = vld [vmem:[#allocation18_spill] sm:$0xff]  ;;  %v10085_v59 = vld [vmem:[#allocation47_spill] sm:$0xff] }
 0x7b5   :  { %3021 = vmatpush.bf16.msrb.mxu1 %v10077_v20  ;;  %v10087_v20 = vld [vmem:[#allocation22_spill] sm:$0xff] }
 0x7b6   :  { %3047 = vmatpush.bf16.msrb.mxu3 %v10078_v5  ;;  %v10089_v5 = vld [vmem:[#allocation49_spill] sm:$0xff] }
 0x7b8   :  { %2932 = vmatpush.bf16.msra.mxu0 %v10079_v44  ;;  %2982 = vmatpush.bf16.msra.mxu2 %v10080_v23  ;;  %v10090_v44 = vld [vmem:[#allocation72_spill] sm:$0xff]  ;;  %v10091_v23 = vld [vmem:[#allocation26_spill] sm:$0xff] }
 0x7b9   :  { %3022 = vmatpush.bf16.msrb.mxu1 %v10081_v29  ;;  %v10092_v29 = vld [vmem:[#allocation74_spill] sm:$0xff] }
 0x7ba   :  { %3048 = vmatpush.bf16.msrb.mxu3 %v10082_v61  ;;  %v10093_v61 = vld [vmem:[#allocation51_spill] sm:$0xff] }
 0x7bc   :  { %2933 = vmatpush.bf16.msra.mxu0 %v10083_v28  ;;  %2983 = vmatpush.bf16.msra.mxu2 %v10084_v53  ;;  %v10094_v28 = vld [vmem:[#allocation76_spill] sm:$0xff]  ;;  %v10095_v53 = vld [vmem:[#allocation30_spill] sm:$0xff] }
 0x7bd   :  { %3023 = vmatpush.bf16.msrb.mxu1 %v10085_v59  ;;  %v10096_v59 = vld [vmem:[#allocation78_spill] sm:$0xff] }
 0x7be   :  { %3049 = vmatpush.bf16.msrb.mxu3 %v10086_v13  ;;  %v10097_v13 = vld [vmem:[#allocation53_spill] sm:$0xff] }
 0x7c0   :  { %2934 = vmatpush.bf16.msra.mxu0 %v10087_v20  ;;  %2984 = vmatpush.bf16.msra.mxu2 %v10088_v10  ;;  %v10098_v20 = vld [vmem:[#allocation80_spill] sm:$0xff]  ;;  %v10099_v10 = vld [vmem:[#allocation34_spill] sm:$0xff] }
 0x7c1   :  { %3024 = vmatpush.bf16.msrb.mxu1 %v10089_v5  ;;  %v10100_v5 = vld [vmem:[#allocation82_spill] sm:$0xff] }
 0x7c2   :  { %3050 = vmatpush.bf16.msrb.mxu3 %v10090_v44  ;;  %v10101_v44 = vld [vmem:[#allocation56_spill] sm:$0xff] }
 0x7c4   :  { %2935 = vmatpush.bf16.msra.mxu0 %v10091_v23  ;;  %2985 = vmatpush.bf16.msra.mxu2 %v10092_v29  ;;  %v10102_v23 = vld [vmem:[#allocation57_spill] sm:$0xff]  ;;  %v10103_v29 = vld [vmem:[#allocation84_spill] sm:$0xff] }
 0x7c5   :  { %3025 = vmatpush.bf16.msrb.mxu1 %v10093_v61  ;;  %v10104_v61 = vld [vmem:[#allocation38_spill] sm:$0xff] }
 0x7c6   :  { %3051 = vmatpush.bf16.msrb.mxu3 %v10094_v28  ;;  %v10105_v28 = vld [vmem:[#allocation59_spill] sm:$0xff] }
 0x7c8   :  { %2936 = vmatpush.bf16.msra.mxu0 %v10095_v53  ;;  %2986 = vmatpush.bf16.msra.mxu2 %v10096_v59  ;;  %v10106_v53 = vld [vmem:[#allocation92_spill] sm:$0xff]  ;;  %v10107_v59 = vld [vmem:[#allocation94_spill] sm:$0xff] }
 0x7c9   :  { %3026 = vmatpush.bf16.msrb.mxu1 %v10097_v13  ;;  %v10132_v13 = vld [vmem:[#allocation101_spill] sm:$0xff] }
 0x7ca   :  { %3052 = vmatpush.bf16.msrb.mxu3 %v10098_v20  ;;  %v10108_v20 = vld [vmem:[#allocation61_spill] sm:$0xff] }
 0x7cc   :  { %2937 = vmatpush.bf16.msra.mxu0 %v10099_v10  ;;  %2987 = vmatpush.bf16.msra.mxu2 %v10100_v5  ;;  %v10109_v10 = vld [vmem:[#allocation63_spill] sm:$0xff]  ;;  %v10110_v5 = vld [vmem:[#allocation96_spill] sm:$0xff] }
 0x7cd   :  { %3027 = vmatpush.bf16.msrb.mxu1 %v10101_v44  ;;  %v10111_v44 = vld [vmem:[#allocation65_spill] sm:$0xff] }
 0x7ce   :  { %3053 = vmatpush.bf16.msrb.mxu3 %v10103_v29  ;;  %v10113_v29 = vld [vmem:[#allocation98_spill] sm:$0xff] }
 0x7d0   :  { %2938 = vmatpush.bf16.msra.mxu0 %v10104_v61  ;;  %2988 = vmatpush.bf16.msra.mxu2 %v10106_v53  ;;  %v10114_v61 = vld [vmem:[#allocation69_spill] sm:$0xff]  ;;  %v10116_v53 = vld [vmem:[#allocation100_spill] sm:$0xff] }
 0x7d1   :  { %3072 = vmatpush.bf16.msra.mxu1 %v10102_v23  ;;  %v10112_v23 = vld [vmem:[#allocation67_spill] sm:$0xff] }
 0x7d3   :  { %2939 = vmatmul.bf16.vlgmr.msra.gmra.mxu0 %v8026_v8  ;;  %v10118_v8 = vld [vmem:[#allocation75_spill] sm:$0xff] }
 0x7d4   :  { %3007 = vmatpush.bf16.msrb.mxu0 %v10105_v28  ;;  %3033 = vmatpush.bf16.msrb.mxu2 %v10107_v59  ;;  %v10115_v28 = vld [vmem:[#allocation71_spill] sm:$0xff]  ;;  %v10117_v59 = vld [vmem:[#allocation73_spill] sm:$0xff] }
 0x7d5   :  { %3073 = vmatpush.bf16.msra.mxu1 %v10108_v20  ;;  %v10119_v20 = vld [vmem:[#allocation102_spill] sm:$0xff] }
 0x7d8   :  { %3008 = vmatpush.bf16.msrb.mxu0 %v10109_v10  ;;  %3034 = vmatpush.bf16.msrb.mxu2 %v10110_v5  ;;  %v10120_v10 = vld [vmem:[#allocation77_spill] sm:$0xff]  ;;  %v10121_v5 = vld [vmem:[#allocation79_spill] sm:$0xff] }
 0x7d9   :  { %3074 = vmatpush.bf16.msra.mxu1 %v10111_v44  ;;  %v10122_v44 = vld [vmem:[#allocation104_spill] sm:$0xff] }
 0x7dc   :  { %3009 = vmatpush.bf16.msrb.mxu0 %v10112_v23  ;;  %3035 = vmatpush.bf16.msrb.mxu2 %v10113_v29  ;;  %v10123_v23 = vld [vmem:[#allocation81_spill] sm:$0xff]  ;;  %v10124_v29 = vld [vmem:[#allocation83_spill] sm:$0xff] }
 0x7dd   :  { %3075 = vmatpush.bf16.msra.mxu1 %v10114_v61  ;;  %v10125_v61 = vld [vmem:[#allocation106_spill] sm:$0xff] }
 0x7e0   :  { %3010 = vmatpush.bf16.msrb.mxu0 %v10115_v28  ;;  %3036 = vmatpush.bf16.msrb.mxu2 %v10116_v53  ;;  %v10126_v28 = vld [vmem:[#allocation85_spill] sm:$0xff] }
 0x7e1   :  { %3076 = vmatpush.bf16.msra.mxu1 %v10117_v59  ;;  %v10127_v53 = vld [vmem:[#allocation93_spill] sm:$0xff]  ;;  %v10128_v59 = vld [vmem:[#allocation95_spill] sm:$0xff] }
 0x7e4   :  { %3011 = vmatpush.bf16.msrb.mxu0 %v10118_v8  ;;  %3037 = vmatpush.bf16.msrb.mxu2 %v10119_v20  ;;  %v10129_v8 = vld [vmem:[#allocation108_spill] sm:$0xff]  ;;  %v10130_v20 = vld [vmem:[#allocation97_spill] sm:$0xff] }
 0x7e5   :  { %3077 = vmatpush.bf16.msra.mxu1 %v10120_v10 }
 0x7e8   :  { %3012 = vmatpush.bf16.msrb.mxu0 %v10121_v5  ;;  %3038 = vmatpush.bf16.msrb.mxu2 %v10122_v44  ;;  %v10131_v5 = vld [vmem:[#allocation99_spill] sm:$0xff] }
 0x7e9   :  { %3078 = vmatpush.bf16.msra.mxu1 %v10123_v23 }
 0x7ec   :  { %3013 = vmatpush.bf16.msrb.mxu0 %v10124_v29  ;;  %3039 = vmatpush.bf16.msrb.mxu2 %v10125_v61  ;;  %v10133_v29 = vld [vmem:[#allocation103_spill] sm:$0xff] }
 0x7ed   :  { %3079 = vmatpush.bf16.msra.mxu1 %v10126_v28  ;;  %v2764_v10 = vpop.f32.mrf.mxu1 }
 0x7f0   :  { %3014 = vmatpush.bf16.msrb.mxu0 %v10127_v53  ;;  %3040 = vmatpush.bf16.msrb.mxu2 %v10129_v8  ;;  %v10135_v53 = vld [vmem:[#allocation107_spill] sm:$0xff] }
 0x7f3   :  { %v2790_v44 = vpop.f32.mrf.mxu3 }
 0x7f4   :  { %3059 = vmatpush.bf16.msra.mxu0 %v10128_v59 }
 0x7f5   :  { %v2766_v23 = vpop.f32.mrf.mxu1 }
 0x7f8   :  { %3060 = vmatpush.bf16.msra.mxu0 %v10130_v20 }
 0x7fb   :  { %v2792_v61 = vpop.f32.mrf.mxu3 }
 0x7fc   :  { %3061 = vmatpush.bf16.msra.mxu0 %v10131_v5 }
 0x7fd   :  { %v2816_v28 = vpop.f32.mrf.mxu1 }
 0x800   :  { %3062 = vmatpush.bf16.msra.mxu0 %v10132_v13 }
 0x803   :  { %v2842_v59 = vpop.f32.mrf.mxu3 }
 0x804   :  { %3063 = vmatpush.bf16.msra.mxu0 %v10133_v29 }
 0x805   :  { %v2818_v8 = vpop.f32.mrf.mxu1 }
 0x806   :  { %v10137_v8 = vld [vmem:[#allocation116_spill] sm:$0xff] }
 0x808   :  { %3064 = vmatpush.bf16.msra.mxu0 %v10134_v47 }
 0x80b   :  { %v2844_v20 = vpop.f32.mrf.mxu3 }
 0x80c   :  { %3065 = vmatpush.bf16.msra.mxu0 %v10135_v53 }
 0x80d   :  { %v2868_v24 = vpop.f32.mrf.mxu1 }
 0x810   :  { %3066 = vmatpush.bf16.msra.mxu0 %v10136_v48  ;;  %v2751_v26 = vpop.f32.mrf.mxu0 }
 0x811   :  { %v2752_v29 = vadd.f32 %v2751_v26, %v6873_v22 }
 0x813   :  { %v2765_v47 = vadd.f32 %v2764_v10, %v2752_v29 }
 0x815   :  { %v2870_v19 = vpop.f32.mrf.mxu1  ;;  %v2884_v40 = vmul.f32 0.5, %v2765_v47 }
 0x816   :  { %v2777_v5 = vpop.f32.mrf.mxu2 }
 0x817   :  { %v2778_v9 = vadd.f32 %v2777_v5, %v9586_v60 }
 0x818   :  { %v2927_v13 = vpop.f32.mrf.mxu3  ;;  %v2753_v23 = vpop.f32.mrf.mxu0 }
 0x819   :  { %v2791_v61 = vadd.f32 %v2790_v44, %v2778_v9 }
 0x81b   :  { %v2872_v36 = vmul.f32 0.5, %v2791_v61 }
 0x81d   :  { %5458 = vtanh.f32 %v2872_v36 }
 0x81e   :  { %v2779_v54 = vpop.f32.mrf.mxu2  ;;  %5460 = vtanh.f32 %v2884_v40 }
 0x820   :  { %v2929_v53 = vpop.f32.mrf.mxu3  ;;  %v2803_v35 = vpop.f32.mrf.mxu0 }
 0x821   :  { %v2804_v20 = vadd.f32 %v2803_v35, %v10137_v8 }
 0x823   :  { %v2817_v48 = vadd.f32 %v2816_v28, %v2804_v20  ;;  %v5459_v5 = vpop.eup %5458 }
 0x824   :  { %v2874_v19 = vmul.f32 0.5, %v5459_v5  ;;  %v5461_v10 = vpop.eup %5460 }
 0x825   :  { %v2877_v31 = vmul.f32 0.5, %v2817_v48  ;;  %v2886_v53 = vmul.f32 0.5, %v5461_v10 }
 0x826   :  { %v2829_v56 = vpop.f32.mrf.mxu2  ;;  %v2875_v44 = vadd.f32 0.5, %v2874_v19 }
 0x827   :  { %5462 = vtanh.f32 %v2877_v31  ;;  %v2830_v23 = vadd.f32 %v2829_v56, %v6882_v4  ;;  %v2887_v61 = vadd.f32 0.5, %v2886_v53 }
 0x828   :  { %v2805_v26 = vpop.f32.mrf.mxu0  ;;  %v2876_v31 = vmul.f32 %v2875_v44, %v7984_v18  ;;  %v5116_v18 = vld [vmem:[%s9138_s0 + $0x128] sm:$0xff] }
 0x829   :  { %v2843_v9 = vadd.f32 %v2842_v59, %v2830_v23  ;;  %v2958_v53 = vadd.f32 %v5116_v18, %v2927_v13  ;;  %v5118_v13 = vld [vmem:[%s9138_s0 + $0x138] sm:$0xff] }
 0x82b   :  { %5464 = vtanh.f32 %v2843_v9 }
 0x82d   :  { %v5463_v54 = vpop.eup %5462 }
 0x82e   :  { %v2879_v47 = vmul.f32 0.5, %v5463_v54  ;;  %v2831_v36 = vpop.f32.mrf.mxu2  ;;  %v5115_v54 = vld [vmem:[%s9138_s0 + $0x120] sm:$0xff] }
 0x82f   :  { %v2953_v29 = vpop.f32.mrf.mxu1 }
 0x830   :  { %v2880_v35 = vadd.f32 0.5, %v2879_v47  ;;  %v2855_v28 = vpop.f32.mrf.mxu0 }
 0x831   :  { %v5465_v40 = vpop.eup %5464  ;;  %v2856_v48 = vadd.f32 %v2855_v28, %v6886_v62 }
 0x832   :  { %v2881_v56 = vmul.f32 %v2880_v35, %v8017_v45  ;;  %v2888_v5 = vmul.f32 %v5465_v40, %v2887_v61  ;;  %v2967_v40 = vmul.f32 0.5, %v2958_v53 }
 0x833   :  { %v2869_v59 = vadd.f32 %v2868_v24, %v2856_v48 }
 0x834   :  { %v2882_v20 = vadd.f32 %v2881_v56, %v2876_v31  ;;  %v2960_v56 = vadd.f32 %v5118_v13, %v2953_v29  ;;  %v10139_v13 = vld [vmem:[#allocation24_spill] sm:$0xff] }
 0x835   :  { %v2890_v23 = vmul.f32 0.5, %v2869_v59  ;;  %v5117_v59 = vld [vmem:[%s9138_s0 + $0x130] sm:$0xff] }
 0x836   :  { %v8140_v26 = vadd.f32 %v2888_v5, %v2882_v20  ;;  %v2914_v19 = vpop.f32.mrf.mxu2 }
 0x837   :  { %5466 = vtanh.f32 %v2890_v23  ;;  %v2955_v9 = vpop.f32.mrf.mxu1  ;;  %v2957_v35 = vadd.f32 %v5115_v54, %v2914_v19 }
 0x838   :  { %5114 = vst [vmem:[%s9143_s5 + $0x40] sm:$0xff] %v8140_v26  ;;  %v2857_v10 = vpop.f32.mrf.mxu0  ;;  %5468 = vtanh.f32 %v8140_v26 }
 0x839   :  { %v2961_v31 = vmul.f32 0.5, %v2957_v35  ;;  %5470 = vtanh.f32 %v2967_v40  ;;  %v2973_v10 = vmul.f32 0.5, %v2960_v56  ;;  %v10140_v56 = vld [vmem:[#allocation31_spill] sm:$0xff] }
 0x83b   :  { %5472 = vtanh.f32 %v2961_v31 }
 0x83d   :  { %v5467_v24 = vpop.eup %5466 }
 0x83e   :  { %v2892_v44 = vmul.f32 0.5, %v5467_v24  ;;  %v2916_v47 = vpop.f32.mrf.mxu2  ;;  %v5469_v28 = vpop.eup %5468 }
 0x83f   :  { %v5471_v20 = vpop.eup %5470 }
 0x840   :  { %v2893_v36 = vadd.f32 0.5, %v2892_v44  ;;  %v2969_v19 = vmul.f32 0.5, %v5471_v20  ;;  %v10142_v20 = vld [vmem:[#allocation112_spill] sm:$0xff] }
 0x841   :  { %v5473_v23 = vpop.eup %5472 }
 0x842   :  { %v2895_v48 = vmul.f32 %v5469_v28, %v2893_v36  ;;  %v2963_v29 = vmul.f32 0.5, %v5473_v23  ;;  %v2970_v18 = vadd.f32 0.5, %v2969_v19  ;;  %v10144_v23 = vld [vmem:[#allocation35_spill] sm:$0xff]  ;;  %v10146_v19 = vld [vmem:[#allocation113_spill] sm:$0xff] }
 0x844   :  { %5113 = vst [vmem:[%s9142_s4 + $0x40] sm:$0xff] %v2895_v48  ;;  %v2980_v61 = vpack.c.bf16 %v2895_v48, %v2895_v48  ;;  %v2964_v24 = vadd.f32 0.5, %v2963_v29  ;;  %v2971_v44 = vmul.f32 %v2970_v18, %v8017_v45  ;;  %v10148_v29 = vld [vmem:[#allocation39_spill] sm:$0xff]  ;;  %v10149_v18 = vld [vmem:[#allocation54_spill] sm:$0xff] }
 0x846   :  { %3002 = vmatmul.bf16.vlgmr.msra.gmra.mxu3 %v2980_v61  ;;  %3028 = vmatmul.bf16.vlgmr.msrb.gmra.mxu1 %v2980_v61 }
 0x847   :  { %3098 = vmatpush.bf16.msra.mxu3 %v6426_v51  ;;  %3157 = vmatpush.bf16.msrb.mxu1 %v5739_v7 }
 0x84b   :  { %3099 = vmatpush.bf16.msra.mxu3 %v6441_v42  ;;  %3158 = vmatpush.bf16.msrb.mxu1 %v5768_v17 }
 0x84f   :  { %3100 = vmatpush.bf16.msra.mxu3 %v9512_v57  ;;  %3159 = vmatpush.bf16.msrb.mxu1 %v9513_v11 }
 0x850   :  { %v2940_v5 = vpop.f32.mrf.mxu0 }
 0x851   :  { %v2959_v9 = vadd.f32 %v5117_v59, %v2940_v5  ;;  %v10141_v59 = vld [vmem:[#allocation50_spill] sm:$0xff]  ;;  %v10143_v5 = vld [vmem:[#allocation28_spill] sm:$0xff] }
 0x853   :  { %5474 = vtanh.f32 %v2959_v9  ;;  %3101 = vmatpush.bf16.msra.mxu3 %v9514_v46  ;;  %3160 = vmatpush.bf16.msrb.mxu1 %v9515_v0  ;;  %v10145_v9 = vld [vmem:[#allocation52_spill] sm:$0xff] }
 0x854   :  { %5476 = vtanh.f32 %v2973_v10  ;;  %v10147_v10 = vld [vmem:[#allocation32_spill] sm:$0xff] }
 0x856   :  { %3054 = vmatmul.bf16.vlgmr.msrb.gmra.mxu3 %v2980_v61  ;;  %3080 = vmatmul.bf16.vlgmr.msra.gmra.mxu1 %v2980_v61 }
 0x857   :  { %3102 = vmatpush.bf16.msra.mxu3 %v9516_v25  ;;  %3161 = vmatpush.bf16.msrb.mxu1 %v9517_v15 }
 0x858   :  { %v2942_v54 = vpop.f32.mrf.mxu0 }
 0x859   :  { %v5475_v53 = vpop.eup %5474  ;;  %v10151_v54 = vld [vmem:[#allocation55_spill] sm:$0xff] }
 0x85a   :  { %v2966_v47 = vmul.f32 %v5475_v53, %v2964_v24  ;;  %v5477_v36 = vpop.eup %5476  ;;  %v10150_v24 = vld [vmem:[#allocation41_spill] sm:$0xff]  ;;  %v10152_v53 = vld [vmem:[#allocation114_spill] sm:$0xff] }
 0x85b   :  { %3103 = vmatpush.bf16.msra.mxu3 %v9518_v55  ;;  %3162 = vmatpush.bf16.msrb.mxu1 %v9519_v50  ;;  %v2975_v28 = vmul.f32 0.5, %v5477_v36  ;;  %v10155_v36 = vld [vmem:[#allocation58_spill] sm:$0xff] }
 0x85c   :  { %v8173_v35 = vadd.f32 %v2971_v44, %v2966_v47  ;;  %v10153_v44 = vld [vmem:[#allocation36_spill] sm:$0xff] }
 0x85d   :  { %v2976_v45 = vadd.f32 0.5, %v2975_v28  ;;  %v10154_v47 = vld [vmem:[#allocation12_spill] sm:$0xff]  ;;  %v10156_v28 = vld [vmem:[#allocation43_spill] sm:$0xff] }
 0x85e   :  { %5478 = vtanh.f32 %v8173_v35 }
 0x85f   :  { %3104 = vmatpush.bf16.msra.mxu3 %v9520_v63  ;;  %3163 = vmatpush.bf16.msrb.mxu1 %v9521_v38 }
 0x863   :  { %3105 = vmatpush.bf16.msra.mxu3 %v9522_v37  ;;  %3164 = vmatpush.bf16.msrb.mxu1 %v9523_v6 }
 0x864   :  { %v5479_v40 = vpop.eup %5478 }
 0x865   :  { %v2978_v48 = vmul.f32 %v5479_v40, %v2976_v45  ;;  %v10157_v45 = vld [vmem:[#allocation60_spill] sm:$0xff]  ;;  %v10158_v40 = vld [vmem:[#allocation14_spill] sm:$0xff] }
 0x866   :  { %3106 = vmatmul.bf16.vlgmr.msra.gmra.mxu3 %v2980_v61  ;;  %v10138_v61 = vld [vmem:[#allocation111_spill] sm:$0xff] }
 0x867   :  { %v8182_v31 = vpack.c.bf16 %v2978_v48, %v2978_v48  ;;  %3183 = vmatpush.bf16.msrb.mxu3 %v9524_v1  ;;  %3233 = vmatpush.bf16.msra.mxu1 %v9525_v43  ;;  %v10159_v48 = vld [vmem:[#allocation62_spill] sm:$0xff] }
 0x869   :  { %2989 = vmatmul.bf16.vlgmr.msra.gmra.mxu2 %v8182_v31  ;;  %3015 = vmatmul.bf16.vlgmr.msrb.gmra.mxu0 %v8182_v31 }
 0x86a   :  { %3085 = vmatpush.bf16.msra.mxu2 %v6717_v33  ;;  %3144 = vmatpush.bf16.msrb.mxu0 %v5728_v3 }
 0x86b   :  { %3165 = vmatmul.bf16.vlgmr.msrb.gmra.mxu1 %v8182_v31  ;;  %3184 = vmatpush.bf16.msrb.mxu3 %v9526_v52 }
 0x86c   :  { %3234 = vmatpush.bf16.msra.mxu1 %v9588_v58 }
 0x86e   :  { %3086 = vmatpush.bf16.msra.mxu2 %v9589_v34  ;;  %3145 = vmatpush.bf16.msrb.mxu0 %v5766_v16 }
 0x86f   :  { %3185 = vmatpush.bf16.msrb.mxu3 %v9528_v41 }
 0x870   :  { %3235 = vmatpush.bf16.msra.mxu1 %v9529_v12 }
 0x872   :  { %3087 = vmatpush.bf16.msra.mxu2 %v6744_v14  ;;  %3146 = vmatpush.bf16.msrb.mxu0 %v9590_v27 }
 0x873   :  { %3186 = vmatpush.bf16.msrb.mxu3 %v9591_v49 }
 0x874   :  { %3236 = vmatpush.bf16.msra.mxu1 %v9531_v21 }
 0x876   :  { %3088 = vmatpush.bf16.msra.mxu2 %v6756_v2  ;;  %3147 = vmatpush.bf16.msrb.mxu0 %v9592_v30 }
 0x877   :  { %3187 = vmatpush.bf16.msrb.mxu3 %v9593_v39 }
 0x878   :  { %3237 = vmatpush.bf16.msra.mxu1 %v9594_v32 }
 0x879   :  { %3041 = vmatmul.bf16.vlgmr.msrb.gmra.mxu2 %v8182_v31  ;;  %3067 = vmatmul.bf16.vlgmr.msra.gmra.mxu0 %v8182_v31 }
 0x87a   :  { %3089 = vmatpush.bf16.msra.mxu2 %v10138_v61  ;;  %3148 = vmatpush.bf16.msrb.mxu0 %v10139_v13 }
 0x87b   :  { %3188 = vmatpush.bf16.msrb.mxu3 %v10140_v56 }
 0x87c   :  { %3238 = vmatpush.bf16.msra.mxu1 %v10141_v59 }
 0x87e   :  { %3090 = vmatpush.bf16.msra.mxu2 %v10142_v20  ;;  %3149 = vmatpush.bf16.msrb.mxu0 %v10143_v5 }
 0x87f   :  { %3189 = vmatpush.bf16.msrb.mxu3 %v10144_v23 }
 0x880   :  { %3239 = vmatpush.bf16.msra.mxu1 %v10145_v9 }
 0x882   :  { %3091 = vmatpush.bf16.msra.mxu2 %v10146_v19  ;;  %3150 = vmatpush.bf16.msrb.mxu0 %v10147_v10  ;;  %v10215_v10 = vld [vmem:[#allocation109_spill] sm:$0xff] }
 0x883   :  { %3190 = vmatpush.bf16.msrb.mxu3 %v10148_v29  ;;  %v10213_v29 = vld [vmem:[#allocation105_spill] sm:$0xff] }
 0x884   :  { %3240 = vmatpush.bf16.msra.mxu1 %v10149_v18  ;;  %v10167_v18 = vld [vmem:[#allocation70_spill] sm:$0xff] }
 0x886   :  { %3092 = vmatpush.bf16.msra.mxu2 %v10152_v53  ;;  %3151 = vmatpush.bf16.msrb.mxu0 %v10153_v44  ;;  %v10160_v53 = vld [vmem:[#allocation45_spill] sm:$0xff]  ;;  %v10161_v44 = vld [vmem:[#allocation64_spill] sm:$0xff] }
 0x887   :  { %3259 = vmatpush.bf16.msra.mxu3 %v10150_v24  ;;  %v10165_v24 = vld [vmem:[#allocation68_spill] sm:$0xff] }
 0x888   :  { %3285 = vmatpush.bf16.msrb.mxu1 %v10151_v54  ;;  %3191 = vmatmul.bf16.vlgmr.msrb.gmra.mxu3 %v8182_v31  ;;  %v10163_v54 = vld [vmem:[#allocation66_spill] sm:$0xff] }
 0x889   :  { %3093 = vmatmul.bf16.vlgmr.msra.gmra.mxu2 %v8182_v31  ;;  %3152 = vmatmul.bf16.vlgmr.msrb.gmra.mxu0 %v8182_v31 }
 0x88a   :  { %3170 = vmatpush.bf16.msrb.mxu2 %v10154_v47  ;;  %3220 = vmatpush.bf16.msra.mxu0 %v10155_v36  ;;  %v10162_v47 = vld [vmem:[#allocation18_spill] sm:$0xff]  ;;  %v10164_v36 = vld [vmem:[#allocation47_spill] sm:$0xff] }
 0x88b   :  { %3260 = vmatpush.bf16.msra.mxu3 %v10156_v28  ;;  %v10166_v28 = vld [vmem:[#allocation22_spill] sm:$0xff] }
 0x88c   :  { %3286 = vmatpush.bf16.msrb.mxu1 %v10157_v45  ;;  %v10168_v45 = vld [vmem:[#allocation49_spill] sm:$0xff] }
 0x88e   :  { %3171 = vmatpush.bf16.msrb.mxu2 %v10158_v40  ;;  %3221 = vmatpush.bf16.msra.mxu0 %v10159_v48  ;;  %v10169_v40 = vld [vmem:[#allocation72_spill] sm:$0xff]  ;;  %v10170_v48 = vld [vmem:[#allocation26_spill] sm:$0xff] }
 0x88f   :  { %3261 = vmatpush.bf16.msra.mxu3 %v10160_v53  ;;  %v10171_v53 = vld [vmem:[#allocation74_spill] sm:$0xff] }
 0x890   :  { %3287 = vmatpush.bf16.msrb.mxu1 %v10161_v44  ;;  %v10172_v44 = vld [vmem:[#allocation51_spill] sm:$0xff] }
 0x892   :  { %3172 = vmatpush.bf16.msrb.mxu2 %v10162_v47  ;;  %3222 = vmatpush.bf16.msra.mxu0 %v10163_v54  ;;  %v10173_v47 = vld [vmem:[#allocation76_spill] sm:$0xff]  ;;  %v10174_v54 = vld [vmem:[#allocation30_spill] sm:$0xff] }
 0x893   :  { %3262 = vmatpush.bf16.msra.mxu3 %v10164_v36  ;;  %v10175_v36 = vld [vmem:[#allocation78_spill] sm:$0xff] }
 0x894   :  { %3288 = vmatpush.bf16.msrb.mxu1 %v10165_v24  ;;  %v10176_v24 = vld [vmem:[#allocation53_spill] sm:$0xff] }
 0x896   :  { %3173 = vmatpush.bf16.msrb.mxu2 %v10166_v28  ;;  %3223 = vmatpush.bf16.msra.mxu0 %v10167_v18  ;;  %v10177_v28 = vld [vmem:[#allocation80_spill] sm:$0xff]  ;;  %v10178_v18 = vld [vmem:[#allocation34_spill] sm:$0xff] }
 0x897   :  { %3263 = vmatpush.bf16.msra.mxu3 %v10168_v45  ;;  %v10179_v45 = vld [vmem:[#allocation82_spill] sm:$0xff] }
 0x898   :  { %3289 = vmatpush.bf16.msrb.mxu1 %v10169_v40  ;;  %v10180_v40 = vld [vmem:[#allocation56_spill] sm:$0xff] }
 0x89a   :  { %3174 = vmatpush.bf16.msrb.mxu2 %v10170_v48  ;;  %3224 = vmatpush.bf16.msra.mxu0 %v10171_v53  ;;  %v10181_v48 = vld [vmem:[#allocation57_spill] sm:$0xff]  ;;  %v10182_v53 = vld [vmem:[#allocation84_spill] sm:$0xff] }
 0x89b   :  { %3264 = vmatpush.bf16.msra.mxu3 %v10172_v44  ;;  %v10183_v44 = vld [vmem:[#allocation38_spill] sm:$0xff] }
 0x89c   :  { %3290 = vmatpush.bf16.msrb.mxu1 %v10173_v47  ;;  %v10184_v47 = vld [vmem:[#allocation59_spill] sm:$0xff] }
 0x89e   :  { %3175 = vmatpush.bf16.msrb.mxu2 %v10174_v54  ;;  %3225 = vmatpush.bf16.msra.mxu0 %v10175_v36  ;;  %v10185_v54 = vld [vmem:[#allocation92_spill] sm:$0xff]  ;;  %v10186_v36 = vld [vmem:[#allocation94_spill] sm:$0xff] }
 0x89f   :  { %3265 = vmatpush.bf16.msra.mxu3 %v10176_v24  ;;  %v10211_v24 = vld [vmem:[#allocation101_spill] sm:$0xff] }
 0x8a0   :  { %3291 = vmatpush.bf16.msrb.mxu1 %v10177_v28  ;;  %v10187_v28 = vld [vmem:[#allocation61_spill] sm:$0xff] }
 0x8a2   :  { %3176 = vmatpush.bf16.msrb.mxu2 %v10178_v18  ;;  %3226 = vmatpush.bf16.msra.mxu0 %v10179_v45  ;;  %v10188_v18 = vld [vmem:[#allocation63_spill] sm:$0xff]  ;;  %v10189_v45 = vld [vmem:[#allocation96_spill] sm:$0xff] }
 0x8a3   :  { %3266 = vmatpush.bf16.msra.mxu3 %v10180_v40  ;;  %v10190_v40 = vld [vmem:[#allocation65_spill] sm:$0xff] }
 0x8a4   :  { %3292 = vmatpush.bf16.msrb.mxu1 %v10182_v53  ;;  %v10192_v53 = vld [vmem:[#allocation98_spill] sm:$0xff] }
 0x8a6   :  { %3177 = vmatpush.bf16.msrb.mxu2 %v10183_v44  ;;  %3227 = vmatpush.bf16.msra.mxu0 %v10185_v54  ;;  %v10193_v44 = vld [vmem:[#allocation69_spill] sm:$0xff]  ;;  %v10195_v54 = vld [vmem:[#allocation100_spill] sm:$0xff] }
 0x8a7   :  { %3311 = vmatpush.bf16.msrb.mxu3 %v10181_v48  ;;  %v10191_v48 = vld [vmem:[#allocation67_spill] sm:$0xff] }
 0x8a9   :  { %3178 = vmatmul.bf16.vlgmr.msrb.gmra.mxu2 %v8182_v31  ;;  %v10197_v31 = vld [vmem:[#allocation75_spill] sm:$0xff] }
 0x8aa   :  { %3246 = vmatpush.bf16.msra.mxu2 %v10184_v47  ;;  %3272 = vmatpush.bf16.msrb.mxu0 %v10186_v36  ;;  %v10194_v47 = vld [vmem:[#allocation71_spill] sm:$0xff]  ;;  %v10196_v36 = vld [vmem:[#allocation73_spill] sm:$0xff] }
 0x8ab   :  { %3312 = vmatpush.bf16.msrb.mxu3 %v10187_v28  ;;  %v10198_v28 = vld [vmem:[#allocation102_spill] sm:$0xff] }
 0x8ae   :  { %3247 = vmatpush.bf16.msra.mxu2 %v10188_v18  ;;  %3273 = vmatpush.bf16.msrb.mxu0 %v10189_v45  ;;  %v10199_v18 = vld [vmem:[#allocation77_spill] sm:$0xff]  ;;  %v10200_v45 = vld [vmem:[#allocation79_spill] sm:$0xff] }
 0x8af   :  { %3313 = vmatpush.bf16.msrb.mxu3 %v10190_v40  ;;  %v10201_v40 = vld [vmem:[#allocation104_spill] sm:$0xff] }
 0x8b2   :  { %3248 = vmatpush.bf16.msra.mxu2 %v10191_v48  ;;  %3274 = vmatpush.bf16.msrb.mxu0 %v10192_v53  ;;  %v10202_v48 = vld [vmem:[#allocation81_spill] sm:$0xff]  ;;  %v10203_v53 = vld [vmem:[#allocation83_spill] sm:$0xff] }
 0x8b3   :  { %3314 = vmatpush.bf16.msrb.mxu3 %v10193_v44  ;;  %v10204_v44 = vld [vmem:[#allocation106_spill] sm:$0xff] }
 0x8b6   :  { %3249 = vmatpush.bf16.msra.mxu2 %v10194_v47  ;;  %3275 = vmatpush.bf16.msrb.mxu0 %v10195_v54  ;;  %v10205_v47 = vld [vmem:[#allocation85_spill] sm:$0xff] }
 0x8b7   :  { %3315 = vmatpush.bf16.msrb.mxu3 %v10196_v36  ;;  %v10206_v54 = vld [vmem:[#allocation93_spill] sm:$0xff]  ;;  %v10207_v36 = vld [vmem:[#allocation95_spill] sm:$0xff] }
 0x8ba   :  { %3250 = vmatpush.bf16.msra.mxu2 %v10197_v31  ;;  %3276 = vmatpush.bf16.msrb.mxu0 %v10198_v28  ;;  %v10208_v31 = vld [vmem:[#allocation108_spill] sm:$0xff]  ;;  %v10209_v28 = vld [vmem:[#allocation97_spill] sm:$0xff] }
 0x8bb   :  { %3316 = vmatpush.bf16.msrb.mxu3 %v10199_v18 }
 0x8be   :  { %3251 = vmatpush.bf16.msra.mxu2 %v10200_v45  ;;  %3277 = vmatpush.bf16.msrb.mxu0 %v10201_v40  ;;  %v10210_v45 = vld [vmem:[#allocation99_spill] sm:$0xff] }
 0x8bf   :  { %3317 = vmatpush.bf16.msrb.mxu3 %v10202_v48 }
 0x8c2   :  { %3252 = vmatpush.bf16.msra.mxu2 %v10203_v53  ;;  %3278 = vmatpush.bf16.msrb.mxu0 %v10204_v44  ;;  %v10212_v53 = vld [vmem:[#allocation103_spill] sm:$0xff] }
 0x8c3   :  { %3318 = vmatpush.bf16.msrb.mxu3 %v10205_v47  ;;  %v3029_v18 = vpop.f32.mrf.mxu1 }
 0x8c6   :  { %3253 = vmatpush.bf16.msra.mxu2 %v10206_v54  ;;  %3279 = vmatpush.bf16.msrb.mxu0 %v10208_v31  ;;  %v10214_v54 = vld [vmem:[#allocation107_spill] sm:$0xff] }
 0x8c9   :  { %v3003_v40 = vpop.f32.mrf.mxu3 }
 0x8ca   :  { %3298 = vmatpush.bf16.msrb.mxu2 %v10207_v36 }
 0x8cb   :  { %v3031_v48 = vpop.f32.mrf.mxu1 }
 0x8ce   :  { %3299 = vmatpush.bf16.msrb.mxu2 %v10209_v28 }
 0x8d1   :  { %v3005_v44 = vpop.f32.mrf.mxu3 }
 0x8d2   :  { %3300 = vmatpush.bf16.msrb.mxu2 %v10210_v45 }
 0x8d3   :  { %v3081_v47 = vpop.f32.mrf.mxu1 }
 0x8d6   :  { %3301 = vmatpush.bf16.msrb.mxu2 %v10211_v24 }
 0x8d9   :  { %v3055_v36 = vpop.f32.mrf.mxu3 }
 0x8da   :  { %3302 = vmatpush.bf16.msrb.mxu2 %v10212_v53 }
 0x8db   :  { %v3083_v31 = vpop.f32.mrf.mxu1 }
 0x8de   :  { %3303 = vmatpush.bf16.msrb.mxu2 %v10213_v29 }
 0x8e1   :  { %v3057_v28 = vpop.f32.mrf.mxu3 }
 0x8e2   :  { %3304 = vmatpush.bf16.msrb.mxu2 %v10214_v54 }
 0x8e6   :  { %3305 = vmatpush.bf16.msrb.mxu2 %v10215_v10  ;;  %v3016_v19 = vpop.f32.mrf.mxu0 }
 0x8e7   :  { %v3017_v48 = vadd.f32 %v3016_v19, %v9586_v60 }
 0x8e8   :  { %v3166_v9 = vpop.f32.mrf.mxu1 }
 0x8e9   :  { %v3107_v23 = vpop.f32.mrf.mxu3  ;;  %v3030_v44 = vadd.f32 %v3029_v18, %v3017_v48 }
 0x8eb   :  { %v3111_v54 = vmul.f32 0.5, %v3030_v44 }
 0x8ec   :  { %v2990_v45 = vpop.f32.mrf.mxu2 }
 0x8ed   :  { %v2991_v29 = vadd.f32 %v2990_v45, %v6873_v22  ;;  %5480 = vtanh.f32 %v3111_v54 }
 0x8ee   :  { %v3018_v5 = vpop.f32.mrf.mxu0 }
 0x8ef   :  { %v3004_v56 = vadd.f32 %v3003_v40, %v2991_v29 }
 0x8f0   :  { %v3168_v24 = vpop.f32.mrf.mxu1 }
 0x8f1   :  { %v3109_v20 = vpop.f32.mrf.mxu3  ;;  %v3123_v31 = vmul.f32 0.5, %v3004_v56 }
 0x8f3   :  { %5482 = vtanh.f32 %v3123_v31  ;;  %v5481_v19 = vpop.eup %5480 }
 0x8f4   :  { %v2992_v53 = vpop.f32.mrf.mxu2  ;;  %v3113_v45 = vmul.f32 0.5, %v5481_v19 }
 0x8f6   :  { %v3068_v59 = vpop.f32.mrf.mxu0  ;;  %v3114_v40 = vadd.f32 0.5, %v3113_v45 }
 0x8f7   :  { %v3069_v61 = vadd.f32 %v3068_v59, %v6882_v4 }
 0x8f9   :  { %v3082_v53 = vadd.f32 %v3081_v47, %v3069_v61  ;;  %v5483_v20 = vpop.eup %5482 }
 0x8fa   :  { %v3125_v54 = vmul.f32 0.5, %v5483_v20 }
 0x8fc   :  { %v3042_v13 = vpop.f32.mrf.mxu2  ;;  %v3126_v31 = vadd.f32 0.5, %v3125_v54 }
 0x8fd   :  { %v3043_v28 = vadd.f32 %v3042_v13, %v10137_v8 }
 0x8fe   :  { %v3070_v10 = vpop.f32.mrf.mxu0 }
 0x8ff   :  { %v3056_v5 = vadd.f32 %v3055_v36, %v3043_v28  ;;  %v3115_v36 = vmul.f32 %v3114_v40, %v8140_v26  ;;  %v5122_v26 = vld [vmem:[%s9138_s0 + $0x148] sm:$0xff] }
 0x900   :  { %v3197_v20 = vadd.f32 %v5122_v26, %v3166_v9  ;;  %v5124_v9 = vld [vmem:[%s9138_s0 + $0x158] sm:$0xff] }
 0x901   :  { %v3116_v24 = vmul.f32 0.5, %v3056_v5 }
 0x903   :  { %5484 = vtanh.f32 %v3116_v24 }
 0x904   :  { %v3044_v18 = vpop.f32.mrf.mxu2  ;;  %5486 = vtanh.f32 %v3082_v53 }
 0x906   :  { %v3153_v48 = vpop.f32.mrf.mxu0 }
 0x909   :  { %v5485_v29 = vpop.eup %5484 }
 0x90a   :  { %v3118_v56 = vmul.f32 0.5, %v5485_v29  ;;  %v5487_v8 = vpop.eup %5486 }
 0x90b   :  { %v3192_v44 = vpop.f32.mrf.mxu3  ;;  %v3127_v5 = vmul.f32 %v5487_v8, %v3126_v31  ;;  %v5121_v8 = vld [vmem:[%s9138_s0 + $0x140] sm:$0xff]  ;;  %v5123_v31 = vld [vmem:[%s9138_s0 + $0x150] sm:$0xff] }
 0x90c   :  { %v3119_v13 = vadd.f32 0.5, %v3118_v56  ;;  %v3094_v10 = vpop.f32.mrf.mxu2  ;;  %v3196_v40 = vadd.f32 %v5121_v8, %v3153_v48  ;;  %v3199_v48 = vadd.f32 %v5124_v9, %v3192_v44  ;;  %v10218_v9 = vld [vmem:[#allocation31_spill] sm:$0xff] }
 0x90d   :  { %v3095_v59 = vadd.f32 %v3094_v10, %v6886_v62 }
 0x90e   :  { %v3120_v61 = vmul.f32 %v3119_v13, %v8173_v35  ;;  %v3155_v28 = vpop.f32.mrf.mxu0  ;;  %v3206_v13 = vmul.f32 0.5, %v3197_v20 }
 0x90f   :  { %v3108_v47 = vadd.f32 %v3107_v23, %v3095_v59  ;;  %v3200_v59 = vmul.f32 0.5, %v3196_v40 }
 0x910   :  { %v3121_v24 = vadd.f32 %v3120_v61, %v3115_v36 }
 0x911   :  { %v3129_v19 = vmul.f32 0.5, %v3108_v47 }
 0x912   :  { %v8296_v53 = vadd.f32 %v3127_v5, %v3121_v24 }
 0x913   :  { %5488 = vtanh.f32 %v3129_v19  ;;  %v3194_v18 = vpop.f32.mrf.mxu3  ;;  %v3212_v19 = vmul.f32 0.5, %v3199_v48  ;;  %v10219_v48 = vld [vmem:[#allocation50_spill] sm:$0xff] }
 0x914   :  { %5120 = vst [vmem:[%s9143_s5 + $0x48] sm:$0xff] %v8296_v53  ;;  %v3096_v45 = vpop.f32.mrf.mxu2  ;;  %5490 = vtanh.f32 %v8296_v53 }
 0x915   :  { %5492 = vtanh.f32 %v3206_v13 }
 0x916   :  { %5494 = vtanh.f32 %v3200_v59  ;;  %v10216_v59 = vld [vmem:[#allocation111_spill] sm:$0xff] }
 0x919   :  { %v5489_v23 = vpop.eup %5488 }
 0x91a   :  { %v3131_v29 = vmul.f32 0.5, %v5489_v23  ;;  %v5491_v56 = vpop.eup %5490 }
 0x91b   :  { %v5493_v61 = vpop.eup %5492 }
 0x91c   :  { %v3132_v54 = vadd.f32 0.5, %v3131_v29  ;;  %v5495_v28 = vpop.eup %5494  ;;  %v3208_v24 = vmul.f32 0.5, %v5493_v61  ;;  %v10221_v61 = vld [vmem:[#allocation28_spill] sm:$0xff] }
 0x91d   :  { %v3202_v44 = vmul.f32 0.5, %v5495_v28  ;;  %v10223_v28 = vld [vmem:[#allocation52_spill] sm:$0xff] }
 0x91e   :  { %v3134_v10 = vmul.f32 %v5491_v56, %v3132_v54  ;;  %v3209_v18 = vadd.f32 0.5, %v3208_v24  ;;  %v10225_v24 = vld [vmem:[#allocation32_spill] sm:$0xff] }
 0x91f   :  { %v3203_v45 = vadd.f32 0.5, %v3202_v44  ;;  %v10227_v44 = vld [vmem:[#allocation54_spill] sm:$0xff] }
 0x920   :  { %5119 = vst [vmem:[%s9142_s4 + $0x48] sm:$0xff] %v3134_v10  ;;  %v3219_v36 = vpack.c.bf16 %v3134_v10, %v3134_v10  ;;  %v3210_v8 = vmul.f32 %v3209_v18, %v8173_v35  ;;  %v10228_v18 = vld [vmem:[#allocation41_spill] sm:$0xff] }
 0x922   :  { %3241 = vmatmul.bf16.vlgmr.msra.gmra.mxu1 %v3219_v36  ;;  %3267 = vmatmul.bf16.vlgmr.msra.gmra.mxu3 %v3219_v36 }
 0x923   :  { %3337 = vmatpush.bf16.msra.mxu1 %v6426_v51  ;;  %3396 = vmatpush.bf16.msra.mxu3 %v5739_v7 }
 0x927   :  { %3338 = vmatpush.bf16.msra.mxu1 %v6441_v42  ;;  %3397 = vmatpush.bf16.msra.mxu3 %v5768_v17 }
 0x92b   :  { %3339 = vmatpush.bf16.msra.mxu1 %v9512_v57  ;;  %3398 = vmatpush.bf16.msra.mxu3 %v9513_v11 }
 0x92c   :  { %v3179_v47 = vpop.f32.mrf.mxu2 }
 0x92d   :  { %v3198_v5 = vadd.f32 %v5123_v31, %v3179_v47  ;;  %v10220_v31 = vld [vmem:[#allocation112_spill] sm:$0xff]  ;;  %v10222_v47 = vld [vmem:[#allocation35_spill] sm:$0xff] }
 0x92f   :  { %5496 = vtanh.f32 %v3198_v5  ;;  %3340 = vmatpush.bf16.msra.mxu1 %v9514_v46  ;;  %3399 = vmatpush.bf16.msra.mxu3 %v9515_v0  ;;  %v10224_v5 = vld [vmem:[#allocation113_spill] sm:$0xff] }
 0x930   :  { %5498 = vtanh.f32 %v3212_v19  ;;  %v10226_v19 = vld [vmem:[#allocation39_spill] sm:$0xff] }
 0x932   :  { %3293 = vmatmul.bf16.vlgmr.msrb.gmra.mxu1 %v3219_v36  ;;  %3319 = vmatmul.bf16.vlgmr.msrb.gmra.mxu3 %v3219_v36 }
 0x933   :  { %3341 = vmatpush.bf16.msra.mxu1 %v9516_v25  ;;  %3400 = vmatpush.bf16.msra.mxu3 %v9517_v15 }
 0x934   :  { %v3181_v26 = vpop.f32.mrf.mxu2 }
 0x935   :  { %v5497_v23 = vpop.eup %5496  ;;  %v10230_v26 = vld [vmem:[#allocation114_spill] sm:$0xff] }
 0x936   :  { %v3205_v20 = vmul.f32 %v5497_v23, %v3203_v45  ;;  %v5499_v29 = vpop.eup %5498  ;;  %v10229_v45 = vld [vmem:[#allocation55_spill] sm:$0xff]  ;;  %v10231_v23 = vld [vmem:[#allocation36_spill] sm:$0xff] }
 0x937   :  { %3342 = vmatpush.bf16.msra.mxu1 %v9518_v55  ;;  %3401 = vmatpush.bf16.msra.mxu3 %v9519_v50  ;;  %v3214_v54 = vmul.f32 0.5, %v5499_v29  ;;  %v10234_v29 = vld [vmem:[#allocation43_spill] sm:$0xff] }
 0x938   :  { %v8329_v40 = vadd.f32 %v3210_v8, %v3205_v20  ;;  %v10232_v8 = vld [vmem:[#allocation12_spill] sm:$0xff]  ;;  %v10233_v20 = vld [vmem:[#allocation58_spill] sm:$0xff] }
 0x939   :  { %v3215_v35 = vadd.f32 0.5, %v3214_v54  ;;  %v10235_v54 = vld [vmem:[#allocation60_spill] sm:$0xff] }
 0x93a   :  { %5500 = vtanh.f32 %v8329_v40 }
 0x93b   :  { %3343 = vmatpush.bf16.msra.mxu1 %v9520_v63  ;;  %3402 = vmatpush.bf16.msra.mxu3 %v9521_v38 }
 0x93f   :  { %3344 = vmatpush.bf16.msra.mxu1 %v9522_v37  ;;  %3403 = vmatpush.bf16.msra.mxu3 %v9523_v6 }
 0x940   :  { %v5501_v56 = vpop.eup %5500 }
 0x941   :  { %v3217_v13 = vmul.f32 %v5501_v56, %v3215_v35  ;;  %v10236_v35 = vld [vmem:[#allocation14_spill] sm:$0xff] }
 0x942   :  { %3345 = vmatmul.bf16.vlgmr.msra.gmra.mxu1 %v3219_v36  ;;  %v10217_v36 = vld [vmem:[#allocation24_spill] sm:$0xff]  ;;  %v10237_v56 = vld [vmem:[#allocation62_spill] sm:$0xff] }
 0x943   :  { %v8338_v10 = vpack.c.bf16 %v3217_v13, %v3217_v13  ;;  %3422 = vmatpush.bf16.msrb.mxu1 %v9524_v1  ;;  %3472 = vmatpush.bf16.msrb.mxu3 %v9525_v43  ;;  %v10238_v13 = vld [vmem:[#allocation45_spill] sm:$0xff] }
 0x945   :  { %3228 = vmatmul.bf16.vlgmr.msra.gmra.mxu0 %v8338_v10  ;;  %3254 = vmatmul.bf16.vlgmr.msra.gmra.mxu2 %v8338_v10 }
 0x946   :  { %3324 = vmatpush.bf16.msra.mxu0 %v6717_v33  ;;  %3383 = vmatpush.bf16.msra.mxu2 %v5728_v3 }
 0x947   :  { %3404 = vmatmul.bf16.vlgmr.msra.gmra.mxu3 %v8338_v10  ;;  %3423 = vmatpush.bf16.msrb.mxu1 %v9526_v52 }
 0x948   :  { %3473 = vmatpush.bf16.msrb.mxu3 %v9588_v58 }
 0x94a   :  { %3325 = vmatpush.bf16.msra.mxu0 %v9589_v34  ;;  %3384 = vmatpush.bf16.msra.mxu2 %v5766_v16 }
 0x94b   :  { %3424 = vmatpush.bf16.msrb.mxu1 %v9528_v41 }
 0x94c   :  { %3474 = vmatpush.bf16.msrb.mxu3 %v9529_v12 }
 0x94e   :  { %3326 = vmatpush.bf16.msra.mxu0 %v6744_v14  ;;  %3385 = vmatpush.bf16.msra.mxu2 %v9590_v27 }
 0x94f   :  { %3425 = vmatpush.bf16.msrb.mxu1 %v9591_v49 }
 0x950   :  { %3475 = vmatpush.bf16.msrb.mxu3 %v9531_v21 }
 0x952   :  { %3327 = vmatpush.bf16.msra.mxu0 %v6756_v2  ;;  %3386 = vmatpush.bf16.msra.mxu2 %v9592_v30 }
 0x953   :  { %3426 = vmatpush.bf16.msrb.mxu1 %v9593_v39 }
 0x954   :  { %3476 = vmatpush.bf16.msrb.mxu3 %v9594_v32 }
 0x955   :  { %3280 = vmatmul.bf16.vlgmr.msrb.gmra.mxu0 %v8338_v10  ;;  %3306 = vmatmul.bf16.vlgmr.msrb.gmra.mxu2 %v8338_v10 }
 0x956   :  { %3328 = vmatpush.bf16.msra.mxu0 %v10216_v59  ;;  %3387 = vmatpush.bf16.msra.mxu2 %v10217_v36 }
 0x957   :  { %3427 = vmatpush.bf16.msrb.mxu1 %v10218_v9 }
 0x958   :  { %3477 = vmatpush.bf16.msrb.mxu3 %v10219_v48 }
 0x95a   :  { %3329 = vmatpush.bf16.msra.mxu0 %v10220_v31  ;;  %3388 = vmatpush.bf16.msra.mxu2 %v10221_v61 }
 0x95b   :  { %3428 = vmatpush.bf16.msrb.mxu1 %v10222_v47 }
 0x95c   :  { %3478 = vmatpush.bf16.msrb.mxu3 %v10223_v28 }
 0x95e   :  { %3330 = vmatpush.bf16.msra.mxu0 %v10224_v5  ;;  %3389 = vmatpush.bf16.msra.mxu2 %v10225_v24 }
 0x95f   :  { %3429 = vmatpush.bf16.msrb.mxu1 %v10226_v19  ;;  %v10293_v19 = vld [vmem:[#allocation109_spill] sm:$0xff] }
 0x960   :  { %3479 = vmatpush.bf16.msrb.mxu3 %v10227_v44  ;;  %v10291_v44 = vld [vmem:[#allocation105_spill] sm:$0xff] }
 0x962   :  { %3331 = vmatpush.bf16.msra.mxu0 %v10230_v26  ;;  %3390 = vmatpush.bf16.msra.mxu2 %v10231_v23  ;;  %v10239_v23 = vld [vmem:[#allocation64_spill] sm:$0xff]  ;;  %v10241_v26 = vld [vmem:[#allocation66_spill] sm:$0xff] }
 0x963   :  { %3498 = vmatpush.bf16.msra.mxu1 %v10228_v18  ;;  %v10245_v18 = vld [vmem:[#allocation70_spill] sm:$0xff] }
 0x964   :  { %3524 = vmatpush.bf16.msra.mxu3 %v10229_v45  ;;  %3430 = vmatmul.bf16.vlgmr.msrb.gmra.mxu1 %v8338_v10  ;;  %v10243_v45 = vld [vmem:[#allocation68_spill] sm:$0xff] }
 0x965   :  { %3332 = vmatmul.bf16.vlgmr.msra.gmra.mxu0 %v8338_v10  ;;  %3391 = vmatmul.bf16.vlgmr.msra.gmra.mxu2 %v8338_v10 }
 0x966   :  { %3409 = vmatpush.bf16.msrb.mxu0 %v10232_v8  ;;  %3459 = vmatpush.bf16.msrb.mxu2 %v10233_v20  ;;  %v10240_v8 = vld [vmem:[#allocation18_spill] sm:$0xff]  ;;  %v10242_v20 = vld [vmem:[#allocation47_spill] sm:$0xff] }
 0x967   :  { %3499 = vmatpush.bf16.msra.mxu1 %v10234_v29  ;;  %v10244_v29 = vld [vmem:[#allocation22_spill] sm:$0xff] }
 0x968   :  { %3525 = vmatpush.bf16.msra.mxu3 %v10235_v54  ;;  %v10246_v54 = vld [vmem:[#allocation49_spill] sm:$0xff] }
 0x96a   :  { %3410 = vmatpush.bf16.msrb.mxu0 %v10236_v35  ;;  %3460 = vmatpush.bf16.msrb.mxu2 %v10237_v56  ;;  %v10247_v35 = vld [vmem:[#allocation72_spill] sm:$0xff]  ;;  %v10248_v56 = vld [vmem:[#allocation26_spill] sm:$0xff] }
 0x96b   :  { %3500 = vmatpush.bf16.msra.mxu1 %v10238_v13  ;;  %v10249_v13 = vld [vmem:[#allocation74_spill] sm:$0xff] }
 0x96c   :  { %3526 = vmatpush.bf16.msra.mxu3 %v10239_v23  ;;  %v10250_v23 = vld [vmem:[#allocation51_spill] sm:$0xff] }
 0x96e   :  { %3411 = vmatpush.bf16.msrb.mxu0 %v10240_v8  ;;  %3461 = vmatpush.bf16.msrb.mxu2 %v10241_v26  ;;  %v10251_v8 = vld [vmem:[#allocation76_spill] sm:$0xff]  ;;  %v10252_v26 = vld [vmem:[#allocation30_spill] sm:$0xff] }
 0x96f   :  { %3501 = vmatpush.bf16.msra.mxu1 %v10242_v20  ;;  %v10253_v20 = vld [vmem:[#allocation78_spill] sm:$0xff] }
 0x970   :  { %3527 = vmatpush.bf16.msra.mxu3 %v10243_v45  ;;  %v10254_v45 = vld [vmem:[#allocation53_spill] sm:$0xff] }
 0x972   :  { %3412 = vmatpush.bf16.msrb.mxu0 %v10244_v29  ;;  %3462 = vmatpush.bf16.msrb.mxu2 %v10245_v18  ;;  %v10255_v29 = vld [vmem:[#allocation80_spill] sm:$0xff]  ;;  %v10256_v18 = vld [vmem:[#allocation34_spill] sm:$0xff] }
 0x973   :  { %3502 = vmatpush.bf16.msra.mxu1 %v10246_v54  ;;  %v10257_v54 = vld [vmem:[#allocation82_spill] sm:$0xff] }
 0x974   :  { %3528 = vmatpush.bf16.msra.mxu3 %v10247_v35  ;;  %v10258_v35 = vld [vmem:[#allocation56_spill] sm:$0xff] }
 0x976   :  { %3413 = vmatpush.bf16.msrb.mxu0 %v10248_v56  ;;  %3463 = vmatpush.bf16.msrb.mxu2 %v10249_v13  ;;  %v10259_v56 = vld [vmem:[#allocation57_spill] sm:$0xff]  ;;  %v10260_v13 = vld [vmem:[#allocation84_spill] sm:$0xff] }
 0x977   :  { %3503 = vmatpush.bf16.msra.mxu1 %v10250_v23  ;;  %v10261_v23 = vld [vmem:[#allocation38_spill] sm:$0xff] }
 0x978   :  { %3529 = vmatpush.bf16.msra.mxu3 %v10251_v8  ;;  %v10262_v8 = vld [vmem:[#allocation59_spill] sm:$0xff] }
 0x97a   :  { %3414 = vmatpush.bf16.msrb.mxu0 %v10252_v26  ;;  %3464 = vmatpush.bf16.msrb.mxu2 %v10253_v20  ;;  %v10263_v26 = vld [vmem:[#allocation92_spill] sm:$0xff]  ;;  %v10264_v20 = vld [vmem:[#allocation94_spill] sm:$0xff] }
 0x97b   :  { %3504 = vmatpush.bf16.msra.mxu1 %v10254_v45  ;;  %v10289_v45 = vld [vmem:[#allocation101_spill] sm:$0xff] }
 0x97c   :  { %3530 = vmatpush.bf16.msra.mxu3 %v10255_v29  ;;  %v10265_v29 = vld [vmem:[#allocation61_spill] sm:$0xff] }
 0x97e   :  { %3415 = vmatpush.bf16.msrb.mxu0 %v10256_v18  ;;  %3465 = vmatpush.bf16.msrb.mxu2 %v10257_v54  ;;  %v10266_v18 = vld [vmem:[#allocation63_spill] sm:$0xff]  ;;  %v10267_v54 = vld [vmem:[#allocation96_spill] sm:$0xff] }
 0x97f   :  { %3505 = vmatpush.bf16.msra.mxu1 %v10258_v35  ;;  %v10268_v35 = vld [vmem:[#allocation65_spill] sm:$0xff] }
 0x980   :  { %3531 = vmatpush.bf16.msra.mxu3 %v10260_v13  ;;  %v10270_v13 = vld [vmem:[#allocation98_spill] sm:$0xff] }
 0x982   :  { %3416 = vmatpush.bf16.msrb.mxu0 %v10261_v23  ;;  %3466 = vmatpush.bf16.msrb.mxu2 %v10263_v26  ;;  %v10271_v23 = vld [vmem:[#allocation69_spill] sm:$0xff]  ;;  %v10273_v26 = vld [vmem:[#allocation100_spill] sm:$0xff] }
 0x983   :  { %3550 = vmatpush.bf16.msrb.mxu1 %v10259_v56  ;;  %v10269_v56 = vld [vmem:[#allocation67_spill] sm:$0xff] }
 0x985   :  { %3417 = vmatmul.bf16.vlgmr.msrb.gmra.mxu0 %v8338_v10  ;;  %v10275_v10 = vld [vmem:[#allocation75_spill] sm:$0xff] }
 0x986   :  { %3485 = vmatpush.bf16.msra.mxu0 %v10262_v8  ;;  %3511 = vmatpush.bf16.msra.mxu2 %v10264_v20  ;;  %v10272_v8 = vld [vmem:[#allocation71_spill] sm:$0xff]  ;;  %v10274_v20 = vld [vmem:[#allocation73_spill] sm:$0xff] }
 0x987   :  { %3551 = vmatpush.bf16.msrb.mxu1 %v10265_v29  ;;  %v10276_v29 = vld [vmem:[#allocation102_spill] sm:$0xff] }
 0x98a   :  { %3486 = vmatpush.bf16.msra.mxu0 %v10266_v18  ;;  %3512 = vmatpush.bf16.msra.mxu2 %v10267_v54  ;;  %v10277_v18 = vld [vmem:[#allocation77_spill] sm:$0xff]  ;;  %v10278_v54 = vld [vmem:[#allocation79_spill] sm:$0xff] }
 0x98b   :  { %3552 = vmatpush.bf16.msrb.mxu1 %v10268_v35  ;;  %v10279_v35 = vld [vmem:[#allocation104_spill] sm:$0xff] }
 0x98e   :  { %3487 = vmatpush.bf16.msra.mxu0 %v10269_v56  ;;  %3513 = vmatpush.bf16.msra.mxu2 %v10270_v13  ;;  %v10280_v56 = vld [vmem:[#allocation81_spill] sm:$0xff]  ;;  %v10281_v13 = vld [vmem:[#allocation83_spill] sm:$0xff] }
 0x98f   :  { %3553 = vmatpush.bf16.msrb.mxu1 %v10271_v23  ;;  %v10282_v23 = vld [vmem:[#allocation106_spill] sm:$0xff] }
 0x992   :  { %3488 = vmatpush.bf16.msra.mxu0 %v10272_v8  ;;  %3514 = vmatpush.bf16.msra.mxu2 %v10273_v26  ;;  %v10283_v8 = vld [vmem:[#allocation85_spill] sm:$0xff] }
 0x993   :  { %3554 = vmatpush.bf16.msrb.mxu1 %v10274_v20  ;;  %v10284_v26 = vld [vmem:[#allocation93_spill] sm:$0xff]  ;;  %v10285_v20 = vld [vmem:[#allocation95_spill] sm:$0xff] }
 0x996   :  { %3489 = vmatpush.bf16.msra.mxu0 %v10275_v10  ;;  %3515 = vmatpush.bf16.msra.mxu2 %v10276_v29  ;;  %v10286_v10 = vld [vmem:[#allocation108_spill] sm:$0xff]  ;;  %v10287_v29 = vld [vmem:[#allocation97_spill] sm:$0xff] }
 0x997   :  { %3555 = vmatpush.bf16.msrb.mxu1 %v10277_v18 }
 0x99a   :  { %3490 = vmatpush.bf16.msra.mxu0 %v10278_v54  ;;  %3516 = vmatpush.bf16.msra.mxu2 %v10279_v35  ;;  %v10288_v54 = vld [vmem:[#allocation99_spill] sm:$0xff] }
 0x99b   :  { %3556 = vmatpush.bf16.msrb.mxu1 %v10280_v56 }
 0x99e   :  { %3491 = vmatpush.bf16.msra.mxu0 %v10281_v13  ;;  %3517 = vmatpush.bf16.msra.mxu2 %v10282_v23  ;;  %v10290_v13 = vld [vmem:[#allocation103_spill] sm:$0xff] }
 0x99f   :  { %3557 = vmatpush.bf16.msrb.mxu1 %v10283_v8  ;;  %v3242_v18 = vpop.f32.mrf.mxu1 }
 0x9a2   :  { %3492 = vmatpush.bf16.msra.mxu0 %v10284_v26  ;;  %3518 = vmatpush.bf16.msra.mxu2 %v10286_v10  ;;  %v10292_v26 = vld [vmem:[#allocation107_spill] sm:$0xff] }
 0x9a5   :  { %v3268_v35 = vpop.f32.mrf.mxu3 }
 0x9a6   :  { %3537 = vmatpush.bf16.msrb.mxu0 %v10285_v20 }
 0x9a7   :  { %v3244_v56 = vpop.f32.mrf.mxu1 }
 0x9aa   :  { %3538 = vmatpush.bf16.msrb.mxu0 %v10287_v29 }
 0x9ad   :  { %v3270_v23 = vpop.f32.mrf.mxu3 }
 0x9ae   :  { %3539 = vmatpush.bf16.msrb.mxu0 %v10288_v54 }
 0x9af   :  { %v3294_v8 = vpop.f32.mrf.mxu1 }
 0x9b2   :  { %3540 = vmatpush.bf16.msrb.mxu0 %v10289_v45 }
 0x9b5   :  { %v3320_v20 = vpop.f32.mrf.mxu3 }
 0x9b6   :  { %3541 = vmatpush.bf16.msrb.mxu0 %v10290_v13 }
 0x9b7   :  { %v3296_v10 = vpop.f32.mrf.mxu1 }
 0x9b8   :  { %v10294_v10 = vld [vmem:[#allocation116_spill] sm:$0xff] }
 0x9ba   :  { %3542 = vmatpush.bf16.msrb.mxu0 %v10291_v44 }
 0x9bd   :  { %v3322_v29 = vpop.f32.mrf.mxu3 }
 0x9be   :  { %3543 = vmatpush.bf16.msrb.mxu0 %v10292_v26 }
 0x9bf   :  { %v3346_v5 = vpop.f32.mrf.mxu1 }
 0x9c2   :  { %3544 = vmatpush.bf16.msrb.mxu0 %v10293_v19  ;;  %v3229_v24 = vpop.f32.mrf.mxu0 }
 0x9c3   :  { %v3230_v13 = vadd.f32 %v3229_v24, %v6873_v22 }
 0x9c5   :  { %v3243_v44 = vadd.f32 %v3242_v18, %v3230_v13 }
 0x9c7   :  { %v3348_v47 = vpop.f32.mrf.mxu1  ;;  %v3362_v9 = vmul.f32 0.5, %v3243_v44 }
 0x9c8   :  { %v3255_v54 = vpop.f32.mrf.mxu2 }
 0x9c9   :  { %v3256_v28 = vadd.f32 %v3255_v54, %v9586_v60 }
 0x9ca   :  { %v3405_v45 = vpop.f32.mrf.mxu3  ;;  %v3231_v56 = vpop.f32.mrf.mxu0 }
 0x9cb   :  { %v3269_v23 = vadd.f32 %v3268_v35, %v3256_v28 }
 0x9cd   :  { %v3350_v61 = vmul.f32 0.5, %v3269_v23 }
 0x9cf   :  { %5502 = vtanh.f32 %v3350_v61 }
 0x9d0   :  { %v3257_v31 = vpop.f32.mrf.mxu2  ;;  %5504 = vtanh.f32 %v3362_v9 }
 0x9d2   :  { %v3407_v26 = vpop.f32.mrf.mxu3  ;;  %v3281_v48 = vpop.f32.mrf.mxu0 }
 0x9d3   :  { %v3282_v29 = vadd.f32 %v3281_v48, %v10294_v10 }
 0x9d5   :  { %v3295_v19 = vadd.f32 %v3294_v8, %v3282_v29  ;;  %v5503_v54 = vpop.eup %5502 }
 0x9d6   :  { %v3352_v47 = vmul.f32 0.5, %v5503_v54  ;;  %v5505_v18 = vpop.eup %5504 }
 0x9d7   :  { %v3355_v36 = vmul.f32 0.5, %v3295_v19  ;;  %v3364_v26 = vmul.f32 0.5, %v5505_v18 }
 0x9d8   :  { %v3307_v59 = vpop.f32.mrf.mxu2  ;;  %v3353_v35 = vadd.f32 0.5, %v3352_v47 }
 0x9d9   :  { %5506 = vtanh.f32 %v3355_v36  ;;  %v3308_v56 = vadd.f32 %v3307_v59, %v6882_v4  ;;  %v3365_v23 = vadd.f32 0.5, %v3364_v26 }
 0x9da   :  { %v3283_v24 = vpop.f32.mrf.mxu0  ;;  %v3354_v36 = vmul.f32 %v3353_v35, %v8296_v53  ;;  %v5128_v53 = vld [vmem:[%s9138_s0 + $0x168] sm:$0xff] }
 0x9db   :  { %v3321_v28 = vadd.f32 %v3320_v20, %v3308_v56  ;;  %v3436_v26 = vadd.f32 %v5128_v53, %v3405_v45  ;;  %v5130_v45 = vld [vmem:[%s9138_s0 + $0x178] sm:$0xff] }
 0x9dd   :  { %5508 = vtanh.f32 %v3321_v28 }
 0x9df   :  { %v5507_v31 = vpop.eup %5506 }
 0x9e0   :  { %v3357_v44 = vmul.f32 0.5, %v5507_v31  ;;  %v3309_v61 = vpop.f32.mrf.mxu2  ;;  %v5127_v31 = vld [vmem:[%s9138_s0 + $0x160] sm:$0xff] }
 0x9e1   :  { %v3431_v13 = vpop.f32.mrf.mxu1 }
 0x9e2   :  { %v3358_v48 = vadd.f32 0.5, %v3357_v44  ;;  %v3333_v8 = vpop.f32.mrf.mxu0 }
 0x9e3   :  { %v5509_v9 = vpop.eup %5508  ;;  %v3334_v19 = vadd.f32 %v3333_v8, %v6886_v62 }
 0x9e4   :  { %v3359_v59 = vmul.f32 %v3358_v48, %v8329_v40  ;;  %v3366_v54 = vmul.f32 %v5509_v9, %v3365_v23  ;;  %v3445_v9 = vmul.f32 0.5, %v3436_v26 }
 0x9e5   :  { %v3347_v20 = vadd.f32 %v3346_v5, %v3334_v19 }
 0x9e6   :  { %v3360_v29 = vadd.f32 %v3359_v59, %v3354_v36  ;;  %v3438_v59 = vadd.f32 %v5130_v45, %v3431_v13  ;;  %v10296_v45 = vld [vmem:[#allocation24_spill] sm:$0xff] }
 0x9e7   :  { %v3368_v56 = vmul.f32 0.5, %v3347_v20  ;;  %v5129_v20 = vld [vmem:[%s9138_s0 + $0x170] sm:$0xff] }
 0x9e8   :  { %v8452_v24 = vadd.f32 %v3366_v54, %v3360_v29  ;;  %v3392_v47 = vpop.f32.mrf.mxu2 }
 0x9e9   :  { %5510 = vtanh.f32 %v3368_v56  ;;  %v3433_v28 = vpop.f32.mrf.mxu1  ;;  %v3435_v48 = vadd.f32 %v5127_v31, %v3392_v47 }
 0x9ea   :  { %5126 = vst [vmem:[%s9143_s5 + $0x50] sm:$0xff] %v8452_v24  ;;  %v3335_v18 = vpop.f32.mrf.mxu0  ;;  %5512 = vtanh.f32 %v8452_v24 }
 0x9eb   :  { %v3439_v36 = vmul.f32 0.5, %v3435_v48  ;;  %5514 = vtanh.f32 %v3445_v9  ;;  %v3451_v18 = vmul.f32 0.5, %v3438_v59  ;;  %v10297_v59 = vld [vmem:[#allocation31_spill] sm:$0xff] }
 0x9ed   :  { %5516 = vtanh.f32 %v3439_v36 }
 0x9ef   :  { %v5511_v5 = vpop.eup %5510 }
 0x9f0   :  { %v3370_v35 = vmul.f32 0.5, %v5511_v5  ;;  %v3394_v44 = vpop.f32.mrf.mxu2  ;;  %v5513_v8 = vpop.eup %5512 }
 0x9f1   :  { %v5515_v29 = vpop.eup %5514 }
 0x9f2   :  { %v3371_v61 = vadd.f32 0.5, %v3370_v35  ;;  %v3447_v47 = vmul.f32 0.5, %v5515_v29  ;;  %v10299_v29 = vld [vmem:[#allocation112_spill] sm:$0xff] }
 0x9f3   :  { %v5517_v56 = vpop.eup %5516 }
 0x9f4   :  { %v3373_v19 = vmul.f32 %v5513_v8, %v3371_v61  ;;  %v3441_v13 = vmul.f32 0.5, %v5517_v56  ;;  %v3448_v53 = vadd.f32 0.5, %v3447_v47  ;;  %v10301_v56 = vld [vmem:[#allocation35_spill] sm:$0xff]  ;;  %v10303_v47 = vld [vmem:[#allocation113_spill] sm:$0xff] }
 0x9f6   :  { %5125 = vst [vmem:[%s9142_s4 + $0x50] sm:$0xff] %v3373_v19  ;;  %v3458_v23 = vpack.c.bf16 %v3373_v19, %v3373_v19  ;;  %v3442_v5 = vadd.f32 0.5, %v3441_v13  ;;  %v3449_v35 = vmul.f32 %v3448_v53, %v8329_v40  ;;  %v10305_v13 = vld [vmem:[#allocation39_spill] sm:$0xff]  ;;  %v10306_v53 = vld [vmem:[#allocation54_spill] sm:$0xff] }
 0x9f8   :  { %3480 = vmatmul.bf16.vlgmr.msrb.gmra.mxu3 %v3458_v23  ;;  %3506 = vmatmul.bf16.vlgmr.msra.gmra.mxu1 %v3458_v23 }
 0x9f9   :  { %3576 = vmatpush.bf16.msrb.mxu3 %v6426_v51  ;;  %3635 = vmatpush.bf16.msra.mxu1 %v5739_v7 }
 0x9fd   :  { %3577 = vmatpush.bf16.msrb.mxu3 %v6441_v42  ;;  %3636 = vmatpush.bf16.msra.mxu1 %v5768_v17 }
 0xa01   :  { %3578 = vmatpush.bf16.msrb.mxu3 %v9512_v57  ;;  %3637 = vmatpush.bf16.msra.mxu1 %v9513_v11 }
 0xa02   :  { %v3418_v54 = vpop.f32.mrf.mxu0 }
 0xa03   :  { %v3437_v28 = vadd.f32 %v5129_v20, %v3418_v54  ;;  %v10298_v20 = vld [vmem:[#allocation50_spill] sm:$0xff]  ;;  %v10300_v54 = vld [vmem:[#allocation28_spill] sm:$0xff] }
 0xa05   :  { %5518 = vtanh.f32 %v3437_v28  ;;  %3579 = vmatpush.bf16.msrb.mxu3 %v9514_v46  ;;  %3638 = vmatpush.bf16.msra.mxu1 %v9515_v0  ;;  %v10302_v28 = vld [vmem:[#allocation52_spill] sm:$0xff] }
 0xa06   :  { %5520 = vtanh.f32 %v3451_v18  ;;  %v10304_v18 = vld [vmem:[#allocation32_spill] sm:$0xff] }
 0xa08   :  { %3532 = vmatmul.bf16.vlgmr.msra.gmra.mxu3 %v3458_v23  ;;  %3558 = vmatmul.bf16.vlgmr.msrb.gmra.mxu1 %v3458_v23 }
 0xa09   :  { %3580 = vmatpush.bf16.msrb.mxu3 %v9516_v25  ;;  %3639 = vmatpush.bf16.msra.mxu1 %v9517_v15 }
 0xa0a   :  { %v3420_v31 = vpop.f32.mrf.mxu0 }
 0xa0b   :  { %v5519_v26 = vpop.eup %5518  ;;  %v10308_v31 = vld [vmem:[#allocation55_spill] sm:$0xff] }
 0xa0c   :  { %v3444_v44 = vmul.f32 %v5519_v26, %v3442_v5  ;;  %v5521_v61 = vpop.eup %5520  ;;  %v10307_v5 = vld [vmem:[#allocation41_spill] sm:$0xff]  ;;  %v10309_v26 = vld [vmem:[#allocation114_spill] sm:$0xff] }
 0xa0d   :  { %3581 = vmatpush.bf16.msrb.mxu3 %v9518_v55  ;;  %3640 = vmatpush.bf16.msra.mxu1 %v9519_v50  ;;  %v3453_v8 = vmul.f32 0.5, %v5521_v61  ;;  %v10312_v61 = vld [vmem:[#allocation58_spill] sm:$0xff] }
 0xa0e   :  { %v8485_v48 = vadd.f32 %v3449_v35, %v3444_v44  ;;  %v10310_v35 = vld [vmem:[#allocation36_spill] sm:$0xff] }
 0xa0f   :  { %v3454_v40 = vadd.f32 0.5, %v3453_v8  ;;  %v10311_v44 = vld [vmem:[#allocation12_spill] sm:$0xff]  ;;  %v10313_v8 = vld [vmem:[#allocation43_spill] sm:$0xff] }
 0xa10   :  { %5522 = vtanh.f32 %v8485_v48 }
 0xa11   :  { %3582 = vmatpush.bf16.msrb.mxu3 %v9520_v63  ;;  %3641 = vmatpush.bf16.msra.mxu1 %v9521_v38 }
 0xa15   :  { %3583 = vmatpush.bf16.msrb.mxu3 %v9522_v37  ;;  %3642 = vmatpush.bf16.msra.mxu1 %v9523_v6 }
 0xa16   :  { %v5523_v9 = vpop.eup %5522 }
 0xa17   :  { %v3456_v19 = vmul.f32 %v5523_v9, %v3454_v40  ;;  %v10314_v40 = vld [vmem:[#allocation60_spill] sm:$0xff]  ;;  %v10315_v9 = vld [vmem:[#allocation14_spill] sm:$0xff] }
 0xa18   :  { %3584 = vmatmul.bf16.vlgmr.msrb.gmra.mxu3 %v3458_v23  ;;  %v10295_v23 = vld [vmem:[#allocation111_spill] sm:$0xff] }
 0xa19   :  { %v8494_v36 = vpack.c.bf16 %v3456_v19, %v3456_v19  ;;  %3661 = vmatpush.bf16.msra.mxu3 %v9524_v1  ;;  %3711 = vmatpush.bf16.msrb.mxu1 %v9525_v43  ;;  %v10316_v19 = vld [vmem:[#allocation62_spill] sm:$0xff] }
 0xa1b   :  { %3467 = vmatmul.bf16.vlgmr.msrb.gmra.mxu2 %v8494_v36  ;;  %3493 = vmatmul.bf16.vlgmr.msra.gmra.mxu0 %v8494_v36 }
 0xa1c   :  { %3563 = vmatpush.bf16.msrb.mxu2 %v6717_v33  ;;  %3622 = vmatpush.bf16.msra.mxu0 %v5728_v3 }
 0xa1d   :  { %3643 = vmatmul.bf16.vlgmr.msra.gmra.mxu1 %v8494_v36  ;;  %3662 = vmatpush.bf16.msra.mxu3 %v9526_v52 }
 0xa1e   :  { %3712 = vmatpush.bf16.msrb.mxu1 %v9588_v58 }
 0xa20   :  { %3564 = vmatpush.bf16.msrb.mxu2 %v9589_v34  ;;  %3623 = vmatpush.bf16.msra.mxu0 %v5766_v16 }
 0xa21   :  { %3663 = vmatpush.bf16.msra.mxu3 %v9528_v41 }
 0xa22   :  { %3713 = vmatpush.bf16.msrb.mxu1 %v9529_v12 }
 0xa24   :  { %3565 = vmatpush.bf16.msrb.mxu2 %v6744_v14  ;;  %3624 = vmatpush.bf16.msra.mxu0 %v9590_v27 }
 0xa25   :  { %3664 = vmatpush.bf16.msra.mxu3 %v9591_v49 }
 0xa26   :  { %3714 = vmatpush.bf16.msrb.mxu1 %v9531_v21 }
 0xa28   :  { %3566 = vmatpush.bf16.msrb.mxu2 %v6756_v2  ;;  %3625 = vmatpush.bf16.msra.mxu0 %v9592_v30 }
 0xa29   :  { %3665 = vmatpush.bf16.msra.mxu3 %v9593_v39 }
 0xa2a   :  { %3715 = vmatpush.bf16.msrb.mxu1 %v9594_v32 }
 0xa2b   :  { %3519 = vmatmul.bf16.vlgmr.msra.gmra.mxu2 %v8494_v36  ;;  %3545 = vmatmul.bf16.vlgmr.msrb.gmra.mxu0 %v8494_v36 }
 0xa2c   :  { %3567 = vmatpush.bf16.msrb.mxu2 %v10295_v23  ;;  %3626 = vmatpush.bf16.msra.mxu0 %v10296_v45 }
 0xa2d   :  { %3666 = vmatpush.bf16.msra.mxu3 %v10297_v59 }
 0xa2e   :  { %3716 = vmatpush.bf16.msrb.mxu1 %v10298_v20 }
 0xa30   :  { %3568 = vmatpush.bf16.msrb.mxu2 %v10299_v29  ;;  %3627 = vmatpush.bf16.msra.mxu0 %v10300_v54 }
 0xa31   :  { %3667 = vmatpush.bf16.msra.mxu3 %v10301_v56 }
 0xa32   :  { %3717 = vmatpush.bf16.msrb.mxu1 %v10302_v28 }
 0xa34   :  { %3569 = vmatpush.bf16.msrb.mxu2 %v10303_v47  ;;  %3628 = vmatpush.bf16.msra.mxu0 %v10304_v18  ;;  %v10372_v18 = vld [vmem:[#allocation109_spill] sm:$0xff] }
 0xa35   :  { %3668 = vmatpush.bf16.msra.mxu3 %v10305_v13  ;;  %v10370_v13 = vld [vmem:[#allocation105_spill] sm:$0xff] }
 0xa36   :  { %3718 = vmatpush.bf16.msrb.mxu1 %v10306_v53  ;;  %v10324_v53 = vld [vmem:[#allocation70_spill] sm:$0xff] }
 0xa38   :  { %3570 = vmatpush.bf16.msrb.mxu2 %v10309_v26  ;;  %3629 = vmatpush.bf16.msra.mxu0 %v10310_v35  ;;  %v10317_v26 = vld [vmem:[#allocation45_spill] sm:$0xff]  ;;  %v10318_v35 = vld [vmem:[#allocation64_spill] sm:$0xff] }
 0xa39   :  { %3737 = vmatpush.bf16.msrb.mxu3 %v10307_v5  ;;  %v10322_v5 = vld [vmem:[#allocation68_spill] sm:$0xff] }
 0xa3a   :  { %3763 = vmatpush.bf16.msra.mxu1 %v10308_v31  ;;  %3669 = vmatmul.bf16.vlgmr.msra.gmra.mxu3 %v8494_v36  ;;  %v10320_v31 = vld [vmem:[#allocation66_spill] sm:$0xff] }
 0xa3b   :  { %3571 = vmatmul.bf16.vlgmr.msrb.gmra.mxu2 %v8494_v36  ;;  %3630 = vmatmul.bf16.vlgmr.msra.gmra.mxu0 %v8494_v36 }
 0xa3c   :  { %3648 = vmatpush.bf16.msra.mxu2 %v10311_v44  ;;  %3698 = vmatpush.bf16.msrb.mxu0 %v10312_v61  ;;  %v10319_v44 = vld [vmem:[#allocation18_spill] sm:$0xff]  ;;  %v10321_v61 = vld [vmem:[#allocation47_spill] sm:$0xff] }
 0xa3d   :  { %3738 = vmatpush.bf16.msrb.mxu3 %v10313_v8  ;;  %v10323_v8 = vld [vmem:[#allocation22_spill] sm:$0xff] }
 0xa3e   :  { %3764 = vmatpush.bf16.msra.mxu1 %v10314_v40  ;;  %v10325_v40 = vld [vmem:[#allocation49_spill] sm:$0xff] }
 0xa40   :  { %3649 = vmatpush.bf16.msra.mxu2 %v10315_v9  ;;  %3699 = vmatpush.bf16.msrb.mxu0 %v10316_v19  ;;  %v10326_v9 = vld [vmem:[#allocation72_spill] sm:$0xff]  ;;  %v10327_v19 = vld [vmem:[#allocation26_spill] sm:$0xff] }
 0xa41   :  { %3739 = vmatpush.bf16.msrb.mxu3 %v10317_v26  ;;  %v10328_v26 = vld [vmem:[#allocation74_spill] sm:$0xff] }
 0xa42   :  { %3765 = vmatpush.bf16.msra.mxu1 %v10318_v35  ;;  %v10329_v35 = vld [vmem:[#allocation51_spill] sm:$0xff] }
 0xa44   :  { %3650 = vmatpush.bf16.msra.mxu2 %v10319_v44  ;;  %3700 = vmatpush.bf16.msrb.mxu0 %v10320_v31  ;;  %v10330_v44 = vld [vmem:[#allocation76_spill] sm:$0xff]  ;;  %v10331_v31 = vld [vmem:[#allocation30_spill] sm:$0xff] }
 0xa45   :  { %3740 = vmatpush.bf16.msrb.mxu3 %v10321_v61  ;;  %v10332_v61 = vld [vmem:[#allocation78_spill] sm:$0xff] }
 0xa46   :  { %3766 = vmatpush.bf16.msra.mxu1 %v10322_v5  ;;  %v10333_v5 = vld [vmem:[#allocation53_spill] sm:$0xff] }
 0xa48   :  { %3651 = vmatpush.bf16.msra.mxu2 %v10323_v8  ;;  %3701 = vmatpush.bf16.msrb.mxu0 %v10324_v53  ;;  %v10334_v8 = vld [vmem:[#allocation80_spill] sm:$0xff]  ;;  %v10335_v53 = vld [vmem:[#allocation34_spill] sm:$0xff] }
 0xa49   :  { %3741 = vmatpush.bf16.msrb.mxu3 %v10325_v40  ;;  %v10336_v40 = vld [vmem:[#allocation82_spill] sm:$0xff] }
 0xa4a   :  { %3767 = vmatpush.bf16.msra.mxu1 %v10326_v9  ;;  %v10337_v9 = vld [vmem:[#allocation56_spill] sm:$0xff] }
 0xa4c   :  { %3652 = vmatpush.bf16.msra.mxu2 %v10327_v19  ;;  %3702 = vmatpush.bf16.msrb.mxu0 %v10328_v26  ;;  %v10338_v19 = vld [vmem:[#allocation57_spill] sm:$0xff]  ;;  %v10339_v26 = vld [vmem:[#allocation84_spill] sm:$0xff] }
 0xa4d   :  { %3742 = vmatpush.bf16.msrb.mxu3 %v10329_v35  ;;  %v10340_v35 = vld [vmem:[#allocation38_spill] sm:$0xff] }
 0xa4e   :  { %3768 = vmatpush.bf16.msra.mxu1 %v10330_v44  ;;  %v10341_v44 = vld [vmem:[#allocation59_spill] sm:$0xff] }
 0xa50   :  { %3653 = vmatpush.bf16.msra.mxu2 %v10331_v31  ;;  %3703 = vmatpush.bf16.msrb.mxu0 %v10332_v61  ;;  %v10342_v31 = vld [vmem:[#allocation92_spill] sm:$0xff]  ;;  %v10343_v61 = vld [vmem:[#allocation94_spill] sm:$0xff] }
 0xa51   :  { %3743 = vmatpush.bf16.msrb.mxu3 %v10333_v5  ;;  %v10368_v5 = vld [vmem:[#allocation101_spill] sm:$0xff] }
 0xa52   :  { %3769 = vmatpush.bf16.msra.mxu1 %v10334_v8  ;;  %v10344_v8 = vld [vmem:[#allocation61_spill] sm:$0xff] }
 0xa54   :  { %3654 = vmatpush.bf16.msra.mxu2 %v10335_v53  ;;  %3704 = vmatpush.bf16.msrb.mxu0 %v10336_v40  ;;  %v10345_v53 = vld [vmem:[#allocation63_spill] sm:$0xff]  ;;  %v10346_v40 = vld [vmem:[#allocation96_spill] sm:$0xff] }
 0xa55   :  { %3744 = vmatpush.bf16.msrb.mxu3 %v10337_v9  ;;  %v10347_v9 = vld [vmem:[#allocation65_spill] sm:$0xff] }
 0xa56   :  { %3770 = vmatpush.bf16.msra.mxu1 %v10339_v26  ;;  %v10349_v26 = vld [vmem:[#allocation98_spill] sm:$0xff] }
 0xa58   :  { %3655 = vmatpush.bf16.msra.mxu2 %v10340_v35  ;;  %3705 = vmatpush.bf16.msrb.mxu0 %v10342_v31  ;;  %v10350_v35 = vld [vmem:[#allocation69_spill] sm:$0xff]  ;;  %v10352_v31 = vld [vmem:[#allocation100_spill] sm:$0xff] }
 0xa59   :  { %3789 = vmatpush.bf16.msra.mxu3 %v10338_v19  ;;  %v10348_v19 = vld [vmem:[#allocation67_spill] sm:$0xff] }
 0xa5b   :  { %3656 = vmatmul.bf16.vlgmr.msra.gmra.mxu2 %v8494_v36  ;;  %v10354_v36 = vld [vmem:[#allocation75_spill] sm:$0xff] }
 0xa5c   :  { %3724 = vmatpush.bf16.msrb.mxu2 %v10341_v44  ;;  %3750 = vmatpush.bf16.msra.mxu0 %v10343_v61  ;;  %v10351_v44 = vld [vmem:[#allocation71_spill] sm:$0xff]  ;;  %v10353_v61 = vld [vmem:[#allocation73_spill] sm:$0xff] }
 0xa5d   :  { %3790 = vmatpush.bf16.msra.mxu3 %v10344_v8  ;;  %v10355_v8 = vld [vmem:[#allocation102_spill] sm:$0xff] }
 0xa60   :  { %3725 = vmatpush.bf16.msrb.mxu2 %v10345_v53  ;;  %3751 = vmatpush.bf16.msra.mxu0 %v10346_v40  ;;  %v10356_v53 = vld [vmem:[#allocation77_spill] sm:$0xff]  ;;  %v10357_v40 = vld [vmem:[#allocation79_spill] sm:$0xff] }
 0xa61   :  { %3791 = vmatpush.bf16.msra.mxu3 %v10347_v9  ;;  %v10358_v9 = vld [vmem:[#allocation104_spill] sm:$0xff] }
 0xa64   :  { %3726 = vmatpush.bf16.msrb.mxu2 %v10348_v19  ;;  %3752 = vmatpush.bf16.msra.mxu0 %v10349_v26  ;;  %v10359_v19 = vld [vmem:[#allocation81_spill] sm:$0xff]  ;;  %v10360_v26 = vld [vmem:[#allocation83_spill] sm:$0xff] }
 0xa65   :  { %3792 = vmatpush.bf16.msra.mxu3 %v10350_v35  ;;  %v10361_v35 = vld [vmem:[#allocation106_spill] sm:$0xff] }
 0xa68   :  { %3727 = vmatpush.bf16.msrb.mxu2 %v10351_v44  ;;  %3753 = vmatpush.bf16.msra.mxu0 %v10352_v31  ;;  %v10362_v44 = vld [vmem:[#allocation85_spill] sm:$0xff] }
 0xa69   :  { %3793 = vmatpush.bf16.msra.mxu3 %v10353_v61  ;;  %v10363_v31 = vld [vmem:[#allocation93_spill] sm:$0xff]  ;;  %v10364_v61 = vld [vmem:[#allocation95_spill] sm:$0xff] }
 0xa6c   :  { %3728 = vmatpush.bf16.msrb.mxu2 %v10354_v36  ;;  %3754 = vmatpush.bf16.msra.mxu0 %v10355_v8  ;;  %v10365_v36 = vld [vmem:[#allocation108_spill] sm:$0xff]  ;;  %v10366_v8 = vld [vmem:[#allocation97_spill] sm:$0xff] }
 0xa6d   :  { %3794 = vmatpush.bf16.msra.mxu3 %v10356_v53 }
 0xa70   :  { %3729 = vmatpush.bf16.msrb.mxu2 %v10357_v40  ;;  %3755 = vmatpush.bf16.msra.mxu0 %v10358_v9  ;;  %v10367_v40 = vld [vmem:[#allocation99_spill] sm:$0xff] }
 0xa71   :  { %3795 = vmatpush.bf16.msra.mxu3 %v10359_v19 }
 0xa74   :  { %3730 = vmatpush.bf16.msrb.mxu2 %v10360_v26  ;;  %3756 = vmatpush.bf16.msra.mxu0 %v10361_v35  ;;  %v10369_v26 = vld [vmem:[#allocation103_spill] sm:$0xff] }
 0xa75   :  { %3796 = vmatpush.bf16.msra.mxu3 %v10362_v44  ;;  %v3507_v53 = vpop.f32.mrf.mxu1 }
 0xa78   :  { %3731 = vmatpush.bf16.msrb.mxu2 %v10363_v31  ;;  %3757 = vmatpush.bf16.msra.mxu0 %v10365_v36  ;;  %v10371_v31 = vld [vmem:[#allocation107_spill] sm:$0xff] }
 0xa7b   :  { %v3481_v9 = vpop.f32.mrf.mxu3 }
 0xa7c   :  { %3776 = vmatpush.bf16.msra.mxu2 %v10364_v61 }
 0xa7d   :  { %v3509_v19 = vpop.f32.mrf.mxu1 }
 0xa80   :  { %3777 = vmatpush.bf16.msra.mxu2 %v10366_v8 }
 0xa83   :  { %v3483_v35 = vpop.f32.mrf.mxu3 }
 0xa84   :  { %3778 = vmatpush.bf16.msra.mxu2 %v10367_v40 }
 0xa85   :  { %v3559_v44 = vpop.f32.mrf.mxu1 }
 0xa88   :  { %3779 = vmatpush.bf16.msra.mxu2 %v10368_v5 }
 0xa8b   :  { %v3533_v61 = vpop.f32.mrf.mxu3 }
 0xa8c   :  { %3780 = vmatpush.bf16.msra.mxu2 %v10369_v26 }
 0xa8d   :  { %v3561_v36 = vpop.f32.mrf.mxu1 }
 0xa90   :  { %3781 = vmatpush.bf16.msra.mxu2 %v10370_v13 }
 0xa93   :  { %v3535_v8 = vpop.f32.mrf.mxu3 }
 0xa94   :  { %3782 = vmatpush.bf16.msra.mxu2 %v10371_v31 }
 0xa98   :  { %3783 = vmatpush.bf16.msra.mxu2 %v10372_v18  ;;  %v3494_v47 = vpop.f32.mrf.mxu0 }
 0xa99   :  { %v3495_v19 = vadd.f32 %v3494_v47, %v9586_v60 }
 0xa9a   :  { %v3644_v28 = vpop.f32.mrf.mxu1 }
 0xa9b   :  { %v3585_v56 = vpop.f32.mrf.mxu3  ;;  %v3508_v35 = vadd.f32 %v3507_v53, %v3495_v19 }
 0xa9d   :  { %v3589_v31 = vmul.f32 0.5, %v3508_v35 }
 0xa9e   :  { %v3468_v40 = vpop.f32.mrf.mxu2 }
 0xa9f   :  { %v3469_v13 = vadd.f32 %v3468_v40, %v6873_v22  ;;  %5524 = vtanh.f32 %v3589_v31 }
 0xaa0   :  { %v3496_v54 = vpop.f32.mrf.mxu0 }
 0xaa1   :  { %v3482_v59 = vadd.f32 %v3481_v9, %v3469_v13 }
 0xaa2   :  { %v3646_v5 = vpop.f32.mrf.mxu1 }
 0xaa3   :  { %v3587_v29 = vpop.f32.mrf.mxu3  ;;  %v3601_v36 = vmul.f32 0.5, %v3482_v59 }
 0xaa5   :  { %5526 = vtanh.f32 %v3601_v36  ;;  %v5525_v47 = vpop.eup %5524 }
 0xaa6   :  { %v3470_v26 = vpop.f32.mrf.mxu2  ;;  %v3591_v40 = vmul.f32 0.5, %v5525_v47 }
 0xaa8   :  { %v3546_v20 = vpop.f32.mrf.mxu0  ;;  %v3592_v9 = vadd.f32 0.5, %v3591_v40 }
 0xaa9   :  { %v3547_v23 = vadd.f32 %v3546_v20, %v6882_v4 }
 0xaab   :  { %v3560_v26 = vadd.f32 %v3559_v44, %v3547_v23  ;;  %v5527_v29 = vpop.eup %5526 }
 0xaac   :  { %v3603_v31 = vmul.f32 0.5, %v5527_v29 }
 0xaae   :  { %v3520_v45 = vpop.f32.mrf.mxu2  ;;  %v3604_v36 = vadd.f32 0.5, %v3603_v31 }
 0xaaf   :  { %v3521_v8 = vadd.f32 %v3520_v45, %v10294_v10 }
 0xab0   :  { %v3548_v18 = vpop.f32.mrf.mxu0 }
 0xab1   :  { %v3534_v54 = vadd.f32 %v3533_v61, %v3521_v8  ;;  %v3593_v61 = vmul.f32 %v3592_v9, %v8452_v24  ;;  %v5134_v24 = vld [vmem:[%s9138_s0 + $0x188] sm:$0xff] }
 0xab2   :  { %v3675_v29 = vadd.f32 %v5134_v24, %v3644_v28  ;;  %v5136_v28 = vld [vmem:[%s9138_s0 + $0x198] sm:$0xff] }
 0xab3   :  { %v3594_v5 = vmul.f32 0.5, %v3534_v54 }
 0xab5   :  { %5528 = vtanh.f32 %v3594_v5 }
 0xab6   :  { %v3522_v53 = vpop.f32.mrf.mxu2  ;;  %5530 = vtanh.f32 %v3560_v26 }
 0xab8   :  { %v3631_v19 = vpop.f32.mrf.mxu0 }
 0xabb   :  { %v5529_v13 = vpop.eup %5528 }
 0xabc   :  { %v3596_v59 = vmul.f32 0.5, %v5529_v13  ;;  %v5531_v10 = vpop.eup %5530 }
 0xabd   :  { %v3670_v35 = vpop.f32.mrf.mxu3  ;;  %v3605_v54 = vmul.f32 %v5531_v10, %v3604_v36  ;;  %v5133_v10 = vld [vmem:[%s9138_s0 + $0x180] sm:$0xff]  ;;  %v5135_v36 = vld [vmem:[%s9138_s0 + $0x190] sm:$0xff] }
 0xabe   :  { %v3597_v45 = vadd.f32 0.5, %v3596_v59  ;;  %v3572_v18 = vpop.f32.mrf.mxu2  ;;  %v3674_v9 = vadd.f32 %v5133_v10, %v3631_v19  ;;  %v3677_v19 = vadd.f32 %v5136_v28, %v3670_v35  ;;  %v10375_v28 = vld [vmem:[#allocation31_spill] sm:$0xff] }
 0xabf   :  { %v3573_v20 = vadd.f32 %v3572_v18, %v6886_v62 }
 0xac0   :  { %v3598_v23 = vmul.f32 %v3597_v45, %v8485_v48  ;;  %v3633_v8 = vpop.f32.mrf.mxu0  ;;  %v3684_v45 = vmul.f32 0.5, %v3675_v29 }
 0xac1   :  { %v3586_v44 = vadd.f32 %v3585_v56, %v3573_v20  ;;  %v3678_v20 = vmul.f32 0.5, %v3674_v9 }
 0xac2   :  { %v3599_v5 = vadd.f32 %v3598_v23, %v3593_v61 }
 0xac3   :  { %v3607_v47 = vmul.f32 0.5, %v3586_v44 }
 0xac4   :  { %v8608_v26 = vadd.f32 %v3605_v54, %v3599_v5 }
 0xac5   :  { %5532 = vtanh.f32 %v3607_v47  ;;  %v3672_v53 = vpop.f32.mrf.mxu3  ;;  %v3690_v47 = vmul.f32 0.5, %v3677_v19  ;;  %v10376_v19 = vld [vmem:[#allocation50_spill] sm:$0xff] }
 0xac6   :  { %5132 = vst [vmem:[%s9143_s5 + $0x58] sm:$0xff] %v8608_v26  ;;  %v3574_v40 = vpop.f32.mrf.mxu2  ;;  %5534 = vtanh.f32 %v8608_v26 }
 0xac7   :  { %5536 = vtanh.f32 %v3684_v45 }
 0xac8   :  { %5538 = vtanh.f32 %v3678_v20  ;;  %v10373_v20 = vld [vmem:[#allocation111_spill] sm:$0xff] }
 0xacb   :  { %v5533_v56 = vpop.eup %5532 }
 0xacc   :  { %v3609_v13 = vmul.f32 0.5, %v5533_v56  ;;  %v5535_v59 = vpop.eup %5534 }
 0xacd   :  { %v5537_v23 = vpop.eup %5536 }
 0xace   :  { %v3610_v31 = vadd.f32 0.5, %v3609_v13  ;;  %v5539_v8 = vpop.eup %5538  ;;  %v3686_v5 = vmul.f32 0.5, %v5537_v23  ;;  %v10378_v23 = vld [vmem:[#allocation28_spill] sm:$0xff] }
 0xacf   :  { %v3680_v35 = vmul.f32 0.5, %v5539_v8  ;;  %v10380_v8 = vld [vmem:[#allocation52_spill] sm:$0xff] }
 0xad0   :  { %v3612_v18 = vmul.f32 %v5535_v59, %v3610_v31  ;;  %v3687_v53 = vadd.f32 0.5, %v3686_v5  ;;  %v10382_v5 = vld [vmem:[#allocation32_spill] sm:$0xff] }
 0xad1   :  { %v3681_v40 = vadd.f32 0.5, %v3680_v35  ;;  %v10384_v35 = vld [vmem:[#allocation54_spill] sm:$0xff] }
 0xad2   :  { %5131 = vst [vmem:[%s9142_s4 + $0x58] sm:$0xff] %v3612_v18  ;;  %v3697_v61 = vpack.c.bf16 %v3612_v18, %v3612_v18  ;;  %v3688_v10 = vmul.f32 %v3687_v53, %v8485_v48  ;;  %v10385_v53 = vld [vmem:[#allocation41_spill] sm:$0xff] }
 0xad4   :  { %3719 = vmatmul.bf16.vlgmr.msrb.gmra.mxu1 %v3697_v61  ;;  %3745 = vmatmul.bf16.vlgmr.msrb.gmra.mxu3 %v3697_v61 }
 0xad5   :  { %3815 = vmatpush.bf16.msrb.mxu1 %v6426_v51  ;;  %3874 = vmatpush.bf16.msrb.mxu3 %v5739_v7 }
 0xad9   :  { %3816 = vmatpush.bf16.msrb.mxu1 %v6441_v42  ;;  %3875 = vmatpush.bf16.msrb.mxu3 %v5768_v17 }
 0xadd   :  { %3817 = vmatpush.bf16.msrb.mxu1 %v9512_v57  ;;  %3876 = vmatpush.bf16.msrb.mxu3 %v9513_v11 }
 0xade   :  { %v3657_v44 = vpop.f32.mrf.mxu2 }
 0xadf   :  { %v3676_v54 = vadd.f32 %v5135_v36, %v3657_v44  ;;  %v10377_v36 = vld [vmem:[#allocation112_spill] sm:$0xff]  ;;  %v10379_v44 = vld [vmem:[#allocation35_spill] sm:$0xff] }
 0xae1   :  { %5540 = vtanh.f32 %v3676_v54  ;;  %3818 = vmatpush.bf16.msrb.mxu1 %v9514_v46  ;;  %3877 = vmatpush.bf16.msrb.mxu3 %v9515_v0  ;;  %v10381_v54 = vld [vmem:[#allocation113_spill] sm:$0xff] }
 0xae2   :  { %5542 = vtanh.f32 %v3690_v47  ;;  %v10383_v47 = vld [vmem:[#allocation39_spill] sm:$0xff] }
 0xae4   :  { %3771 = vmatmul.bf16.vlgmr.msra.gmra.mxu1 %v3697_v61  ;;  %3797 = vmatmul.bf16.vlgmr.msra.gmra.mxu3 %v3697_v61 }
 0xae5   :  { %3819 = vmatpush.bf16.msrb.mxu1 %v9516_v25  ;;  %3878 = vmatpush.bf16.msrb.mxu3 %v9517_v15 }
 0xae6   :  { %v3659_v24 = vpop.f32.mrf.mxu2 }
 0xae7   :  { %v5541_v56 = vpop.eup %5540  ;;  %v10387_v24 = vld [vmem:[#allocation114_spill] sm:$0xff] }
 0xae8   :  { %v3683_v29 = vmul.f32 %v5541_v56, %v3681_v40  ;;  %v5543_v13 = vpop.eup %5542  ;;  %v10386_v40 = vld [vmem:[#allocation55_spill] sm:$0xff]  ;;  %v10388_v56 = vld [vmem:[#allocation36_spill] sm:$0xff] }
 0xae9   :  { %3820 = vmatpush.bf16.msrb.mxu1 %v9518_v55  ;;  %3879 = vmatpush.bf16.msrb.mxu3 %v9519_v50  ;;  %v3692_v31 = vmul.f32 0.5, %v5543_v13  ;;  %v10391_v13 = vld [vmem:[#allocation43_spill] sm:$0xff] }
 0xaea   :  { %v8641_v9 = vadd.f32 %v3688_v10, %v3683_v29  ;;  %v10389_v10 = vld [vmem:[#allocation12_spill] sm:$0xff]  ;;  %v10390_v29 = vld [vmem:[#allocation58_spill] sm:$0xff] }
 0xaeb   :  { %v3693_v48 = vadd.f32 0.5, %v3692_v31  ;;  %v10392_v31 = vld [vmem:[#allocation60_spill] sm:$0xff] }
 0xaec   :  { %5544 = vtanh.f32 %v8641_v9 }
 0xaed   :  { %3821 = vmatpush.bf16.msrb.mxu1 %v9520_v63  ;;  %3880 = vmatpush.bf16.msrb.mxu3 %v9521_v38 }
 0xaf1   :  { %3822 = vmatpush.bf16.msrb.mxu1 %v9522_v37  ;;  %3881 = vmatpush.bf16.msrb.mxu3 %v9523_v6 }
 0xaf2   :  { %v5545_v59 = vpop.eup %5544 }
 0xaf3   :  { %v3695_v45 = vmul.f32 %v5545_v59, %v3693_v48  ;;  %v10393_v48 = vld [vmem:[#allocation14_spill] sm:$0xff] }
 0xaf4   :  { %3823 = vmatmul.bf16.vlgmr.msrb.gmra.mxu1 %v3697_v61  ;;  %v10374_v61 = vld [vmem:[#allocation24_spill] sm:$0xff]  ;;  %v10394_v59 = vld [vmem:[#allocation62_spill] sm:$0xff] }
 0xaf5   :  { %v8650_v18 = vpack.c.bf16 %v3695_v45, %v3695_v45  ;;  %3900 = vmatpush.bf16.msra.mxu1 %v9524_v1  ;;  %3950 = vmatpush.bf16.msra.mxu3 %v9525_v43  ;;  %v10395_v45 = vld [vmem:[#allocation45_spill] sm:$0xff] }
 0xaf7   :  { %3706 = vmatmul.bf16.vlgmr.msrb.gmra.mxu0 %v8650_v18  ;;  %3732 = vmatmul.bf16.vlgmr.msrb.gmra.mxu2 %v8650_v18 }
 0xaf8   :  { %3802 = vmatpush.bf16.msrb.mxu0 %v6717_v33  ;;  %3861 = vmatpush.bf16.msrb.mxu2 %v5728_v3 }
 0xaf9   :  { %3882 = vmatmul.bf16.vlgmr.msrb.gmra.mxu3 %v8650_v18  ;;  %3901 = vmatpush.bf16.msra.mxu1 %v9526_v52 }
 0xafa   :  { %3951 = vmatpush.bf16.msra.mxu3 %v9588_v58 }
 0xafc   :  { %3803 = vmatpush.bf16.msrb.mxu0 %v9589_v34  ;;  %3862 = vmatpush.bf16.msrb.mxu2 %v5766_v16 }
 0xafd   :  { %3902 = vmatpush.bf16.msra.mxu1 %v9528_v41 }
 0xafe   :  { %3952 = vmatpush.bf16.msra.mxu3 %v9529_v12 }
 0xb00   :  { %3804 = vmatpush.bf16.msrb.mxu0 %v6744_v14  ;;  %3863 = vmatpush.bf16.msrb.mxu2 %v9590_v27 }
 0xb01   :  { %3903 = vmatpush.bf16.msra.mxu1 %v9591_v49 }
 0xb02   :  { %3953 = vmatpush.bf16.msra.mxu3 %v9531_v21 }
 0xb04   :  { %3805 = vmatpush.bf16.msrb.mxu0 %v6756_v2  ;;  %3864 = vmatpush.bf16.msrb.mxu2 %v9592_v30 }
 0xb05   :  { %3904 = vmatpush.bf16.msra.mxu1 %v9593_v39 }
 0xb06   :  { %3954 = vmatpush.bf16.msra.mxu3 %v9594_v32 }
 0xb07   :  { %3758 = vmatmul.bf16.vlgmr.msra.gmra.mxu0 %v8650_v18  ;;  %3784 = vmatmul.bf16.vlgmr.msra.gmra.mxu2 %v8650_v18 }
 0xb08   :  { %3806 = vmatpush.bf16.msrb.mxu0 %v10373_v20  ;;  %3865 = vmatpush.bf16.msrb.mxu2 %v10374_v61 }
 0xb09   :  { %3905 = vmatpush.bf16.msra.mxu1 %v10375_v28 }
 0xb0a   :  { %3955 = vmatpush.bf16.msra.mxu3 %v10376_v19 }
 0xb0c   :  { %3807 = vmatpush.bf16.msrb.mxu0 %v10377_v36  ;;  %3866 = vmatpush.bf16.msrb.mxu2 %v10378_v23 }
 0xb0d   :  { %3906 = vmatpush.bf16.msra.mxu1 %v10379_v44 }
 0xb0e   :  { %3956 = vmatpush.bf16.msra.mxu3 %v10380_v8 }
 0xb10   :  { %3808 = vmatpush.bf16.msrb.mxu0 %v10381_v54  ;;  %3867 = vmatpush.bf16.msrb.mxu2 %v10382_v5 }
 0xb11   :  { %3907 = vmatpush.bf16.msra.mxu1 %v10383_v47  ;;  %v10450_v47 = vld [vmem:[#allocation109_spill] sm:$0xff] }
 0xb12   :  { %3957 = vmatpush.bf16.msra.mxu3 %v10384_v35  ;;  %v10448_v35 = vld [vmem:[#allocation105_spill] sm:$0xff] }
 0xb14   :  { %3809 = vmatpush.bf16.msrb.mxu0 %v10387_v24  ;;  %3868 = vmatpush.bf16.msrb.mxu2 %v10388_v56  ;;  %v10396_v56 = vld [vmem:[#allocation64_spill] sm:$0xff]  ;;  %v10398_v24 = vld [vmem:[#allocation66_spill] sm:$0xff] }
 0xb15   :  { %3976 = vmatpush.bf16.msrb.mxu1 %v10385_v53  ;;  %v10402_v53 = vld [vmem:[#allocation70_spill] sm:$0xff] }
 0xb16   :  { %4002 = vmatpush.bf16.msrb.mxu3 %v10386_v40  ;;  %3908 = vmatmul.bf16.vlgmr.msra.gmra.mxu1 %v8650_v18  ;;  %v10400_v40 = vld [vmem:[#allocation68_spill] sm:$0xff] }
 0xb17   :  { %3810 = vmatmul.bf16.vlgmr.msrb.gmra.mxu0 %v8650_v18  ;;  %3869 = vmatmul.bf16.vlgmr.msrb.gmra.mxu2 %v8650_v18 }
 0xb18   :  { %3887 = vmatpush.bf16.msra.mxu0 %v10389_v10  ;;  %3937 = vmatpush.bf16.msra.mxu2 %v10390_v29  ;;  %v10397_v10 = vld [vmem:[#allocation18_spill] sm:$0xff]  ;;  %v10399_v29 = vld [vmem:[#allocation47_spill] sm:$0xff] }
 0xb19   :  { %3977 = vmatpush.bf16.msrb.mxu1 %v10391_v13  ;;  %v10401_v13 = vld [vmem:[#allocation22_spill] sm:$0xff] }
 0xb1a   :  { %4003 = vmatpush.bf16.msrb.mxu3 %v10392_v31  ;;  %v10403_v31 = vld [vmem:[#allocation49_spill] sm:$0xff] }
 0xb1c   :  { %3888 = vmatpush.bf16.msra.mxu0 %v10393_v48  ;;  %3938 = vmatpush.bf16.msra.mxu2 %v10394_v59  ;;  %v10404_v48 = vld [vmem:[#allocation72_spill] sm:$0xff]  ;;  %v10405_v59 = vld [vmem:[#allocation26_spill] sm:$0xff] }
 0xb1d   :  { %3978 = vmatpush.bf16.msrb.mxu1 %v10395_v45  ;;  %v10406_v45 = vld [vmem:[#allocation74_spill] sm:$0xff] }
 0xb1e   :  { %4004 = vmatpush.bf16.msrb.mxu3 %v10396_v56  ;;  %v10407_v56 = vld [vmem:[#allocation51_spill] sm:$0xff] }
 0xb20   :  { %3889 = vmatpush.bf16.msra.mxu0 %v10397_v10  ;;  %3939 = vmatpush.bf16.msra.mxu2 %v10398_v24  ;;  %v10408_v10 = vld [vmem:[#allocation76_spill] sm:$0xff]  ;;  %v10409_v24 = vld [vmem:[#allocation30_spill] sm:$0xff] }
 0xb21   :  { %3979 = vmatpush.bf16.msrb.mxu1 %v10399_v29  ;;  %v10410_v29 = vld [vmem:[#allocation78_spill] sm:$0xff] }
 0xb22   :  { %4005 = vmatpush.bf16.msrb.mxu3 %v10400_v40  ;;  %v10411_v40 = vld [vmem:[#allocation53_spill] sm:$0xff] }
 0xb24   :  { %3890 = vmatpush.bf16.msra.mxu0 %v10401_v13  ;;  %3940 = vmatpush.bf16.msra.mxu2 %v10402_v53  ;;  %v10412_v13 = vld [vmem:[#allocation80_spill] sm:$0xff]  ;;  %v10413_v53 = vld [vmem:[#allocation34_spill] sm:$0xff] }
 0xb25   :  { %3980 = vmatpush.bf16.msrb.mxu1 %v10403_v31  ;;  %v10414_v31 = vld [vmem:[#allocation82_spill] sm:$0xff] }
 0xb26   :  { %4006 = vmatpush.bf16.msrb.mxu3 %v10404_v48  ;;  %v10415_v48 = vld [vmem:[#allocation56_spill] sm:$0xff] }
 0xb28   :  { %3891 = vmatpush.bf16.msra.mxu0 %v10405_v59  ;;  %3941 = vmatpush.bf16.msra.mxu2 %v10406_v45  ;;  %v10416_v59 = vld [vmem:[#allocation57_spill] sm:$0xff]  ;;  %v10417_v45 = vld [vmem:[#allocation84_spill] sm:$0xff] }
 0xb29   :  { %3981 = vmatpush.bf16.msrb.mxu1 %v10407_v56  ;;  %v10418_v56 = vld [vmem:[#allocation38_spill] sm:$0xff] }
 0xb2a   :  { %4007 = vmatpush.bf16.msrb.mxu3 %v10408_v10  ;;  %v10419_v10 = vld [vmem:[#allocation59_spill] sm:$0xff] }
 0xb2c   :  { %3892 = vmatpush.bf16.msra.mxu0 %v10409_v24  ;;  %3942 = vmatpush.bf16.msra.mxu2 %v10410_v29  ;;  %v10420_v24 = vld [vmem:[#allocation92_spill] sm:$0xff]  ;;  %v10421_v29 = vld [vmem:[#allocation94_spill] sm:$0xff] }
 0xb2d   :  { %3982 = vmatpush.bf16.msrb.mxu1 %v10411_v40  ;;  %v10446_v40 = vld [vmem:[#allocation101_spill] sm:$0xff] }
 0xb2e   :  { %4008 = vmatpush.bf16.msrb.mxu3 %v10412_v13  ;;  %v10422_v13 = vld [vmem:[#allocation61_spill] sm:$0xff] }
 0xb30   :  { %3893 = vmatpush.bf16.msra.mxu0 %v10413_v53  ;;  %3943 = vmatpush.bf16.msra.mxu2 %v10414_v31  ;;  %v10423_v53 = vld [vmem:[#allocation63_spill] sm:$0xff]  ;;  %v10424_v31 = vld [vmem:[#allocation96_spill] sm:$0xff] }
 0xb31   :  { %3983 = vmatpush.bf16.msrb.mxu1 %v10415_v48  ;;  %v10425_v48 = vld [vmem:[#allocation65_spill] sm:$0xff] }
 0xb32   :  { %4009 = vmatpush.bf16.msrb.mxu3 %v10417_v45  ;;  %v10427_v45 = vld [vmem:[#allocation98_spill] sm:$0xff] }
 0xb34   :  { %3894 = vmatpush.bf16.msra.mxu0 %v10418_v56  ;;  %3944 = vmatpush.bf16.msra.mxu2 %v10420_v24  ;;  %v10428_v56 = vld [vmem:[#allocation69_spill] sm:$0xff]  ;;  %v10430_v24 = vld [vmem:[#allocation100_spill] sm:$0xff] }
 0xb35   :  { %4028 = vmatpush.bf16.msra.mxu1 %v10416_v59  ;;  %v10426_v59 = vld [vmem:[#allocation67_spill] sm:$0xff] }
 0xb37   :  { %3895 = vmatmul.bf16.vlgmr.msra.gmra.mxu0 %v8650_v18  ;;  %v10432_v18 = vld [vmem:[#allocation75_spill] sm:$0xff] }
 0xb38   :  { %3963 = vmatpush.bf16.msrb.mxu0 %v10419_v10  ;;  %3989 = vmatpush.bf16.msrb.mxu2 %v10421_v29  ;;  %v10429_v10 = vld [vmem:[#allocation71_spill] sm:$0xff]  ;;  %v10431_v29 = vld [vmem:[#allocation73_spill] sm:$0xff] }
 0xb39   :  { %4029 = vmatpush.bf16.msra.mxu1 %v10422_v13  ;;  %v10433_v13 = vld [vmem:[#allocation102_spill] sm:$0xff] }
 0xb3c   :  { %3964 = vmatpush.bf16.msrb.mxu0 %v10423_v53  ;;  %3990 = vmatpush.bf16.msrb.mxu2 %v10424_v31  ;;  %v10434_v53 = vld [vmem:[#allocation77_spill] sm:$0xff]  ;;  %v10435_v31 = vld [vmem:[#allocation79_spill] sm:$0xff] }
 0xb3d   :  { %4030 = vmatpush.bf16.msra.mxu1 %v10425_v48  ;;  %v10436_v48 = vld [vmem:[#allocation104_spill] sm:$0xff] }
 0xb40   :  { %3965 = vmatpush.bf16.msrb.mxu0 %v10426_v59  ;;  %3991 = vmatpush.bf16.msrb.mxu2 %v10427_v45  ;;  %v10437_v59 = vld [vmem:[#allocation81_spill] sm:$0xff]  ;;  %v10438_v45 = vld [vmem:[#allocation83_spill] sm:$0xff] }
 0xb41   :  { %4031 = vmatpush.bf16.msra.mxu1 %v10428_v56  ;;  %v10439_v56 = vld [vmem:[#allocation106_spill] sm:$0xff] }
 0xb44   :  { %3966 = vmatpush.bf16.msrb.mxu0 %v10429_v10  ;;  %3992 = vmatpush.bf16.msrb.mxu2 %v10430_v24  ;;  %v10440_v10 = vld [vmem:[#allocation85_spill] sm:$0xff] }
 0xb45   :  { %4032 = vmatpush.bf16.msra.mxu1 %v10431_v29  ;;  %v10441_v24 = vld [vmem:[#allocation93_spill] sm:$0xff]  ;;  %v10442_v29 = vld [vmem:[#allocation95_spill] sm:$0xff] }
 0xb48   :  { %3967 = vmatpush.bf16.msrb.mxu0 %v10432_v18  ;;  %3993 = vmatpush.bf16.msrb.mxu2 %v10433_v13  ;;  %v10443_v18 = vld [vmem:[#allocation108_spill] sm:$0xff]  ;;  %v10444_v13 = vld [vmem:[#allocation97_spill] sm:$0xff] }
 0xb49   :  { %4033 = vmatpush.bf16.msra.mxu1 %v10434_v53 }
 0xb4c   :  { %3968 = vmatpush.bf16.msrb.mxu0 %v10435_v31  ;;  %3994 = vmatpush.bf16.msrb.mxu2 %v10436_v48  ;;  %v10445_v31 = vld [vmem:[#allocation99_spill] sm:$0xff] }
 0xb4d   :  { %4034 = vmatpush.bf16.msra.mxu1 %v10437_v59 }
 0xb50   :  { %3969 = vmatpush.bf16.msrb.mxu0 %v10438_v45  ;;  %3995 = vmatpush.bf16.msrb.mxu2 %v10439_v56  ;;  %v10447_v45 = vld [vmem:[#allocation103_spill] sm:$0xff] }
 0xb51   :  { %4035 = vmatpush.bf16.msra.mxu1 %v10440_v10  ;;  %v3720_v53 = vpop.f32.mrf.mxu1 }
 0xb54   :  { %3970 = vmatpush.bf16.msrb.mxu0 %v10441_v24  ;;  %3996 = vmatpush.bf16.msrb.mxu2 %v10443_v18  ;;  %v10449_v24 = vld [vmem:[#allocation107_spill] sm:$0xff] }
 0xb57   :  { %v3746_v48 = vpop.f32.mrf.mxu3 }
 0xb58   :  { %4015 = vmatpush.bf16.msra.mxu0 %v10442_v29 }
 0xb59   :  { %v3722_v59 = vpop.f32.mrf.mxu1 }
 0xb5c   :  { %4016 = vmatpush.bf16.msra.mxu0 %v10444_v13 }
 0xb5f   :  { %v3748_v56 = vpop.f32.mrf.mxu3 }
 0xb60   :  { %4017 = vmatpush.bf16.msra.mxu0 %v10445_v31 }
 0xb61   :  { %v3772_v10 = vpop.f32.mrf.mxu1 }
 0xb64   :  { %4018 = vmatpush.bf16.msra.mxu0 %v10446_v40 }
 0xb67   :  { %v3798_v29 = vpop.f32.mrf.mxu3 }
 0xb68   :  { %4019 = vmatpush.bf16.msra.mxu0 %v10447_v45 }
 0xb69   :  { %v3774_v18 = vpop.f32.mrf.mxu1 }
 0xb6a   :  { %v10451_v18 = vld [vmem:[#allocation116_spill] sm:$0xff] }
 0xb6c   :  { %4020 = vmatpush.bf16.msra.mxu0 %v10448_v35 }
 0xb6f   :  { %v3800_v13 = vpop.f32.mrf.mxu3 }
 0xb70   :  { %4021 = vmatpush.bf16.msra.mxu0 %v10449_v24 }
 0xb71   :  { %v3824_v54 = vpop.f32.mrf.mxu1 }
 0xb74   :  { %4022 = vmatpush.bf16.msra.mxu0 %v10450_v47  ;;  %v3707_v5 = vpop.f32.mrf.mxu0 }
 0xb75   :  { %v3708_v45 = vadd.f32 %v3707_v5, %v6873_v22 }
 0xb77   :  { %v3721_v35 = vadd.f32 %v3720_v53, %v3708_v45 }
 0xb79   :  { %v3826_v44 = vpop.f32.mrf.mxu1  ;;  %v3840_v28 = vmul.f32 0.5, %v3721_v35 }
 0xb7a   :  { %v3733_v31 = vpop.f32.mrf.mxu2 }
 0xb7b   :  { %v3734_v8 = vadd.f32 %v3733_v31, %v9586_v60 }
 0xb7c   :  { %v3883_v40 = vpop.f32.mrf.mxu3  ;;  %v3709_v59 = vpop.f32.mrf.mxu0 }
 0xb7d   :  { %v3747_v56 = vadd.f32 %v3746_v48, %v3734_v8 }
 0xb7f   :  { %v3828_v23 = vmul.f32 0.5, %v3747_v56 }
 0xb81   :  { %5546 = vtanh.f32 %v3828_v23 }
 0xb82   :  { %v3735_v36 = vpop.f32.mrf.mxu2  ;;  %5548 = vtanh.f32 %v3840_v28 }
 0xb84   :  { %v3885_v24 = vpop.f32.mrf.mxu3  ;;  %v3759_v19 = vpop.f32.mrf.mxu0 }
 0xb85   :  { %v3760_v13 = vadd.f32 %v3759_v19, %v10451_v18 }
 0xb87   :  { %v3773_v47 = vadd.f32 %v3772_v10, %v3760_v13  ;;  %v5547_v31 = vpop.eup %5546 }
 0xb88   :  { %v3830_v44 = vmul.f32 0.5, %v5547_v31  ;;  %v5549_v53 = vpop.eup %5548 }
 0xb89   :  { %v3833_v61 = vmul.f32 0.5, %v3773_v47  ;;  %v3842_v24 = vmul.f32 0.5, %v5549_v53 }
 0xb8a   :  { %v3785_v20 = vpop.f32.mrf.mxu2  ;;  %v3831_v48 = vadd.f32 0.5, %v3830_v44 }
 0xb8b   :  { %5550 = vtanh.f32 %v3833_v61  ;;  %v3786_v59 = vadd.f32 %v3785_v20, %v6882_v4  ;;  %v3843_v56 = vadd.f32 0.5, %v3842_v24 }
 0xb8c   :  { %v3761_v5 = vpop.f32.mrf.mxu0  ;;  %v3832_v61 = vmul.f32 %v3831_v48, %v8608_v26  ;;  %v5140_v26 = vld [vmem:[%s9138_s0 + $0x1a8] sm:$0xff] }
 0xb8d   :  { %v3799_v8 = vadd.f32 %v3798_v29, %v3786_v59  ;;  %v3914_v24 = vadd.f32 %v5140_v26, %v3883_v40  ;;  %v5142_v40 = vld [vmem:[%s9138_s0 + $0x1b8] sm:$0xff] }
 0xb8f   :  { %5552 = vtanh.f32 %v3799_v8 }
 0xb91   :  { %v5551_v36 = vpop.eup %5550 }
 0xb92   :  { %v3835_v35 = vmul.f32 0.5, %v5551_v36  ;;  %v3787_v23 = vpop.f32.mrf.mxu2  ;;  %v5139_v36 = vld [vmem:[%s9138_s0 + $0x1a0] sm:$0xff] }
 0xb93   :  { %v3909_v45 = vpop.f32.mrf.mxu1 }
 0xb94   :  { %v3836_v19 = vadd.f32 0.5, %v3835_v35  ;;  %v3811_v10 = vpop.f32.mrf.mxu0 }
 0xb95   :  { %v5553_v28 = vpop.eup %5552  ;;  %v3812_v47 = vadd.f32 %v3811_v10, %v6886_v62 }
 0xb96   :  { %v3837_v20 = vmul.f32 %v3836_v19, %v8641_v9  ;;  %v3844_v31 = vmul.f32 %v5553_v28, %v3843_v56  ;;  %v3923_v28 = vmul.f32 0.5, %v3914_v24 }
 0xb97   :  { %v3825_v29 = vadd.f32 %v3824_v54, %v3812_v47 }
 0xb98   :  { %v3838_v13 = vadd.f32 %v3837_v20, %v3832_v61  ;;  %v3916_v20 = vadd.f32 %v5142_v40, %v3909_v45  ;;  %v10453_v40 = vld [vmem:[#allocation24_spill] sm:$0xff] }
 0xb99   :  { %v3846_v59 = vmul.f32 0.5, %v3825_v29  ;;  %v5141_v29 = vld [vmem:[%s9138_s0 + $0x1b0] sm:$0xff] }
 0xb9a   :  { %v8764_v5 = vadd.f32 %v3844_v31, %v3838_v13  ;;  %v3870_v44 = vpop.f32.mrf.mxu2 }
 0xb9b   :  { %5554 = vtanh.f32 %v3846_v59  ;;  %v3911_v8 = vpop.f32.mrf.mxu1  ;;  %v3913_v19 = vadd.f32 %v5139_v36, %v3870_v44 }
 0xb9c   :  { %5138 = vst [vmem:[%s9143_s5 + $0x60] sm:$0xff] %v8764_v5  ;;  %v3813_v53 = vpop.f32.mrf.mxu0  ;;  %5556 = vtanh.f32 %v8764_v5 }
 0xb9d   :  { %v3917_v61 = vmul.f32 0.5, %v3913_v19  ;;  %5558 = vtanh.f32 %v3923_v28  ;;  %v3929_v53 = vmul.f32 0.5, %v3916_v20  ;;  %v10454_v20 = vld [vmem:[#allocation31_spill] sm:$0xff] }
 0xb9f   :  { %5560 = vtanh.f32 %v3917_v61 }
 0xba1   :  { %v5555_v54 = vpop.eup %5554 }
 0xba2   :  { %v3848_v48 = vmul.f32 0.5, %v5555_v54  ;;  %v3872_v35 = vpop.f32.mrf.mxu2  ;;  %v5557_v10 = vpop.eup %5556 }
 0xba3   :  { %v5559_v13 = vpop.eup %5558 }
 0xba4   :  { %v3849_v23 = vadd.f32 0.5, %v3848_v48  ;;  %v3925_v44 = vmul.f32 0.5, %v5559_v13  ;;  %v10456_v13 = vld [vmem:[#allocation112_spill] sm:$0xff] }
 0xba5   :  { %v5561_v59 = vpop.eup %5560 }
 0xba6   :  { %v3851_v47 = vmul.f32 %v5557_v10, %v3849_v23  ;;  %v3919_v45 = vmul.f32 0.5, %v5561_v59  ;;  %v3926_v26 = vadd.f32 0.5, %v3925_v44  ;;  %v10458_v59 = vld [vmem:[#allocation35_spill] sm:$0xff]  ;;  %v10460_v44 = vld [vmem:[#allocation113_spill] sm:$0xff] }
 0xba8   :  { %5137 = vst [vmem:[%s9142_s4 + $0x60] sm:$0xff] %v3851_v47  ;;  %v3936_v56 = vpack.c.bf16 %v3851_v47, %v3851_v47  ;;  %v3920_v54 = vadd.f32 0.5, %v3919_v45  ;;  %v3927_v48 = vmul.f32 %v3926_v26, %v8641_v9  ;;  %v10462_v45 = vld [vmem:[#allocation39_spill] sm:$0xff]  ;;  %v10463_v26 = vld [vmem:[#allocation54_spill] sm:$0xff] }
 0xbaa   :  { %3958 = vmatmul.bf16.vlgmr.msra.gmra.mxu3 %v3936_v56  ;;  %3984 = vmatmul.bf16.vlgmr.msrb.gmra.mxu1 %v3936_v56 }
 0xbab   :  { %4054 = vmatpush.bf16.msra.mxu3 %v6426_v51  ;;  %4113 = vmatpush.bf16.msrb.mxu1 %v5739_v7 }
 0xbaf   :  { %4055 = vmatpush.bf16.msra.mxu3 %v6441_v42  ;;  %4114 = vmatpush.bf16.msrb.mxu1 %v5768_v17 }
 0xbb3   :  { %4056 = vmatpush.bf16.msra.mxu3 %v9512_v57  ;;  %4115 = vmatpush.bf16.msrb.mxu1 %v9513_v11 }
 0xbb4   :  { %v3896_v31 = vpop.f32.mrf.mxu0 }
 0xbb5   :  { %v3915_v8 = vadd.f32 %v5141_v29, %v3896_v31  ;;  %v10455_v29 = vld [vmem:[#allocation50_spill] sm:$0xff]  ;;  %v10457_v31 = vld [vmem:[#allocation28_spill] sm:$0xff] }
 0xbb7   :  { %5562 = vtanh.f32 %v3915_v8  ;;  %4057 = vmatpush.bf16.msra.mxu3 %v9514_v46  ;;  %4116 = vmatpush.bf16.msrb.mxu1 %v9515_v0  ;;  %v10459_v8 = vld [vmem:[#allocation52_spill] sm:$0xff] }
 0xbb8   :  { %5564 = vtanh.f32 %v3929_v53  ;;  %v10461_v53 = vld [vmem:[#allocation32_spill] sm:$0xff] }
 0xbba   :  { %4010 = vmatmul.bf16.vlgmr.msrb.gmra.mxu3 %v3936_v56  ;;  %4036 = vmatmul.bf16.vlgmr.msra.gmra.mxu1 %v3936_v56 }
 0xbbb   :  { %4058 = vmatpush.bf16.msra.mxu3 %v9516_v25  ;;  %4117 = vmatpush.bf16.msrb.mxu1 %v9517_v15 }
 0xbbc   :  { %v3898_v36 = vpop.f32.mrf.mxu0 }
 0xbbd   :  { %v5563_v24 = vpop.eup %5562  ;;  %v10465_v36 = vld [vmem:[#allocation55_spill] sm:$0xff] }
 0xbbe   :  { %v3922_v35 = vmul.f32 %v5563_v24, %v3920_v54  ;;  %v5565_v23 = vpop.eup %5564  ;;  %v10464_v54 = vld [vmem:[#allocation41_spill] sm:$0xff]  ;;  %v10466_v24 = vld [vmem:[#allocation114_spill] sm:$0xff] }
 0xbbf   :  { %4059 = vmatpush.bf16.msra.mxu3 %v9518_v55  ;;  %4118 = vmatpush.bf16.msrb.mxu1 %v9519_v50  ;;  %v3931_v10 = vmul.f32 0.5, %v5565_v23  ;;  %v10469_v23 = vld [vmem:[#allocation58_spill] sm:$0xff] }
 0xbc0   :  { %v8797_v19 = vadd.f32 %v3927_v48, %v3922_v35  ;;  %v10467_v48 = vld [vmem:[#allocation36_spill] sm:$0xff] }
 0xbc1   :  { %v3932_v9 = vadd.f32 0.5, %v3931_v10  ;;  %v10468_v35 = vld [vmem:[#allocation12_spill] sm:$0xff]  ;;  %v10470_v10 = vld [vmem:[#allocation43_spill] sm:$0xff] }
 0xbc2   :  { %5566 = vtanh.f32 %v8797_v19 }
 0xbc3   :  { %4060 = vmatpush.bf16.msra.mxu3 %v9520_v63  ;;  %4119 = vmatpush.bf16.msrb.mxu1 %v9521_v38 }
 0xbc7   :  { %4061 = vmatpush.bf16.msra.mxu3 %v9522_v37  ;;  %4120 = vmatpush.bf16.msrb.mxu1 %v9523_v6 }
 0xbc8   :  { %v5567_v28 = vpop.eup %5566 }
 0xbc9   :  { %v3934_v47 = vmul.f32 %v5567_v28, %v3932_v9  ;;  %v10471_v9 = vld [vmem:[#allocation60_spill] sm:$0xff]  ;;  %v10472_v28 = vld [vmem:[#allocation14_spill] sm:$0xff] }
 0xbca   :  { %4062 = vmatmul.bf16.vlgmr.msra.gmra.mxu3 %v3936_v56  ;;  %v10452_v56 = vld [vmem:[#allocation111_spill] sm:$0xff] }
 0xbcb   :  { %v8806_v61 = vpack.c.bf16 %v3934_v47, %v3934_v47  ;;  %4139 = vmatpush.bf16.msrb.mxu3 %v9524_v1  ;;  %4189 = vmatpush.bf16.msra.mxu1 %v9525_v43  ;;  %v10473_v47 = vld [vmem:[#allocation62_spill] sm:$0xff] }
 0xbcd   :  { %3945 = vmatmul.bf16.vlgmr.msra.gmra.mxu2 %v8806_v61  ;;  %3971 = vmatmul.bf16.vlgmr.msrb.gmra.mxu0 %v8806_v61 }
 0xbce   :  { %4041 = vmatpush.bf16.msra.mxu2 %v6717_v33  ;;  %4100 = vmatpush.bf16.msrb.mxu0 %v5728_v3 }
 0xbcf   :  { %4121 = vmatmul.bf16.vlgmr.msrb.gmra.mxu1 %v8806_v61  ;;  %4140 = vmatpush.bf16.msrb.mxu3 %v9526_v52 }
 0xbd0   :  { %4190 = vmatpush.bf16.msra.mxu1 %v9588_v58 }
 0xbd2   :  { %4042 = vmatpush.bf16.msra.mxu2 %v9589_v34  ;;  %4101 = vmatpush.bf16.msrb.mxu0 %v5766_v16 }
 0xbd3   :  { %4141 = vmatpush.bf16.msrb.mxu3 %v9528_v41 }
 0xbd4   :  { %4191 = vmatpush.bf16.msra.mxu1 %v9529_v12 }
 0xbd6   :  { %4043 = vmatpush.bf16.msra.mxu2 %v6744_v14  ;;  %4102 = vmatpush.bf16.msrb.mxu0 %v9590_v27 }
 0xbd7   :  { %4142 = vmatpush.bf16.msrb.mxu3 %v9591_v49 }
 0xbd8   :  { %4192 = vmatpush.bf16.msra.mxu1 %v9531_v21 }
 0xbda   :  { %4044 = vmatpush.bf16.msra.mxu2 %v6756_v2  ;;  %4103 = vmatpush.bf16.msrb.mxu0 %v9592_v30 }
 0xbdb   :  { %4143 = vmatpush.bf16.msrb.mxu3 %v9593_v39 }
 0xbdc   :  { %4193 = vmatpush.bf16.msra.mxu1 %v9594_v32 }
 0xbdd   :  { %3997 = vmatmul.bf16.vlgmr.msrb.gmra.mxu2 %v8806_v61  ;;  %4023 = vmatmul.bf16.vlgmr.msra.gmra.mxu0 %v8806_v61 }
 0xbde   :  { %4045 = vmatpush.bf16.msra.mxu2 %v10452_v56  ;;  %4104 = vmatpush.bf16.msrb.mxu0 %v10453_v40 }
 0xbdf   :  { %4144 = vmatpush.bf16.msrb.mxu3 %v10454_v20 }
 0xbe0   :  { %4194 = vmatpush.bf16.msra.mxu1 %v10455_v29 }
 0xbe2   :  { %4046 = vmatpush.bf16.msra.mxu2 %v10456_v13  ;;  %4105 = vmatpush.bf16.msrb.mxu0 %v10457_v31 }
 0xbe3   :  { %4145 = vmatpush.bf16.msrb.mxu3 %v10458_v59 }
 0xbe4   :  { %4195 = vmatpush.bf16.msra.mxu1 %v10459_v8 }
 0xbe6   :  { %4047 = vmatpush.bf16.msra.mxu2 %v10460_v44  ;;  %4106 = vmatpush.bf16.msrb.mxu0 %v10461_v53  ;;  %v10529_v53 = vld [vmem:[#allocation109_spill] sm:$0xff] }
 0xbe7   :  { %4146 = vmatpush.bf16.msrb.mxu3 %v10462_v45  ;;  %v10527_v45 = vld [vmem:[#allocation105_spill] sm:$0xff] }
 0xbe8   :  { %4196 = vmatpush.bf16.msra.mxu1 %v10463_v26  ;;  %v10481_v26 = vld [vmem:[#allocation70_spill] sm:$0xff] }
 0xbea   :  { %4048 = vmatpush.bf16.msra.mxu2 %v10466_v24  ;;  %4107 = vmatpush.bf16.msrb.mxu0 %v10467_v48  ;;  %v10474_v24 = vld [vmem:[#allocation45_spill] sm:$0xff]  ;;  %v10475_v48 = vld [vmem:[#allocation64_spill] sm:$0xff] }
 0xbeb   :  { %4215 = vmatpush.bf16.msra.mxu3 %v10464_v54  ;;  %v10479_v54 = vld [vmem:[#allocation68_spill] sm:$0xff] }
 0xbec   :  { %4241 = vmatpush.bf16.msrb.mxu1 %v10465_v36  ;;  %4147 = vmatmul.bf16.vlgmr.msrb.gmra.mxu3 %v8806_v61  ;;  %v10477_v36 = vld [vmem:[#allocation66_spill] sm:$0xff] }
 0xbed   :  { %4049 = vmatmul.bf16.vlgmr.msra.gmra.mxu2 %v8806_v61  ;;  %4108 = vmatmul.bf16.vlgmr.msrb.gmra.mxu0 %v8806_v61 }
 0xbee   :  { %4126 = vmatpush.bf16.msrb.mxu2 %v10468_v35  ;;  %4176 = vmatpush.bf16.msra.mxu0 %v10469_v23  ;;  %v10476_v35 = vld [vmem:[#allocation18_spill] sm:$0xff]  ;;  %v10478_v23 = vld [vmem:[#allocation47_spill] sm:$0xff] }
 0xbef   :  { %4216 = vmatpush.bf16.msra.mxu3 %v10470_v10  ;;  %v10480_v10 = vld [vmem:[#allocation22_spill] sm:$0xff] }
 0xbf0   :  { %4242 = vmatpush.bf16.msrb.mxu1 %v10471_v9  ;;  %v10482_v9 = vld [vmem:[#allocation49_spill] sm:$0xff] }
 0xbf2   :  { %4127 = vmatpush.bf16.msrb.mxu2 %v10472_v28  ;;  %4177 = vmatpush.bf16.msra.mxu0 %v10473_v47  ;;  %v10483_v28 = vld [vmem:[#allocation72_spill] sm:$0xff]  ;;  %v10484_v47 = vld [vmem:[#allocation26_spill] sm:$0xff] }
 0xbf3   :  { %4217 = vmatpush.bf16.msra.mxu3 %v10474_v24  ;;  %v10485_v24 = vld [vmem:[#allocation74_spill] sm:$0xff] }
 0xbf4   :  { %4243 = vmatpush.bf16.msrb.mxu1 %v10475_v48  ;;  %v10486_v48 = vld [vmem:[#allocation51_spill] sm:$0xff] }
 0xbf6   :  { %4128 = vmatpush.bf16.msrb.mxu2 %v10476_v35  ;;  %4178 = vmatpush.bf16.msra.mxu0 %v10477_v36  ;;  %v10487_v35 = vld [vmem:[#allocation76_spill] sm:$0xff]  ;;  %v10488_v36 = vld [vmem:[#allocation30_spill] sm:$0xff] }
 0xbf7   :  { %4218 = vmatpush.bf16.msra.mxu3 %v10478_v23  ;;  %v10489_v23 = vld [vmem:[#allocation78_spill] sm:$0xff] }
 0xbf8   :  { %4244 = vmatpush.bf16.msrb.mxu1 %v10479_v54  ;;  %v10490_v54 = vld [vmem:[#allocation53_spill] sm:$0xff] }
 0xbfa   :  { %4129 = vmatpush.bf16.msrb.mxu2 %v10480_v10  ;;  %4179 = vmatpush.bf16.msra.mxu0 %v10481_v26  ;;  %v10491_v10 = vld [vmem:[#allocation80_spill] sm:$0xff]  ;;  %v10492_v26 = vld [vmem:[#allocation34_spill] sm:$0xff] }
 0xbfb   :  { %4219 = vmatpush.bf16.msra.mxu3 %v10482_v9  ;;  %v10493_v9 = vld [vmem:[#allocation82_spill] sm:$0xff] }
 0xbfc   :  { %4245 = vmatpush.bf16.msrb.mxu1 %v10483_v28  ;;  %v10494_v28 = vld [vmem:[#allocation56_spill] sm:$0xff] }
 0xbfe   :  { %4130 = vmatpush.bf16.msrb.mxu2 %v10484_v47  ;;  %4180 = vmatpush.bf16.msra.mxu0 %v10485_v24  ;;  %v10495_v47 = vld [vmem:[#allocation57_spill] sm:$0xff]  ;;  %v10496_v24 = vld [vmem:[#allocation84_spill] sm:$0xff] }
 0xbff   :  { %4220 = vmatpush.bf16.msra.mxu3 %v10486_v48  ;;  %v10497_v48 = vld [vmem:[#allocation38_spill] sm:$0xff] }
 0xc00   :  { %4246 = vmatpush.bf16.msrb.mxu1 %v10487_v35  ;;  %v10498_v35 = vld [vmem:[#allocation59_spill] sm:$0xff] }
 0xc02   :  { %4131 = vmatpush.bf16.msrb.mxu2 %v10488_v36  ;;  %4181 = vmatpush.bf16.msra.mxu0 %v10489_v23  ;;  %v10499_v36 = vld [vmem:[#allocation92_spill] sm:$0xff]  ;;  %v10500_v23 = vld [vmem:[#allocation94_spill] sm:$0xff] }
 0xc03   :  { %4221 = vmatpush.bf16.msra.mxu3 %v10490_v54  ;;  %v10525_v54 = vld [vmem:[#allocation101_spill] sm:$0xff] }
 0xc04   :  { %4247 = vmatpush.bf16.msrb.mxu1 %v10491_v10  ;;  %v10501_v10 = vld [vmem:[#allocation61_spill] sm:$0xff] }
 0xc06   :  { %4132 = vmatpush.bf16.msrb.mxu2 %v10492_v26  ;;  %4182 = vmatpush.bf16.msra.mxu0 %v10493_v9  ;;  %v10502_v26 = vld [vmem:[#allocation63_spill] sm:$0xff]  ;;  %v10503_v9 = vld [vmem:[#allocation96_spill] sm:$0xff] }
 0xc07   :  { %4222 = vmatpush.bf16.msra.mxu3 %v10494_v28  ;;  %v10504_v28 = vld [vmem:[#allocation65_spill] sm:$0xff] }
 0xc08   :  { %4248 = vmatpush.bf16.msrb.mxu1 %v10496_v24  ;;  %v10506_v24 = vld [vmem:[#allocation98_spill] sm:$0xff] }
 0xc0a   :  { %4133 = vmatpush.bf16.msrb.mxu2 %v10497_v48  ;;  %4183 = vmatpush.bf16.msra.mxu0 %v10499_v36  ;;  %v10507_v48 = vld [vmem:[#allocation69_spill] sm:$0xff]  ;;  %v10509_v36 = vld [vmem:[#allocation100_spill] sm:$0xff] }
 0xc0b   :  { %4267 = vmatpush.bf16.msrb.mxu3 %v10495_v47  ;;  %v10505_v47 = vld [vmem:[#allocation67_spill] sm:$0xff] }
 0xc0d   :  { %4134 = vmatmul.bf16.vlgmr.msrb.gmra.mxu2 %v8806_v61  ;;  %v10511_v61 = vld [vmem:[#allocation75_spill] sm:$0xff] }
 0xc0e   :  { %4202 = vmatpush.bf16.msra.mxu2 %v10498_v35  ;;  %4228 = vmatpush.bf16.msrb.mxu0 %v10500_v23  ;;  %v10508_v35 = vld [vmem:[#allocation71_spill] sm:$0xff]  ;;  %v10510_v23 = vld [vmem:[#allocation73_spill] sm:$0xff] }
 0xc0f   :  { %4268 = vmatpush.bf16.msrb.mxu3 %v10501_v10  ;;  %v10512_v10 = vld [vmem:[#allocation102_spill] sm:$0xff] }
 0xc12   :  { %4203 = vmatpush.bf16.msra.mxu2 %v10502_v26  ;;  %4229 = vmatpush.bf16.msrb.mxu0 %v10503_v9  ;;  %v10513_v26 = vld [vmem:[#allocation77_spill] sm:$0xff]  ;;  %v10514_v9 = vld [vmem:[#allocation79_spill] sm:$0xff] }
 0xc13   :  { %4269 = vmatpush.bf16.msrb.mxu3 %v10504_v28  ;;  %v10515_v28 = vld [vmem:[#allocation104_spill] sm:$0xff] }
 0xc16   :  { %4204 = vmatpush.bf16.msra.mxu2 %v10505_v47  ;;  %4230 = vmatpush.bf16.msrb.mxu0 %v10506_v24  ;;  %v10516_v47 = vld [vmem:[#allocation81_spill] sm:$0xff]  ;;  %v10517_v24 = vld [vmem:[#allocation83_spill] sm:$0xff] }
 0xc17   :  { %4270 = vmatpush.bf16.msrb.mxu3 %v10507_v48  ;;  %v10518_v48 = vld [vmem:[#allocation106_spill] sm:$0xff] }
 0xc1a   :  { %4205 = vmatpush.bf16.msra.mxu2 %v10508_v35  ;;  %4231 = vmatpush.bf16.msrb.mxu0 %v10509_v36  ;;  %v10519_v35 = vld [vmem:[#allocation85_spill] sm:$0xff] }
 0xc1b   :  { %4271 = vmatpush.bf16.msrb.mxu3 %v10510_v23  ;;  %v10520_v36 = vld [vmem:[#allocation93_spill] sm:$0xff]  ;;  %v10521_v23 = vld [vmem:[#allocation95_spill] sm:$0xff] }
 0xc1e   :  { %4206 = vmatpush.bf16.msra.mxu2 %v10511_v61  ;;  %4232 = vmatpush.bf16.msrb.mxu0 %v10512_v10  ;;  %v10522_v61 = vld [vmem:[#allocation108_spill] sm:$0xff]  ;;  %v10523_v10 = vld [vmem:[#allocation97_spill] sm:$0xff] }
 0xc1f   :  { %4272 = vmatpush.bf16.msrb.mxu3 %v10513_v26 }
 0xc22   :  { %4207 = vmatpush.bf16.msra.mxu2 %v10514_v9  ;;  %4233 = vmatpush.bf16.msrb.mxu0 %v10515_v28  ;;  %v10524_v9 = vld [vmem:[#allocation99_spill] sm:$0xff] }
 0xc23   :  { %4273 = vmatpush.bf16.msrb.mxu3 %v10516_v47 }
 0xc26   :  { %4208 = vmatpush.bf16.msra.mxu2 %v10517_v24  ;;  %4234 = vmatpush.bf16.msrb.mxu0 %v10518_v48  ;;  %v10526_v24 = vld [vmem:[#allocation103_spill] sm:$0xff] }
 0xc27   :  { %4274 = vmatpush.bf16.msrb.mxu3 %v10519_v35  ;;  %v3985_v26 = vpop.f32.mrf.mxu1 }
 0xc2a   :  { %4209 = vmatpush.bf16.msra.mxu2 %v10520_v36  ;;  %4235 = vmatpush.bf16.msrb.mxu0 %v10522_v61  ;;  %v10528_v36 = vld [vmem:[#allocation107_spill] sm:$0xff] }
 0xc2d   :  { %v3959_v28 = vpop.f32.mrf.mxu3 }
 0xc2e   :  { %4254 = vmatpush.bf16.msrb.mxu2 %v10521_v23 }
 0xc2f   :  { %v3987_v47 = vpop.f32.mrf.mxu1 }
 0xc32   :  { %4255 = vmatpush.bf16.msrb.mxu2 %v10523_v10 }
 0xc35   :  { %v3961_v48 = vpop.f32.mrf.mxu3 }
 0xc36   :  { %4256 = vmatpush.bf16.msrb.mxu2 %v10524_v9 }
 0xc37   :  { %v4037_v35 = vpop.f32.mrf.mxu1 }
 0xc3a   :  { %4257 = vmatpush.bf16.msrb.mxu2 %v10525_v54 }
 0xc3d   :  { %v4011_v23 = vpop.f32.mrf.mxu3 }
 0xc3e   :  { %4258 = vmatpush.bf16.msrb.mxu2 %v10526_v24 }
 0xc3f   :  { %v4039_v61 = vpop.f32.mrf.mxu1 }
 0xc42   :  { %4259 = vmatpush.bf16.msrb.mxu2 %v10527_v45 }
 0xc45   :  { %v4013_v10 = vpop.f32.mrf.mxu3 }
 0xc46   :  { %4260 = vmatpush.bf16.msrb.mxu2 %v10528_v36 }
 0xc4a   :  { %4261 = vmatpush.bf16.msrb.mxu2 %v10529_v53  ;;  %v3972_v44 = vpop.f32.mrf.mxu0 }
 0xc4b   :  { %v3973_v47 = vadd.f32 %v3972_v44, %v9586_v60 }
 0xc4c   :  { %v4122_v8 = vpop.f32.mrf.mxu1 }
 0xc4d   :  { %v4063_v59 = vpop.f32.mrf.mxu3  ;;  %v3986_v48 = vadd.f32 %v3985_v26, %v3973_v47 }
 0xc4f   :  { %v4067_v36 = vmul.f32 0.5, %v3986_v48 }
 0xc50   :  { %v3946_v9 = vpop.f32.mrf.mxu2 }
 0xc51   :  { %v3947_v45 = vadd.f32 %v3946_v9, %v6873_v22  ;;  %5568 = vtanh.f32 %v4067_v36 }
 0xc52   :  { %v3974_v31 = vpop.f32.mrf.mxu0 }
 0xc53   :  { %v3960_v20 = vadd.f32 %v3959_v28, %v3947_v45 }
 0xc54   :  { %v4124_v54 = vpop.f32.mrf.mxu1 }
 0xc55   :  { %v4065_v13 = vpop.f32.mrf.mxu3  ;;  %v4079_v61 = vmul.f32 0.5, %v3960_v20 }
 0xc57   :  { %5570 = vtanh.f32 %v4079_v61  ;;  %v5569_v44 = vpop.eup %5568 }
 0xc58   :  { %v3948_v24 = vpop.f32.mrf.mxu2  ;;  %v4069_v9 = vmul.f32 0.5, %v5569_v44 }
 0xc5a   :  { %v4024_v29 = vpop.f32.mrf.mxu0  ;;  %v4070_v28 = vadd.f32 0.5, %v4069_v9 }
 0xc5b   :  { %v4025_v56 = vadd.f32 %v4024_v29, %v6882_v4 }
 0xc5d   :  { %v4038_v24 = vadd.f32 %v4037_v35, %v4025_v56  ;;  %v5571_v13 = vpop.eup %5570 }
 0xc5e   :  { %v4081_v36 = vmul.f32 0.5, %v5571_v13 }
 0xc60   :  { %v3998_v40 = vpop.f32.mrf.mxu2  ;;  %v4082_v61 = vadd.f32 0.5, %v4081_v36 }
 0xc61   :  { %v3999_v10 = vadd.f32 %v3998_v40, %v10451_v18 }
 0xc62   :  { %v4026_v53 = vpop.f32.mrf.mxu0 }
 0xc63   :  { %v4012_v31 = vadd.f32 %v4011_v23, %v3999_v10  ;;  %v4071_v23 = vmul.f32 %v4070_v28, %v8764_v5  ;;  %v5146_v5 = vld [vmem:[%s9138_s0 + $0x1c8] sm:$0xff] }
 0xc64   :  { %v4153_v13 = vadd.f32 %v5146_v5, %v4122_v8  ;;  %v5148_v8 = vld [vmem:[%s9138_s0 + $0x1d8] sm:$0xff] }
 0xc65   :  { %v4072_v54 = vmul.f32 0.5, %v4012_v31 }
 0xc67   :  { %5572 = vtanh.f32 %v4072_v54 }
 0xc68   :  { %v4000_v26 = vpop.f32.mrf.mxu2  ;;  %5574 = vtanh.f32 %v4038_v24 }
 0xc6a   :  { %v4109_v47 = vpop.f32.mrf.mxu0 }
 0xc6d   :  { %v5573_v45 = vpop.eup %5572 }
 0xc6e   :  { %v4074_v20 = vmul.f32 0.5, %v5573_v45  ;;  %v5575_v18 = vpop.eup %5574 }
 0xc6f   :  { %v4148_v48 = vpop.f32.mrf.mxu3  ;;  %v4083_v31 = vmul.f32 %v5575_v18, %v4082_v61  ;;  %v5145_v18 = vld [vmem:[%s9138_s0 + $0x1c0] sm:$0xff]  ;;  %v5147_v61 = vld [vmem:[%s9138_s0 + $0x1d0] sm:$0xff] }
 0xc70   :  { %v4075_v40 = vadd.f32 0.5, %v4074_v20  ;;  %v4050_v53 = vpop.f32.mrf.mxu2  ;;  %v4152_v28 = vadd.f32 %v5145_v18, %v4109_v47  ;;  %v4155_v47 = vadd.f32 %v5148_v8, %v4148_v48  ;;  %v10554_v8 = vld [vmem:[#allocation18_spill] sm:$0xff] }
 0xc71   :  { %v4051_v29 = vadd.f32 %v4050_v53, %v6886_v62 }
 0xc72   :  { %v4076_v56 = vmul.f32 %v4075_v40, %v8797_v19  ;;  %v4111_v10 = vpop.f32.mrf.mxu0  ;;  %v4162_v40 = vmul.f32 0.5, %v4153_v13 }
 0xc73   :  { %v4064_v35 = vadd.f32 %v4063_v59, %v4051_v29  ;;  %v4156_v29 = vmul.f32 0.5, %v4152_v28  ;;  %v10547_v28 = vld [vmem:[#allocation58_spill] sm:$0xff] }
 0xc74   :  { %v4077_v54 = vadd.f32 %v4076_v56, %v4071_v23 }
 0xc75   :  { %v4085_v44 = vmul.f32 0.5, %v4064_v35 }
 0xc76   :  { %v8920_v24 = vadd.f32 %v4083_v31, %v4077_v54 }
 0xc77   :  { %5576 = vtanh.f32 %v4085_v44  ;;  %v4150_v26 = vpop.f32.mrf.mxu3 }
 0xc78   :  { %5144 = vst [vmem:[%s9143_s5 + $0x68] sm:$0xff] %v8920_v24  ;;  %v4052_v9 = vpop.f32.mrf.mxu2  ;;  %5578 = vtanh.f32 %v8920_v24 }
 0xc79   :  { %5580 = vtanh.f32 %v4162_v40  ;;  %v10550_v40 = vld [vmem:[#allocation14_spill] sm:$0xff] }
 0xc7a   :  { %5582 = vtanh.f32 %v4156_v29  ;;  %v10552_v29 = vld [vmem:[#allocation45_spill] sm:$0xff] }
 0xc7d   :  { %v5577_v59 = vpop.eup %5576 }
 0xc7e   :  { %v4087_v45 = vmul.f32 0.5, %v5577_v59  ;;  %v5579_v20 = vpop.eup %5578 }
 0xc7f   :  { %v5581_v56 = vpop.eup %5580 }
 0xc80   :  { %v4088_v36 = vadd.f32 0.5, %v4087_v45  ;;  %v5583_v10 = vpop.eup %5582  ;;  %v4164_v54 = vmul.f32 0.5, %v5581_v56  ;;  %v10557_v56 = vld [vmem:[#allocation68_spill] sm:$0xff] }
 0xc81   :  { %v4158_v48 = vmul.f32 0.5, %v5583_v10  ;;  %v10559_v10 = vld [vmem:[#allocation70_spill] sm:$0xff] }
 0xc82   :  { %v4090_v53 = vmul.f32 %v5579_v20, %v4088_v36  ;;  %v4165_v44 = vadd.f32 0.5, %v4164_v54  ;;  %v10548_v36 = vld [vmem:[#allocation43_spill] sm:$0xff]  ;;  %v10549_v20 = vld [vmem:[#allocation60_spill] sm:$0xff] }
 0xc83   :  { %v10561_v54 = vld [vmem:[#allocation72_spill] sm:$0xff] }
 0xc84   :  { %5143 = vst [vmem:[%s9142_s4 + $0x68] sm:$0xff] %v4090_v53  ;;  %v4175_v23 = vpack.c.bf16 %v4090_v53, %v4090_v53  ;;  %v4166_v5 = vmul.f32 %v4165_v44, %v8797_v19  ;;  %v10551_v53 = vld [vmem:[#allocation62_spill] sm:$0xff]  ;;  %v10564_v44 = vld [vmem:[#allocation51_spill] sm:$0xff] }
 0xc86   :  { %4197 = vmatmul.bf16.vlgmr.msra.gmra.mxu1 %v4175_v23  ;;  %4223 = vmatmul.bf16.vlgmr.msra.gmra.mxu3 %v4175_v23 }
 0xc87   :  { %4293 = vmatpush.bf16.msra.mxu1 %v6426_v51  ;;  %4352 = vmatpush.bf16.msra.mxu3 %v5739_v7  ;;  %v4168_v7 = vmul.f32 0.5, %v4155_v47  ;;  %v10555_v47 = vld [vmem:[#allocation66_spill] sm:$0xff] }
 0xc8b   :  { %4294 = vmatpush.bf16.msra.mxu1 %v6441_v42  ;;  %4353 = vmatpush.bf16.msra.mxu3 %v5768_v17  ;;  %v4159_v17 = vadd.f32 0.5, %v4158_v48  ;;  %v10563_v48 = vld [vmem:[#allocation74_spill] sm:$0xff] }
 0xc8f   :  { %4295 = vmatpush.bf16.msra.mxu1 %v9512_v57  ;;  %4354 = vmatpush.bf16.msra.mxu3 %v9513_v11 }
 0xc90   :  { %v4135_v35 = vpop.f32.mrf.mxu2 }
 0xc91   :  { %v4154_v31 = vadd.f32 %v5147_v61, %v4135_v35  ;;  %v10556_v61 = vld [vmem:[#allocation47_spill] sm:$0xff]  ;;  %v10558_v35 = vld [vmem:[#allocation22_spill] sm:$0xff] }
 0xc93   :  { %5584 = vtanh.f32 %v4154_v31  ;;  %4296 = vmatpush.bf16.msra.mxu1 %v9514_v46  ;;  %4355 = vmatpush.bf16.msra.mxu3 %v9515_v0  ;;  %v10560_v31 = vld [vmem:[#allocation49_spill] sm:$0xff] }
 0xc94   :  { %5586 = vtanh.f32 %v4168_v7  ;;  %v10562_v7 = vld [vmem:[#allocation26_spill] sm:$0xff] }
 0xc96   :  { %4249 = vmatmul.bf16.vlgmr.msrb.gmra.mxu1 %v4175_v23  ;;  %4275 = vmatmul.bf16.vlgmr.msrb.gmra.mxu3 %v4175_v23 }
 0xc97   :  { %4297 = vmatpush.bf16.msra.mxu1 %v9516_v25  ;;  %4356 = vmatpush.bf16.msra.mxu3 %v9517_v15 }
 0xc98   :  { %v4137_v26 = vpop.f32.mrf.mxu2 }
 0xc99   :  { %v5585_v9 = vpop.eup %5584  ;;  %v10566_v26 = vld [vmem:[#allocation30_spill] sm:$0xff] }
 0xc9a   :  { %v4161_v59 = vmul.f32 %v5585_v9, %v4159_v17  ;;  %v5587_v11 = vpop.eup %5586  ;;  %v10565_v17 = vld [vmem:[#allocation76_spill] sm:$0xff]  ;;  %v10567_v9 = vld [vmem:[#allocation78_spill] sm:$0xff] }
 0xc9b   :  { %4298 = vmatpush.bf16.msra.mxu1 %v9518_v55  ;;  %4357 = vmatpush.bf16.msra.mxu3 %v9519_v50  ;;  %v4170_v0 = vmul.f32 0.5, %v5587_v11  ;;  %v10532_v50 = vld [vmem:[#allocation31_spill] sm:$0xff]  ;;  %v10570_v11 = vld [vmem:[#allocation34_spill] sm:$0xff] }
 0xc9c   :  { %v8953_v18 = vadd.f32 %v4166_v5, %v4161_v59  ;;  %v10568_v5 = vld [vmem:[#allocation53_spill] sm:$0xff]  ;;  %v10569_v59 = vld [vmem:[#allocation80_spill] sm:$0xff] }
 0xc9d   :  { %v4171_v19 = vadd.f32 0.5, %v4170_v0  ;;  %v10571_v0 = vld [vmem:[#allocation82_spill] sm:$0xff] }
 0xc9e   :  { %5588 = vtanh.f32 %v8953_v18 }
 0xc9f   :  { %4299 = vmatpush.bf16.msra.mxu1 %v9520_v63  ;;  %4358 = vmatpush.bf16.msra.mxu3 %v9521_v38  ;;  %v10533_v38 = vld [vmem:[#allocation50_spill] sm:$0xff] }
 0xca3   :  { %4300 = vmatpush.bf16.msra.mxu1 %v9522_v37  ;;  %4359 = vmatpush.bf16.msra.mxu3 %v9523_v6  ;;  %v10534_v6 = vld [vmem:[#allocation112_spill] sm:$0xff] }
 0xca4   :  { %v5589_v13 = vpop.eup %5588 }
 0xca5   :  { %v4173_v45 = vmul.f32 %v5589_v13, %v4171_v19  ;;  %v10572_v19 = vld [vmem:[#allocation56_spill] sm:$0xff]  ;;  %v10573_v13 = vld [vmem:[#allocation57_spill] sm:$0xff] }
 0xca6   :  { %4301 = vmatmul.bf16.vlgmr.msra.gmra.mxu1 %v4175_v23  ;;  %v10553_v23 = vld [vmem:[#allocation64_spill] sm:$0xff] }
 0xca7   :  { %v8962_v15 = vpack.c.bf16 %v4173_v45, %v4173_v45  ;;  %4378 = vmatpush.bf16.msrb.mxu1 %v9524_v1  ;;  %4428 = vmatpush.bf16.msrb.mxu3 %v9525_v43  ;;  %v10535_v1 = vld [vmem:[#allocation28_spill] sm:$0xff]  ;;  %v10536_v43 = vld [vmem:[#allocation35_spill] sm:$0xff] }
 0xca8   :  { %v10574_v45 = vld [vmem:[#allocation84_spill] sm:$0xff] }
 0xca9   :  { %4184 = vmatmul.bf16.vlgmr.msra.gmra.mxu0 %v8962_v15  ;;  %4210 = vmatmul.bf16.vlgmr.msra.gmra.mxu2 %v8962_v15 }
 0xcaa   :  { %4280 = vmatpush.bf16.msra.mxu0 %v6717_v33  ;;  %4339 = vmatpush.bf16.msra.mxu2 %v5728_v3  ;;  %v10530_v3 = vld [vmem:[#allocation111_spill] sm:$0xff] }
 0xcab   :  { %4360 = vmatmul.bf16.vlgmr.msra.gmra.mxu3 %v8962_v15  ;;  %4379 = vmatpush.bf16.msrb.mxu1 %v9526_v52  ;;  %v10537_v52 = vld [vmem:[#allocation52_spill] sm:$0xff] }
 0xcac   :  { %4429 = vmatpush.bf16.msrb.mxu3 %v9588_v58  ;;  %v10541_v58 = vld [vmem:[#allocation54_spill] sm:$0xff] }
 0xcae   :  { %4281 = vmatpush.bf16.msra.mxu0 %v9589_v34  ;;  %4340 = vmatpush.bf16.msra.mxu2 %v5766_v16  ;;  %v10531_v16 = vld [vmem:[#allocation24_spill] sm:$0xff] }
 0xcaf   :  { %4380 = vmatpush.bf16.msrb.mxu1 %v9528_v41  ;;  %v10538_v41 = vld [vmem:[#allocation113_spill] sm:$0xff] }
 0xcb0   :  { %4430 = vmatpush.bf16.msrb.mxu3 %v9529_v12  ;;  %v10539_v12 = vld [vmem:[#allocation32_spill] sm:$0xff] }
 0xcb2   :  { %4282 = vmatpush.bf16.msra.mxu0 %v6744_v14  ;;  %4341 = vmatpush.bf16.msra.mxu2 %v9590_v27  ;;  %v10542_v27 = vld [vmem:[#allocation41_spill] sm:$0xff] }
 0xcb3   :  { %4381 = vmatpush.bf16.msrb.mxu1 %v9591_v49  ;;  %v10543_v49 = vld [vmem:[#allocation55_spill] sm:$0xff] }
 0xcb4   :  { %4431 = vmatpush.bf16.msrb.mxu3 %v9531_v21  ;;  %v10540_v21 = vld [vmem:[#allocation39_spill] sm:$0xff] }
 0xcb6   :  { %4283 = vmatpush.bf16.msra.mxu0 %v6756_v2  ;;  %4342 = vmatpush.bf16.msra.mxu2 %v9592_v30  ;;  %v10544_v30 = vld [vmem:[#allocation114_spill] sm:$0xff] }
 0xcb7   :  { %4382 = vmatpush.bf16.msrb.mxu1 %v9593_v39  ;;  %v10545_v39 = vld [vmem:[#allocation36_spill] sm:$0xff] }
 0xcb8   :  { %4432 = vmatpush.bf16.msrb.mxu3 %v9594_v32  ;;  %v10546_v32 = vld [vmem:[#allocation12_spill] sm:$0xff] }
 0xcb9   :  { %4236 = vmatmul.bf16.vlgmr.msrb.gmra.mxu0 %v8962_v15  ;;  %4262 = vmatmul.bf16.vlgmr.msrb.gmra.mxu2 %v8962_v15 }
 0xcba   :  { %4284 = vmatpush.bf16.msra.mxu0 %v10530_v3  ;;  %4343 = vmatpush.bf16.msra.mxu2 %v10531_v16  ;;  %v10575_v16 = vld [vmem:[#allocation38_spill] sm:$0xff] }
 0xcbb   :  { %4383 = vmatpush.bf16.msrb.mxu1 %v10532_v50  ;;  %v10576_v50 = vld [vmem:[#allocation59_spill] sm:$0xff] }
 0xcbc   :  { %4433 = vmatpush.bf16.msrb.mxu3 %v10533_v38  ;;  %v10577_v38 = vld [vmem:[#allocation92_spill] sm:$0xff] }
 0xcbe   :  { %4285 = vmatpush.bf16.msra.mxu0 %v10534_v6  ;;  %4344 = vmatpush.bf16.msra.mxu2 %v10535_v1  ;;  %v10578_v1 = vld [vmem:[#allocation94_spill] sm:$0xff] }
 0xcbf   :  { %4384 = vmatpush.bf16.msrb.mxu1 %v10536_v43  ;;  %v10579_v43 = vld [vmem:[#allocation61_spill] sm:$0xff] }
 0xcc0   :  { %4434 = vmatpush.bf16.msrb.mxu3 %v10537_v52  ;;  %v10580_v52 = vld [vmem:[#allocation63_spill] sm:$0xff] }
 0xcc2   :  { %4286 = vmatpush.bf16.msra.mxu0 %v10538_v41  ;;  %4345 = vmatpush.bf16.msra.mxu2 %v10539_v12  ;;  %v10581_v12 = vld [vmem:[#allocation96_spill] sm:$0xff] }
 0xcc3   :  { %4385 = vmatpush.bf16.msrb.mxu1 %v10540_v21  ;;  %v10582_v21 = vld [vmem:[#allocation65_spill] sm:$0xff] }
 0xcc4   :  { %4435 = vmatpush.bf16.msrb.mxu3 %v10541_v58  ;;  %v10583_v58 = vld [vmem:[#allocation67_spill] sm:$0xff] }
 0xcc6   :  { %4287 = vmatpush.bf16.msra.mxu0 %v10544_v30  ;;  %4346 = vmatpush.bf16.msra.mxu2 %v10545_v39  ;;  %v10586_v39 = vld [vmem:[#allocation71_spill] sm:$0xff] }
 0xcc7   :  { %4454 = vmatpush.bf16.msra.mxu1 %v10542_v27  ;;  %v10584_v27 = vld [vmem:[#allocation98_spill] sm:$0xff] }
 0xcc8   :  { %4480 = vmatpush.bf16.msra.mxu3 %v10543_v49  ;;  %4386 = vmatmul.bf16.vlgmr.msrb.gmra.mxu1 %v8962_v15  ;;  %v10585_v49 = vld [vmem:[#allocation69_spill] sm:$0xff] }
 0xcc9   :  { %4288 = vmatmul.bf16.vlgmr.msra.gmra.mxu0 %v8962_v15  ;;  %4347 = vmatmul.bf16.vlgmr.msra.gmra.mxu2 %v8962_v15 }
 0xcca   :  { %4365 = vmatpush.bf16.msrb.mxu0 %v10546_v32  ;;  %4415 = vmatpush.bf16.msrb.mxu2 %v10547_v28  ;;  %v10587_v32 = vld [vmem:[#allocation100_spill] sm:$0xff]  ;;  %v10588_v28 = vld [vmem:[#allocation73_spill] sm:$0xff] }
 0xccb   :  { %4455 = vmatpush.bf16.msra.mxu1 %v10548_v36  ;;  %v10590_v36 = vld [vmem:[#allocation102_spill] sm:$0xff] }
 0xccc   :  { %4481 = vmatpush.bf16.msra.mxu3 %v10549_v20  ;;  %v10591_v20 = vld [vmem:[#allocation77_spill] sm:$0xff] }
 0xcce   :  { %4366 = vmatpush.bf16.msrb.mxu0 %v10550_v40  ;;  %4416 = vmatpush.bf16.msrb.mxu2 %v10551_v53  ;;  %v10592_v40 = vld [vmem:[#allocation79_spill] sm:$0xff]  ;;  %v10593_v53 = vld [vmem:[#allocation104_spill] sm:$0xff] }
 0xccf   :  { %4456 = vmatpush.bf16.msra.mxu1 %v10552_v29  ;;  %v10594_v29 = vld [vmem:[#allocation81_spill] sm:$0xff] }
 0xcd0   :  { %4482 = vmatpush.bf16.msra.mxu3 %v10553_v23  ;;  %v10595_v23 = vld [vmem:[#allocation83_spill] sm:$0xff] }
 0xcd2   :  { %4367 = vmatpush.bf16.msrb.mxu0 %v10554_v8  ;;  %4417 = vmatpush.bf16.msrb.mxu2 %v10555_v47  ;;  %v10596_v8 = vld [vmem:[#allocation106_spill] sm:$0xff]  ;;  %v10597_v47 = vld [vmem:[#allocation85_spill] sm:$0xff] }
 0xcd3   :  { %4457 = vmatpush.bf16.msra.mxu1 %v10556_v61  ;;  %v10598_v61 = vld [vmem:[#allocation93_spill] sm:$0xff] }
 0xcd4   :  { %4483 = vmatpush.bf16.msra.mxu3 %v10557_v56  ;;  %v10599_v56 = vld [vmem:[#allocation95_spill] sm:$0xff] }
 0xcd6   :  { %4368 = vmatpush.bf16.msrb.mxu0 %v10558_v35  ;;  %4418 = vmatpush.bf16.msrb.mxu2 %v10559_v10  ;;  %v10600_v35 = vld [vmem:[#allocation108_spill] sm:$0xff]  ;;  %v10601_v10 = vld [vmem:[#allocation97_spill] sm:$0xff] }
 0xcd7   :  { %4458 = vmatpush.bf16.msra.mxu1 %v10560_v31 }
 0xcd8   :  { %4484 = vmatpush.bf16.msra.mxu3 %v10561_v54  ;;  %v10602_v54 = vld [vmem:[#allocation99_spill] sm:$0xff] }
 0xcda   :  { %4369 = vmatpush.bf16.msrb.mxu0 %v10562_v7  ;;  %4419 = vmatpush.bf16.msrb.mxu2 %v10563_v48  ;;  %v10603_v48 = vld [vmem:[#allocation101_spill] sm:$0xff] }
 0xcdb   :  { %4459 = vmatpush.bf16.msra.mxu1 %v10564_v44 }
 0xcdc   :  { %4485 = vmatpush.bf16.msra.mxu3 %v10565_v17  ;;  %v10604_v17 = vld [vmem:[#allocation103_spill] sm:$0xff] }
 0xcde   :  { %4370 = vmatpush.bf16.msrb.mxu0 %v10566_v26  ;;  %4420 = vmatpush.bf16.msrb.mxu2 %v10567_v9  ;;  %v10605_v9 = vld [vmem:[#allocation105_spill] sm:$0xff] }
 0xcdf   :  { %4460 = vmatpush.bf16.msra.mxu1 %v10568_v5 }
 0xce0   :  { %4486 = vmatpush.bf16.msra.mxu3 %v10569_v59  ;;  %v10606_v59 = vld [vmem:[#allocation107_spill] sm:$0xff] }
 0xce2   :  { %4371 = vmatpush.bf16.msrb.mxu0 %v10570_v11  ;;  %4421 = vmatpush.bf16.msrb.mxu2 %v10571_v0  ;;  %v10607_v0 = vld [vmem:[#allocation109_spill] sm:$0xff] }
 0xce3   :  { %4461 = vmatpush.bf16.msra.mxu1 %v10572_v19 }
 0xce4   :  { %4487 = vmatpush.bf16.msra.mxu3 %v10574_v45 }
 0xce6   :  { %4372 = vmatpush.bf16.msrb.mxu0 %v10575_v16  ;;  %4422 = vmatpush.bf16.msrb.mxu2 %v10577_v38 }
 0xce7   :  { %4506 = vmatpush.bf16.msrb.mxu1 %v10573_v13 }
 0xce9   :  { %4373 = vmatmul.bf16.vlgmr.msrb.gmra.mxu0 %v8962_v15  ;;  %v10589_v15 = vld [vmem:[#allocation75_spill] sm:$0xff] }
 0xcea   :  { %4441 = vmatpush.bf16.msra.mxu0 %v10576_v50  ;;  %4467 = vmatpush.bf16.msra.mxu2 %v10578_v1 }
 0xceb   :  { %4507 = vmatpush.bf16.msrb.mxu1 %v10579_v43 }
 0xcee   :  { %4442 = vmatpush.bf16.msra.mxu0 %v10580_v52  ;;  %4468 = vmatpush.bf16.msra.mxu2 %v10581_v12 }
 0xcef   :  { %4508 = vmatpush.bf16.msrb.mxu1 %v10582_v21 }
 0xcf2   :  { %4443 = vmatpush.bf16.msra.mxu0 %v10583_v58  ;;  %4469 = vmatpush.bf16.msra.mxu2 %v10584_v27 }
 0xcf3   :  { %4509 = vmatpush.bf16.msrb.mxu1 %v10585_v49 }
 0xcf6   :  { %4444 = vmatpush.bf16.msra.mxu0 %v10586_v39  ;;  %4470 = vmatpush.bf16.msra.mxu2 %v10587_v32 }
 0xcf7   :  { %4510 = vmatpush.bf16.msrb.mxu1 %v10588_v28 }
 0xcfa   :  { %4445 = vmatpush.bf16.msra.mxu0 %v10589_v15  ;;  %4471 = vmatpush.bf16.msra.mxu2 %v10590_v36  ;;  %v10608_v15 = vld [vmem:[#allocation116_spill] sm:$0xff] }
 0xcfb   :  { %4511 = vmatpush.bf16.msrb.mxu1 %v10591_v20 }
 0xcfe   :  { %4446 = vmatpush.bf16.msra.mxu0 %v10592_v40  ;;  %4472 = vmatpush.bf16.msra.mxu2 %v10593_v53 }
 0xcff   :  { %4512 = vmatpush.bf16.msrb.mxu1 %v10594_v29 }
 0xd02   :  { %4447 = vmatpush.bf16.msra.mxu0 %v10595_v23  ;;  %4473 = vmatpush.bf16.msra.mxu2 %v10596_v8 }
 0xd03   :  { %4513 = vmatpush.bf16.msrb.mxu1 %v10597_v47  ;;  %v4198_v31 = vpop.f32.mrf.mxu1 }
 0xd06   :  { %4448 = vmatpush.bf16.msra.mxu0 %v10598_v61  ;;  %4474 = vmatpush.bf16.msra.mxu2 %v10600_v35 }
 0xd09   :  { %v4224_v7 = vpop.f32.mrf.mxu3 }
 0xd0a   :  { %4493 = vmatpush.bf16.msrb.mxu0 %v10599_v56 }
 0xd0b   :  { %v4200_v44 = vpop.f32.mrf.mxu1 }
 0xd0e   :  { %4494 = vmatpush.bf16.msrb.mxu0 %v10601_v10 }
 0xd11   :  { %v4226_v26 = vpop.f32.mrf.mxu3 }
 0xd12   :  { %4495 = vmatpush.bf16.msrb.mxu0 %v10602_v54 }
 0xd13   :  { %v4250_v5 = vpop.f32.mrf.mxu1 }
 0xd16   :  { %4496 = vmatpush.bf16.msrb.mxu0 %v10603_v48 }
 0xd19   :  { %v4276_v11 = vpop.f32.mrf.mxu3 }
 0xd1a   :  { %4497 = vmatpush.bf16.msrb.mxu0 %v10604_v17 }
 0xd1b   :  { %v4252_v19 = vpop.f32.mrf.mxu1 }
 0xd1e   :  { %4498 = vmatpush.bf16.msrb.mxu0 %v10605_v9 }
 0xd21   :  { %v4278_v13 = vpop.f32.mrf.mxu3 }
 0xd22   :  { %4499 = vmatpush.bf16.msrb.mxu0 %v10606_v59 }
 0xd23   :  { %v4302_v16 = vpop.f32.mrf.mxu1 }
 0xd26   :  { %4500 = vmatpush.bf16.msrb.mxu0 %v10607_v0  ;;  %v4185_v45 = vpop.f32.mrf.mxu0 }
 0xd27   :  { %v4186_v52 = vadd.f32 %v4185_v45, %v6873_v22 }
 0xd29   :  { %v4199_v58 = vadd.f32 %v4198_v31, %v4186_v52 }
 0xd2b   :  { %v4304_v21 = vpop.f32.mrf.mxu1  ;;  %v4318_v28 = vmul.f32 0.5, %v4199_v58 }
 0xd2c   :  { %v4211_v50 = vpop.f32.mrf.mxu2 }
 0xd2d   :  { %v4212_v38 = vadd.f32 %v4211_v50, %v9586_v60 }
 0xd2e   :  { %v4361_v1 = vpop.f32.mrf.mxu3  ;;  %v4187_v43 = vpop.f32.mrf.mxu0 }
 0xd2f   :  { %v4225_v12 = vadd.f32 %v4224_v7, %v4212_v38 }
 0xd31   :  { %v4306_v27 = vmul.f32 0.5, %v4225_v12  ;;  %v5151_v12 = vld [vmem:[%s9138_s0 + $0x1e0] sm:$0xff] }
 0xd33   :  { %5590 = vtanh.f32 %v4306_v27 }
 0xd34   :  { %v4213_v49 = vpop.f32.mrf.mxu2  ;;  %5592 = vtanh.f32 %v4318_v28 }
 0xd36   :  { %v4363_v39 = vpop.f32.mrf.mxu3  ;;  %v4237_v32 = vpop.f32.mrf.mxu0 }
 0xd37   :  { %v4238_v36 = vadd.f32 %v4237_v32, %v10608_v15 }
 0xd39   :  { %v4251_v20 = vadd.f32 %v4250_v5, %v4238_v36  ;;  %v5591_v29 = vpop.eup %5590 }
 0xd3a   :  { %v4308_v61 = vmul.f32 0.5, %v5591_v29  ;;  %v5593_v56 = vpop.eup %5592  ;;  %v5153_v29 = vld [vmem:[%s9138_s0 + $0x1f0] sm:$0xff] }
 0xd3b   :  { %v4311_v40 = vmul.f32 0.5, %v4251_v20  ;;  %v4320_v10 = vmul.f32 0.5, %v5593_v56 }
 0xd3c   :  { %v4263_v53 = vpop.f32.mrf.mxu2  ;;  %v4309_v31 = vadd.f32 0.5, %v4308_v61 }
 0xd3d   :  { %5594 = vtanh.f32 %v4311_v40  ;;  %v4264_v23 = vadd.f32 %v4263_v53, %v6882_v4  ;;  %v4321_v5 = vadd.f32 0.5, %v4320_v10 }
 0xd3e   :  { %v4239_v8 = vpop.f32.mrf.mxu0  ;;  %v4310_v59 = vmul.f32 %v4309_v31, %v8920_v24  ;;  %v5152_v24 = vld [vmem:[%s9138_s0 + $0x1e8] sm:$0xff] }
 0xd3f   :  { %v4277_v47 = vadd.f32 %v4276_v11, %v4264_v23  ;;  %v4392_v21 = vadd.f32 %v5152_v24, %v4361_v1  ;;  %v5154_v1 = vld [vmem:[%s9138_s0 + $0x1f8] sm:$0xff]  ;;  %s5677_s0 = smov [#allocation6]  }
 0xd40   :  { %s4588_s2 = sshll.u32 %s5677_s0, 4  ;;  %s4589_s2 = int_to_ptr.vmem [resolvable:$true] %s4588_s2 }
 0xd41   :  { %5596 = vtanh.f32 %v4277_v47  ;;  %v4401_v28 = vmul.f32 0.5, %v4392_v21 }
 0xd43   :  { %v5595_v35 = vpop.eup %5594 }
 0xd44   :  { %v4313_v54 = vmul.f32 0.5, %v5595_v35  ;;  %v4265_v7 = vpop.f32.mrf.mxu2 }
 0xd45   :  { %v4387_v48 = vpop.f32.mrf.mxu1 }
 0xd46   :  { %v4314_v44 = vadd.f32 0.5, %v4313_v54  ;;  %v4289_v17 = vpop.f32.mrf.mxu0  ;;  %v4394_v53 = vadd.f32 %v5154_v1, %v4387_v48 }
 0xd47   :  { %v5597_v26 = vpop.eup %5596  ;;  %v4290_v9 = vadd.f32 %v4289_v17, %v6886_v62 }
 0xd48   :  { %v4315_v0 = vmul.f32 %v4314_v44, %v8953_v18  ;;  %v4322_v13 = vmul.f32 %v5597_v26, %v4321_v5  ;;  %v4407_v35 = vmul.f32 0.5, %v4394_v53 }
 0xd49   :  { %v4303_v11 = vadd.f32 %v4302_v16, %v4290_v9 }
 0xd4a   :  { %v4316_v19 = vadd.f32 %v4315_v0, %v4310_v59 }
 0xd4b   :  { %v4324_v45 = vmul.f32 0.5, %v4303_v11 }
 0xd4c   :  { %v9076_v50 = vadd.f32 %v4322_v13, %v4316_v19  ;;  %v4348_v43 = vpop.f32.mrf.mxu2 }
 0xd4d   :  { %5598 = vtanh.f32 %v4324_v45  ;;  %v4389_v38 = vpop.f32.mrf.mxu1  ;;  %v4391_v39 = vadd.f32 %v5151_v12, %v4348_v43 }
 0xd4e   :  { %5150 = vst [vmem:[%s9143_s5 + $0x70] sm:$0xff] %v9076_v50  ;;  %v4291_v52 = vpop.f32.mrf.mxu0  ;;  %5600 = vtanh.f32 %v9076_v50 }
 0xd4f   :  { %v4395_v40 = vmul.f32 0.5, %v4391_v39  ;;  %5602 = vtanh.f32 %v4401_v28 }
 0xd51   :  { %5604 = vtanh.f32 %v4395_v40 }
 0xd53   :  { %v5599_v16 = vpop.eup %5598 }
 0xd54   :  { %v4326_v58 = vmul.f32 0.5, %v5599_v16  ;;  %v4350_v27 = vpop.f32.mrf.mxu2  ;;  %v5601_v32 = vpop.eup %5600 }
 0xd55   :  { %v5603_v23 = vpop.eup %5602 }
 0xd56   :  { %v4327_v49 = vadd.f32 0.5, %v4326_v58  ;;  %v4403_v56 = vmul.f32 0.5, %v5603_v23 }
 0xd57   :  { %v5605_v47 = vpop.eup %5604 }
 0xd58   :  { %v4329_v36 = vmul.f32 %v5601_v32, %v4327_v49  ;;  %v4404_v10 = vadd.f32 0.5, %v4403_v56 }
 0xd5a   :  { %5149 = vst [vmem:[%s9142_s4 + $0x70] sm:$0xff] %v4329_v36  ;;  %v4414_v20 = vpack.c.bf16 %v4329_v36, %v4329_v36  ;;  %v4405_v7 = vmul.f32 %v4404_v10, %v8953_v18 }
 0xd5c   :  { %4436 = vmatmul.bf16.vlgmr.msrb.gmra.mxu3 %v4414_v20  ;;  %4462 = vmatmul.bf16.vlgmr.msra.gmra.mxu1 %v4414_v20 }
 0xd5d   :  { %4532 = vmatpush.bf16.msrb.mxu3 %v6426_v51  ;;  %v4397_v51 = vmul.f32 0.5, %v5605_v47 }
 0xd5f   :  { %v4398_v31 = vadd.f32 0.5, %v4397_v51 }
 0xd61   :  { %4533 = vmatpush.bf16.msrb.mxu3 %v6441_v42 }
 0xd65   :  { %4534 = vmatpush.bf16.msrb.mxu3 %v9512_v57 }
 0xd66   :  { %v4374_v8 = vpop.f32.mrf.mxu0 }
 0xd67   :  { %v4393_v61 = vadd.f32 %v5153_v29, %v4374_v8 }
 0xd69   :  { %5606 = vtanh.f32 %v4393_v61  ;;  %4535 = vmatpush.bf16.msrb.mxu3 %v9514_v46 }
 0xd6a   :  { %5608 = vtanh.f32 %v4407_v35 }
 0xd6c   :  { %4488 = vmatmul.bf16.vlgmr.msra.gmra.mxu3 %v4414_v20  ;;  %4514 = vmatmul.bf16.vlgmr.msrb.gmra.mxu1 %v4414_v20 }
 0xd6d   :  { %4536 = vmatpush.bf16.msrb.mxu3 %v9516_v25 }
 0xd6e   :  { %v4376_v42 = vpop.f32.mrf.mxu0 }
 0xd6f   :  { %v5607_v54 = vpop.eup %5606 }
 0xd70   :  { %v4400_v48 = vmul.f32 %v5607_v54, %v4398_v31  ;;  %v5609_v44 = vpop.eup %5608 }
 0xd71   :  { %4537 = vmatpush.bf16.msrb.mxu3 %v9518_v55  ;;  %v4409_v57 = vmul.f32 0.5, %v5609_v44 }
 0xd72   :  { %v9104_v17 = vadd.f32 %v4405_v7, %v4400_v48 }
 0xd73   :  { %v4410_v46 = vadd.f32 0.5, %v4409_v57 }
 0xd74   :  { %5610 = vtanh.f32 %v9104_v17  ;;  %4578 = vst [vmem:[#allocation8] sm:$0xff] %v9104_v17 }
 0xd75   :  { %4538 = vmatpush.bf16.msrb.mxu3 %v9520_v63  ;;  %4604 = dma.vmem_to_hbm [thread:$0]  %s4600_s9, 128, %s4602_s12, [#allocation9]  }
 0xd79   :  { %4539 = vmatpush.bf16.msrb.mxu3 %v9522_v37 }
 0xd7a   :  { %v5611_v26 = vpop.eup %5610 }
 0xd7b   :  { %v4412_v9 = vmul.f32 %v5611_v26, %v4410_v46 }
 0xd7c   :  { %4540 = vmatmul.bf16.vlgmr.msrb.gmra.mxu3 %v4414_v20 }
 0xd7d   :  { %v4413_v18 = vpack.c.bf16 %v4412_v9, %v4412_v9  ;;  %4577 = vst [vmem:[#allocation6] sm:$0xff] %v4412_v9 }
 0xd7e   :  { %4593 = dma.vmem_to_hbm [thread:$0]  %s4589_s2, 128, %s4591_s30, [#allocation7]  }
 0xd7f   :  { %4423 = vmatmul.bf16.vlgmr.msrb.gmra.mxu2 %v4413_v18  ;;  %4449 = vmatmul.bf16.vlgmr.msra.gmra.mxu0 %v4413_v18 }
 0xd80   :  { %4519 = vmatpush.bf16.msrb.mxu2 %v6717_v33 }
 0xd84   :  { %4520 = vmatpush.bf16.msrb.mxu2 %v9589_v34 }
 0xd88   :  { %4521 = vmatpush.bf16.msrb.mxu2 %v6744_v14 }
 0xd8c   :  { %4522 = vmatpush.bf16.msrb.mxu2 %v6756_v2 }
 0xd8f   :  { %4475 = vmatmul.bf16.vlgmr.msra.gmra.mxu2 %v4413_v18  ;;  %4501 = vmatmul.bf16.vlgmr.msrb.gmra.mxu0 %v4413_v18 }
 0xd90   :  { %4523 = vmatpush.bf16.msrb.mxu2 %v10530_v3 }
 0xd94   :  { %4524 = vmatpush.bf16.msrb.mxu2 %v10534_v6 }
 0xd98   :  { %4525 = vmatpush.bf16.msrb.mxu2 %v10538_v41 }
 0xd9c   :  { %4526 = vmatpush.bf16.msrb.mxu2 %v10544_v30 }
 0xd9f   :  { %4527 = vmatmul.bf16.vlgmr.msrb.gmra.mxu2 %v4413_v18 }
 0xdd9   :  { %v4463_v33 = vpop.f32.mrf.mxu1 }
 0xddf   :  { %v4437_v14 = vpop.f32.mrf.mxu3 }
 0xde1   :  { %v4465_v2 = vpop.f32.mrf.mxu1 }
 0xde7   :  { %v4439_v25 = vpop.f32.mrf.mxu3 }
 0xde9   :  { %v4515_v55 = vpop.f32.mrf.mxu1 }
 0xdef   :  { %v4489_v63 = vpop.f32.mrf.mxu3 }
 0xdf1   :  { %v4517_v37 = vpop.f32.mrf.mxu1 }
 0xdf7   :  { %v4491_v34 = vpop.f32.mrf.mxu3 }
 0xdfc   :  { %v4450_v3 = vpop.f32.mrf.mxu0 }
 0xdfd   :  { %v4451_v5 = vadd.f32 %v4450_v3, %v9586_v60 }
 0xdff   :  { %v4541_v41 = vpop.f32.mrf.mxu3  ;;  %v4464_v0 = vadd.f32 %v4463_v33, %v4451_v5 }
 0xe01   :  { %v4545_v45 = vmul.f32 0.5, %v4464_v0 }
 0xe02   :  { %v4424_v6 = vpop.f32.mrf.mxu2 }
 0xe03   :  { %v4425_v11 = vadd.f32 %v4424_v6, %v6873_v22  ;;  %5612 = vtanh.f32 %v4545_v45 }
 0xe04   :  { %v4452_v30 = vpop.f32.mrf.mxu0 }
 0xe05   :  { %v4438_v38 = vadd.f32 %v4437_v14, %v4425_v11 }
 0xe07   :  { %v4543_v19 = vpop.f32.mrf.mxu3  ;;  %v4557_v52 = vmul.f32 0.5, %v4438_v38 }
 0xe09   :  { %5614 = vtanh.f32 %v4557_v52  ;;  %v5613_v60 = vpop.eup %5612 }
 0xe0a   :  { %v4426_v59 = vpop.f32.mrf.mxu2  ;;  %v4547_v22 = vmul.f32 0.5, %v5613_v60 }
 0xe0c   :  { %v4502_v13 = vpop.f32.mrf.mxu0  ;;  %v4548_v28 = vadd.f32 0.5, %v4547_v22 }
 0xe0d   :  { %v4503_v12 = vadd.f32 %v4502_v13, %v6882_v4 }
 0xe0e   :  { %v4549_v4 = vmul.f32 %v4548_v28, %v9076_v50 }
 0xe0f   :  { %v4516_v27 = vadd.f32 %v4515_v55, %v4503_v12  ;;  %v5615_v39 = vpop.eup %5614 }
 0xe10   :  { %v4559_v36 = vmul.f32 0.5, %v5615_v39 }
 0xe12   :  { %v4476_v43 = vpop.f32.mrf.mxu2  ;;  %v4560_v29 = vadd.f32 0.5, %v4559_v36 }
 0xe13   :  { %v4477_v24 = vadd.f32 %v4476_v43, %v10608_v15 }
 0xe14   :  { %v4504_v16 = vpop.f32.mrf.mxu0 }
 0xe15   :  { %v4490_v21 = vadd.f32 %v4489_v63, %v4477_v24 }
 0xe17   :  { %v4550_v58 = vmul.f32 0.5, %v4490_v21 }
 0xe19   :  { %5616 = vtanh.f32 %v4550_v58 }
 0xe1a   :  { %v4478_v49 = vpop.f32.mrf.mxu2  ;;  %5618 = vtanh.f32 %v4516_v27 }
 0xe1f   :  { %v5617_v32 = vpop.eup %5616 }
 0xe20   :  { %v4552_v20 = vmul.f32 0.5, %v5617_v32  ;;  %v5619_v15 = vpop.eup %5618 }
 0xe21   :  { %v4561_v47 = vmul.f32 %v5619_v15, %v4560_v29 }
 0xe22   :  { %v4553_v40 = vadd.f32 0.5, %v4552_v20  ;;  %v4528_v1 = vpop.f32.mrf.mxu2 }
 0xe23   :  { %v4529_v53 = vadd.f32 %v4528_v1, %v6886_v62 }
 0xe24   :  { %v4554_v23 = vmul.f32 %v4553_v40, %v9104_v17 }
 0xe25   :  { %v4542_v8 = vadd.f32 %v4541_v41, %v4529_v53 }
 0xe26   :  { %v4555_v61 = vadd.f32 %v4554_v23, %v4549_v4 }
 0xe27   :  { %v4563_v56 = vmul.f32 0.5, %v4542_v8 }
 0xe28   :  { %v4562_v35 = vadd.f32 %v4561_v47, %v4555_v61 }
 0xe29   :  { %5620 = vtanh.f32 %v4563_v56 }
 0xe2a   :  { %5156 = vst [vmem:[%s9143_s5 + $0x78] sm:$0xff] %v4562_v35  ;;  %v4530_v51 = vpop.f32.mrf.mxu2  ;;  %5622 = vtanh.f32 %v4562_v35 }
 0xe2f   :  { %v5621_v10 = vpop.eup %5620 }
 0xe30   :  { %v4565_v31 = vmul.f32 0.5, %v5621_v10  ;;  %v5623_v42 = vpop.eup %5622 }
 0xe32   :  { %v4566_v62 = vadd.f32 0.5, %v4565_v31 }
 0xe34   :  { %v4568_v50 = vmul.f32 %v5623_v42, %v4566_v62 }
 0xe36   :  { %5155 = vst [vmem:[%s9142_s4 + $0x78] sm:$0xff] %v4568_v50 }
 0xe37   :  { %5672 = dma.done.wait [#allocation7], 128  }
 0xe38   :  { %5673 = vsyncadd [#allocation7], 4294967168 }
 0xe39   :  { %5674 = dma.done.wait [#allocation9], 128  }
 0xe3a   :  { %5675 = vsyncadd [#allocation9], 4294967168 }
 0xe3b   :  { %4617 = vsyncpa [#allocation7], 1 }
 0xe3c   :  { %4618 = vsyncpa [#allocation9], 1 }

</bundles_post_ra>
